<compile_context>
chip_gen: v7x
topology: tpu7x:2x2x1
jax: 0.10.0
libtpu: 0.0.40
codegen_flags: <defaults>
</compile_context>

<pallas_src>
import math
from functools import partial

import jax
import jax.numpy as jnp
from jax.experimental import pallas as pl
from jax.experimental.pallas import tpu as pltpu

EPS = 1e-5  # PyTorch LayerNorm default


def _layernorm(v, g, b):
    mean = jnp.mean(v, axis=-1, keepdims=True)
    var = jnp.mean(jnp.square(v - mean), axis=-1, keepdims=True)
    return (v - mean) * jax.lax.rsqrt(var + EPS) * g + b


# ---------------------------------------------------------------------------
# Fused kernel: one grid step == one batch image, everything stays in VMEM
# ---------------------------------------------------------------------------
def _swin_block_kernel(x_ref, g1_ref, b1_ref, sw_ref, sb_ref, g2_ref, b2_ref,
                       w1_ref, fb1_ref, w2_ref, fb2_ref,      # inputs
                       o_ref,                                  # output
                       xpad_ref, ypad_ref,                     # VMEM scratch
                       *, H, W, C, num_heads, ws, pad_t, pad_l, Hp, Wp):
    hd = C // num_heads
    area = ws * ws
    nWh, nWw = Hp // ws, Wp // ws
    pad_b = Hp - H - pad_t
    pad_r = Wp - W - pad_l

    # ---- LayerNorm 1 (norm1) ------------------------------------------------
    x = x_ref[...].astype(jnp.float32)                       # (H*W, C)
    xn = _layernorm(x, g1_ref[...], b1_ref[...])

    # ---- shifted-window zero padding: zero ONLY the halo --------------------
    # NOT gated on program_id(0)==0: with a "parallel" grid on a 2-core part
    # each core sees a different first step and must zero its own halo.
    if pad_t > 0:
        xpad_ref[0:pad_t, :, :] = jnp.zeros((pad_t, Wp, C), jnp.float32)
    if pad_b > 0:
        xpad_ref[pad_t + H:Hp, :, :] = jnp.zeros((pad_b, Wp, C), jnp.float32)
    if pad_l > 0:
        xpad_ref[pad_t:pad_t + H, 0:pad_l, :] = jnp.zeros((H, pad_l, C), jnp.float32)
    if pad_r > 0:
        xpad_ref[pad_t:pad_t + H, pad_l + W:Wp, :] = jnp.zeros((H, pad_r, C), jnp.float32)
    xpad_ref[pad_t:pad_t + H, pad_l:pad_l + W, :] = xn.reshape(H, W, C)

    # ---- grouped spatial window MLP (Conv1d k=1, groups=num_heads) ----------
    # One (area, area) @ (area, nW*hd) matmul per head over ALL windows at once
    # (4 matmuls instead of 36), results scattered directly into ypad channel
    # slices (no concatenates on the output path).
    # ypad_ref needs no init: Hp, Wp are exact multiples of ws, so every
    # element is overwritten below (invariant asserted in the wrapper).
    for h in range(num_heads):
        cs = h * hd
        # Gather head-h channels of every window: columns ordered (window, d).
        cols = []
        for wr in range(nWh):
            for wc in range(nWw):
                r0, c0 = wr * ws, wc * ws
                cols.append(
                    xpad_ref[r0:r0 + ws, c0:c0 + ws, cs:cs + hd].reshape(area, hd))
        x_h = jnp.concatenate(cols, axis=1)                   # (area, nW*hd)
        y_h = jnp.dot(sw_ref[h], x_h,
                      preferred_element_type=jnp.float32) + sb_ref[:, h:h + 1]
        # Scatter each window's slab straight back into its channel slice.
        for wr in range(nWh):
            for wc in range(nWw):
                w = wr * nWw + wc
                r0, c0 = wr * ws, wc * ws
                ypad_ref[r0:r0 + ws, c0:c0 + ws, cs:cs + hd] = (
                    y_h[:, w * hd:(w + 1) * hd].reshape(ws, ws, hd))

    # ---- window reverse + crop (still in VMEM) + residual --------------------
    y = ypad_ref[pad_t:pad_t + H, pad_l:pad_l + W, :].reshape(H * W, C)
    hres = x + y

    # ---- LayerNorm 2 + channel MLP (fc1 -> GELU -> fc2) + residual -----------
    hn = _layernorm(hres, g2_ref[...], b2_ref[...])
    z = jnp.dot(hn, w1_ref[...], preferred_element_type=jnp.float32) + fb1_ref[...]
    # exact (erf-based) GELU, matching torch.nn.GELU default.
    # TODO(synk): tanh-approx GELU would run on the idle EUP slot but changes numerics.
    z = 0.5 * z * (1.0 + jax.lax.erf(z * (1.0 / math.sqrt(2.0))))
    y2 = jnp.dot(z, w2_ref[...], preferred_element_type=jnp.float32) + fb2_ref[...]
    o_ref[...] = (hres + y2).astype(o_ref.dtype)


# ---------------------------------------------------------------------------
# Wrapper
# ---------------------------------------------------------------------------
@partial(jax.jit, static_argnums=(2, 3, 4, 5, 6))
def swin_mlp_block_forward(x, params, H, W, num_heads, window_size, shift_size):
    B, L, C = x.shape
    assert L == H * W
    # SwinMLPBlock.__init__ adjustment
    if min(H, W) <= window_size:
        shift_size = 0
        window_size = min(H, W)
    ws = window_size
    area = ws * ws
    hidden = params["fc1_w"].shape[0]

    pad_t = ws - shift_size if shift_size > 0 else 0
    pad_l = ws - shift_size if shift_size > 0 else 0
    Hp = -(-(H + pad_t) // ws) * ws
    Wp = -(-(W + pad_l) // ws) * ws
    # Invariant that lets ypad_ref stay uninitialized inside the kernel.
    assert Hp % ws == 0 and Wp % ws == 0

    kernel = partial(_swin_block_kernel, H=H, W=W, C=int(C),
                     num_heads=num_heads, ws=ws,
                     pad_t=pad_t, pad_l=pad_l, Hp=Hp, Wp=Wp)

    g1 = params["g1"].reshape(1, C)
    b1 = params["b1"].reshape(1, C)
    g2 = params["g2"].reshape(1, C)
    b2 = params["b2"].reshape(1, C)
    sw = params["spatial_w"].reshape(num_heads, area, area)
    sb = params["spatial_b"].reshape(num_heads, area).T          # (area, heads)
    w1 = params["fc1_w"].T                                       # (C, hidden)
    fb1 = params["fc1_b"].reshape(1, hidden)
    w2 = params["fc2_w"].T                                       # (hidden, C)
    fb2 = params["fc2_b"].reshape(1, C)

    out = pl.pallas_call(
        kernel,
        out_shape=jax.ShapeDtypeStruct((B, L, C), x.dtype),
        grid=(B,),
        in_specs=[
            pl.BlockSpec((None, L, C), lambda b: (b, 0, 0)),     # x (one image)
            pl.BlockSpec((1, C), lambda b: (0, 0)),              # g1
            pl.BlockSpec((1, C), lambda b: (0, 0)),              # b1
            pl.BlockSpec((num_heads, area, area), lambda b: (0, 0, 0)),  # spatial W
            pl.BlockSpec((area, num_heads), lambda b: (0, 0)),   # spatial bias
            pl.BlockSpec((1, C), lambda b: (0, 0)),              # g2
            pl.BlockSpec((1, C), lambda b: (0, 0)),              # b2
            pl.BlockSpec((C, hidden), lambda b: (0, 0)),         # fc1 W
            pl.BlockSpec((1, hidden), lambda b: (0, 0)),         # fc1 b
            pl.BlockSpec((hidden, C), lambda b: (0, 0)),         # fc2 W
            pl.BlockSpec((1, C), lambda b: (0, 0)),              # fc2 b
        ],
        out_specs=pl.BlockSpec((None, L, C), lambda b: (b, 0, 0)),
        scratch_shapes=[
            pltpu.VMEM((Hp, Wp, C), jnp.float32),   # padded norm1 activations
            pltpu.VMEM((Hp, Wp, C), jnp.float32),   # padded spatial-MLP output
        ],
        compiler_params=pltpu.CompilerParams(
            dimension_semantics=("parallel",)),     # B steps -> 2 TCs on v7x
    )(x, g1, b1, sw, sb, g2, b2, w1, fb1, w2, fb2)
    return out


# ---------------------------------------------------------------------------
# Pure-JAX reference (same math, no Pallas) for a correctness check
# ---------------------------------------------------------------------------
def _window_partition(xp, B, Hp, Wp, C, ws, num_heads):
    nWh, nWw = Hp // ws, Wp // ws
    head_dim = C // num_heads
    xw = xp.reshape(B, nWh, ws, nWw, ws, C).transpose(0, 1, 3, 2, 4, 5)
    xw = xw.reshape(B * nWh * nWw, ws * ws, num_heads, head_dim)
    return xw.transpose(0, 2, 1, 3)  # (NW, heads, area, head_dim)


def _window_reverse(yw, B, Hp, Wp, C, ws):
    nWh, nWw = Hp // ws, Wp // ws
    y = yw.transpose(0, 2, 1, 3).reshape(B, nWh, nWw, ws, ws, C)
    y = y.transpose(0, 1, 3, 2, 4, 5).reshape(B, Hp, Wp, C)
    return y


def reference_forward(x, params, H, W, num_heads, window_size, shift_size):
    B, L, C = x.shape
    ws = window_size
    area = ws * ws

    shortcut = x
    xn = _layernorm(x, params["g1"], params["b1"]).reshape(B, H, W, C)
    pad_t = ws - shift_size if shift_size > 0 else 0
    pad_l = ws - shift_size if shift_size > 0 else 0
    Hp = -(-(H + pad_t) // ws) * ws
    Wp = -(-(W + pad_l) // ws) * ws
    xp = jnp.pad(xn, ((0, 0), (pad_t, Hp - H - pad_t), (pad_l, Wp - W - pad_l), (0, 0)))
    xw = _window_partition(xp, B, Hp, Wp, C, ws, num_heads)
    w_sp = params["spatial_w"].reshape(num_heads, area, area)
    b_sp = params["spatial_b"].reshape(num_heads, area, 1)
    yw = jnp.einsum("hpq,whqd->whpd", w_sp, xw) + b_sp[None]
    y = _window_reverse(yw, B, Hp, Wp, C, ws)
    y = y[:, pad_t:pad_t + H, pad_l:pad_l + W, :].reshape(B, L, C)

    h = shortcut + y
    hn = _layernorm(h, params["g2"], params["b2"])
    z = hn @ params["fc1_w"].T + params["fc1_b"]
    z = 0.5 * z * (1.0 + jax.lax.erf(z * (1.0 / math.sqrt(2.0))))
    return h + (z @ params["fc2_w"].T + params["fc2_b"])


# ---------------------------------------------------------------------------
if __name__ == "__main__":
    # Config: dim=32, input_resolution=(16,16), num_heads=4, window_size=8,
    #         shift_size=4, mlp_ratio=4.0
    B, H, W, C = 2, 16, 16, 32
    num_heads, window_size, shift_size = 4, 8, 4
    mlp_ratio = 4.0
    hidden = int(C * mlp_ratio)
    area = window_size * window_size

    key = jax.random.PRNGKey(0)
    ks = jax.random.split(key, 9)
    params = {
        "g1": 1.0 + 0.1 * jax.random.normal(ks[0], (C,), jnp.float32),
        "b1": 0.1 * jax.random.normal(ks[1], (C,), jnp.float32),
        "g2": 1.0 + 0.1 * jax.random.normal(ks[2], (C,), jnp.float32),
        "b2": 0.1 * jax.random.normal(ks[3], (C,), jnp.float32),
        # Conv1d(num_heads*area, num_heads*area, 1, groups=num_heads)
        "spatial_w": 0.05 * jax.random.normal(ks[4], (num_heads * area, area, 1), jnp.float32),
        "spatial_b": 0.05 * jax.random.normal(ks[5], (num_heads * area,), jnp.float32),
        # Mlp: fc1 (hidden, C), fc2 (C, hidden)   (PyTorch Linear weight layout)
        "fc1_w": 0.05 * jax.random.normal(ks[6], (hidden, C), jnp.float32),
        "fc1_b": jnp.zeros((hidden,), jnp.float32),
        "fc2_w": 0.05 * jax.random.normal(ks[7], (C, hidden), jnp.float32),
        "fc2_b": jnp.zeros((C,), jnp.float32),
    }

    x = jax.random.normal(ks[8], (B, H * W, C), jnp.float32)

    out = swin_mlp_block_forward(x, params, H, W, num_heads, window_size, shift_size)
    out = jax.block_until_ready(out)

    ref = reference_forward(x, params, H, W, num_heads, window_size, shift_size)
    ref = jax.block_until_ready(ref)

    assert out.shape == (B, H * W, C)
    assert jnp.allclose(out, ref, atol=2e-4, rtol=2e-4), (
        float(jnp.max(jnp.abs(out - ref))))
    print("KERNEL_OK")
</pallas_src>

<mosaic_0001>
module attributes {stable_mosaic.version = 11 : i64} {
  func.func @_swin_block_kernel(%arg0: i32, %arg1: memref<1x256x32xf32, #tpu.memory_space<vmem>>, %arg2: memref<1x32xf32, #tpu.memory_space<vmem>>, %arg3: memref<1x32xf32, #tpu.memory_space<vmem>>, %arg4: memref<4x64x64xf32, #tpu.memory_space<vmem>>, %arg5: memref<64x4xf32, #tpu.memory_space<vmem>>, %arg6: memref<1x32xf32, #tpu.memory_space<vmem>>, %arg7: memref<1x32xf32, #tpu.memory_space<vmem>>, %arg8: memref<32x128xf32, #tpu.memory_space<vmem>>, %arg9: memref<1x128xf32, #tpu.memory_space<vmem>>, %arg10: memref<128x32xf32, #tpu.memory_space<vmem>>, %arg11: memref<1x32xf32, #tpu.memory_space<vmem>>, %arg12: memref<1x256x32xf32, #tpu.memory_space<vmem>>, %arg13: memref<24x24x32xf32, #tpu.memory_space<vmem>>, %arg14: memref<24x24x32xf32, #tpu.memory_space<vmem>>) attributes {dimension_semantics = [#tpu.dimension_semantics<parallel>], iteration_bounds = array<i64: 2>, scalar_prefetch = 0 : i64, scratch_operands = 2 : i64, tpu.core_type = #tpu.core_type<tc>, window_params = [{transform_indices = @transform_0, window_bounds = array<i64: 1, 256, 32>}, {pipeline_mode = #tpu.pipeline_mode<synchronous>, transform_indices = @transform_1, window_bounds = array<i64: 1, 32>}, {pipeline_mode = #tpu.pipeline_mode<synchronous>, transform_indices = @transform_2, window_bounds = array<i64: 1, 32>}, {pipeline_mode = #tpu.pipeline_mode<synchronous>, transform_indices = @transform_3, window_bounds = array<i64: 4, 64, 64>}, {pipeline_mode = #tpu.pipeline_mode<synchronous>, transform_indices = @transform_4, window_bounds = array<i64: 64, 4>}, {pipeline_mode = #tpu.pipeline_mode<synchronous>, transform_indices = @transform_5, window_bounds = array<i64: 1, 32>}, {pipeline_mode = #tpu.pipeline_mode<synchronous>, transform_indices = @transform_6, window_bounds = array<i64: 1, 32>}, {pipeline_mode = #tpu.pipeline_mode<synchronous>, transform_indices = @transform_7, window_bounds = array<i64: 32, 128>}, {pipeline_mode = #tpu.pipeline_mode<synchronous>, transform_indices = @transform_8, window_bounds = array<i64: 1, 128>}, {pipeline_mode = #tpu.pipeline_mode<synchronous>, transform_indices = @transform_9, window_bounds = array<i64: 128, 32>}, {pipeline_mode = #tpu.pipeline_mode<synchronous>, transform_indices = @transform_10, window_bounds = array<i64: 1, 32>}, {transform_indices = @transform_11, window_bounds = array<i64: 1, 256, 32>}]} {
    %c0 = arith.constant 0 : index
    %c0_0 = arith.constant 0 : index
    %c0_1 = arith.constant 0 : index
    %0 = vector.load %arg1[%c0, %c0_0, %c0_1] : memref<1x256x32xf32, #tpu.memory_space<vmem>>, vector<1x256x32xf32>
    %1 = vector.shape_cast %0 : vector<1x256x32xf32> to vector<256x32xf32>
    %c0_2 = arith.constant 0 : index
    %c0_3 = arith.constant 0 : index
    %2 = vector.load %arg2[%c0_2, %c0_3] : memref<1x32xf32, #tpu.memory_space<vmem>>, vector<1x32xf32>
    %c0_4 = arith.constant 0 : index
    %c0_5 = arith.constant 0 : index
    %3 = vector.load %arg3[%c0_4, %c0_5] : memref<1x32xf32, #tpu.memory_space<vmem>>, vector<1x32xf32>
    %cst = arith.constant dense<0.000000e+00> : vector<256xf32>
    %4 = vector.multi_reduction <add>, %1, %cst [1] : vector<256x32xf32> to vector<256xf32>
    %5 = vector.shape_cast %4 : vector<256xf32> to vector<256x1xf32>
    %cst_6 = arith.constant 3.200000e+01 : f32
    %6 = vector.broadcast %cst_6 : f32 to vector<256x1xf32>
    %7 = arith.divf %5, %6 : vector<256x1xf32>
    %8 = vector.broadcast %7 : vector<256x1xf32> to vector<256x32xf32>
    %9 = arith.subf %1, %8 : vector<256x32xf32>
    %10 = arith.mulf %9, %9 : vector<256x32xf32>
    %cst_7 = arith.constant dense<0.000000e+00> : vector<256xf32>
    %11 = vector.multi_reduction <add>, %10, %cst_7 [1] : vector<256x32xf32> to vector<256xf32>
    %12 = vector.shape_cast %11 : vector<256xf32> to vector<256x1xf32>
    %cst_8 = arith.constant 3.200000e+01 : f32
    %13 = vector.broadcast %cst_8 : f32 to vector<256x1xf32>
    %14 = arith.divf %12, %13 : vector<256x1xf32>
    %15 = vector.broadcast %7 : vector<256x1xf32> to vector<256x32xf32>
    %16 = arith.subf %1, %15 : vector<256x32xf32>
    %cst_9 = arith.constant 9.99999974E-6 : f32
    %17 = vector.broadcast %cst_9 : f32 to vector<256x1xf32>
    %18 = arith.addf %14, %17 : vector<256x1xf32>
    %19 = math.rsqrt %18 : vector<256x1xf32>
    %20 = vector.broadcast %19 : vector<256x1xf32> to vector<256x32xf32>
    %21 = arith.mulf %16, %20 : vector<256x32xf32>
    %22 = vector.broadcast %2 : vector<1x32xf32> to vector<256x32xf32>
    %23 = arith.mulf %21, %22 : vector<256x32xf32>
    %24 = vector.broadcast %3 : vector<1x32xf32> to vector<256x32xf32>
    %25 = arith.addf %23, %24 : vector<256x32xf32>
    %cst_10 = arith.constant 0.000000e+00 : f32
    %26 = vector.broadcast %cst_10 : f32 to vector<4x24x32xf32>
    %c0_11 = arith.constant 0 : index
    %c0_12 = arith.constant 0 : index
    %c0_13 = arith.constant 0 : index
    %27 = vector.load %arg13[%c0_11, %c0_12, %c0_13] : memref<24x24x32xf32, #tpu.memory_space<vmem>>, vector<4x24x32xf32>
    tpu.vector_store %arg13[%c0_11, %c0_12, %c0_13], %26 {strides = array<i32>} : memref<24x24x32xf32, #tpu.memory_space<vmem>>, vector<4x24x32xf32>,
    %cst_14 = arith.constant 0.000000e+00 : f32
    %28 = vector.broadcast %cst_14 : f32 to vector<4x24x32xf32>
    %c20 = arith.constant 20 : index
    %c0_15 = arith.constant 0 : index
    %c0_16 = arith.constant 0 : index
    %29 = vector.load %arg13[%c20, %c0_15, %c0_16] : memref<24x24x32xf32, #tpu.memory_space<vmem>>, vector<4x24x32xf32>
    tpu.vector_store %arg13[%c20, %c0_15, %c0_16], %28 {strides = array<i32>} : memref<24x24x32xf32, #tpu.memory_space<vmem>>, vector<4x24x32xf32>,
    %cst_17 = arith.constant 0.000000e+00 : f32
    %30 = vector.broadcast %cst_17 : f32 to vector<16x4x32xf32>
    %c4 = arith.constant 4 : index
    %c0_18 = arith.constant 0 : index
    %c0_19 = arith.constant 0 : index
    %31 = vector.load %arg13[%c4, %c0_18, %c0_19] : memref<24x24x32xf32, #tpu.memory_space<vmem>>, vector<16x4x32xf32>
    tpu.vector_store %arg13[%c4, %c0_18, %c0_19], %30 {strides = array<i32>} : memref<24x24x32xf32, #tpu.memory_space<vmem>>, vector<16x4x32xf32>,
    %cst_20 = arith.constant 0.000000e+00 : f32
    %32 = vector.broadcast %cst_20 : f32 to vector<16x4x32xf32>
    %c4_21 = arith.constant 4 : index
    %c20_22 = arith.constant 20 : index
    %c0_23 = arith.constant 0 : index
    %33 = vector.load %arg13[%c4_21, %c20_22, %c0_23] : memref<24x24x32xf32, #tpu.memory_space<vmem>>, vector<16x4x32xf32>
    tpu.vector_store %arg13[%c4_21, %c20_22, %c0_23], %32 {strides = array<i32>} : memref<24x24x32xf32, #tpu.memory_space<vmem>>, vector<16x4x32xf32>,
    %34 = vector.shape_cast %25 : vector<256x32xf32> to vector<16x16x32xf32>
    %c4_24 = arith.constant 4 : index
    %c4_25 = arith.constant 4 : index
    %c0_26 = arith.constant 0 : index
    %35 = vector.load %arg13[%c4_24, %c4_25, %c0_26] : memref<24x24x32xf32, #tpu.memory_space<vmem>>, vector<16x16x32xf32>
    tpu.vector_store %arg13[%c4_24, %c4_25, %c0_26], %34 {strides = array<i32>} : memref<24x24x32xf32, #tpu.memory_space<vmem>>, vector<16x16x32xf32>,
    %c0_27 = arith.constant 0 : index
    %c0_28 = arith.constant 0 : index
    %c0_29 = arith.constant 0 : index
    %36 = vector.load %arg13[%c0_27, %c0_28, %c0_29] : memref<24x24x32xf32, #tpu.memory_space<vmem>>, vector<8x8x8xf32>
    %37 = vector.shape_cast %36 : vector<8x8x8xf32> to vector<64x8xf32>
    %c0_30 = arith.constant 0 : index
    %c8 = arith.constant 8 : index
    %c0_31 = arith.constant 0 : index
    %38 = vector.load %arg13[%c0_30, %c8, %c0_31] : memref<24x24x32xf32, #tpu.memory_space<vmem>>, vector<8x8x8xf32>
    %39 = vector.shape_cast %38 : vector<8x8x8xf32> to vector<64x8xf32>
    %c0_32 = arith.constant 0 : index
    %c16 = arith.constant 16 : index
    %c0_33 = arith.constant 0 : index
    %40 = vector.load %arg13[%c0_32, %c16, %c0_33] : memref<24x24x32xf32, #tpu.memory_space<vmem>>, vector<8x8x8xf32>
    %41 = vector.shape_cast %40 : vector<8x8x8xf32> to vector<64x8xf32>
    %c8_34 = arith.constant 8 : index
    %c0_35 = arith.constant 0 : index
    %c0_36 = arith.constant 0 : index
    %42 = vector.load %arg13[%c8_34, %c0_35, %c0_36] : memref<24x24x32xf32, #tpu.memory_space<vmem>>, vector<8x8x8xf32>
    %43 = vector.shape_cast %42 : vector<8x8x8xf32> to vector<64x8xf32>
    %c8_37 = arith.constant 8 : index
    %c8_38 = arith.constant 8 : index
    %c0_39 = arith.constant 0 : index
    %44 = vector.load %arg13[%c8_37, %c8_38, %c0_39] : memref<24x24x32xf32, #tpu.memory_space<vmem>>, vector<8x8x8xf32>
    %45 = vector.shape_cast %44 : vector<8x8x8xf32> to vector<64x8xf32>
    %c8_40 = arith.constant 8 : index
    %c16_41 = arith.constant 16 : index
    %c0_42 = arith.constant 0 : index
    %46 = vector.load %arg13[%c8_40, %c16_41, %c0_42] : memref<24x24x32xf32, #tpu.memory_space<vmem>>, vector<8x8x8xf32>
    %47 = vector.shape_cast %46 : vector<8x8x8xf32> to vector<64x8xf32>
    %c16_43 = arith.constant 16 : index
    %c0_44 = arith.constant 0 : index
    %c0_45 = arith.constant 0 : index
    %48 = vector.load %arg13[%c16_43, %c0_44, %c0_45] : memref<24x24x32xf32, #tpu.memory_space<vmem>>, vector<8x8x8xf32>
    %49 = vector.shape_cast %48 : vector<8x8x8xf32> to vector<64x8xf32>
    %c16_46 = arith.constant 16 : index
    %c8_47 = arith.constant 8 : index
    %c0_48 = arith.constant 0 : index
    %50 = vector.load %arg13[%c16_46, %c8_47, %c0_48] : memref<24x24x32xf32, #tpu.memory_space<vmem>>, vector<8x8x8xf32>
    %51 = vector.shape_cast %50 : vector<8x8x8xf32> to vector<64x8xf32>
    %c16_49 = arith.constant 16 : index
    %c16_50 = arith.constant 16 : index
    %c0_51 = arith.constant 0 : index
    %52 = vector.load %arg13[%c16_49, %c16_50, %c0_51] : memref<24x24x32xf32, #tpu.memory_space<vmem>>, vector<8x8x8xf32>
    %53 = vector.shape_cast %52 : vector<8x8x8xf32> to vector<64x8xf32>
    %54 = tpu.concatenate %37, %39, %41, %43, %45, %47, %49, %51, %53 in 1 : vector<64x8xf32>, vector<64x8xf32>, vector<64x8xf32>, vector<64x8xf32>, vector<64x8xf32>, vector<64x8xf32>, vector<64x8xf32>, vector<64x8xf32>, vector<64x8xf32> -> vector<64x72xf32>
    %c0_52 = arith.constant 0 : index
    %c0_53 = arith.constant 0 : index
    %c0_54 = arith.constant 0 : index
    %55 = vector.load %arg4[%c0_52, %c0_53, %c0_54] : memref<4x64x64xf32, #tpu.memory_space<vmem>>, vector<1x64x64xf32>
    %56 = vector.shape_cast %55 : vector<1x64x64xf32> to vector<64x64xf32>
    %cst_55 = arith.constant dense<0.000000e+00> : vector<64x72xf32>
    %57 = tpu.matmul %56, %54, %cst_55 {dimension_numbers = #tpu.dot_dimension_numbers<[1], [0], [0], [1], [0, 0, 1, 1], [], []>} : vector<64x64xf32>, vector<64x72xf32>, vector<64x72xf32> -> vector<64x72xf32>
    %c0_56 = arith.constant 0 : index
    %c0_57 = arith.constant 0 : index
    %58 = vector.load %arg5[%c0_56, %c0_57] : memref<64x4xf32, #tpu.memory_space<vmem>>, vector<64x1xf32>
    %59 = vector.broadcast %58 : vector<64x1xf32> to vector<64x72xf32>
    %60 = arith.addf %57, %59 : vector<64x72xf32>
    %61 = vector.extract_strided_slice %60 {offsets = [0, 0], sizes = [64, 8], strides = [1, 1]} : vector<64x72xf32> to vector<64x8xf32>
    %62 = vector.shape_cast %61 : vector<64x8xf32> to vector<8x8x8xf32>
    %c0_58 = arith.constant 0 : index
    %c0_59 = arith.constant 0 : index
    %c0_60 = arith.constant 0 : index
    %63 = vector.load %arg14[%c0_58, %c0_59, %c0_60] : memref<24x24x32xf32, #tpu.memory_space<vmem>>, vector<8x8x8xf32>
    tpu.vector_store %arg14[%c0_58, %c0_59, %c0_60], %62 {strides = array<i32>} : memref<24x24x32xf32, #tpu.memory_space<vmem>>, vector<8x8x8xf32>,
    %64 = vector.extract_strided_slice %60 {offsets = [0, 8], sizes = [64, 8], strides = [1, 1]} : vector<64x72xf32> to vector<64x8xf32>
    %65 = vector.shape_cast %64 : vector<64x8xf32> to vector<8x8x8xf32>
    %c0_61 = arith.constant 0 : index
    %c8_62 = arith.constant 8 : index
    %c0_63 = arith.constant 0 : index
    %66 = vector.load %arg14[%c0_61, %c8_62, %c0_63] : memref<24x24x32xf32, #tpu.memory_space<vmem>>, vector<8x8x8xf32>
    tpu.vector_store %arg14[%c0_61, %c8_62, %c0_63], %65 {strides = array<i32>} : memref<24x24x32xf32, #tpu.memory_space<vmem>>, vector<8x8x8xf32>,
    %67 = vector.extract_strided_slice %60 {offsets = [0, 16], sizes = [64, 8], strides = [1, 1]} : vector<64x72xf32> to vector<64x8xf32>
    %68 = vector.shape_cast %67 : vector<64x8xf32> to vector<8x8x8xf32>
    %c0_64 = arith.constant 0 : index
    %c16_65 = arith.constant 16 : index
    %c0_66 = arith.constant 0 : index
    %69 = vector.load %arg14[%c0_64, %c16_65, %c0_66] : memref<24x24x32xf32, #tpu.memory_space<vmem>>, vector<8x8x8xf32>
    tpu.vector_store %arg14[%c0_64, %c16_65, %c0_66], %68 {strides = array<i32>} : memref<24x24x32xf32, #tpu.memory_space<vmem>>, vector<8x8x8xf32>,
    %70 = vector.extract_strided_slice %60 {offsets = [0, 24], sizes = [64, 8], strides = [1, 1]} : vector<64x72xf32> to vector<64x8xf32>
    %71 = vector.shape_cast %70 : vector<64x8xf32> to vector<8x8x8xf32>
    %c8_67 = arith.constant 8 : index
    %c0_68 = arith.constant 0 : index
    %c0_69 = arith.constant 0 : index
    %72 = vector.load %arg14[%c8_67, %c0_68, %c0_69] : memref<24x24x32xf32, #tpu.memory_space<vmem>>, vector<8x8x8xf32>
    tpu.vector_store %arg14[%c8_67, %c0_68, %c0_69], %71 {strides = array<i32>} : memref<24x24x32xf32, #tpu.memory_space<vmem>>, vector<8x8x8xf32>,
    %73 = vector.extract_strided_slice %60 {offsets = [0, 32], sizes = [64, 8], strides = [1, 1]} : vector<64x72xf32> to vector<64x8xf32>
    %74 = vector.shape_cast %73 : vector<64x8xf32> to vector<8x8x8xf32>
    %c8_70 = arith.constant 8 : index
    %c8_71 = arith.constant 8 : index
    %c0_72 = arith.constant 0 : index
    %75 = vector.load %arg14[%c8_70, %c8_71, %c0_72] : memref<24x24x32xf32, #tpu.memory_space<vmem>>, vector<8x8x8xf32>
    tpu.vector_store %arg14[%c8_70, %c8_71, %c0_72], %74 {strides = array<i32>} : memref<24x24x32xf32, #tpu.memory_space<vmem>>, vector<8x8x8xf32>,
    %76 = vector.extract_strided_slice %60 {offsets = [0, 40], sizes = [64, 8], strides = [1, 1]} : vector<64x72xf32> to vector<64x8xf32>
    %77 = vector.shape_cast %76 : vector<64x8xf32> to vector<8x8x8xf32>
    %c8_73 = arith.constant 8 : index
    %c16_74 = arith.constant 16 : index
    %c0_75 = arith.constant 0 : index
    %78 = vector.load %arg14[%c8_73, %c16_74, %c0_75] : memref<24x24x32xf32, #tpu.memory_space<vmem>>, vector<8x8x8xf32>
    tpu.vector_store %arg14[%c8_73, %c16_74, %c0_75], %77 {strides = array<i32>} : memref<24x24x32xf32, #tpu.memory_space<vmem>>, vector<8x8x8xf32>,
    %79 = vector.extract_strided_slice %60 {offsets = [0, 48], sizes = [64, 8], strides = [1, 1]} : vector<64x72xf32> to vector<64x8xf32>
    %80 = vector.shape_cast %79 : vector<64x8xf32> to vector<8x8x8xf32>
    %c16_76 = arith.constant 16 : index
    %c0_77 = arith.constant 0 : index
    %c0_78 = arith.constant 0 : index
    %81 = vector.load %arg14[%c16_76, %c0_77, %c0_78] : memref<24x24x32xf32, #tpu.memory_space<vmem>>, vector<8x8x8xf32>
    tpu.vector_store %arg14[%c16_76, %c0_77, %c0_78], %80 {strides = array<i32>} : memref<24x24x32xf32, #tpu.memory_space<vmem>>, vector<8x8x8xf32>,
    %82 = vector.extract_strided_slice %60 {offsets = [0, 56], sizes = [64, 8], strides = [1, 1]} : vector<64x72xf32> to vector<64x8xf32>
    %83 = vector.shape_cast %82 : vector<64x8xf32> to vector<8x8x8xf32>
    %c16_79 = arith.constant 16 : index
    %c8_80 = arith.constant 8 : index
    %c0_81 = arith.constant 0 : index
    %84 = vector.load %arg14[%c16_79, %c8_80, %c0_81] : memref<24x24x32xf32, #tpu.memory_space<vmem>>, vector<8x8x8xf32>
    tpu.vector_store %arg14[%c16_79, %c8_80, %c0_81], %83 {strides = array<i32>} : memref<24x24x32xf32, #tpu.memory_space<vmem>>, vector<8x8x8xf32>,
    %85 = vector.extract_strided_slice %60 {offsets = [0, 64], sizes = [64, 8], strides = [1, 1]} : vector<64x72xf32> to vector<64x8xf32>
    %86 = vector.shape_cast %85 : vector<64x8xf32> to vector<8x8x8xf32>
    %c16_82 = arith.constant 16 : index
    %c16_83 = arith.constant 16 : index
    %c0_84 = arith.constant 0 : index
    %87 = vector.load %arg14[%c16_82, %c16_83, %c0_84] : memref<24x24x32xf32, #tpu.memory_space<vmem>>, vector<8x8x8xf32>
    tpu.vector_store %arg14[%c16_82, %c16_83, %c0_84], %86 {strides = array<i32>} : memref<24x24x32xf32, #tpu.memory_space<vmem>>, vector<8x8x8xf32>,
    %c0_85 = arith.constant 0 : index
    %c0_86 = arith.constant 0 : index
    %c8_87 = arith.constant 8 : index
    %88 = vector.load %arg13[%c0_85, %c0_86, %c8_87] : memref<24x24x32xf32, #tpu.memory_space<vmem>>, vector<8x8x8xf32>
    %89 = vector.shape_cast %88 : vector<8x8x8xf32> to vector<64x8xf32>
    %c0_88 = arith.constant 0 : index
    %c8_89 = arith.constant 8 : index
    %c8_90 = arith.constant 8 : index
    %90 = vector.load %arg13[%c0_88, %c8_89, %c8_90] : memref<24x24x32xf32, #tpu.memory_space<vmem>>, vector<8x8x8xf32>
    %91 = vector.shape_cast %90 : vector<8x8x8xf32> to vector<64x8xf32>
    %c0_91 = arith.constant 0 : index
    %c16_92 = arith.constant 16 : index
    %c8_93 = arith.constant 8 : index
    %92 = vector.load %arg13[%c0_91, %c16_92, %c8_93] : memref<24x24x32xf32, #tpu.memory_space<vmem>>, vector<8x8x8xf32>
    %93 = vector.shape_cast %92 : vector<8x8x8xf32> to vector<64x8xf32>
    %c8_94 = arith.constant 8 : index
    %c0_95 = arith.constant 0 : index
    %c8_96 = arith.constant 8 : index
    %94 = vector.load %arg13[%c8_94, %c0_95, %c8_96] : memref<24x24x32xf32, #tpu.memory_space<vmem>>, vector<8x8x8xf32>
    %95 = vector.shape_cast %94 : vector<8x8x8xf32> to vector<64x8xf32>
    %c8_97 = arith.constant 8 : index
    %c8_98 = arith.constant 8 : index
    %c8_99 = arith.constant 8 : index
    %96 = vector.load %arg13[%c8_97, %c8_98, %c8_99] : memref<24x24x32xf32, #tpu.memory_space<vmem>>, vector<8x8x8xf32>
    %97 = vector.shape_cast %96 : vector<8x8x8xf32> to vector<64x8xf32>
    %c8_100 = arith.constant 8 : index
    %c16_101 = arith.constant 16 : index
    %c8_102 = arith.constant 8 : index
    %98 = vector.load %arg13[%c8_100, %c16_101, %c8_102] : memref<24x24x32xf32, #tpu.memory_space<vmem>>, vector<8x8x8xf32>
    %99 = vector.shape_cast %98 : vector<8x8x8xf32> to vector<64x8xf32>
    %c16_103 = arith.constant 16 : index
    %c0_104 = arith.constant 0 : index
    %c8_105 = arith.constant 8 : index
    %100 = vector.load %arg13[%c16_103, %c0_104, %c8_105] : memref<24x24x32xf32, #tpu.memory_space<vmem>>, vector<8x8x8xf32>
    %101 = vector.shape_cast %100 : vector<8x8x8xf32> to vector<64x8xf32>
    %c16_106 = arith.constant 16 : index
    %c8_107 = arith.constant 8 : index
    %c8_108 = arith.constant 8 : index
    %102 = vector.load %arg13[%c16_106, %c8_107, %c8_108] : memref<24x24x32xf32, #tpu.memory_space<vmem>>, vector<8x8x8xf32>
    %103 = vector.shape_cast %102 : vector<8x8x8xf32> to vector<64x8xf32>
    %c16_109 = arith.constant 16 : index
    %c16_110 = arith.constant 16 : index
    %c8_111 = arith.constant 8 : index
    %104 = vector.load %arg13[%c16_109, %c16_110, %c8_111] : memref<24x24x32xf32, #tpu.memory_space<vmem>>, vector<8x8x8xf32>
    %105 = vector.shape_cast %104 : vector<8x8x8xf32> to vector<64x8xf32>
    %106 = tpu.concatenate %89, %91, %93, %95, %97, %99, %101, %103, %105 in 1 : vector<64x8xf32>, vector<64x8xf32>, vector<64x8xf32>, vector<64x8xf32>, vector<64x8xf32>, vector<64x8xf32>, vector<64x8xf32>, vector<64x8xf32>, vector<64x8xf32> -> vector<64x72xf32>
    %c1 = arith.constant 1 : index
    %c0_112 = arith.constant 0 : index
    %c0_113 = arith.constant 0 : index
    %107 = vector.load %arg4[%c1, %c0_112, %c0_113] : memref<4x64x64xf32, #tpu.memory_space<vmem>>, vector<1x64x64xf32>
    %108 = vector.shape_cast %107 : vector<1x64x64xf32> to vector<64x64xf32>
    %cst_114 = arith.constant dense<0.000000e+00> : vector<64x72xf32>
    %109 = tpu.matmul %108, %106, %cst_114 {dimension_numbers = #tpu.dot_dimension_numbers<[1], [0], [0], [1], [0, 0, 1, 1], [], []>} : vector<64x64xf32>, vector<64x72xf32>, vector<64x72xf32> -> vector<64x72xf32>
    %c0_115 = arith.constant 0 : index
    %c1_116 = arith.constant 1 : index
    %110 = vector.load %arg5[%c0_115, %c1_116] : memref<64x4xf32, #tpu.memory_space<vmem>>, vector<64x1xf32>
    %111 = vector.broadcast %110 : vector<64x1xf32> to vector<64x72xf32>
    %112 = arith.addf %109, %111 : vector<64x72xf32>
    %113 = vector.extract_strided_slice %112 {offsets = [0, 0], sizes = [64, 8], strides = [1, 1]} : vector<64x72xf32> to vector<64x8xf32>
    %114 = vector.shape_cast %113 : vector<64x8xf32> to vector<8x8x8xf32>
    %c0_117 = arith.constant 0 : index
    %c0_118 = arith.constant 0 : index
    %c8_119 = arith.constant 8 : index
    %115 = vector.load %arg14[%c0_117, %c0_118, %c8_119] : memref<24x24x32xf32, #tpu.memory_space<vmem>>, vector<8x8x8xf32>
    tpu.vector_store %arg14[%c0_117, %c0_118, %c8_119], %114 {strides = array<i32>} : memref<24x24x32xf32, #tpu.memory_space<vmem>>, vector<8x8x8xf32>,
    %116 = vector.extract_strided_slice %112 {offsets = [0, 8], sizes = [64, 8], strides = [1, 1]} : vector<64x72xf32> to vector<64x8xf32>
    %117 = vector.shape_cast %116 : vector<64x8xf32> to vector<8x8x8xf32>
    %c0_120 = arith.constant 0 : index
    %c8_121 = arith.constant 8 : index
    %c8_122 = arith.constant 8 : index
    %118 = vector.load %arg14[%c0_120, %c8_121, %c8_122] : memref<24x24x32xf32, #tpu.memory_space<vmem>>, vector<8x8x8xf32>
    tpu.vector_store %arg14[%c0_120, %c8_121, %c8_122], %117 {strides = array<i32>} : memref<24x24x32xf32, #tpu.memory_space<vmem>>, vector<8x8x8xf32>,
    %119 = vector.extract_strided_slice %112 {offsets = [0, 16], sizes = [64, 8], strides = [1, 1]} : vector<64x72xf32> to vector<64x8xf32>
    %120 = vector.shape_cast %119 : vector<64x8xf32> to vector<8x8x8xf32>
    %c0_123 = arith.constant 0 : index
    %c16_124 = arith.constant 16 : index
    %c8_125 = arith.constant 8 : index
    %121 = vector.load %arg14[%c0_123, %c16_124, %c8_125] : memref<24x24x32xf32, #tpu.memory_space<vmem>>, vector<8x8x8xf32>
    tpu.vector_store %arg14[%c0_123, %c16_124, %c8_125], %120 {strides = array<i32>} : memref<24x24x32xf32, #tpu.memory_space<vmem>>, vector<8x8x8xf32>,
    %122 = vector.extract_strided_slice %112 {offsets = [0, 24], sizes = [64, 8], strides = [1, 1]} : vector<64x72xf32> to vector<64x8xf32>
    %123 = vector.shape_cast %122 : vector<64x8xf32> to vector<8x8x8xf32>
    %c8_126 = arith.constant 8 : index
    %c0_127 = arith.constant 0 : index
    %c8_128 = arith.constant 8 : index
    %124 = vector.load %arg14[%c8_126, %c0_127, %c8_128] : memref<24x24x32xf32, #tpu.memory_space<vmem>>, vector<8x8x8xf32>
    tpu.vector_store %arg14[%c8_126, %c0_127, %c8_128], %123 {strides = array<i32>} : memref<24x24x32xf32, #tpu.memory_space<vmem>>, vector<8x8x8xf32>,
    %125 = vector.extract_strided_slice %112 {offsets = [0, 32], sizes = [64, 8], strides = [1, 1]} : vector<64x72xf32> to vector<64x8xf32>
    %126 = vector.shape_cast %125 : vector<64x8xf32> to vector<8x8x8xf32>
    %c8_129 = arith.constant 8 : index
    %c8_130 = arith.constant 8 : index
    %c8_131 = arith.constant 8 : index
    %127 = vector.load %arg14[%c8_129, %c8_130, %c8_131] : memref<24x24x32xf32, #tpu.memory_space<vmem>>, vector<8x8x8xf32>
    tpu.vector_store %arg14[%c8_129, %c8_130, %c8_131], %126 {strides = array<i32>} : memref<24x24x32xf32, #tpu.memory_space<vmem>>, vector<8x8x8xf32>,
    %128 = vector.extract_strided_slice %112 {offsets = [0, 40], sizes = [64, 8], strides = [1, 1]} : vector<64x72xf32> to vector<64x8xf32>
    %129 = vector.shape_cast %128 : vector<64x8xf32> to vector<8x8x8xf32>
    %c8_132 = arith.constant 8 : index
    %c16_133 = arith.constant 16 : index
    %c8_134 = arith.constant 8 : index
    %130 = vector.load %arg14[%c8_132, %c16_133, %c8_134] : memref<24x24x32xf32, #tpu.memory_space<vmem>>, vector<8x8x8xf32>
    tpu.vector_store %arg14[%c8_132, %c16_133, %c8_134], %129 {strides = array<i32>} : memref<24x24x32xf32, #tpu.memory_space<vmem>>, vector<8x8x8xf32>,
    %131 = vector.extract_strided_slice %112 {offsets = [0, 48], sizes = [64, 8], strides = [1, 1]} : vector<64x72xf32> to vector<64x8xf32>
    %132 = vector.shape_cast %131 : vector<64x8xf32> to vector<8x8x8xf32>
    %c16_135 = arith.constant 16 : index
    %c0_136 = arith.constant 0 : index
    %c8_137 = arith.constant 8 : index
    %133 = vector.load %arg14[%c16_135, %c0_136, %c8_137] : memref<24x24x32xf32, #tpu.memory_space<vmem>>, vector<8x8x8xf32>
    tpu.vector_store %arg14[%c16_135, %c0_136, %c8_137], %132 {strides = array<i32>} : memref<24x24x32xf32, #tpu.memory_space<vmem>>, vector<8x8x8xf32>,
    %134 = vector.extract_strided_slice %112 {offsets = [0, 56], sizes = [64, 8], strides = [1, 1]} : vector<64x72xf32> to vector<64x8xf32>
    %135 = vector.shape_cast %134 : vector<64x8xf32> to vector<8x8x8xf32>
    %c16_138 = arith.constant 16 : index
    %c8_139 = arith.constant 8 : index
    %c8_140 = arith.constant 8 : index
    %136 = vector.load %arg14[%c16_138, %c8_139, %c8_140] : memref<24x24x32xf32, #tpu.memory_space<vmem>>, vector<8x8x8xf32>
    tpu.vector_store %arg14[%c16_138, %c8_139, %c8_140], %135 {strides = array<i32>} : memref<24x24x32xf32, #tpu.memory_space<vmem>>, vector<8x8x8xf32>,
    %137 = vector.extract_strided_slice %112 {offsets = [0, 64], sizes = [64, 8], strides = [1, 1]} : vector<64x72xf32> to vector<64x8xf32>
    %138 = vector.shape_cast %137 : vector<64x8xf32> to vector<8x8x8xf32>
    %c16_141 = arith.constant 16 : index
    %c16_142 = arith.constant 16 : index
    %c8_143 = arith.constant 8 : index
    %139 = vector.load %arg14[%c16_141, %c16_142, %c8_143] : memref<24x24x32xf32, #tpu.memory_space<vmem>>, vector<8x8x8xf32>
    tpu.vector_store %arg14[%c16_141, %c16_142, %c8_143], %138 {strides = array<i32>} : memref<24x24x32xf32, #tpu.memory_space<vmem>>, vector<8x8x8xf32>,
    %c0_144 = arith.constant 0 : index
    %c0_145 = arith.constant 0 : index
    %c16_146 = arith.constant 16 : index
    %140 = vector.load %arg13[%c0_144, %c0_145, %c16_146] : memref<24x24x32xf32, #tpu.memory_space<vmem>>, vector<8x8x8xf32>
    %141 = vector.shape_cast %140 : vector<8x8x8xf32> to vector<64x8xf32>
    %c0_147 = arith.constant 0 : index
    %c8_148 = arith.constant 8 : index
    %c16_149 = arith.constant 16 : index
    %142 = vector.load %arg13[%c0_147, %c8_148, %c16_149] : memref<24x24x32xf32, #tpu.memory_space<vmem>>, vector<8x8x8xf32>
    %143 = vector.shape_cast %142 : vector<8x8x8xf32> to vector<64x8xf32>
    %c0_150 = arith.constant 0 : index
    %c16_151 = arith.constant 16 : index
    %c16_152 = arith.constant 16 : index
    %144 = vector.load %arg13[%c0_150, %c16_151, %c16_152] : memref<24x24x32xf32, #tpu.memory_space<vmem>>, vector<8x8x8xf32>
    %145 = vector.shape_cast %144 : vector<8x8x8xf32> to vector<64x8xf32>
    %c8_153 = arith.constant 8 : index
    %c0_154 = arith.constant 0 : index
    %c16_155 = arith.constant 16 : index
    %146 = vector.load %arg13[%c8_153, %c0_154, %c16_155] : memref<24x24x32xf32, #tpu.memory_space<vmem>>, vector<8x8x8xf32>
    %147 = vector.shape_cast %146 : vector<8x8x8xf32> to vector<64x8xf32>
    %c8_156 = arith.constant 8 : index
    %c8_157 = arith.constant 8 : index
    %c16_158 = arith.constant 16 : index
    %148 = vector.load %arg13[%c8_156, %c8_157, %c16_158] : memref<24x24x32xf32, #tpu.memory_space<vmem>>, vector<8x8x8xf32>
    %149 = vector.shape_cast %148 : vector<8x8x8xf32> to vector<64x8xf32>
    %c8_159 = arith.constant 8 : index
    %c16_160 = arith.constant 16 : index
    %c16_161 = arith.constant 16 : index
    %150 = vector.load %arg13[%c8_159, %c16_160, %c16_161] : memref<24x24x32xf32, #tpu.memory_space<vmem>>, vector<8x8x8xf32>
    %151 = vector.shape_cast %150 : vector<8x8x8xf32> to vector<64x8xf32>
    %c16_162 = arith.constant 16 : index
    %c0_163 = arith.constant 0 : index
    %c16_164 = arith.constant 16 : index
    %152 = vector.load %arg13[%c16_162, %c0_163, %c16_164] : memref<24x24x32xf32, #tpu.memory_space<vmem>>, vector<8x8x8xf32>
    %153 = vector.shape_cast %152 : vector<8x8x8xf32> to vector<64x8xf32>
    %c16_165 = arith.constant 16 : index
    %c8_166 = arith.constant 8 : index
    %c16_167 = arith.constant 16 : index
    %154 = vector.load %arg13[%c16_165, %c8_166, %c16_167] : memref<24x24x32xf32, #tpu.memory_space<vmem>>, vector<8x8x8xf32>
    %155 = vector.shape_cast %154 : vector<8x8x8xf32> to vector<64x8xf32>
    %c16_168 = arith.constant 16 : index
    %c16_169 = arith.constant 16 : index
    %c16_170 = arith.constant 16 : index
    %156 = vector.load %arg13[%c16_168, %c16_169, %c16_170] : memref<24x24x32xf32, #tpu.memory_space<vmem>>, vector<8x8x8xf32>
    %157 = vector.shape_cast %156 : vector<8x8x8xf32> to vector<64x8xf32>
    %158 = tpu.concatenate %141, %143, %145, %147, %149, %151, %153, %155, %157 in 1 : vector<64x8xf32>, vector<64x8xf32>, vector<64x8xf32>, vector<64x8xf32>, vector<64x8xf32>, vector<64x8xf32>, vector<64x8xf32>, vector<64x8xf32>, vector<64x8xf32> -> vector<64x72xf32>
    %c2 = arith.constant 2 : index
    %c0_171 = arith.constant 0 : index
    %c0_172 = arith.constant 0 : index
    %159 = vector.load %arg4[%c2, %c0_171, %c0_172] : memref<4x64x64xf32, #tpu.memory_space<vmem>>, vector<1x64x64xf32>
    %160 = vector.shape_cast %159 : vector<1x64x64xf32> to vector<64x64xf32>
    %cst_173 = arith.constant dense<0.000000e+00> : vector<64x72xf32>
    %161 = tpu.matmul %160, %158, %cst_173 {dimension_numbers = #tpu.dot_dimension_numbers<[1], [0], [0], [1], [0, 0, 1, 1], [], []>} : vector<64x64xf32>, vector<64x72xf32>, vector<64x72xf32> -> vector<64x72xf32>
    %c0_174 = arith.constant 0 : index
    %c2_175 = arith.constant 2 : index
    %162 = vector.load %arg5[%c0_174, %c2_175] : memref<64x4xf32, #tpu.memory_space<vmem>>, vector<64x1xf32>
    %163 = vector.broadcast %162 : vector<64x1xf32> to vector<64x72xf32>
    %164 = arith.addf %161, %163 : vector<64x72xf32>
    %165 = vector.extract_strided_slice %164 {offsets = [0, 0], sizes = [64, 8], strides = [1, 1]} : vector<64x72xf32> to vector<64x8xf32>
    %166 = vector.shape_cast %165 : vector<64x8xf32> to vector<8x8x8xf32>
    %c0_176 = arith.constant 0 : index
    %c0_177 = arith.constant 0 : index
    %c16_178 = arith.constant 16 : index
    %167 = vector.load %arg14[%c0_176, %c0_177, %c16_178] : memref<24x24x32xf32, #tpu.memory_space<vmem>>, vector<8x8x8xf32>
    tpu.vector_store %arg14[%c0_176, %c0_177, %c16_178], %166 {strides = array<i32>} : memref<24x24x32xf32, #tpu.memory_space<vmem>>, vector<8x8x8xf32>,
    %168 = vector.extract_strided_slice %164 {offsets = [0, 8], sizes = [64, 8], strides = [1, 1]} : vector<64x72xf32> to vector<64x8xf32>
    %169 = vector.shape_cast %168 : vector<64x8xf32> to vector<8x8x8xf32>
    %c0_179 = arith.constant 0 : index
    %c8_180 = arith.constant 8 : index
    %c16_181 = arith.constant 16 : index
    %170 = vector.load %arg14[%c0_179, %c8_180, %c16_181] : memref<24x24x32xf32, #tpu.memory_space<vmem>>, vector<8x8x8xf32>
    tpu.vector_store %arg14[%c0_179, %c8_180, %c16_181], %169 {strides = array<i32>} : memref<24x24x32xf32, #tpu.memory_space<vmem>>, vector<8x8x8xf32>,
    %171 = vector.extract_strided_slice %164 {offsets = [0, 16], sizes = [64, 8], strides = [1, 1]} : vector<64x72xf32> to vector<64x8xf32>
    %172 = vector.shape_cast %171 : vector<64x8xf32> to vector<8x8x8xf32>
    %c0_182 = arith.constant 0 : index
    %c16_183 = arith.constant 16 : index
    %c16_184 = arith.constant 16 : index
    %173 = vector.load %arg14[%c0_182, %c16_183, %c16_184] : memref<24x24x32xf32, #tpu.memory_space<vmem>>, vector<8x8x8xf32>
    tpu.vector_store %arg14[%c0_182, %c16_183, %c16_184], %172 {strides = array<i32>} : memref<24x24x32xf32, #tpu.memory_space<vmem>>, vector<8x8x8xf32>,
    %174 = vector.extract_strided_slice %164 {offsets = [0, 24], sizes = [64, 8], strides = [1, 1]} : vector<64x72xf32> to vector<64x8xf32>
    %175 = vector.shape_cast %174 : vector<64x8xf32> to vector<8x8x8xf32>
    %c8_185 = arith.constant 8 : index
    %c0_186 = arith.constant 0 : index
    %c16_187 = arith.constant 16 : index
    %176 = vector.load %arg14[%c8_185, %c0_186, %c16_187] : memref<24x24x32xf32, #tpu.memory_space<vmem>>, vector<8x8x8xf32>
    tpu.vector_store %arg14[%c8_185, %c0_186, %c16_187], %175 {strides = array<i32>} : memref<24x24x32xf32, #tpu.memory_space<vmem>>, vector<8x8x8xf32>,
    %177 = vector.extract_strided_slice %164 {offsets = [0, 32], sizes = [64, 8], strides = [1, 1]} : vector<64x72xf32> to vector<64x8xf32>
    %178 = vector.shape_cast %177 : vector<64x8xf32> to vector<8x8x8xf32>
    %c8_188 = arith.constant 8 : index
    %c8_189 = arith.constant 8 : index
    %c16_190 = arith.constant 16 : index
    %179 = vector.load %arg14[%c8_188, %c8_189, %c16_190] : memref<24x24x32xf32, #tpu.memory_space<vmem>>, vector<8x8x8xf32>
    tpu.vector_store %arg14[%c8_188, %c8_189, %c16_190], %178 {strides = array<i32>} : memref<24x24x32xf32, #tpu.memory_space<vmem>>, vector<8x8x8xf32>,
    %180 = vector.extract_strided_slice %164 {offsets = [0, 40], sizes = [64, 8], strides = [1, 1]} : vector<64x72xf32> to vector<64x8xf32>
    %181 = vector.shape_cast %180 : vector<64x8xf32> to vector<8x8x8xf32>
    %c8_191 = arith.constant 8 : index
    %c16_192 = arith.constant 16 : index
    %c16_193 = arith.constant 16 : index
    %182 = vector.load %arg14[%c8_191, %c16_192, %c16_193] : memref<24x24x32xf32, #tpu.memory_space<vmem>>, vector<8x8x8xf32>
    tpu.vector_store %arg14[%c8_191, %c16_192, %c16_193], %181 {strides = array<i32>} : memref<24x24x32xf32, #tpu.memory_space<vmem>>, vector<8x8x8xf32>,
    %183 = vector.extract_strided_slice %164 {offsets = [0, 48], sizes = [64, 8], strides = [1, 1]} : vector<64x72xf32> to vector<64x8xf32>
    %184 = vector.shape_cast %183 : vector<64x8xf32> to vector<8x8x8xf32>
    %c16_194 = arith.constant 16 : index
    %c0_195 = arith.constant 0 : index
    %c16_196 = arith.constant 16 : index
    %185 = vector.load %arg14[%c16_194, %c0_195, %c16_196] : memref<24x24x32xf32, #tpu.memory_space<vmem>>, vector<8x8x8xf32>
    tpu.vector_store %arg14[%c16_194, %c0_195, %c16_196], %184 {strides = array<i32>} : memref<24x24x32xf32, #tpu.memory_space<vmem>>, vector<8x8x8xf32>,
    %186 = vector.extract_strided_slice %164 {offsets = [0, 56], sizes = [64, 8], strides = [1, 1]} : vector<64x72xf32> to vector<64x8xf32>
    %187 = vector.shape_cast %186 : vector<64x8xf32> to vector<8x8x8xf32>
    %c16_197 = arith.constant 16 : index
    %c8_198 = arith.constant 8 : index
    %c16_199 = arith.constant 16 : index
    %188 = vector.load %arg14[%c16_197, %c8_198, %c16_199] : memref<24x24x32xf32, #tpu.memory_space<vmem>>, vector<8x8x8xf32>
    tpu.vector_store %arg14[%c16_197, %c8_198, %c16_199], %187 {strides = array<i32>} : memref<24x24x32xf32, #tpu.memory_space<vmem>>, vector<8x8x8xf32>,
    %189 = vector.extract_strided_slice %164 {offsets = [0, 64], sizes = [64, 8], strides = [1, 1]} : vector<64x72xf32> to vector<64x8xf32>
    %190 = vector.shape_cast %189 : vector<64x8xf32> to vector<8x8x8xf32>
    %c16_200 = arith.constant 16 : index
    %c16_201 = arith.constant 16 : index
    %c16_202 = arith.constant 16 : index
    %191 = vector.load %arg14[%c16_200, %c16_201, %c16_202] : memref<24x24x32xf32, #tpu.memory_space<vmem>>, vector<8x8x8xf32>
    tpu.vector_store %arg14[%c16_200, %c16_201, %c16_202], %190 {strides = array<i32>} : memref<24x24x32xf32, #tpu.memory_space<vmem>>, vector<8x8x8xf32>,
    %c0_203 = arith.constant 0 : index
    %c0_204 = arith.constant 0 : index
    %c24 = arith.constant 24 : index
    %192 = vector.load %arg13[%c0_203, %c0_204, %c24] : memref<24x24x32xf32, #tpu.memory_space<vmem>>, vector<8x8x8xf32>
    %193 = vector.shape_cast %192 : vector<8x8x8xf32> to vector<64x8xf32>
    %c0_205 = arith.constant 0 : index
    %c8_206 = arith.constant 8 : index
    %c24_207 = arith.constant 24 : index
    %194 = vector.load %arg13[%c0_205, %c8_206, %c24_207] : memref<24x24x32xf32, #tpu.memory_space<vmem>>, vector<8x8x8xf32>
    %195 = vector.shape_cast %194 : vector<8x8x8xf32> to vector<64x8xf32>
    %c0_208 = arith.constant 0 : index
    %c16_209 = arith.constant 16 : index
    %c24_210 = arith.constant 24 : index
    %196 = vector.load %arg13[%c0_208, %c16_209, %c24_210] : memref<24x24x32xf32, #tpu.memory_space<vmem>>, vector<8x8x8xf32>
    %197 = vector.shape_cast %196 : vector<8x8x8xf32> to vector<64x8xf32>
    %c8_211 = arith.constant 8 : index
    %c0_212 = arith.constant 0 : index
    %c24_213 = arith.constant 24 : index
    %198 = vector.load %arg13[%c8_211, %c0_212, %c24_213] : memref<24x24x32xf32, #tpu.memory_space<vmem>>, vector<8x8x8xf32>
    %199 = vector.shape_cast %198 : vector<8x8x8xf32> to vector<64x8xf32>
    %c8_214 = arith.constant 8 : index
    %c8_215 = arith.constant 8 : index
    %c24_216 = arith.constant 24 : index
    %200 = vector.load %arg13[%c8_214, %c8_215, %c24_216] : memref<24x24x32xf32, #tpu.memory_space<vmem>>, vector<8x8x8xf32>
    %201 = vector.shape_cast %200 : vector<8x8x8xf32> to vector<64x8xf32>
    %c8_217 = arith.constant 8 : index
    %c16_218 = arith.constant 16 : index
    %c24_219 = arith.constant 24 : index
    %202 = vector.load %arg13[%c8_217, %c16_218, %c24_219] : memref<24x24x32xf32, #tpu.memory_space<vmem>>, vector<8x8x8xf32>
    %203 = vector.shape_cast %202 : vector<8x8x8xf32> to vector<64x8xf32>
    %c16_220 = arith.constant 16 : index
    %c0_221 = arith.constant 0 : index
    %c24_222 = arith.constant 24 : index
    %204 = vector.load %arg13[%c16_220, %c0_221, %c24_222] : memref<24x24x32xf32, #tpu.memory_space<vmem>>, vector<8x8x8xf32>
    %205 = vector.shape_cast %204 : vector<8x8x8xf32> to vector<64x8xf32>
    %c16_223 = arith.constant 16 : index
    %c8_224 = arith.constant 8 : index
    %c24_225 = arith.constant 24 : index
    %206 = vector.load %arg13[%c16_223, %c8_224, %c24_225] : memref<24x24x32xf32, #tpu.memory_space<vmem>>, vector<8x8x8xf32>
    %207 = vector.shape_cast %206 : vector<8x8x8xf32> to vector<64x8xf32>
    %c16_226 = arith.constant 16 : index
    %c16_227 = arith.constant 16 : index
    %c24_228 = arith.constant 24 : index
    %208 = vector.load %arg13[%c16_226, %c16_227, %c24_228] : memref<24x24x32xf32, #tpu.memory_space<vmem>>, vector<8x8x8xf32>
    %209 = vector.shape_cast %208 : vector<8x8x8xf32> to vector<64x8xf32>
    %210 = tpu.concatenate %193, %195, %197, %199, %201, %203, %205, %207, %209 in 1 : vector<64x8xf32>, vector<64x8xf32>, vector<64x8xf32>, vector<64x8xf32>, vector<64x8xf32>, vector<64x8xf32>, vector<64x8xf32>, vector<64x8xf32>, vector<64x8xf32> -> vector<64x72xf32>
    %c3 = arith.constant 3 : index
    %c0_229 = arith.constant 0 : index
    %c0_230 = arith.constant 0 : index
    %211 = vector.load %arg4[%c3, %c0_229, %c0_230] : memref<4x64x64xf32, #tpu.memory_space<vmem>>, vector<1x64x64xf32>
    %212 = vector.shape_cast %211 : vector<1x64x64xf32> to vector<64x64xf32>
    %cst_231 = arith.constant dense<0.000000e+00> : vector<64x72xf32>
    %213 = tpu.matmul %212, %210, %cst_231 {dimension_numbers = #tpu.dot_dimension_numbers<[1], [0], [0], [1], [0, 0, 1, 1], [], []>} : vector<64x64xf32>, vector<64x72xf32>, vector<64x72xf32> -> vector<64x72xf32>
    %c0_232 = arith.constant 0 : index
    %c3_233 = arith.constant 3 : index
    %214 = vector.load %arg5[%c0_232, %c3_233] : memref<64x4xf32, #tpu.memory_space<vmem>>, vector<64x1xf32>
    %215 = vector.broadcast %214 : vector<64x1xf32> to vector<64x72xf32>
    %216 = arith.addf %213, %215 : vector<64x72xf32>
    %217 = vector.extract_strided_slice %216 {offsets = [0, 0], sizes = [64, 8], strides = [1, 1]} : vector<64x72xf32> to vector<64x8xf32>
    %218 = vector.shape_cast %217 : vector<64x8xf32> to vector<8x8x8xf32>
    %c0_234 = arith.constant 0 : index
    %c0_235 = arith.constant 0 : index
    %c24_236 = arith.constant 24 : index
    %219 = vector.load %arg14[%c0_234, %c0_235, %c24_236] : memref<24x24x32xf32, #tpu.memory_space<vmem>>, vector<8x8x8xf32>
    tpu.vector_store %arg14[%c0_234, %c0_235, %c24_236], %218 {strides = array<i32>} : memref<24x24x32xf32, #tpu.memory_space<vmem>>, vector<8x8x8xf32>,
    %220 = vector.extract_strided_slice %216 {offsets = [0, 8], sizes = [64, 8], strides = [1, 1]} : vector<64x72xf32> to vector<64x8xf32>
    %221 = vector.shape_cast %220 : vector<64x8xf32> to vector<8x8x8xf32>
    %c0_237 = arith.constant 0 : index
    %c8_238 = arith.constant 8 : index
    %c24_239 = arith.constant 24 : index
    %222 = vector.load %arg14[%c0_237, %c8_238, %c24_239] : memref<24x24x32xf32, #tpu.memory_space<vmem>>, vector<8x8x8xf32>
    tpu.vector_store %arg14[%c0_237, %c8_238, %c24_239], %221 {strides = array<i32>} : memref<24x24x32xf32, #tpu.memory_space<vmem>>, vector<8x8x8xf32>,
    %223 = vector.extract_strided_slice %216 {offsets = [0, 16], sizes = [64, 8], strides = [1, 1]} : vector<64x72xf32> to vector<64x8xf32>
    %224 = vector.shape_cast %223 : vector<64x8xf32> to vector<8x8x8xf32>
    %c0_240 = arith.constant 0 : index
    %c16_241 = arith.constant 16 : index
    %c24_242 = arith.constant 24 : index
    %225 = vector.load %arg14[%c0_240, %c16_241, %c24_242] : memref<24x24x32xf32, #tpu.memory_space<vmem>>, vector<8x8x8xf32>
    tpu.vector_store %arg14[%c0_240, %c16_241, %c24_242], %224 {strides = array<i32>} : memref<24x24x32xf32, #tpu.memory_space<vmem>>, vector<8x8x8xf32>,
    %226 = vector.extract_strided_slice %216 {offsets = [0, 24], sizes = [64, 8], strides = [1, 1]} : vector<64x72xf32> to vector<64x8xf32>
    %227 = vector.shape_cast %226 : vector<64x8xf32> to vector<8x8x8xf32>
    %c8_243 = arith.constant 8 : index
    %c0_244 = arith.constant 0 : index
    %c24_245 = arith.constant 24 : index
    %228 = vector.load %arg14[%c8_243, %c0_244, %c24_245] : memref<24x24x32xf32, #tpu.memory_space<vmem>>, vector<8x8x8xf32>
    tpu.vector_store %arg14[%c8_243, %c0_244, %c24_245], %227 {strides = array<i32>} : memref<24x24x32xf32, #tpu.memory_space<vmem>>, vector<8x8x8xf32>,
    %229 = vector.extract_strided_slice %216 {offsets = [0, 32], sizes = [64, 8], strides = [1, 1]} : vector<64x72xf32> to vector<64x8xf32>
    %230 = vector.shape_cast %229 : vector<64x8xf32> to vector<8x8x8xf32>
    %c8_246 = arith.constant 8 : index
    %c8_247 = arith.constant 8 : index
    %c24_248 = arith.constant 24 : index
    %231 = vector.load %arg14[%c8_246, %c8_247, %c24_248] : memref<24x24x32xf32, #tpu.memory_space<vmem>>, vector<8x8x8xf32>
    tpu.vector_store %arg14[%c8_246, %c8_247, %c24_248], %230 {strides = array<i32>} : memref<24x24x32xf32, #tpu.memory_space<vmem>>, vector<8x8x8xf32>,
    %232 = vector.extract_strided_slice %216 {offsets = [0, 40], sizes = [64, 8], strides = [1, 1]} : vector<64x72xf32> to vector<64x8xf32>
    %233 = vector.shape_cast %232 : vector<64x8xf32> to vector<8x8x8xf32>
    %c8_249 = arith.constant 8 : index
    %c16_250 = arith.constant 16 : index
    %c24_251 = arith.constant 24 : index
    %234 = vector.load %arg14[%c8_249, %c16_250, %c24_251] : memref<24x24x32xf32, #tpu.memory_space<vmem>>, vector<8x8x8xf32>
    tpu.vector_store %arg14[%c8_249, %c16_250, %c24_251], %233 {strides = array<i32>} : memref<24x24x32xf32, #tpu.memory_space<vmem>>, vector<8x8x8xf32>,
    %235 = vector.extract_strided_slice %216 {offsets = [0, 48], sizes = [64, 8], strides = [1, 1]} : vector<64x72xf32> to vector<64x8xf32>
    %236 = vector.shape_cast %235 : vector<64x8xf32> to vector<8x8x8xf32>
    %c16_252 = arith.constant 16 : index
    %c0_253 = arith.constant 0 : index
    %c24_254 = arith.constant 24 : index
    %237 = vector.load %arg14[%c16_252, %c0_253, %c24_254] : memref<24x24x32xf32, #tpu.memory_space<vmem>>, vector<8x8x8xf32>
    tpu.vector_store %arg14[%c16_252, %c0_253, %c24_254], %236 {strides = array<i32>} : memref<24x24x32xf32, #tpu.memory_space<vmem>>, vector<8x8x8xf32>,
    %238 = vector.extract_strided_slice %216 {offsets = [0, 56], sizes = [64, 8], strides = [1, 1]} : vector<64x72xf32> to vector<64x8xf32>
    %239 = vector.shape_cast %238 : vector<64x8xf32> to vector<8x8x8xf32>
    %c16_255 = arith.constant 16 : index
    %c8_256 = arith.constant 8 : index
    %c24_257 = arith.constant 24 : index
    %240 = vector.load %arg14[%c16_255, %c8_256, %c24_257] : memref<24x24x32xf32, #tpu.memory_space<vmem>>, vector<8x8x8xf32>
    tpu.vector_store %arg14[%c16_255, %c8_256, %c24_257], %239 {strides = array<i32>} : memref<24x24x32xf32, #tpu.memory_space<vmem>>, vector<8x8x8xf32>,
    %241 = vector.extract_strided_slice %216 {offsets = [0, 64], sizes = [64, 8], strides = [1, 1]} : vector<64x72xf32> to vector<64x8xf32>
    %242 = vector.shape_cast %241 : vector<64x8xf32> to vector<8x8x8xf32>
    %c16_258 = arith.constant 16 : index
    %c16_259 = arith.constant 16 : index
    %c24_260 = arith.constant 24 : index
    %243 = vector.load %arg14[%c16_258, %c16_259, %c24_260] : memref<24x24x32xf32, #tpu.memory_space<vmem>>, vector<8x8x8xf32>
    tpu.vector_store %arg14[%c16_258, %c16_259, %c24_260], %242 {strides = array<i32>} : memref<24x24x32xf32, #tpu.memory_space<vmem>>, vector<8x8x8xf32>,
    %c4_261 = arith.constant 4 : index
    %c4_262 = arith.constant 4 : index
    %c0_263 = arith.constant 0 : index
    %244 = vector.load %arg14[%c4_261, %c4_262, %c0_263] : memref<24x24x32xf32, #tpu.memory_space<vmem>>, vector<16x16x32xf32>
    %245 = vector.shape_cast %244 : vector<16x16x32xf32> to vector<256x32xf32>
    %246 = arith.addf %1, %245 : vector<256x32xf32>
    %c0_264 = arith.constant 0 : index
    %c0_265 = arith.constant 0 : index
    %247 = vector.load %arg6[%c0_264, %c0_265] : memref<1x32xf32, #tpu.memory_space<vmem>>, vector<1x32xf32>
    %c0_266 = arith.constant 0 : index
    %c0_267 = arith.constant 0 : index
    %248 = vector.load %arg7[%c0_266, %c0_267] : memref<1x32xf32, #tpu.memory_space<vmem>>, vector<1x32xf32>
    %cst_268 = arith.constant dense<0.000000e+00> : vector<256xf32>
    %249 = vector.multi_reduction <add>, %246, %cst_268 [1] : vector<256x32xf32> to vector<256xf32>
    %250 = vector.shape_cast %249 : vector<256xf32> to vector<256x1xf32>
    %cst_269 = arith.constant 3.200000e+01 : f32
    %251 = vector.broadcast %cst_269 : f32 to vector<256x1xf32>
    %252 = arith.divf %250, %251 : vector<256x1xf32>
    %253 = vector.broadcast %252 : vector<256x1xf32> to vector<256x32xf32>
    %254 = arith.subf %246, %253 : vector<256x32xf32>
    %255 = arith.mulf %254, %254 : vector<256x32xf32>
    %cst_270 = arith.constant dense<0.000000e+00> : vector<256xf32>
    %256 = vector.multi_reduction <add>, %255, %cst_270 [1] : vector<256x32xf32> to vector<256xf32>
    %257 = vector.shape_cast %256 : vector<256xf32> to vector<256x1xf32>
    %cst_271 = arith.constant 3.200000e+01 : f32
    %258 = vector.broadcast %cst_271 : f32 to vector<256x1xf32>
    %259 = arith.divf %257, %258 : vector<256x1xf32>
    %260 = vector.broadcast %252 : vector<256x1xf32> to vector<256x32xf32>
    %261 = arith.subf %246, %260 : vector<256x32xf32>
    %cst_272 = arith.constant 9.99999974E-6 : f32
    %262 = vector.broadcast %cst_272 : f32 to vector<256x1xf32>
    %263 = arith.addf %259, %262 : vector<256x1xf32>
    %264 = math.rsqrt %263 : vector<256x1xf32>
    %265 = vector.broadcast %264 : vector<256x1xf32> to vector<256x32xf32>
    %266 = arith.mulf %261, %265 : vector<256x32xf32>
    %267 = vector.broadcast %247 : vector<1x32xf32> to vector<256x32xf32>
    %268 = arith.mulf %266, %267 : vector<256x32xf32>
    %269 = vector.broadcast %248 : vector<1x32xf32> to vector<256x32xf32>
    %270 = arith.addf %268, %269 : vector<256x32xf32>
    %c0_273 = arith.constant 0 : index
    %c0_274 = arith.constant 0 : index
    %271 = vector.load %arg8[%c0_273, %c0_274] : memref<32x128xf32, #tpu.memory_space<vmem>>, vector<32x128xf32>
    %cst_275 = arith.constant dense<0.000000e+00> : vector<256x128xf32>
    %272 = tpu.matmul %270, %271, %cst_275 {dimension_numbers = #tpu.dot_dimension_numbers<[1], [0], [0], [1], [0, 0, 1, 1], [], []>} : vector<256x32xf32>, vector<32x128xf32>, vector<256x128xf32> -> vector<256x128xf32>
    %c0_276 = arith.constant 0 : index
    %c0_277 = arith.constant 0 : index
    %273 = vector.load %arg9[%c0_276, %c0_277] : memref<1x128xf32, #tpu.memory_space<vmem>>, vector<1x128xf32>
    %274 = vector.broadcast %273 : vector<1x128xf32> to vector<256x128xf32>
    %275 = arith.addf %272, %274 : vector<256x128xf32>
    %cst_278 = arith.constant 5.000000e-01 : f32
    %276 = vector.broadcast %cst_278 : f32 to vector<256x128xf32>
    %277 = arith.mulf %276, %275 : vector<256x128xf32>
    %cst_279 = arith.constant 0.707106769 : f32
    %278 = vector.broadcast %cst_279 : f32 to vector<256x128xf32>
    %279 = arith.mulf %275, %278 : vector<256x128xf32>
    %280 = math.erf %279 : vector<256x128xf32>
    %cst_280 = arith.constant 1.000000e+00 : f32
    %281 = vector.broadcast %cst_280 : f32 to vector<256x128xf32>
    %282 = arith.addf %281, %280 : vector<256x128xf32>
    %283 = arith.mulf %277, %282 : vector<256x128xf32>
    %c0_281 = arith.constant 0 : index
    %c0_282 = arith.constant 0 : index
    %284 = vector.load %arg10[%c0_281, %c0_282] : memref<128x32xf32, #tpu.memory_space<vmem>>, vector<128x32xf32>
    %cst_283 = arith.constant dense<0.000000e+00> : vector<256x32xf32>
    %285 = tpu.matmul %283, %284, %cst_283 {dimension_numbers = #tpu.dot_dimension_numbers<[1], [0], [0], [1], [0, 0, 1, 1], [], []>} : vector<256x128xf32>, vector<128x32xf32>, vector<256x32xf32> -> vector<256x32xf32>
    %c0_284 = arith.constant 0 : index
    %c0_285 = arith.constant 0 : index
    %286 = vector.load %arg11[%c0_284, %c0_285] : memref<1x32xf32, #tpu.memory_space<vmem>>, vector<1x32xf32>
    %287 = vector.broadcast %286 : vector<1x32xf32> to vector<256x32xf32>
    %288 = arith.addf %285, %287 : vector<256x32xf32>
    %289 = arith.addf %246, %288 : vector<256x32xf32>
    %c0_286 = arith.constant 0 : index
    %c0_287 = arith.constant 0 : index
    %c0_288 = arith.constant 0 : index
    %290 = vector.load %arg12[%c0_286, %c0_287, %c0_288] : memref<1x256x32xf32, #tpu.memory_space<vmem>>, vector<1x256x32xf32>
    %291 = vector.shape_cast %290 : vector<1x256x32xf32> to vector<256x32xf32>
    %292 = vector.shape_cast %289 : vector<256x32xf32> to vector<1x256x32xf32>
    tpu.vector_store %arg12[%c0_286, %c0_287, %c0_288], %292 {strides = array<i32>} : memref<1x256x32xf32, #tpu.memory_space<vmem>>, vector<1x256x32xf32>,
    return
  }
  func.func @transform_0(%arg0: i32) -> (i32, i32, i32) {
    %c0_i32 = arith.constant 0 : i32
    %c0_i32_0 = arith.constant 0 : i32
    %c0_i32_1 = arith.constant 0 : i32
    return %arg0, %c0_i32, %c0_i32_0 : i32, i32, i32
  }
  func.func @transform_1(%arg0: i32) -> (i32, i32) {
    %c0_i32 = arith.constant 0 : i32
    %c0_i32_0 = arith.constant 0 : i32
    %c0_i32_1 = arith.constant 0 : i32
    return %c0_i32, %c0_i32_0 : i32, i32
  }
  func.func @transform_2(%arg0: i32) -> (i32, i32) {
    %c0_i32 = arith.constant 0 : i32
    %c0_i32_0 = arith.constant 0 : i32
    %c0_i32_1 = arith.constant 0 : i32
    return %c0_i32, %c0_i32_0 : i32, i32
  }
  func.func @transform_3(%arg0: i32) -> (i32, i32, i32) {
    %c0_i32 = arith.constant 0 : i32
    %c0_i32_0 = arith.constant 0 : i32
    %c0_i32_1 = arith.constant 0 : i32
    %c0_i32_2 = arith.constant 0 : i32
    return %c0_i32, %c0_i32_0, %c0_i32_1 : i32, i32, i32
  }
  func.func @transform_4(%arg0: i32) -> (i32, i32) {
    %c0_i32 = arith.constant 0 : i32
    %c0_i32_0 = arith.constant 0 : i32
    %c0_i32_1 = arith.constant 0 : i32
    return %c0_i32, %c0_i32_0 : i32, i32
  }
  func.func @transform_5(%arg0: i32) -> (i32, i32) {
    %c0_i32 = arith.constant 0 : i32
    %c0_i32_0 = arith.constant 0 : i32
    %c0_i32_1 = arith.constant 0 : i32
    return %c0_i32, %c0_i32_0 : i32, i32
  }
  func.func @transform_6(%arg0: i32) -> (i32, i32) {
    %c0_i32 = arith.constant 0 : i32
    %c0_i32_0 = arith.constant 0 : i32
    %c0_i32_1 = arith.constant 0 : i32
    return %c0_i32, %c0_i32_0 : i32, i32
  }
  func.func @transform_7(%arg0: i32) -> (i32, i32) {
    %c0_i32 = arith.constant 0 : i32
    %c0_i32_0 = arith.constant 0 : i32
    %c0_i32_1 = arith.constant 0 : i32
    return %c0_i32, %c0_i32_0 : i32, i32
  }
  func.func @transform_8(%arg0: i32) -> (i32, i32) {
    %c0_i32 = arith.constant 0 : i32
    %c0_i32_0 = arith.constant 0 : i32
    %c0_i32_1 = arith.constant 0 : i32
    return %c0_i32, %c0_i32_0 : i32, i32
  }
  func.func @transform_9(%arg0: i32) -> (i32, i32) {
    %c0_i32 = arith.constant 0 : i32
    %c0_i32_0 = arith.constant 0 : i32
    %c0_i32_1 = arith.constant 0 : i32
    return %c0_i32, %c0_i32_0 : i32, i32
  }
  func.func @transform_10(%arg0: i32) -> (i32, i32) {
    %c0_i32 = arith.constant 0 : i32
    %c0_i32_0 = arith.constant 0 : i32
    %c0_i32_1 = arith.constant 0 : i32
    return %c0_i32, %c0_i32_0 : i32, i32
  }
  func.func @transform_11(%arg0: i32) -> (i32, i32, i32) {
    %c0_i32 = arith.constant 0 : i32
    %c0_i32_0 = arith.constant 0 : i32
    %c0_i32_1 = arith.constant 0 : i32
    return %arg0, %c0_i32, %c0_i32_0 : i32, i32, i32
  }
}

</mosaic_0001>

<bundles_post_ra>
// kernel: swin_mlp_block_forward.1
= control target key start
LH: loop header
LB: loop body
LE: loop exit
PB: predicated region body
PF: predicated region fallthrough
CT: control target
= control target key end

     0   :  { %s7470_s17 = smov 0   ;;  %s11037_s0 = inlined_call_operand.vmem [shape: f32[2,256,32], index: 0, kind: input, shape index: {}]   ;;  %s11038_s1 = inlined_call_operand.vmem [shape: f32[1,32], index: 1, kind: input, shape index: {}]   ;;  %s11039_s2 = inlined_call_operand.vmem [shape: f32[1,32], index: 2, kind: input, shape index: {}]   ;;  %s11040_s3 = inlined_call_operand.vmem [shape: f32[4,64,64], index: 3, kind: input, shape index: {}]   ;;  %s11041_s4 = inlined_call_operand.vmem [shape: f32[64,4], index: 4, kind: input, shape index: {}]   ;;  %s11042_s5 = inlined_call_operand.vmem [shape: f32[1,32], index: 5, kind: input, shape index: {}]   ;;  %s11043_s6 = inlined_call_operand.vmem [shape: f32[1,32], index: 6, kind: input, shape index: {}]   ;;  %s11044_s7 = inlined_call_operand.vmem [shape: f32[32,128], index: 7, kind: input, shape index: {}]   ;;  %s11045_s8 = inlined_call_operand.vmem [shape: f32[1,128], index: 8, kind: input, shape index: {}]   ;;  %s11046_s9 = inlined_call_operand.vmem [shape: f32[128,32], index: 9, kind: input, shape index: {}]   ;;  %s11047_s10 = inlined_call_operand.vmem [shape: f32[1,32], index: 10, kind: input, shape index: {}]   ;;  %s11048_s11 = inlined_call_operand.vmem [shape: f32[2,256,32], index: 11, kind: output, shape index: {}]  }
   0x1 LB: > { %s5837_s18 = sadd.s32 4294967295, %s7388_s17   ;;  %p5841_p0 = scmp.ge.s32.totalorder %s7388_s17, 1  ;;  %s7388_s17 = sphi %s7470_s17, %s21_s17  }
   0x2   : > { %p337_p1 = scmp.lt.s32.totalorder %s7388_s17, 3 }
   0x4   : > { %p338_p2 = pnand %p5841_p0, %p337_p1 }
   0x6   : > { %341 = sbr.rel (%p338_p2) target bundleno = 2093 (0x82d), region = 64 }
   0xd   : > { %p7480_p3 = scmp.lt.s32.totalorder %s5837_s18, 1  ;;  %vm421_vm0 = vcmask 261120   ;;  %v7390_v0 = vmov 0.0   ;;  %s7391_s24 = smov 8   ;;  %vm941_vm1 = vcmask 257024   ;;  %vm1398_vm2 = vcmask 523264  }
   0xe   : > { %922 = vst.msk [vmem:[#allocation2 + $0x38] sm:$0xff] %vm421_vm0, %v7390_v0  ;;  %925 = vst.msk [vmem:[#allocation2 + $0x50] sm:$0xff] %vm421_vm0, %v7390_v0  ;;  %s7392_s25 = smov 16   ;;  %s7393_s26 = smov 48   ;;  %vm1336_vm3 = vcmask 64512   ;;  %vm1345_vm4 = vcmask 130048  }
   0xf   : > { %915 = vst.msk [vmem:[#allocation2] sm:$0xff] %vm421_vm0, %v7390_v0  ;;  %916 = vst.msk [vmem:[#allocation2 + $0x8] sm:$0xff] %vm421_vm0, %v7390_v0  ;;  %s11251_s18 = smov (!%p7480_p3, %s5837_s18), 1  ;;  %s7395_s27 = smov 56   ;;  %vm1354_vm5 = vcmask 195584   ;;  %vm1371_vm6 = vcmask 326656  }
  0x10   : > { %917 = vst.msk [vmem:[#allocation2 + $0x10] sm:$0xff] %vm421_vm0, %v7390_v0  ;;  %918 = vst.msk [vmem:[#allocation2 + $0x18] sm:$0xff] %vm421_vm0, %v7390_v0  ;;  %s11066_s20 = sshll.u32 %s11251_s18, 8  ;;  %s7396_s28 = smov 64   ;;  %vm1380_vm7 = vcmask 392192   ;;  %vm1389_vm8 = vcmask 457728  }
  0x11   : > { %919 = vst.msk [vmem:[#allocation2 + $0x20] sm:$0xff] %vm421_vm0, %v7390_v0  ;;  %920 = vst.msk [vmem:[#allocation2 + $0x28] sm:$0xff] %vm421_vm0, %v7390_v0  ;;  %s7544_s23 = scalar_lea.vmem %s11037_s0, %s11066_s20  ;;  %s7397_s21 = smov 40   ;;  %vm2476_vm9 = vcmask 130112   ;;  %vm3327_vm10 = vcmask 195712   ;;  %vm4178_vm11 = vcmask 261312  }
  0x12   : > { %921 = vst.msk [vmem:[#allocation2 + $0x30] sm:$0xff] %vm421_vm0, %v7390_v0  ;;  %923 = vst.msk [vmem:[#allocation2 + $0x40] sm:$0xff] %vm421_vm0, %v7390_v0  ;;  %v7547_v1 = vld [vmem:[%s7544_s23] sm:$0xff]  ;;  %v7550_v2 = vld [vmem:[%s7544_s23 + $0x10] sm:$0xff]  ;;  %s7398_s22 = smov 120   ;;  %s7399_s29 = smov 104  }
  0x13   : > { %924 = vst.msk [vmem:[#allocation2 + $0x48] sm:$0xff] %vm421_vm0, %v7390_v0  ;;  %926 = vst.msk [vmem:[#allocation2 + $0x58] sm:$0xff] %vm421_vm0, %v7390_v0  ;;  %v7553_v3 = vld [vmem:[%s7544_s23 + $0x8] sm:$0xff]  ;;  %v422_v4 = vsel %vm421_vm0, %v7547_v1, 0.0  ;;  %v428_v5 = vsel %vm421_vm0, %v7550_v2, 0.0  ;;  %v7560_v6 = vld [vmem:[%s7544_s23 + $0x18] sm:$0xff] }
  0x14   : > { %928 = vst.msk [vmem:[#allocation2 + $0x1e0] sm:$0xff] %vm421_vm0, %v7390_v0  ;;  %929 = vst.msk [vmem:[#allocation2 + $0x1e8] sm:$0xff] %vm421_vm0, %v7390_v0  ;;  %423 = vadd.xlane.f32.xlu0 %v422_v4  ;;  %429 = vadd.xlane.f32.xlu1 %v428_v5  ;;  %v425_v7 = vsel %vm421_vm0, %v7553_v3, 0.0  ;;  %v431_v8 = vsel %vm421_vm0, %v7560_v6, 0.0  ;;  %v7567_v9 = vld [vmem:[%s7544_s23 + $0x20] sm:$0xff]  ;;  %v7570_v10 = vld [vmem:[%s7544_s23 + $0x28] sm:$0xff] }
  0x15   : > { %930 = vst.msk [vmem:[#allocation2 + $0x1f0] sm:$0xff] %vm421_vm0, %v7390_v0  ;;  %931 = vst.msk [vmem:[#allocation2 + $0x1f8] sm:$0xff] %vm421_vm0, %v7390_v0  ;;  %v434_v11 = vsel %vm421_vm0, %v7567_v9, 0.0  ;;  %v437_v12 = vsel %vm421_vm0, %v7570_v10, 0.0  ;;  %v7577_v13 = vld [vmem:[%s7544_s23 + $0x30] sm:$0xff]  ;;  %v7580_v14 = vld [vmem:[%s7544_s23 + $0x38] sm:$0xff] }
  0x16   : > { %932 = vst.msk [vmem:[#allocation2 + $0x200] sm:$0xff] %vm421_vm0, %v7390_v0  ;;  %933 = vst.msk [vmem:[#allocation2 + $0x208] sm:$0xff] %vm421_vm0, %v7390_v0  ;;  %v440_v15 = vsel %vm421_vm0, %v7577_v13, 0.0  ;;  %v443_v16 = vsel %vm421_vm0, %v7580_v14, 0.0  ;;  %v7587_v17 = vld [vmem:[%s7544_s23 + $0x40] sm:$0xff]  ;;  %v7590_v18 = vld [vmem:[%s7544_s23 + $0x48] sm:$0xff] }
  0x17   : > { %934 = vst.msk [vmem:[#allocation2 + $0x210] sm:$0xff] %vm421_vm0, %v7390_v0  ;;  %935 = vst.msk [vmem:[#allocation2 + $0x218] sm:$0xff] %vm421_vm0, %v7390_v0  ;;  %v446_v19 = vsel %vm421_vm0, %v7587_v17, 0.0  ;;  %v449_v20 = vsel %vm421_vm0, %v7590_v18, 0.0  ;;  %v7597_v21 = vld [vmem:[%s7544_s23 + $0x50] sm:$0xff]  ;;  %v7600_v22 = vld [vmem:[%s7544_s23 + $0x58] sm:$0xff] }
  0x18   : > { %936 = vst.msk [vmem:[#allocation2 + $0x220] sm:$0xff] %vm421_vm0, %v7390_v0  ;;  %937 = vst.msk [vmem:[#allocation2 + $0x228] sm:$0xff] %vm421_vm0, %v7390_v0  ;;  %426 = vadd.xlane.f32.xlu0 %v425_v7  ;;  %432 = vadd.xlane.f32.xlu1 %v431_v8  ;;  %v452_v23 = vsel %vm421_vm0, %v7597_v21, 0.0  ;;  %v455_v24 = vsel %vm421_vm0, %v7600_v22, 0.0  ;;  %v7607_v25 = vld [vmem:[%s7544_s23 + $0x60] sm:$0xff]  ;;  %v7610_v26 = vld [vmem:[%s7544_s23 + $0x68] sm:$0xff] }
  0x19   : > { %938 = vst.msk [vmem:[#allocation2 + $0x230] sm:$0xff] %vm421_vm0, %v7390_v0  ;;  %939 = vst.msk [vmem:[#allocation2 + $0x238] sm:$0xff] %vm421_vm0, %v7390_v0  ;;  %v458_v27 = vsel %vm421_vm0, %v7607_v25, 0.0  ;;  %v461_v28 = vsel %vm421_vm0, %v7610_v26, 0.0  ;;  %v7617_v29 = vld [vmem:[%s7544_s23 + $0x70] sm:$0xff]  ;;  %v7620_v30 = vld [vmem:[%s7544_s23 + $0x78] sm:$0xff] }
  0x1a   : > { %v464_v31 = vsel %vm421_vm0, %v7617_v29, 0.0  ;;  %v467_v32 = vsel %vm421_vm0, %v7620_v30, 0.0  ;;  %v7627_v33 = vld [vmem:[%s7544_s23 + $0x80] sm:$0xff]  ;;  %v7630_v34 = vld [vmem:[%s7544_s23 + $0x88] sm:$0xff]  ;;  %v7637_v37 = vld [vmem:[%s7544_s23 + $0x90] sm:$0xff]  ;;  %s7400_s15 = smov 112  }
  0x1b   : > { %v470_v35 = vsel %vm421_vm0, %v7627_v33, 0.0  ;;  %v473_v36 = vsel %vm421_vm0, %v7630_v34, 0.0  ;;  %v7640_v38 = vld [vmem:[%s7544_s23 + $0x98] sm:$0xff]  ;;  %v476_v39 = vsel %vm421_vm0, %v7637_v37, 0.0  ;;  %v7647_v41 = vld [vmem:[%s7544_s23 + $0xa0] sm:$0xff]  ;;  %v7650_v42 = vld [vmem:[%s7544_s23 + $0xa8] sm:$0xff] }
  0x1c   : > { %435 = vadd.xlane.f32.xlu0 %v434_v11  ;;  %438 = vadd.xlane.f32.xlu1 %v437_v12  ;;  %v479_v40 = vsel %vm421_vm0, %v7640_v38, 0.0  ;;  %v482_v43 = vsel %vm421_vm0, %v7647_v41, 0.0  ;;  %v485_v44 = vsel %vm421_vm0, %v7650_v42, 0.0  ;;  %v7657_v45 = vld [vmem:[%s7544_s23 + $0xb0] sm:$0xff]  ;;  %v7660_v46 = vld [vmem:[%s7544_s23 + $0xb8] sm:$0xff]  ;;  %v7667_v49 = vld [vmem:[%s7544_s23 + $0xc0] sm:$0xff] }
  0x1d   : > { %v488_v47 = vsel %vm421_vm0, %v7657_v45, 0.0  ;;  %v491_v48 = vsel %vm421_vm0, %v7660_v46, 0.0  ;;  %v7670_v50 = vld [vmem:[%s7544_s23 + $0xc8] sm:$0xff]  ;;  %v494_v51 = vsel %vm421_vm0, %v7667_v49, 0.0  ;;  %v7677_v53 = vld [vmem:[%s7544_s23 + $0xd0] sm:$0xff]  ;;  %v7680_v54 = vld [vmem:[%s7544_s23 + $0xd8] sm:$0xff] }
  0x1e   : > { %v497_v52 = vsel %vm421_vm0, %v7670_v50, 0.0  ;;  %v500_v55 = vsel %vm421_vm0, %v7677_v53, 0.0  ;;  %v503_v56 = vsel %vm421_vm0, %v7680_v54, 0.0  ;;  %v7687_v57 = vld [vmem:[%s7544_s23 + $0xe0] sm:$0xff]  ;;  %v7690_v58 = vld [vmem:[%s7544_s23 + $0xe8] sm:$0xff]  ;;  %v7697_v61 = vld [vmem:[%s7544_s23 + $0xf0] sm:$0xff] }
  0x1f   : > { %v506_v59 = vsel %vm421_vm0, %v7687_v57, 0.0  ;;  %v509_v60 = vsel %vm421_vm0, %v7690_v58, 0.0  ;;  %v7700_v62 = vld [vmem:[%s7544_s23 + $0xf8] sm:$0xff]  ;;  %v512_v63 = vsel %vm421_vm0, %v7697_v61, 0.0  ;;  %v1017_v7 = vld [vmem:[#allocation2 + $0x50] sm:$0xff]  ;;  %v1024_v11 = vld [vmem:[#allocation2 + $0x40] sm:$0xff] }
  0x20   : > { %441 = vadd.xlane.f32.xlu0 %v440_v15  ;;  %444 = vadd.xlane.f32.xlu1 %v443_v16  ;;  %v515_v4 = vsel %vm421_vm0, %v7700_v62, 0.0  ;;  %v1016_v5 = vld [vmem:[#allocation2 + $0x38] sm:$0xff]  ;;  %v1014_v15 = vld [vmem:[#allocation2 + $0x8] sm:$0xff]  ;;  %v1015_v16 = vld [vmem:[#allocation2 + $0x20] sm:$0xff]  ;;  %958 = vst.msk [vmem:[#allocation2 + $0x74] sm:$0xf] %vm941_vm1, %v7390_v0 }
  0x21   : > { %v7706_v8 = vpack.i.bf16 %v1017_v7, %v1016_v5  ;;  %v1025_v12 = vld [vmem:[#allocation2 + $0x58] sm:$0xff]  ;;  %959 = vst.msk [vmem:[#allocation2 + $0x8c] sm:$0xf] %vm941_vm1, %v7390_v0  ;;  %942 = vst.msk [vmem:[#allocation2 + $0x60] sm:$0xf] %vm941_vm1, %v7390_v0  ;;  %s7401_s30 = smov 24  }
  0x22   : > { %943 = vst.msk [vmem:[#allocation2 + $0x78] sm:$0xf] %vm941_vm1, %v7390_v0  ;;  %944 = vst.msk [vmem:[#allocation2 + $0x90] sm:$0xf] %vm941_vm1, %v7390_v0  ;;  %s7402_s12 = smov 32   ;;  %s7406_s16 = smov 88  }
  0x23   : > { %945 = vst.msk [vmem:[#allocation2 + $0xa8] sm:$0xf] %vm941_vm1, %v7390_v0  ;;  %946 = vst.msk [vmem:[#allocation2 + $0xc0] sm:$0xf] %vm941_vm1, %v7390_v0  ;;  %s7408_s19 = smov 72   ;;  %s7409_s20 = smov 80  }
  0x24   : > { %447 = vadd.xlane.f32.xlu0 %v446_v19  ;;  %450 = vadd.xlane.f32.xlu1 %v449_v20  ;;  %v7710_v19 = vpack.i.bf16 %v1025_v12, %v1024_v11  ;;  %v7712_v20 = vpack.i.bf16 %v1015_v16, %v1014_v15  ;;  %947 = vst.msk [vmem:[#allocation2 + $0xd8] sm:$0xf] %vm941_vm1, %v7390_v0  ;;  %948 = vst.msk [vmem:[#allocation2 + $0xf0] sm:$0xf] %vm941_vm1, %v7390_v0 }
  0x25   : > { %949 = vst.msk [vmem:[#allocation2 + $0x108] sm:$0xf] %vm941_vm1, %v7390_v0  ;;  %950 = vst.msk [vmem:[#allocation2 + $0x120] sm:$0xf] %vm941_vm1, %v7390_v0 }
  0x26   : > { %951 = vst.msk [vmem:[#allocation2 + $0x138] sm:$0xf] %vm941_vm1, %v7390_v0  ;;  %952 = vst.msk [vmem:[#allocation2 + $0x150] sm:$0xf] %vm941_vm1, %v7390_v0 }
  0x27   : > { %953 = vst.msk [vmem:[#allocation2 + $0x168] sm:$0xf] %vm941_vm1, %v7390_v0  ;;  %954 = vst.msk [vmem:[#allocation2 + $0x180] sm:$0xf] %vm941_vm1, %v7390_v0 }
  0x28   : > { %453 = vadd.xlane.f32.xlu0 %v452_v23  ;;  %456 = vadd.xlane.f32.xlu1 %v455_v24  ;;  %v1062_v23 = vld [vmem:[#allocation2 + $0x210] sm:$0xff]  ;;  %v1063_v24 = vld [vmem:[#allocation2 + $0x228] sm:$0xff]  ;;  %955 = vst.msk [vmem:[#allocation2 + $0x198] sm:$0xf] %vm941_vm1, %v7390_v0  ;;  %956 = vst.msk [vmem:[#allocation2 + $0x1b0] sm:$0xf] %vm941_vm1, %v7390_v0 }
  0x29   : > { %957 = vst.msk [vmem:[#allocation2 + $0x1c8] sm:$0xf] %vm941_vm1, %v7390_v0  ;;  %960 = vst.msk [vmem:[#allocation2 + $0xa4] sm:$0xf] %vm941_vm1, %v7390_v0 }
  0x2a   : > { %961 = vst.msk [vmem:[#allocation2 + $0xbc] sm:$0xf] %vm941_vm1, %v7390_v0  ;;  %962 = vst.msk [vmem:[#allocation2 + $0xd4] sm:$0xf] %vm941_vm1, %v7390_v0 }
  0x2b   : > { %963 = vst.msk [vmem:[#allocation2 + $0xec] sm:$0xf] %vm941_vm1, %v7390_v0  ;;  %964 = vst.msk [vmem:[#allocation2 + $0x104] sm:$0xf] %vm941_vm1, %v7390_v0 }
  0x2c   : > { %459 = vadd.xlane.f32.xlu0 %v458_v27  ;;  %462 = vadd.xlane.f32.xlu1 %v461_v28  ;;  %v1022_v27 = vld [vmem:[#allocation2 + $0x10] sm:$0xff]  ;;  %v1023_v28 = vld [vmem:[#allocation2 + $0x28] sm:$0xff]  ;;  %965 = vst.msk [vmem:[#allocation2 + $0x11c] sm:$0xf] %vm941_vm1, %v7390_v0  ;;  %966 = vst.msk [vmem:[#allocation2 + $0x134] sm:$0xf] %vm941_vm1, %v7390_v0 }
  0x2d   : > { %967 = vst.msk [vmem:[#allocation2 + $0x14c] sm:$0xf] %vm941_vm1, %v7390_v0  ;;  %968 = vst.msk [vmem:[#allocation2 + $0x164] sm:$0xf] %vm941_vm1, %v7390_v0 }
  0x2e   : > { %969 = vst.msk [vmem:[#allocation2 + $0x17c] sm:$0xf] %vm941_vm1, %v7390_v0  ;;  %970 = vst.msk [vmem:[#allocation2 + $0x194] sm:$0xf] %vm941_vm1, %v7390_v0 }
  0x2f   : > { %971 = vst.msk [vmem:[#allocation2 + $0x1ac] sm:$0xf] %vm941_vm1, %v7390_v0  ;;  %972 = vst.msk [vmem:[#allocation2 + $0x1c4] sm:$0xf] %vm941_vm1, %v7390_v0 }
  0x30   : > { %465 = vadd.xlane.f32.xlu0 %v464_v31  ;;  %468 = vadd.xlane.f32.xlu1 %v467_v32  ;;  %v7716_v31 = vpack.i.bf16 %v1063_v24, %v1062_v23  ;;  %v7720_v32 = vpack.i.bf16 %v1023_v28, %v1022_v27  ;;  %973 = vst.msk [vmem:[#allocation2 + $0x1dc] sm:$0xf] %vm941_vm1, %v7390_v0 }
  0x34   : > { %471 = vadd.xlane.f32.xlu0 %v470_v35  ;;  %474 = vadd.xlane.f32.xlu1 %v473_v36  ;;  %v1060_v35 = vld [vmem:[#allocation2 + $0x1e0] sm:$0xff]  ;;  %v1061_v36 = vld [vmem:[#allocation2 + $0x1f8] sm:$0xff] }
  0x38   : > { %477 = vadd.xlane.f32.xlu0 %v476_v39  ;;  %480 = vadd.xlane.f32.xlu1 %v479_v40  ;;  %v7726_v39 = vpack.i.bf16 %v1061_v36, %v1060_v35  ;;  %v7394_v40 = vmov 0  }
  0x39   : > { %6538 = vset.pattern.permute.xlu0 %v7394_v40  ;;  %6539 = vset.pattern.permute.xlu1 %v7394_v40 }
  0x3c   : > { %483 = vadd.xlane.f32.xlu0 %v482_v43  ;;  %486 = vadd.xlane.f32.xlu1 %v485_v44 }
  0x40   : > { %489 = vadd.xlane.f32.xlu0 %v488_v47  ;;  %492 = vadd.xlane.f32.xlu1 %v491_v48 }
  0x44   : > { %495 = vadd.xlane.f32.xlu0 %v494_v51  ;;  %498 = vadd.xlane.f32.xlu1 %v497_v52 }
  0x48   : > { %501 = vadd.xlane.f32.xlu0 %v500_v55  ;;  %504 = vadd.xlane.f32.xlu1 %v503_v56 }
  0x4c   : > { %507 = vadd.xlane.f32.xlu0 %v506_v59  ;;  %510 = vadd.xlane.f32.xlu1 %v509_v60 }
  0x50   : > { %513 = vadd.xlane.f32.xlu0 %v512_v63  ;;  %516 = vadd.xlane.f32.xlu1 %v515_v4 }
  0x61   : > { %6494 = vrot.lane.b32.xlu1 %v7706_v8, %s7391_s24 }
  0x65   : > { %6504 = vrot.lane.b32.xlu1 %v7710_v19, %s7392_s25 }
  0x66   : > { %6489 = vrot.lane.b32.xlu0 %v7712_v20, %s7391_s24 }
  0x69   : > { %6514 = vrot.lane.b32.xlu1 %v7716_v31, %s7393_s26 }
  0x6a   : > { %6499 = vrot.lane.b32.xlu0 %v7720_v32, %s7392_s25 }
  0x6e   : > { %6509 = vrot.lane.b32.xlu0 %v7726_v39, %s7393_s26 }
  0xa1   : > { %v424_v43 = vpop.xlane.xlu0 %423  ;;  %v430_v44 = vpop.xlane.xlu1 %429 }
  0xa2   : > { %v519_v47 = vmul.f32 0.03125, %v424_v43  ;;  %v521_v48 = vmul.f32 0.03125, %v430_v44 }
  0xa4   : > { %v7731_v51 = vsub.f32 %v7547_v1, %v519_v47  ;;  %v7734_v52 = vsub.f32 %v7550_v2, %v521_v48 }
  0xa5   : > { %v427_v55 = vpop.xlane.xlu0 %426  ;;  %v433_v56 = vpop.xlane.xlu1 %432 }
  0xa6   : > { %v520_v59 = vmul.f32 0.03125, %v427_v55  ;;  %v522_v60 = vmul.f32 0.03125, %v433_v56  ;;  %v583_v63 = vmul.f32 %v7731_v51, %v7731_v51  ;;  %v585_v4 = vmul.f32 %v7734_v52, %v7734_v52 }
  0xa8   : > { %v7741_v5 = vsub.f32 %v7553_v3, %v520_v59  ;;  %v7744_v7 = vsub.f32 %v7560_v6, %v522_v60  ;;  %v615_v1 = vsel %vm421_vm0, %v583_v63, 0.0  ;;  %v621_v12 = vsel %vm421_vm0, %v585_v4, 0.0 }
  0xa9   : > { %616 = vadd.xlane.f32.xlu0 %v615_v1  ;;  %v436_v2 = vpop.xlane.xlu0 %435  ;;  %v439_v11 = vpop.xlane.xlu1 %438 }
  0xaa   : > { %v523_v15 = vmul.f32 0.03125, %v436_v2  ;;  %v524_v16 = vmul.f32 0.03125, %v439_v11  ;;  %v584_v23 = vmul.f32 %v7741_v5, %v7741_v5  ;;  %v586_v24 = vmul.f32 %v7744_v7, %v7744_v7 }
  0xac   : > { %v7753_v3 = vsub.f32 %v7567_v9, %v523_v15  ;;  %v7756_v6 = vsub.f32 %v7570_v10, %v524_v16  ;;  %v618_v27 = vsel %vm421_vm0, %v584_v23, 0.0  ;;  %v624_v36 = vsel %vm421_vm0, %v586_v24, 0.0 }
  0xad   : > { %622 = vadd.xlane.f32.xlu0 %v621_v12  ;;  %619 = vadd.xlane.f32.xlu1 %v618_v27  ;;  %v442_v28 = vpop.xlane.xlu0 %441  ;;  %v445_v35 = vpop.xlane.xlu1 %444 }
  0xae   : > { %v525_v40 = vmul.f32 0.03125, %v442_v28  ;;  %v526_v43 = vmul.f32 0.03125, %v445_v35  ;;  %v587_v44 = vmul.f32 %v7753_v3, %v7753_v3  ;;  %v588_v9 = vmul.f32 %v7756_v6, %v7756_v6 }
  0xb0   : > { %v7765_v47 = vsub.f32 %v7577_v13, %v525_v40  ;;  %v7768_v10 = vsub.f32 %v7580_v14, %v526_v43  ;;  %v627_v48 = vsel %vm421_vm0, %v587_v44, 0.0  ;;  %v630_v59 = vsel %vm421_vm0, %v588_v9, 0.0 }
  0xb1   : > { %625 = vadd.xlane.f32.xlu1 %v624_v36  ;;  %628 = vadd.xlane.f32.xlu0 %v627_v48  ;;  %v448_v55 = vpop.xlane.xlu0 %447  ;;  %v451_v56 = vpop.xlane.xlu1 %450 }
  0xb2   : > { %v527_v60 = vmul.f32 0.03125, %v448_v55  ;;  %v528_v63 = vmul.f32 0.03125, %v451_v56  ;;  %v589_v4 = vmul.f32 %v7765_v47, %v7765_v47  ;;  %v590_v13 = vmul.f32 %v7768_v10, %v7768_v10 }
  0xb4   : > { %v7777_v1 = vsub.f32 %v7587_v17, %v527_v60  ;;  %v7780_v14 = vsub.f32 %v7590_v18, %v528_v63  ;;  %v633_v2 = vsel %vm421_vm0, %v589_v4, 0.0  ;;  %v636_v15 = vsel %vm421_vm0, %v590_v13, 0.0 }
  0xb5   : > { %631 = vadd.xlane.f32.xlu1 %v630_v59  ;;  %634 = vadd.xlane.f32.xlu0 %v633_v2  ;;  %v454_v11 = vpop.xlane.xlu0 %453  ;;  %v457_v12 = vpop.xlane.xlu1 %456 }
  0xb6   : > { %v529_v16 = vmul.f32 0.03125, %v454_v11  ;;  %v530_v23 = vmul.f32 0.03125, %v457_v12  ;;  %v591_v24 = vmul.f32 %v7777_v1, %v7777_v1  ;;  %v592_v17 = vmul.f32 %v7780_v14, %v7780_v14 }
  0xb8   : > { %v7789_v27 = vsub.f32 %v7597_v21, %v529_v16  ;;  %v7792_v18 = vsub.f32 %v7600_v22, %v530_v23  ;;  %v639_v28 = vsel %vm421_vm0, %v591_v24, 0.0  ;;  %v642_v40 = vsel %vm421_vm0, %v592_v17, 0.0 }
  0xb9   : > { %637 = vadd.xlane.f32.xlu1 %v636_v15  ;;  %640 = vadd.xlane.f32.xlu0 %v639_v28  ;;  %v460_v35 = vpop.xlane.xlu0 %459  ;;  %v463_v36 = vpop.xlane.xlu1 %462 }
  0xba   : > { %v531_v43 = vmul.f32 0.03125, %v460_v35  ;;  %v532_v44 = vmul.f32 0.03125, %v463_v36  ;;  %v593_v9 = vmul.f32 %v7789_v27, %v7789_v27  ;;  %v594_v21 = vmul.f32 %v7792_v18, %v7792_v18 }
  0xbc   : > { %v7801_v48 = vsub.f32 %v7607_v25, %v531_v43  ;;  %v7804_v22 = vsub.f32 %v7610_v26, %v532_v44  ;;  %v645_v55 = vsel %vm421_vm0, %v593_v9, 0.0  ;;  %v648_v60 = vsel %vm421_vm0, %v594_v21, 0.0 }
  0xbd   : > { %643 = vadd.xlane.f32.xlu1 %v642_v40  ;;  %646 = vadd.xlane.f32.xlu0 %v645_v55  ;;  %v466_v56 = vpop.xlane.xlu0 %465  ;;  %v469_v59 = vpop.xlane.xlu1 %468 }
  0xbe   : > { %v533_v63 = vmul.f32 0.03125, %v466_v56  ;;  %v534_v4 = vmul.f32 0.03125, %v469_v59  ;;  %v595_v13 = vmul.f32 %v7801_v48, %v7801_v48  ;;  %v596_v25 = vmul.f32 %v7804_v22, %v7804_v22 }
  0xc0   : > { %v7813_v2 = vsub.f32 %v7617_v29, %v533_v63  ;;  %v7816_v26 = vsub.f32 %v7620_v30, %v534_v4  ;;  %v651_v11 = vsel %vm421_vm0, %v595_v13, 0.0  ;;  %v654_v16 = vsel %vm421_vm0, %v596_v25, 0.0 }
  0xc1   : > { %649 = vadd.xlane.f32.xlu1 %v648_v60  ;;  %652 = vadd.xlane.f32.xlu0 %v651_v11  ;;  %v472_v12 = vpop.xlane.xlu0 %471  ;;  %v475_v15 = vpop.xlane.xlu1 %474 }
  0xc2   : > { %v535_v23 = vmul.f32 0.03125, %v472_v12  ;;  %v536_v24 = vmul.f32 0.03125, %v475_v15  ;;  %v597_v17 = vmul.f32 %v7813_v2, %v7813_v2  ;;  %v598_v29 = vmul.f32 %v7816_v26, %v7816_v26 }
  0xc4   : > { %v7825_v28 = vsub.f32 %v7627_v33, %v535_v23  ;;  %v7828_v30 = vsub.f32 %v7630_v34, %v536_v24  ;;  %v657_v35 = vsel %vm421_vm0, %v597_v17, 0.0  ;;  %v660_v43 = vsel %vm421_vm0, %v598_v29, 0.0 }
  0xc5   : > { %655 = vadd.xlane.f32.xlu1 %v654_v16  ;;  %658 = vadd.xlane.f32.xlu0 %v657_v35  ;;  %v478_v36 = vpop.xlane.xlu0 %477  ;;  %v481_v40 = vpop.xlane.xlu1 %480 }
  0xc6   : > { %v537_v44 = vmul.f32 0.03125, %v478_v36  ;;  %v538_v9 = vmul.f32 0.03125, %v481_v40  ;;  %v599_v21 = vmul.f32 %v7825_v28, %v7825_v28  ;;  %v600_v33 = vmul.f32 %v7828_v30, %v7828_v30 }
  0xc8   : > { %v7837_v55 = vsub.f32 %v7637_v37, %v537_v44  ;;  %v7840_v34 = vsub.f32 %v7640_v38, %v538_v9  ;;  %v663_v56 = vsel %vm421_vm0, %v599_v21, 0.0  ;;  %v666_v63 = vsel %vm421_vm0, %v600_v33, 0.0 }
  0xc9   : > { %661 = vadd.xlane.f32.xlu1 %v660_v43  ;;  %664 = vadd.xlane.f32.xlu0 %v663_v56  ;;  %v484_v59 = vpop.xlane.xlu0 %483  ;;  %v487_v60 = vpop.xlane.xlu1 %486 }
  0xca   : > { %v539_v4 = vmul.f32 0.03125, %v484_v59  ;;  %v540_v13 = vmul.f32 0.03125, %v487_v60  ;;  %v601_v25 = vmul.f32 %v7837_v55, %v7837_v55  ;;  %v602_v37 = vmul.f32 %v7840_v34, %v7840_v34 }
  0xcc   : > { %v7849_v11 = vsub.f32 %v7647_v41, %v539_v4  ;;  %v7852_v38 = vsub.f32 %v7650_v42, %v540_v13  ;;  %v669_v12 = vsel %vm421_vm0, %v601_v25, 0.0  ;;  %v672_v23 = vsel %vm421_vm0, %v602_v37, 0.0 }
  0xcd   : > { %667 = vadd.xlane.f32.xlu1 %v666_v63  ;;  %670 = vadd.xlane.f32.xlu0 %v669_v12  ;;  %v490_v15 = vpop.xlane.xlu0 %489  ;;  %v493_v16 = vpop.xlane.xlu1 %492 }
  0xce   : > { %v541_v24 = vmul.f32 0.03125, %v490_v15  ;;  %v542_v17 = vmul.f32 0.03125, %v493_v16  ;;  %v603_v29 = vmul.f32 %v7849_v11, %v7849_v11  ;;  %v604_v41 = vmul.f32 %v7852_v38, %v7852_v38 }
  0xd0   : > { %v7925_v42 = vsub.f32 %v7657_v45, %v541_v24  ;;  %v7928_v35 = vsub.f32 %v7660_v46, %v542_v17  ;;  %v675_v36 = vsel %vm421_vm0, %v603_v29, 0.0  ;;  %v678_v44 = vsel %vm421_vm0, %v604_v41, 0.0 }
  0xd1   : > { %673 = vadd.xlane.f32.xlu1 %v672_v23  ;;  %676 = vadd.xlane.f32.xlu0 %v675_v36  ;;  %v496_v40 = vpop.xlane.xlu0 %495  ;;  %v499_v43 = vpop.xlane.xlu1 %498 }
  0xd2   : > { %v543_v9 = vmul.f32 0.03125, %v496_v40  ;;  %v544_v21 = vmul.f32 0.03125, %v499_v43  ;;  %v605_v33 = vmul.f32 %v7925_v42, %v7925_v42  ;;  %v606_v0 = vmul.f32 %v7928_v35, %v7928_v35 }
  0xd4   : > { %v7937_v45 = vsub.f32 %v7667_v49, %v543_v9  ;;  %v7940_v46 = vsub.f32 %v7670_v50, %v544_v21  ;;  %v681_v56 = vsel %vm421_vm0, %v605_v33, 0.0  ;;  %v684_v63 = vsel %vm421_vm0, %v606_v0, 0.0 }
  0xd5   : > { %679 = vadd.xlane.f32.xlu1 %v678_v44  ;;  %682 = vadd.xlane.f32.xlu0 %v681_v56  ;;  %v502_v59 = vpop.xlane.xlu0 %501  ;;  %v505_v60 = vpop.xlane.xlu1 %504 }
  0xd6   : > { %v545_v4 = vmul.f32 0.03125, %v502_v59  ;;  %v546_v13 = vmul.f32 0.03125, %v505_v60  ;;  %v607_v25 = vmul.f32 %v7937_v45, %v7937_v45  ;;  %v608_v49 = vmul.f32 %v7940_v46, %v7940_v46  ;;  %v1070_v59 = vld [vmem:[#allocation2 + $0x218] sm:$0xff]  ;;  %v1071_v60 = vld [vmem:[#allocation2 + $0x230] sm:$0xff] }
  0xd8   : > { %v7949_v37 = vsub.f32 %v7677_v53, %v545_v4  ;;  %v7952_v50 = vsub.f32 %v7680_v54, %v546_v13  ;;  %v687_v12 = vsel %vm421_vm0, %v607_v25, 0.0  ;;  %v690_v23 = vsel %vm421_vm0, %v608_v49, 0.0  ;;  %v1078_v4 = vld [vmem:[#allocation2 + $0x220] sm:$0xff]  ;;  %v1068_v13 = vld [vmem:[#allocation2 + $0x1e8] sm:$0xff] }
  0xd9   : > { %685 = vadd.xlane.f32.xlu1 %v684_v63  ;;  %688 = vadd.xlane.f32.xlu0 %v687_v12  ;;  %v508_v15 = vpop.xlane.xlu0 %507  ;;  %v511_v16 = vpop.xlane.xlu1 %510  ;;  %v7980_v63 = vpack.i.bf16 %v1071_v60, %v1070_v59  ;;  %v1069_v25 = vld [vmem:[#allocation2 + $0x200] sm:$0xff]  ;;  %v1008_v59 = vld [vmem:[#allocation2 + $0x30] sm:$0xff]  ;;  %v1009_v60 = vld [vmem:[#allocation2 + $0x48] sm:$0xff] }
  0xda   : > { %v547_v24 = vmul.f32 0.03125, %v508_v15  ;;  %v548_v17 = vmul.f32 0.03125, %v511_v16  ;;  %v609_v29 = vmul.f32 %v7949_v37, %v7949_v37  ;;  %v610_v53 = vmul.f32 %v7952_v50, %v7952_v50  ;;  %v1076_v15 = vld [vmem:[#allocation2 + $0x1f0] sm:$0xff]  ;;  %v1077_v16 = vld [vmem:[#allocation2 + $0x208] sm:$0xff] }
  0xdb   : > { %v6518_v12 = vpack.i.bf16 %v1069_v25, %v1068_v13 }
  0xdc   : > { %v7961_v41 = vsub.f32 %v7687_v57, %v547_v24  ;;  %v7964_v54 = vsub.f32 %v7690_v58, %v548_v17  ;;  %v693_v36 = vsel %vm421_vm0, %v609_v29, 0.0  ;;  %v696_v44 = vsel %vm421_vm0, %v610_v53, 0.0  ;;  %v1415_v24 = vld [vmem:[%s11041_s4] sm:$0xff]  ;;  %v1418_v17 = vld [vmem:[%s11041_s4 + $0x18] sm:$0xff]  ;;  %v1420_v29 = vld [vmem:[%s11041_s4 + $0x28] sm:$0xff] }
  0xdd   : > { %691 = vadd.xlane.f32.xlu1 %v690_v23  ;;  %694 = vadd.xlane.f32.xlu0 %v693_v36  ;;  %v514_v40 = vpop.xlane.xlu0 %513  ;;  %v6528_v23 = vpack.i.bf16 %v1077_v16, %v1076_v15  ;;  %v1422_v53 = vld [vmem:[%s11041_s4 + $0x38] sm:$0xff]  ;;  %v517_v36 = vpop.xlane.xlu1 %516  ;;  %v1421_v16 = vld [vmem:[%s11041_s4 + $0x30] sm:$0xff] }
  0xde   : > { %v549_v43 = vmul.f32 0.03125, %v514_v40  ;;  %v611_v9 = vmul.f32 %v7961_v41, %v7961_v41  ;;  %v612_v21 = vmul.f32 %v7964_v54, %v7964_v54  ;;  %v550_v40 = vmul.f32 0.03125, %v517_v36 }
  0xe0   : > { %v7973_v57 = vsub.f32 %v7697_v61, %v549_v43  ;;  %v699_v58 = vsel %vm421_vm0, %v611_v9, 0.0  ;;  %v702_v33 = vsel %vm421_vm0, %v612_v21, 0.0  ;;  %v1079_v61 = vld [vmem:[#allocation2 + $0x238] sm:$0xff]  ;;  %v8005_v43 = vsub.f32 %v7700_v62, %v550_v40  ;;  %v1006_v62 = vld [vmem:[#allocation2] sm:$0xff] }
  0xe1   : > { %697 = vadd.xlane.f32.xlu1 %v696_v44  ;;  %700 = vadd.xlane.f32.xlu0 %v699_v58  ;;  %v7984_v49 = vpack.i.bf16 %v1079_v61, %v1078_v4  ;;  %v8016_v21 = vld [vmem:[#allocation2 + $0x18] sm:$0xff]  ;;  %v1417_v4 = vld [vmem:[%s11041_s4 + $0x10] sm:$0xff]  ;;  %v8039_v61 = vpack.i.bf16 %v1009_v60, %v1008_v59 }
  0xe2   : > { %v613_v0 = vmul.f32 %v7973_v57, %v7973_v57  ;;  %v614_v44 = vmul.f32 %v8005_v43, %v8005_v43  ;;  %v8019_v58 = vpack.i.bf16 %v8016_v21, %v1006_v62 }
  0xe4   : > { %v705_v56 = vsel %vm421_vm0, %v613_v0, 0.0  ;;  %v708_v9 = vsel %vm421_vm0, %v614_v44, 0.0  ;;  %v1416_v0 = vld [vmem:[%s11041_s4 + $0x8] sm:$0xff] }
  0xe5   : > { %703 = vadd.xlane.f32.xlu1 %v702_v33  ;;  %706 = vadd.xlane.f32.xlu0 %v705_v56  ;;  %v8027_v33 = vpop.permute.xlu1 %6494 }
  0xf6   : > { %6524 = vrot.lane.b32.xlu1 %v7980_v63, %s7395_s27 }
  0xfa   : > { %6534 = vrot.lane.b32.xlu1 %v7984_v49, %s7396_s28 }
  0xfb   : > { %6519 = vrot.lane.b32.xlu0 %v6518_v12, %s7395_s27 }
  0xff   : > { %6529 = vrot.lane.b32.xlu0 %v6528_v23, %s7396_s28 }
 0x103   : > { %1425 = vperm.xlu0 %6538, %v1415_v24  }
 0x107   : > { %1440 = vperm.xlu0 %6538, %v1418_v17  }
 0x10b   : > { %1450 = vperm.xlu0 %6538, %v1420_v29  }
 0x10f   : > { %1460 = vperm.xlu0 %6538, %v1422_v53  }
 0x113   : > { %6546 = vrot.lane.b32.xlu0 %v7720_v32, %s7391_s24 }
 0x117   : > { %6561 = vrot.lane.b32.xlu0 %v7726_v39, %s7397_s21  ;;  %v8023_v39 = vpop.permute.xlu0 %6489 }
 0x11b   : > { %6566 = vrot.lane.b32.xlu0 %v6518_v12, %s7393_s26  ;;  %v8032_v56 = vpop.permute.xlu0 %6499 }
 0x11e   : > { %709 = vadd.xlane.f32.xlu1 %v708_v9 }
 0x11f   : > { %6571 = vrot.lane.b32.xlu0 %v6528_v23, %s7395_s27  ;;  %v8043_v13 = vpop.permute.xlu0 %6509 }
 0x123   : > { %6581 = vrot.lane.b32.xlu0 %v7712_v20, %s7398_s22 }
 0x127   : > { %6586 = vrot.lane.b32.xlu0 %v8019_v58, %s7399_s29 }
 0x12b   : > { %6596 = vrot.lane.b32.xlu0 %v7716_v31, %s7397_s21  ;;  %v8041_v31 = vpop.permute.xlu1 %6504 }
 0x12f   : > { %1430 = vperm.xlu1 %6539, %v1416_v0   ;;  %6601 = vrot.lane.b32.xlu0 %v7720_v32, %s7398_s22  ;;  %v1419_v32 = vld [vmem:[%s11041_s4 + $0x20] sm:$0xff]  ;;  %v8050_v25 = vpop.permute.xlu1 %6514 }
 0x133   : > { %1435 = vperm.xlu1 %6539, %v1417_v4   ;;  %6616 = vrot.lane.b32.xlu0 %v8039_v61, %s7400_s15 }
 0x136   : > { %v617_v12 = vpop.xlane.xlu0 %616 }
 0x137   : > { %v711_v15 = vmul.f32 0.03125, %v617_v12  ;;  %1445 = vperm.xlu1 %6539, %v1419_v32   ;;  %6631 = vrot.lane.b32.xlu0 %v7706_v8, %s7400_s15 }
 0x139   : > { %v743_v23 = vadd.f32 1e-05, %v711_v15 }
 0x13a   : > { %v620_v24 = vpop.xlane.xlu1 %619  ;;  %v623_v17 = vpop.xlane.xlu0 %622 }
 0x13b   : > { %7149 = vrsqrt.f32 %v743_v23  ;;  %v712_v29 = vmul.f32 0.03125, %v620_v24  ;;  %v713_v53 = vmul.f32 0.03125, %v623_v17  ;;  %1455 = vperm.xlu1 %6539, %v1421_v16   ;;  %6636 = vrot.lane.b32.xlu0 %v7710_v19, %s7398_s22  ;;  %v8066_v16 = vld [vmem:[%s11038_s1] ss:$0 sm:$0xff] }
 0x13d   : > { %v744_v36 = vadd.f32 1e-05, %v712_v29  ;;  %v745_v40 = vadd.f32 1e-05, %v713_v53 }
 0x13e   : > { %v626_v44 = vpop.xlane.xlu1 %625  ;;  %v629_v9 = vpop.xlane.xlu0 %628 }
 0x13f   : > { %7151 = vrsqrt.f32 %v744_v36  ;;  %v714_v8 = vmul.f32 0.03125, %v626_v44  ;;  %v715_v62 = vmul.f32 0.03125, %v629_v9  ;;  %6541 = vrot.lane.b32.xlu1 %v8019_v58, %s7398_s22  ;;  %v8072_v36 = vld [vmem:[%s11039_s2] ss:$0 sm:$0xff] }
 0x140   : > { %7153 = vrsqrt.f32 %v745_v40 }
 0x141   : > { %v746_v0 = vadd.f32 1e-05, %v714_v8  ;;  %v747_v59 = vadd.f32 1e-05, %v715_v62 }
 0x142   : > { %v632_v60 = vpop.xlane.xlu1 %631  ;;  %v635_v4 = vpop.xlane.xlu0 %634 }
 0x143   : > { %7155 = vrsqrt.f32 %v746_v0  ;;  %v716_v32 = vmul.f32 0.03125, %v632_v60  ;;  %v717_v12 = vmul.f32 0.03125, %v635_v4  ;;  %6551 = vrot.lane.b32.xlu1 %v8039_v61, %s7398_s22 }
 0x144   : > { %7157 = vrsqrt.f32 %v747_v59 }
 0x145   : > { %v7150_v15 = vpop.eup %7149  ;;  %v748_v23 = vadd.f32 1e-05, %v716_v32  ;;  %v749_v24 = vadd.f32 1e-05, %v717_v12 }
 0x146   : > { %v807_v17 = vmul.f32 %v7150_v15, %v7731_v51  ;;  %v638_v29 = vpop.xlane.xlu1 %637  ;;  %v641_v53 = vpop.xlane.xlu0 %640 }
 0x147   : > { %7159 = vrsqrt.f32 %v748_v23  ;;  %v718_v40 = vmul.f32 0.03125, %v638_v29  ;;  %v719_v44 = vmul.f32 0.03125, %v641_v53  ;;  %6556 = vrot.lane.b32.xlu1 %v7710_v19, %s7391_s24 }
 0x148   : > { %v845_v9 = vmul.f32 %v8066_v16, %v807_v17  ;;  %7161 = vrsqrt.f32 %v749_v24 }
 0x149   : > { %v7152_v8 = vpop.eup %7151  ;;  %v750_v62 = vadd.f32 1e-05, %v718_v40  ;;  %v751_v0 = vadd.f32 1e-05, %v719_v44 }
 0x14a   : > { %v7154_v51 = vpop.eup %7153  ;;  %v883_v59 = vadd.f32 %v8072_v36, %v845_v9  ;;  %v808_v60 = vmul.f32 %v7152_v8, %v7741_v5  ;;  %v644_v4 = vpop.xlane.xlu1 %643 }
 0x14b   : > { %v647_v32 = vpop.xlane.xlu0 %646  ;;  %v809_v12 = vmul.f32 %v7154_v51, %v7734_v52  ;;  %7163 = vrsqrt.f32 %v750_v62  ;;  %v720_v15 = vmul.f32 0.03125, %v644_v4  ;;  %6576 = vrot.lane.b32.xlu1 %v8019_v58, %s7400_s15 }
 0x14c   : > { %v721_v23 = vmul.f32 0.03125, %v647_v32  ;;  %974 = vst.msk [vmem:[#allocation2 + $0x64] sm:$0xff] %vm421_vm0, %v883_v59  ;;  %v846_v19 = vmul.f32 %v8066_v16, %v808_v60  ;;  %7165 = vrsqrt.f32 %v751_v0 }
 0x14d   : > { %v7156_v24 = vpop.eup %7155  ;;  %v847_v17 = vmul.f32 %v8066_v16, %v809_v12  ;;  %v752_v29 = vadd.f32 1e-05, %v720_v15 }
 0x14e   : > { %v753_v5 = vadd.f32 1e-05, %v721_v23  ;;  %v7158_v53 = vpop.eup %7157  ;;  %v884_v40 = vadd.f32 %v8072_v36, %v846_v19  ;;  %v810_v52 = vmul.f32 %v7156_v24, %v7744_v7  ;;  %v650_v44 = vpop.xlane.xlu1 %649 }
 0x14f   : > { %v653_v9 = vpop.xlane.xlu0 %652  ;;  %v885_v8 = vadd.f32 %v8072_v36, %v847_v17  ;;  %v811_v58 = vmul.f32 %v7158_v53, %v7753_v3  ;;  %7167 = vrsqrt.f32 %v752_v29  ;;  %v722_v62 = vmul.f32 0.03125, %v650_v44  ;;  %6591 = vrot.lane.b32.xlu1 %v7712_v20, %s7400_s15  ;;  %v2727_v17 = vld [vmem:[#allocation2 + $0x38] sm:$0xff]  ;;  %v2728_v29 = vld [vmem:[#allocation2 + $0x50] sm:$0xff] }
 0x150   : > { %975 = vst.msk [vmem:[#allocation2 + $0x6c] sm:$0xff] %vm421_vm0, %v884_v40  ;;  %v848_v0 = vmul.f32 %v8066_v16, %v810_v52  ;;  %7169 = vrsqrt.f32 %v753_v5  ;;  %v723_v51 = vmul.f32 0.03125, %v653_v9 }
 0x151   : > { %v7160_v59 = vpop.eup %7159  ;;  %976 = vst.msk [vmem:[#allocation2 + $0x7c] sm:$0xff] %vm421_vm0, %v885_v8  ;;  %v849_v7 = vmul.f32 %v8066_v16, %v811_v58  ;;  %v754_v60 = vadd.f32 1e-05, %v722_v62  ;;  %v6620_v62 = vpack.i.bf16 %v2728_v29, %v2727_v17 }
 0x152   : > { %v7162_v4 = vpop.eup %7161  ;;  %v886_v3 = vadd.f32 %v8072_v36, %v848_v0  ;;  %v812_v32 = vmul.f32 %v7160_v59, %v7756_v6  ;;  %v755_v12 = vadd.f32 1e-05, %v723_v51  ;;  %v656_v15 = vpop.xlane.xlu1 %655 }
 0x153   : > { %v659_v20 = vpop.xlane.xlu0 %658  ;;  %v887_v23 = vadd.f32 %v8072_v36, %v849_v7  ;;  %v813_v19 = vmul.f32 %v7162_v4, %v7765_v47  ;;  %7171 = vrsqrt.f32 %v754_v60  ;;  %v724_v24 = vmul.f32 0.03125, %v656_v15  ;;  %6606 = vrot.lane.b32.xlu1 %v7980_v63, %s7393_s26 }
 0x154   : > { %977 = vst.msk [vmem:[#allocation2 + $0x84] sm:$0xff] %vm421_vm0, %v886_v3  ;;  %v850_v5 = vmul.f32 %v8066_v16, %v812_v32  ;;  %7173 = vrsqrt.f32 %v755_v12  ;;  %v725_v6 = vmul.f32 0.03125, %v659_v20 }
 0x155   : > { %v7164_v53 = vpop.eup %7163  ;;  %978 = vst.msk [vmem:[#allocation2 + $0x94] sm:$0xff] %vm421_vm0, %v887_v23  ;;  %v851_v40 = vmul.f32 %v8066_v16, %v813_v19  ;;  %v756_v52 = vadd.f32 1e-05, %v724_v24 }
 0x156   : > { %v7166_v47 = vpop.eup %7165  ;;  %v888_v44 = vadd.f32 %v8072_v36, %v850_v5  ;;  %v814_v9 = vmul.f32 %v7164_v53, %v7768_v10  ;;  %v757_v63 = vadd.f32 1e-05, %v725_v6  ;;  %v662_v8 = vpop.xlane.xlu1 %661 }
 0x157   : > { %v665_v58 = vpop.xlane.xlu0 %664  ;;  %v889_v0 = vadd.f32 %v8072_v36, %v851_v40  ;;  %v815_v51 = vmul.f32 %v7166_v47, %v7777_v1  ;;  %7175 = vrsqrt.f32 %v756_v52  ;;  %v726_v59 = vmul.f32 0.03125, %v662_v8  ;;  %6611 = vrot.lane.b32.xlu1 %v7984_v49, %s7395_s27  ;;  %v1026_v17 = vld [vmem:[#allocation2 + $0x70] sm:$0xff] }
 0x158   : > { %979 = vst.msk [vmem:[#allocation2 + $0x9c] sm:$0xff] %vm421_vm0, %v888_v44  ;;  %v852_v7 = vmul.f32 %v8066_v16, %v814_v9  ;;  %7177 = vrsqrt.f32 %v757_v63  ;;  %v727_v60 = vmul.f32 0.03125, %v665_v58 }
 0x159   : > { %v7168_v10 = vpop.eup %7167  ;;  %980 = vst.msk [vmem:[#allocation2 + $0xac] sm:$0xff] %vm421_vm0, %v889_v0  ;;  %v853_v4 = vmul.f32 %v8066_v16, %v815_v51  ;;  %v758_v3 = vadd.f32 1e-05, %v726_v59 }
 0x15a   : > { %v7170_v32 = vpop.eup %7169  ;;  %v890_v1 = vadd.f32 %v8072_v36, %v852_v7  ;;  %v816_v12 = vmul.f32 %v7168_v10, %v7780_v14  ;;  %v759_v15 = vadd.f32 1e-05, %v727_v60  ;;  %v668_v20 = vpop.xlane.xlu1 %667  ;;  %v1018_v7 = vld [vmem:[#allocation2 + $0x68] sm:$0xff] }
 0x15b   : > { %v671_v49 = vpop.xlane.xlu0 %670  ;;  %v891_v23 = vadd.f32 %v8072_v36, %v853_v4  ;;  %v817_v19 = vmul.f32 %v7170_v32, %v7789_v27  ;;  %7179 = vrsqrt.f32 %v758_v3  ;;  %v728_v24 = vmul.f32 0.03125, %v668_v20  ;;  %6621 = vrot.lane.b32.xlu1 %v6620_v62, %s7398_s22  ;;  %v1027_v29 = vld [vmem:[#allocation2 + $0x88] sm:$0xff]  ;;  %v1019_v58 = vld [vmem:[#allocation2 + $0x80] sm:$0xff] }
 0x15c   : > { %981 = vst.msk [vmem:[#allocation2 + $0xb4] sm:$0xff] %vm421_vm0, %v890_v1  ;;  %v854_v5 = vmul.f32 %v8066_v16, %v816_v12  ;;  %7181 = vrsqrt.f32 %v759_v15  ;;  %v729_v6 = vmul.f32 0.03125, %v671_v49  ;;  %v8122_v14 = vpack.i.bf16 %v1027_v29, %v1026_v17 }
 0x15d   : > { %v7172_v53 = vpop.eup %7171  ;;  %982 = vst.msk [vmem:[#allocation2 + $0xc4] sm:$0xff] %vm421_vm0, %v891_v23  ;;  %v855_v40 = vmul.f32 %v8066_v16, %v817_v19  ;;  %v760_v27 = vadd.f32 1e-05, %v728_v24  ;;  %v8138_v3 = vpack.i.bf16 %v1019_v58, %v1018_v7 }
 0x15e   : > { %v7174_v52 = vpop.eup %7173  ;;  %v892_v47 = vadd.f32 %v8072_v36, %v854_v5  ;;  %v818_v44 = vmul.f32 %v7172_v53, %v7792_v18  ;;  %v761_v9 = vadd.f32 1e-05, %v729_v6  ;;  %v674_v63 = vpop.xlane.xlu1 %673  ;;  %6651 = vrot.lane.b32.xlu0 %v8122_v14, %s7392_s25 }
 0x15f   : > { %v677_v8 = vpop.xlane.xlu0 %676  ;;  %v893_v62 = vadd.f32 %v8072_v36, %v855_v40  ;;  %v819_v0 = vmul.f32 %v7174_v52, %v7801_v48  ;;  %7183 = vrsqrt.f32 %v760_v27  ;;  %v730_v51 = vmul.f32 0.03125, %v674_v63  ;;  %6626 = vrot.lane.b32.xlu1 %v8039_v61, %s7399_s29  ;;  %v1020_v19 = vld [vmem:[#allocation2 + $0x98] sm:$0xff] }
 0x160   : > { %983 = vst.msk [vmem:[#allocation2 + $0xcc] sm:$0xff] %vm421_vm0, %v892_v47  ;;  %v856_v18 = vmul.f32 %v8066_v16, %v818_v44  ;;  %7185 = vrsqrt.f32 %v761_v9  ;;  %v731_v59 = vmul.f32 0.03125, %v677_v8 }
 0x161   : > { %v7176_v60 = vpop.eup %7175  ;;  %984 = vst.msk [vmem:[#allocation2 + $0xdc] sm:$0xff] %vm421_vm0, %v893_v62  ;;  %v857_v10 = vmul.f32 %v8066_v16, %v819_v0  ;;  %v762_v4 = vadd.f32 1e-05, %v730_v51 }
 0x162   : > { %v7178_v48 = vpop.eup %7177  ;;  %v894_v32 = vadd.f32 %v8072_v36, %v856_v18  ;;  %v820_v61 = vmul.f32 %v7176_v60, %v7804_v22  ;;  %v763_v1 = vadd.f32 1e-05, %v731_v59  ;;  %v680_v12 = vpop.xlane.xlu1 %679  ;;  %v1028_v18 = vld [vmem:[#allocation2 + $0xa0] sm:$0xff] }
 0x163   : > { %v683_v15 = vpop.xlane.xlu0 %682  ;;  %v895_v20 = vadd.f32 %v8072_v36, %v857_v10  ;;  %v821_v49 = vmul.f32 %v7178_v48, %v7813_v2  ;;  %7187 = vrsqrt.f32 %v762_v4  ;;  %v732_v23 = vmul.f32 0.03125, %v680_v12  ;;  %6641 = vrot.lane.b32.xlu1 %v8138_v3, %s7391_s24  ;;  %v1021_v24 = vld [vmem:[#allocation2 + $0xb0] sm:$0xff]  ;;  %v1029_v9 = vld [vmem:[#allocation2 + $0xb8] sm:$0xff] }
 0x164   : > { %985 = vst.msk [vmem:[#allocation2 + $0xe4] sm:$0xff] %vm421_vm0, %v894_v32  ;;  %v858_v17 = vmul.f32 %v8066_v16, %v820_v61  ;;  %7189 = vrsqrt.f32 %v763_v1  ;;  %v733_v22 = vmul.f32 0.03125, %v683_v15  ;;  %v6645_v29 = vpack.i.bf16 %v1021_v24, %v1020_v19  ;;  %v1031_v51 = vld [vmem:[#allocation2 + $0xc0] sm:$0xff] }
 0x165   : > { %v7180_v5 = vpop.eup %7179  ;;  %986 = vst.msk [vmem:[#allocation2 + $0xf4] sm:$0xff] %vm421_vm0, %v895_v20  ;;  %v859_v6 = vmul.f32 %v8066_v16, %v821_v49  ;;  %v764_v2 = vadd.f32 1e-05, %v732_v23  ;;  %v8161_v10 = vpack.i.bf16 %v1029_v9, %v1028_v18 }
 0x166   : > { %v7182_v53 = vpop.eup %7181  ;;  %v896_v40 = vadd.f32 %v8072_v36, %v858_v17  ;;  %v822_v27 = vmul.f32 %v7180_v5, %v7816_v26  ;;  %v765_v52 = vadd.f32 1e-05, %v733_v22  ;;  %v686_v47 = vpop.xlane.xlu1 %685 }
 0x167   : > { %v689_v44 = vpop.xlane.xlu0 %688  ;;  %v897_v63 = vadd.f32 %v8072_v36, %v859_v6  ;;  %v823_v8 = vmul.f32 %v7182_v53, %v7825_v28  ;;  %7191 = vrsqrt.f32 %v764_v2  ;;  %v734_v58 = vmul.f32 0.03125, %v686_v47  ;;  %6646 = vrot.lane.b32.xlu1 %v6645_v29, %s7391_s24 }
 0x168   : > { %987 = vst.msk [vmem:[#allocation2 + $0xfc] sm:$0xff] %vm421_vm0, %v896_v40  ;;  %v860_v62 = vmul.f32 %v8066_v16, %v822_v27  ;;  %7193 = vrsqrt.f32 %v765_v52  ;;  %v735_v0 = vmul.f32 0.03125, %v689_v44  ;;  %v1032_v26 = vld [vmem:[#allocation2 + $0xd8] sm:$0xff] }
 0x169   : > { %v7184_v59 = vpop.eup %7183  ;;  %988 = vst.msk [vmem:[#allocation2 + $0x10c] sm:$0xff] %vm421_vm0, %v897_v63  ;;  %v861_v7 = vmul.f32 %v8066_v16, %v823_v8  ;;  %v766_v60 = vadd.f32 1e-05, %v734_v58  ;;  %v8159_v28 = vpack.i.bf16 %v1032_v26, %v1031_v51 }
 0x16a   : > { %v7186_v4 = vpop.eup %7185  ;;  %v898_v48 = vadd.f32 %v8072_v36, %v860_v62  ;;  %v824_v32 = vmul.f32 %v7184_v59, %v7828_v30  ;;  %v767_v61 = vadd.f32 1e-05, %v735_v0  ;;  %v692_v1 = vpop.xlane.xlu1 %691 }
 0x16b   : > { %v695_v12 = vpop.xlane.xlu0 %694  ;;  %v899_v15 = vadd.f32 %v8072_v36, %v861_v7  ;;  %v825_v20 = vmul.f32 %v7186_v4, %v7837_v55  ;;  %7195 = vrsqrt.f32 %v766_v60  ;;  %v736_v49 = vmul.f32 0.03125, %v692_v1  ;;  %6661 = vrot.lane.b32.xlu0 %v8159_v28, %s7401_s30  ;;  %6656 = vrot.lane.b32.xlu1 %v8161_v10, %s7392_s25 }
 0x16c   : > { %989 = vst.msk [vmem:[#allocation2 + $0x114] sm:$0xff] %vm421_vm0, %v898_v48  ;;  %v862_v30 = vmul.f32 %v8066_v16, %v824_v32  ;;  %7197 = vrsqrt.f32 %v767_v61  ;;  %v737_v23 = vmul.f32 0.03125, %v695_v12  ;;  %v1033_v44 = vld [vmem:[#allocation2 + $0xf0] sm:$0xff] }
 0x16d   : > { %v7188_v19 = vpop.eup %7187  ;;  %990 = vst.msk [vmem:[#allocation2 + $0x124] sm:$0xff] %vm421_vm0, %v899_v15  ;;  %v863_v55 = vmul.f32 %v8066_v16, %v825_v20  ;;  %v768_v24 = vadd.f32 1e-05, %v736_v49 }
 0x16e   : > { %v7190_v17 = vpop.eup %7189  ;;  %v900_v22 = vadd.f32 %v8072_v36, %v862_v30  ;;  %v826_v29 = vmul.f32 %v7188_v19, %v7840_v34  ;;  %v769_v5 = vadd.f32 1e-05, %v737_v23  ;;  %v698_v6 = vpop.xlane.xlu1 %697 }
 0x16f   : > { %v701_v2 = vpop.xlane.xlu0 %700  ;;  %v901_v53 = vadd.f32 %v8072_v36, %v863_v55  ;;  %v827_v40 = vmul.f32 %v7190_v17, %v7849_v11  ;;  %7199 = vrsqrt.f32 %v768_v24  ;;  %v738_v27 = vmul.f32 0.03125, %v698_v6 }
 0x170   : > { %991 = vst.msk [vmem:[#allocation2 + $0x12c] sm:$0xff] %vm421_vm0, %v900_v22  ;;  %v864_v52 = vmul.f32 %v8066_v16, %v826_v29  ;;  %7201 = vrsqrt.f32 %v769_v5  ;;  %v739_v47 = vmul.f32 0.03125, %v701_v2  ;;  %v1034_v9 = vld [vmem:[#allocation2 + $0x108] sm:$0xff]  ;;  %v1040_v29 = vld [vmem:[#allocation2 + $0xe0] sm:$0xff] }
 0x171   : > { %v7192_v63 = vpop.eup %7191  ;;  %992 = vst.msk [vmem:[#allocation2 + $0x13c] sm:$0xff] %vm421_vm0, %v901_v53  ;;  %v865_v34 = vmul.f32 %v8066_v16, %v827_v40  ;;  %v770_v8 = vadd.f32 1e-05, %v738_v27  ;;  %v8183_v58 = vpack.i.bf16 %v1034_v9, %v1033_v44  ;;  %v1039_v53 = vld [vmem:[#allocation2 + $0xc8] sm:$0xff] }
 0x172   : > { %v7194_v62 = vpop.eup %7193  ;;  %v902_v11 = vadd.f32 %v8072_v36, %v864_v52  ;;  %v828_v0 = vmul.f32 %v7192_v63, %v7852_v38  ;;  %v771_v51 = vadd.f32 1e-05, %v739_v47  ;;  %v704_v26 = vpop.xlane.xlu1 %703  ;;  %v8215_v52 = vpack.i.bf16 %v1040_v29, %v1039_v53  ;;  %v1049_v29 = vld [vmem:[#allocation2 + $0x100] sm:$0xff] }
 0x173   : > { %v707_v18 = vpop.xlane.xlu0 %706  ;;  %v903_v59 = vadd.f32 %v8072_v36, %v865_v34  ;;  %v829_v7 = vmul.f32 %v7194_v62, %v7925_v42  ;;  %7203 = vrsqrt.f32 %v770_v8  ;;  %v740_v60 = vmul.f32 0.03125, %v704_v26  ;;  %6666 = vrot.lane.b32.xlu1 %v8183_v58, %s7401_s30 }
 0x174   : > { %993 = vst.msk [vmem:[#allocation2 + $0x144] sm:$0xff] %vm421_vm0, %v902_v11  ;;  %v866_v4 = vmul.f32 %v8066_v16, %v828_v0  ;;  %7205 = vrsqrt.f32 %v771_v51  ;;  %v741_v48 = vmul.f32 0.03125, %v707_v18  ;;  %v1035_v23 = vld [vmem:[#allocation2 + $0x120] sm:$0xff] }
 0x175   : > { %v7196_v32 = vpop.eup %7195  ;;  %994 = vst.msk [vmem:[#allocation2 + $0x154] sm:$0xff] %vm421_vm0, %v903_v59  ;;  %v867_v38 = vmul.f32 %v8066_v16, %v829_v7  ;;  %v772_v61 = vadd.f32 1e-05, %v740_v60  ;;  %v1048_v60 = vld [vmem:[#allocation2 + $0xe8] sm:$0xff] }
 0x176   : > { %v7198_v1 = vpop.eup %7197  ;;  %v904_v42 = vadd.f32 %v8072_v36, %v866_v4  ;;  %v830_v12 = vmul.f32 %v7196_v32, %v7928_v35  ;;  %v773_v15 = vadd.f32 1e-05, %v741_v48  ;;  %v1042_v4 = vld [vmem:[#allocation2 + $0x110] sm:$0xff] }
 0x177   : > { %v905_v20 = vadd.f32 %v8072_v36, %v867_v38  ;;  %v831_v49 = vmul.f32 %v7198_v1, %v7937_v45  ;;  %7207 = vrsqrt.f32 %v772_v61  ;;  %v8223_v34 = vpop.permute.xlu0 %6519  ;;  %v1043_v62 = vld [vmem:[#allocation2 + $0x128] sm:$0xff]  ;;  %v1047_v61 = vld [vmem:[#allocation2 + $0xd0] sm:$0xff]  ;;  %v1041_v1 = vld [vmem:[#allocation2 + $0xf8] sm:$0xff] }
 0x178   : > { %995 = vst.msk [vmem:[#allocation2 + $0x15c] sm:$0xff] %vm421_vm0, %v904_v42  ;;  %v868_v30 = vmul.f32 %v8066_v16, %v830_v12  ;;  %7209 = vrsqrt.f32 %v773_v15  ;;  %v1036_v19 = vld [vmem:[#allocation2 + $0x138] sm:$0xff]  ;;  %v8245_v42 = vpack.i.bf16 %v1048_v60, %v1047_v61  ;;  %v8247_v12 = vpack.i.bf16 %v1042_v4, %v1041_v1 }
 0x179   : > { %v7200_v55 = vpop.eup %7199  ;;  %996 = vst.msk [vmem:[#allocation2 + $0x16c] sm:$0xff] %vm421_vm0, %v905_v20  ;;  %v869_v24 = vmul.f32 %v8066_v16, %v831_v49  ;;  %v8203_v17 = vpack.i.bf16 %v1036_v19, %v1035_v23  ;;  %v1051_v23 = vld [vmem:[#allocation2 + $0x130] sm:$0xff] }
 0x17a   : > { %v7202_v35 = vpop.eup %7201  ;;  %v906_v22 = vadd.f32 %v8072_v36, %v868_v30  ;;  %v832_v45 = vmul.f32 %v7200_v55, %v7940_v46 }
 0x17b   : > { %v907_v5 = vadd.f32 %v8072_v36, %v869_v24  ;;  %v833_v6 = vmul.f32 %v7202_v35, %v7949_v37  ;;  %6671 = vrot.lane.b32.xlu0 %v8203_v17, %s7401_s30  ;;  %v1044_v44 = vld [vmem:[#allocation2 + $0x140] sm:$0xff]  ;;  %v1052_v20 = vld [vmem:[#allocation2 + $0x148] sm:$0xff]  ;;  %v1050_v35 = vld [vmem:[#allocation2 + $0x118] sm:$0xff] }
 0x17c   : > { %997 = vst.msk [vmem:[#allocation2 + $0x174] sm:$0xff] %vm421_vm0, %v906_v22  ;;  %v870_v2 = vmul.f32 %v8066_v16, %v832_v45  ;;  %v1037_v11 = vld [vmem:[#allocation2 + $0x150] sm:$0xff]  ;;  %v8229_v26 = vpack.i.bf16 %v1044_v44, %v1043_v62  ;;  %v8259_v55 = vpack.i.bf16 %v1052_v20, %v1051_v23 }
 0x17d   : > { %v7204_v40 = vpop.eup %7203  ;;  %998 = vst.msk [vmem:[#allocation2 + $0x184] sm:$0xff] %vm421_vm0, %v907_v5  ;;  %v871_v27 = vmul.f32 %v8066_v16, %v833_v6  ;;  %v8269_v6 = vpack.i.bf16 %v1050_v35, %v1049_v29 }
 0x17e   : > { %v7206_v46 = vpop.eup %7205  ;;  %v908_v47 = vadd.f32 %v8072_v36, %v870_v2  ;;  %v834_v37 = vmul.f32 %v7204_v40, %v7952_v50 }
 0x17f   : > { %v909_v9 = vadd.f32 %v8072_v36, %v871_v27  ;;  %v835_v63 = vmul.f32 %v7206_v46, %v7961_v41  ;;  %6681 = vrot.lane.b32.xlu0 %v8215_v52, %s7402_s12  ;;  %v1045_v19 = vld [vmem:[#allocation2 + $0x158] sm:$0xff]  ;;  %v1053_v27 = vld [vmem:[#allocation2 + $0x160] sm:$0xff] }
 0x180   : > { %999 = vst.msk [vmem:[#allocation2 + $0x18c] sm:$0xff] %vm421_vm0, %v908_v47  ;;  %v872_v8 = vmul.f32 %v8066_v16, %v834_v37  ;;  %v1038_v0 = vld [vmem:[#allocation2 + $0x168] sm:$0xff] }
 0x181   : > { %v7208_v51 = vpop.eup %7207  ;;  %1000 = vst.msk [vmem:[#allocation2 + $0x19c] sm:$0xff] %vm421_vm0, %v909_v9  ;;  %v873_v50 = vmul.f32 %v8066_v16, %v835_v63  ;;  %v8231_v41 = vpack.i.bf16 %v1038_v0, %v1037_v11 }
 0x182   : > { %v7210_v18 = vpop.eup %7209  ;;  %v910_v59 = vadd.f32 %v8072_v36, %v872_v8  ;;  %v836_v7 = vmul.f32 %v7208_v51, %v7964_v54 }
 0x183   : > { %v911_v48 = vadd.f32 %v8072_v36, %v873_v50  ;;  %v837_v32 = vmul.f32 %v7210_v18, %v7973_v57  ;;  %6691 = vrot.lane.b32.xlu0 %v8229_v26, %s7402_s12  ;;  %6676 = vrot.lane.b32.xlu1 %v8231_v41, %s7401_s30  ;;  %v8249_v57 = vpop.permute.xlu0 %6529  ;;  %v1046_v49 = vld [vmem:[#allocation2 + $0x170] sm:$0xff]  ;;  %v1054_v53 = vld [vmem:[#allocation2 + $0x178] sm:$0xff]  ;;  %v8303_v18 = vpop.permute.xlu1 %6524 }
 0x184   : > { %1001 = vst.msk [vmem:[#allocation2 + $0x1a4] sm:$0xff] %vm421_vm0, %v910_v59  ;;  %v874_v38 = vmul.f32 %v8066_v16, %v836_v7  ;;  %v8261_v24 = vpack.i.bf16 %v1046_v49, %v1045_v19  ;;  %v1056_v5 = vld [vmem:[#allocation2 + $0x180] sm:$0xff]  ;;  %v8277_v47 = vpack.i.bf16 %v1054_v53, %v1053_v27 }
 0x185   : > { %1002 = vst.msk [vmem:[#allocation2 + $0x1b4] sm:$0xff] %vm421_vm0, %v911_v48  ;;  %v875_v54 = vmul.f32 %v8066_v16, %v837_v32 }
 0x186   : > { %v912_v15 = vadd.f32 %v8072_v36, %v874_v38 }
 0x187   : > { %v913_v30 = vadd.f32 %v8072_v36, %v875_v54  ;;  %6701 = vrot.lane.b32.xlu0 %v8245_v42, %s7397_s21  ;;  %6686 = vrot.lane.b32.xlu1 %v8247_v12, %s7402_s12  ;;  %v8267_v45 = vpop.permute.xlu0 %1425  ;;  %v1064_v46 = vld [vmem:[#allocation2 + $0x188] sm:$0xff]  ;;  %v1072_v8 = vld [vmem:[#allocation2 + $0x190] sm:$0xff]  ;;  %v8309_v7 = vpop.permute.xlu1 %6534 }
 0x188   : > { %1003 = vst.msk [vmem:[#allocation2 + $0x1bc] sm:$0xff] %vm421_vm0, %v912_v15  ;;  %v1057_v22 = vld [vmem:[#allocation2 + $0x198] sm:$0xff]  ;;  %11116 = vst [vmem:[#allocation4_spill] sm:$0xff] %v8267_v45  ;;  %v6491_v45 = vunpack.i.l.bf16 %v8023_v39 }
 0x189   : > { %1004 = vst.msk [vmem:[#allocation2 + $0x1cc] sm:$0xff] %vm421_vm0, %v913_v30  ;;  %v8271_v2 = vpack.i.bf16 %v1057_v22, %v1056_v5 }
 0x18b   : > { %6711 = vrot.lane.b32.xlu0 %v8259_v55, %s7397_s21  ;;  %6696 = vrot.lane.b32.xlu1 %v8261_v24, %s7402_s12  ;;  %v1065_v40 = vld [vmem:[#allocation2 + $0x1a0] sm:$0xff]  ;;  %v8281_v44 = vpop.permute.xlu0 %1440  ;;  %v1073_v9 = vld [vmem:[#allocation2 + $0x1a8] sm:$0xff] }
 0x18c   : > { %v8279_v37 = vpack.i.bf16 %v1065_v40, %v1064_v46  ;;  %11117 = vst [vmem:[#allocation5_spill] sm:$0xff] %v8281_v44  ;;  %v1058_v62 = vld [vmem:[#allocation2 + $0x1b0] sm:$0xff]  ;;  %v8287_v11 = vpack.i.bf16 %v1073_v9, %v1072_v8  ;;  %v1407_v8 = vld [vmem:[%s11040_s3] sm:$0xff]  ;;  %v6492_v44 = vunpack.i.h.bf16 %v8023_v39 }
 0x18d   : > { %6108 = vmatprep.mubr.msk.f32.mxu0 %vm1398_vm2, %v1407_v8 }
 0x18f   : > { %6706 = vrot.lane.b32.xlu1 %v8269_v6, %s7397_s21  ;;  %6721 = vrot.lane.b32.xlu0 %v8271_v2, %s7393_s26  ;;  %v8295_v51 = vpop.permute.xlu0 %1450  ;;  %v1924_v5 = vld [vmem:[#allocation2 + $0x1b8] sm:$0xff] }
 0x190   : > { %v1059_v63 = vld [vmem:[#allocation2 + $0x1c8] sm:$0xff]  ;;  %11118 = vst [vmem:[#allocation6_spill] sm:$0xff] %v8295_v51 }
 0x191   : > { %v8289_v0 = vpack.i.bf16 %v1059_v63, %v1058_v62 }
 0x193   : > { %6716 = vrot.lane.b32.xlu1 %v8277_v47, %s7397_s21  ;;  %6731 = vrot.lane.b32.xlu0 %v8279_v37, %s7395_s27  ;;  %v8299_v50 = vpop.permute.xlu0 %1460 }
 0x194   : > { %11119 = vst [vmem:[#allocation7_spill] sm:$0xff] %v8299_v50 }
 0x197   : > { %6741 = vrot.lane.b32.xlu0 %v8287_v11, %s7396_s28  ;;  %6726 = vrot.lane.b32.xlu1 %v8289_v0, %s7393_s26  ;;  %v8307_v59 = vpop.permute.xlu0 %6546 }
 0x19b   : > { %6756 = vrot.lane.b32.xlu0 %v8215_v52, %s7401_s30  ;;  %v8313_v60 = vpop.permute.xlu0 %6561 }
 0x19f   : > { %6761 = vrot.lane.b32.xlu0 %v8245_v42, %s7402_s12  ;;  %v8317_v38 = vpop.permute.xlu0 %6566 }
 0x1a3   : > { %6766 = vrot.lane.b32.xlu0 %v8271_v2, %s7397_s21  ;;  %v8325_v1 = vpop.permute.xlu0 %6571 }
 0x1a7   : > { %6776 = vrot.lane.b32.xlu0 %v8279_v37, %s7393_s26  ;;  %v8330_v49 = vpop.permute.xlu0 %6581 }
 0x1a8   : > { %11122 = vst [vmem:[#allocation10_spill] sm:$0xff] %v8330_v49 }
 0x1ab   : > { %6786 = vrot.lane.b32.xlu0 %v8287_v11, %s7395_s27  ;;  %v710_v4 = vpop.xlane.xlu1 %709  ;;  %v8337_v35 = vpop.permute.xlu0 %6586 }
 0x1ac   : > { %v742_v48 = vmul.f32 0.03125, %v710_v4  ;;  %11124 = vst [vmem:[#allocation12_spill] sm:$0xff] %v8337_v35 }
 0x1ae   : > { %v774_v32 = vadd.f32 1e-05, %v742_v48  ;;  %v8385_v48 = vld [vmem:[#allocation2 + $0x60] sm:$0xff] }
 0x1af   : > { %6796 = vrot.lane.b32.xlu0 %v8269_v6, %s7402_s12  ;;  %v8323_v61 = vpop.permute.xlu1 %1430  ;;  %v8341_v29 = vpop.permute.xlu0 %6596 }
 0x1b0   : > { %7211 = vrsqrt.f32 %v774_v32  ;;  %11120 = vst [vmem:[#allocation8_spill] sm:$0xff] %v8323_v61  ;;  %11126 = vst [vmem:[#allocation14_spill] sm:$0xff] %v8341_v29  ;;  %v3589_v61 = vld [vmem:[#allocation2 + $0x88] sm:$0xff] }
 0x1b3   : > { %6806 = vrot.lane.b32.xlu0 %v8289_v0, %s7397_s21  ;;  %v8328_v20 = vpop.permute.xlu1 %1435  ;;  %v8351_v27 = vpop.permute.xlu0 %6601 }
 0x1b4   : > { %11121 = vst [vmem:[#allocation9_spill] sm:$0xff] %v8328_v20  ;;  %11127 = vst [vmem:[#allocation15_spill] sm:$0xff] %v8351_v27 }
 0x1b7   : > { %v8335_v19 = vpop.permute.xlu1 %1445  ;;  %v8361_v63 = vpop.permute.xlu0 %6616 }
 0x1b8   : > { %11123 = vst [vmem:[#allocation11_spill] sm:$0xff] %v8335_v19  ;;  %11128 = vst [vmem:[#allocation16_spill] sm:$0xff] %v8361_v63  ;;  %v7341_v63 = vld [vmem:[#allocation2] sm:$0xff] }
 0x1b9   : > { %v1337_v39 = vsel %vm1336_vm3, %v7341_v63, %v6491_v45 }
 0x1ba   : > { %v7212_v54 = vpop.eup %7211 }
 0x1bb   : > { %v838_v15 = vmul.f32 %v7212_v54, %v8005_v43  ;;  %v8339_v22 = vpop.permute.xlu1 %1455  ;;  %v8377_v4 = vpop.permute.xlu0 %6631 }
 0x1bc   : > { %11125 = vst [vmem:[#allocation13_spill] sm:$0xff] %v8339_v22  ;;  %11129 = vst [vmem:[#allocation17_spill] sm:$0xff] %v8377_v4 }
 0x1bd   : > { %v876_v30 = vmul.f32 %v8066_v16, %v838_v15  ;;  %v1932_v16 = vld [vmem:[#allocation2 + $0x1c0] sm:$0xff] }
 0x1bf   : > { %v914_v23 = vadd.f32 %v8072_v36, %v876_v30  ;;  %v8349_v36 = vpop.permute.xlu1 %6541  ;;  %v8393_v15 = vpop.permute.xlu0 %6636 }
 0x1c0   : > { %11131 = vst [vmem:[#allocation19_spill] sm:$0xff] %v8393_v15  ;;  %v6502_v15 = vunpack.i.h.bf16 %v8032_v56 }
 0x1c1   : > { %1005 = vst.msk [vmem:[#allocation2 + $0x1d4] sm:$0xff] %vm421_vm0, %v914_v23 }
 0x1c3   : > { %v8359_v9 = vpop.permute.xlu1 %6551 }
 0x1c7   : > { %v8375_v62 = vpop.permute.xlu1 %6556 }
 0x1c8   : > { %v1925_v43 = vld [vmem:[#allocation2 + $0x1d0] sm:$0xff]  ;;  %v1933_v40 = vld [vmem:[#allocation2 + $0x1d8] sm:$0xff] }
 0x1c9   : > { %v8343_v53 = vpack.i.bf16 %v1925_v43, %v1924_v5  ;;  %v8353_v46 = vpack.i.bf16 %v1933_v40, %v1932_v16  ;;  %v8411_v43 = vld [vmem:[#allocation2 + $0xa8] sm:$0xff] }
 0x1cb   : > { %6816 = vrot.lane.b32.xlu0 %v8343_v53, %s7393_s26  ;;  %6736 = vrot.lane.b32.xlu1 %v8343_v53, %s7395_s27  ;;  %v8391_v54 = vpop.permute.xlu1 %6576 }
 0x1cc   : > { %11130 = vst [vmem:[#allocation18_spill] sm:$0xff] %v8391_v54 }
 0x1cf   : > { %6826 = vrot.lane.b32.xlu0 %v8353_v46, %s7395_s27  ;;  %6746 = vrot.lane.b32.xlu1 %v8353_v46, %s7396_s28  ;;  %v8403_v30 = vpop.permute.xlu1 %6591 }
 0x1d0   : > { %11132 = vst [vmem:[#allocation20_spill] sm:$0xff] %v8403_v30  ;;  %v8405_v23 = vpop.permute.xlu0 %6651 }
 0x1d1   : > { %v6654_v49 = vunpack.i.h.bf16 %v8405_v23  ;;  %v6653_v29 = vunpack.i.l.bf16 %v8405_v23 }
 0x1d3   : > { %6836 = vrot.lane.b32.xlu0 %v8259_v55, %s7402_s12  ;;  %6751 = vrot.lane.b32.xlu1 %v8159_v28, %s7392_s25  ;;  %v8379_v55 = vld [vmem:[#allocation2 + $0x78] sm:$0xff]  ;;  %v8413_v40 = vpop.permute.xlu1 %6606 }
 0x1d4   : > { %v8389_v32 = vpack.i.bf16 %v8379_v55, %v8385_v48  ;;  %11133 = vst [vmem:[#allocation21_spill] sm:$0xff] %v8413_v40 }
 0x1d7   : > { %6866 = vrot.lane.b32.xlu0 %v8215_v52, %s7392_s25  ;;  %6771 = vrot.lane.b32.xlu1 %v8183_v58, %s7392_s25  ;;  %v8431_v8 = vpop.permute.xlu1 %6611 }
 0x1d8   : > { %11134 = vst [vmem:[#allocation22_spill] sm:$0xff] %v8431_v8  ;;  %v2788_v8 = vld [vmem:[#allocation2 + $0x238] sm:$0xff] }
 0x1db   : > { %6871 = vrot.lane.b32.xlu0 %v8245_v42, %s7401_s30  ;;  %6781 = vrot.lane.b32.xlu1 %v8247_v12, %s7401_s30  ;;  %v8439_v19 = vpop.permute.xlu1 %6621 }
 0x1dc   : > { %11135 = vst [vmem:[#allocation23_spill] sm:$0xff] %v8439_v19 }
 0x1dd   : > { %v6662_v5 = vpop.permute.xlu0 %6661 }
 0x1de   : > { %v6664_v27 = vunpack.i.h.bf16 %v6662_v5  ;;  %v6663_v30 = vunpack.i.l.bf16 %v6662_v5 }
 0x1df   : > { %6881 = vrot.lane.b32.xlu0 %v8271_v2, %s7402_s12  ;;  %6791 = vrot.lane.b32.xlu1 %v8389_v32, %s7398_s22 }
 0x1e3   : > { %6891 = vrot.lane.b32.xlu0 %v8183_v58, %s7391_s24  ;;  %6801 = vrot.lane.b32.xlu1 %v8122_v14, %s7391_s24  ;;  %v8419_v14 = vld [vmem:[#allocation2 + $0x90] sm:$0xff] }
 0x1e4   : > { %v8425_v16 = vpack.i.bf16 %v8411_v43, %v8419_v14 }
 0x1e7   : > { %6906 = vrot.lane.b32.xlu0 %v8247_v12, %s7392_s25  ;;  %6811 = vrot.lane.b32.xlu1 %v8203_v17, %s7392_s25 }
 0x1eb   : > { %6916 = vrot.lane.b32.xlu0 %v8279_v37, %s7402_s12  ;;  %6821 = vrot.lane.b32.xlu1 %v8229_v26, %s7401_s30 }
 0x1ed   : > { %v8421_v58 = vpop.permute.xlu0 %6671 }
 0x1ef   : > { %6926 = vrot.lane.b32.xlu0 %v8138_v3, %s7398_s22  ;;  %6831 = vrot.lane.b32.xlu1 %v8425_v16, %s7398_s22 }
 0x1f1   : > { %v6682_v22 = vpop.permute.xlu0 %6681 }
 0x1f3   : > { %6936 = vrot.lane.b32.xlu0 %v8247_v12, %s7391_s24  ;;  %6841 = vrot.lane.b32.xlu1 %v8161_v10, %s7391_s24  ;;  %v5856_v10 = vld [vmem:[%s11040_s3 + $0x40] sm:$0xff]  ;;  %v8452_v12 = vpop.permute.xlu1 %6626 }
 0x1f4   : > { %11136 = vst [vmem:[#allocation24_spill] sm:$0xff] %v8452_v12  ;;  %6136 = vmatprep.mubr.msk.f32.mxu1 %vm1398_vm2, %v5856_v10  ;;  %v6501_v12 = vunpack.i.l.bf16 %v8032_v56  ;;  %v1338_v10 = vsel %vm1336_vm3, %v8016_v21, %v6492_v44  ;;  %v6683_v56 = vunpack.i.l.bf16 %v6682_v22 }
 0x1f5   : > { %v8437_v50 = vpop.permute.xlu0 %6691 }
 0x1f7   : > { %6946 = vrot.lane.b32.xlu0 %v8289_v0, %s7402_s12  ;;  %6846 = vrot.lane.b32.xlu1 %v8231_v41, %s7392_s25 }
 0x1f9   : > { %v6702_v51 = vpop.permute.xlu0 %6701 }
 0x1fa   : > { %v6704_v21 = vunpack.i.h.bf16 %v6702_v51  ;;  %v6703_v44 = vunpack.i.l.bf16 %v6702_v51 }
 0x1fb   : > { %6956 = vrot.lane.b32.xlu0 %v8138_v3, %s7400_s15  ;;  %6851 = vrot.lane.b32.xlu1 %v8261_v24, %s7401_s30  ;;  %v3588_v3 = vld [vmem:[#allocation2 + $0x70] sm:$0xff] }
 0x1fc   : > { %v6975_v19 = vpack.i.bf16 %v3589_v61, %v3588_v3  ;;  %v1346_v61 = vsel %vm1345_vm4, %v1337_v39, %v6501_v12  ;;  %v1347_v3 = vsel %vm1345_vm4, %v1338_v10, %v6502_v15 }
 0x1fd   : > { %v8454_v20 = vpop.permute.xlu0 %6711  ;;  %v1355_v5 = vsel %vm1354_vm5, %v1346_v61, %v6663_v30 }
 0x1ff   : > { %6966 = vrot.lane.b32.xlu0 %v8203_v17, %s7391_s24  ;;  %6856 = vrot.lane.b32.xlu1 %v8277_v47, %s7402_s12  ;;  %v8468_v17 = vpop.permute.xlu1 %6641  ;;  %v6684_v47 = vunpack.i.h.bf16 %v6682_v22  ;;  %v1363_v22 = vsel %vm421_vm0, %v1355_v5, %v6683_v56  ;;  %v8495_v56 = vld [vmem:[#allocation2 + $0xb0] sm:$0xff] }
 0x201   : > { %v6722_v4 = vpop.permute.xlu0 %6721 }
 0x202   : > { %v6724_v45 = vunpack.i.h.bf16 %v6722_v4  ;;  %v6723_v63 = vunpack.i.l.bf16 %v6722_v4  ;;  %v1372_v4 = vsel %vm1371_vm6, %v1363_v22, %v6703_v44  ;;  %v8499_v44 = vld [vmem:[#allocation2 + $0x98] sm:$0xff] }
 0x203   : > { %6976 = vrot.lane.b32.xlu0 %v6975_v19, %s7398_s22  ;;  %6861 = vrot.lane.b32.xlu1 %v8159_v28, %s7391_s24  ;;  %v1356_v19 = vsel %vm1354_vm5, %v1347_v3, %v6664_v27  ;;  %v8483_v15 = vpop.permute.xlu1 %6646 }
 0x204   : > { %v1364_v51 = vsel %vm421_vm0, %v1356_v19, %v6684_v47 }
 0x205   : > { %v6732_v35 = vpop.permute.xlu0 %6731  ;;  %v1373_v30 = vsel %vm1371_vm6, %v1364_v51, %v6704_v21 }
 0x206   : > { %v6734_v54 = vunpack.i.h.bf16 %v6732_v35  ;;  %v6733_v28 = vunpack.i.l.bf16 %v6732_v35  ;;  %v1382_v10 = vsel %vm1380_vm7, %v1373_v30, %v6724_v45  ;;  %v7005_v45 = vpack.i.bf16 %v8495_v56, %v8499_v44 }
 0x207   : > { %6876 = vrot.lane.b32.xlu1 %v8215_v52, %s7391_s24  ;;  %6986 = vrot.lane.b32.xlu0 %v8229_v26, %s7392_s25  ;;  %v1381_v52 = vsel %vm1380_vm7, %v1372_v4, %v6723_v63  ;;  %v2770_v63 = vld [vmem:[#allocation2 + $0x1f8] sm:$0xff]  ;;  %v3590_v4 = vld [vmem:[#allocation2 + $0xa0] sm:$0xff] }
 0x208   : > { %v1390_v39 = vsel %vm1389_vm8, %v1381_v52, %v6733_v28  ;;  %v1391_v47 = vsel %vm1389_vm8, %v1382_v10, %v6734_v54  ;;  %v2769_v54 = vld [vmem:[#allocation2 + $0x1e0] sm:$0xff]  ;;  %v3628_v52 = vld [vmem:[#allocation2 + $0x1e8] sm:$0xff]  ;;  %v6507_v10 = vunpack.i.h.bf16 %v8041_v31 }
 0x209   : > { %v6742_v27 = vpop.permute.xlu0 %6741  ;;  %v8512_v5 = vpack.i.bf16 %v2770_v63, %v2769_v54  ;;  %v11058_v54 = vmov 3  }
 0x20a   : > { %v6744_v35 = vunpack.i.h.bf16 %v6742_v27  ;;  %v6743_v12 = vunpack.i.l.bf16 %v6742_v27  ;;  %v6497_v27 = vunpack.i.h.bf16 %v8027_v33  ;;  %7137 = vset.pattern.permute.xlu0 %v11058_v54  ;;  %v1875_v54 = vld [vmem:[#allocation2 + $0x20] sm:$0xff] }
 0x20b   : > { %6886 = vrot.lane.b32.xlu1 %v8245_v42, %s7392_s25  ;;  %6996 = vrot.lane.b32.xlu0 %v8343_v53, %s7402_s12  ;;  %v8503_v42 = vpop.permute.xlu1 %6656 }
 0x20c   : > { %v1399_v61 = vsel %vm1398_vm2, %v1390_v39, %v6743_v12  ;;  %v1400_v3 = vsel %vm1398_vm2, %v1391_v47, %v6744_v35  ;;  %v6496_v35 = vunpack.i.l.bf16 %v8027_v33  ;;  %v11060_v12 = vmov 1  }
 0x20d   : > { %v6340_v21 = vpack.c.bf16 %v1400_v3, %v1399_v61  ;;  %v8516_v28 = vpop.permute.xlu0 %6756  ;;  %7130 = vset.pattern.permute.xlu1 %v11060_v12  ;;  %v6506_v39 = vunpack.i.l.bf16 %v8041_v31  ;;  %v7343_v3 = vld [vmem:[#allocation2 + $0x30] sm:$0xff]  ;;  %v6544_v12 = vunpack.i.h.bf16 %v8349_v36 }
 0x20f   : > { %6341 = vmatprep.subr.bf16.mxu0 %v6340_v21  ;;  %6896 = vrot.lane.b32.xlu1 %v8279_v37, %s7397_s21  ;;  %v8514_v19 = vpop.permute.xlu1 %6666 }
 0x210   : > { %7006 = vrot.lane.b32.xlu0 %v7005_v45, %s7398_s22  ;;  %6343 = vmatpush3.bf16.msra.mxu0 %v6340_v21  ;;  %v1339_v21 = vsel %vm1336_vm3, %v7343_v3, %v6496_v35  ;;  %v2772_v3 = vld [vmem:[#allocation2 + $0x228] sm:$0xff] }
 0x211   : > { %v8524_v22 = vpop.permute.xlu0 %6761  ;;  %v8559_v31 = vsel %vm1345_vm4, %v1339_v21, %v6506_v39  ;;  %v2787_v21 = vld [vmem:[#allocation2 + $0x220] sm:$0xff] }
 0x213   : > { %6901 = vrot.lane.b32.xlu1 %v8271_v2, %s7401_s30  ;;  %v8522_v37 = vpop.permute.xlu1 %6676 }
 0x214   : > { %7016 = vrot.lane.b32.xlu0 %v8229_v26, %s7391_s24  ;;  %v3591_v26 = vld [vmem:[#allocation2 + $0xb8] sm:$0xff] }
 0x215   : > { %v8535_v51 = vpop.permute.xlu0 %6766  ;;  %v7055_v30 = vpack.i.bf16 %v3591_v26, %v3590_v4  ;;  %v6644_v4 = vunpack.i.h.bf16 %v8468_v17  ;;  %v2779_v26 = vld [vmem:[#allocation2 + $0x218] sm:$0xff] }
 0x217   : > { %6911 = vrot.lane.b32.xlu1 %v8287_v11, %s7393_s26  ;;  %v8533_v2 = vpop.permute.xlu1 %6686 }
 0x218   : > { %7026 = vrot.lane.b32.xlu0 %v8512_v5, %s7402_s12 }
 0x219   : > { %v8547_v61 = vpop.permute.xlu0 %6776 }
 0x21b   : > { %6921 = vrot.lane.b32.xlu1 %v8389_v32, %s7400_s15  ;;  %v8545_v47 = vpop.permute.xlu1 %6696 }
 0x21c   : > { %7036 = vrot.lane.b32.xlu0 %v7005_v45, %s7400_s15 }
 0x21d   : > { %v8578_v39 = vpop.permute.xlu0 %6786 }
 0x21f   : > { %6931 = vrot.lane.b32.xlu1 %v8269_v6, %s7401_s30 }
 0x220   : > { %7046 = vrot.lane.b32.xlu0 %v8231_v41, %s7391_s24  ;;  %v3629_v41 = vld [vmem:[#allocation2 + $0x200] sm:$0xff] }
 0x221   : > { %v8555_v45 = vpack.i.bf16 %v3629_v41, %v3628_v52  ;;  %v2761_v52 = vld [vmem:[#allocation2 + $0x130] sm:$0xff]  ;;  %v8618_v23 = vpop.permute.xlu0 %6796 }
 0x223   : > { %6941 = vrot.lane.b32.xlu1 %v8287_v11, %s7397_s21  ;;  %v7342_v11 = vld [vmem:[#allocation2 + $0x48] sm:$0xff] }
 0x224   : > { %7056 = vrot.lane.b32.xlu0 %v7055_v30, %s7398_s22  ;;  %v1340_v33 = vsel %vm1336_vm3, %v7342_v11, %v6497_v27  ;;  %v6643_v30 = vunpack.i.l.bf16 %v8468_v17  ;;  %v2762_v11 = vld [vmem:[#allocation2 + $0x148] sm:$0xff]  ;;  %v2780_v17 = vld [vmem:[#allocation2 + $0x230] sm:$0xff] }
 0x225   : > { %v8562_v63 = vsel %vm1345_vm4, %v1340_v33, %v6507_v10  ;;  %v8576_v10 = vpop.permute.xlu1 %6706  ;;  %v2771_v33 = vld [vmem:[#allocation2 + $0x210] sm:$0xff]  ;;  %v8596_v41 = vpack.i.bf16 %v2762_v11, %v2761_v52  ;;  %v6648_v52 = vunpack.i.l.bf16 %v8483_v15 }
 0x226   : > { %v1341_v40 = vsel %vm1336_vm3, %v8385_v48, %v6643_v30  ;;  %v8598_v27 = vpack.i.bf16 %v2772_v3, %v2771_v33  ;;  %v8605_v48 = vsel %vm1336_vm3, %v6544_v12, %v1875_v54  ;;  %v6649_v30 = vunpack.i.h.bf16 %v8483_v15 }
 0x227   : > { %6951 = vrot.lane.b32.xlu1 %v8389_v32, %s7399_s29  ;;  %v6543_v32 = vunpack.i.l.bf16 %v8349_v36  ;;  %v1342_v36 = vsel %vm1336_vm3, %v8379_v55, %v6644_v4  ;;  %v8610_v4 = vpack.i.bf16 %v2780_v17, %v2779_v26  ;;  %v1350_v11 = vsel %vm1345_vm4, %v1341_v40, %v6653_v29 }
 0x228   : > { %7066 = vrot.lane.b32.xlu0 %v8261_v24, %s7392_s25  ;;  %v1351_v33 = vsel %vm1345_vm4, %v1342_v36, %v6654_v49  ;;  %v6659_v12 = vunpack.i.h.bf16 %v8503_v42  ;;  %v6658_v54 = vunpack.i.l.bf16 %v8503_v42  ;;  %v6679_v29 = vunpack.i.h.bf16 %v8522_v37 }
 0x229   : > { %v6717_v3 = vpop.permute.xlu1 %6716  ;;  %v6678_v49 = vunpack.i.l.bf16 %v8522_v37  ;;  %v6694_v40 = vunpack.i.h.bf16 %v8437_v50  ;;  %v6693_v15 = vunpack.i.l.bf16 %v8437_v50  ;;  %v6698_v26 = vunpack.i.l.bf16 %v8545_v47 }
 0x22a   : > { %v6714_v42 = vunpack.i.h.bf16 %v8454_v20  ;;  %v1344_v17 = vsel %vm1336_vm3, %v8411_v43, %v6649_v30  ;;  %v6718_v37 = vunpack.i.l.bf16 %v6717_v3 }
 0x22b   : > { %6961 = vrot.lane.b32.xlu1 %v8269_v6, %s7392_s25  ;;  %v1874_v6 = vld [vmem:[#allocation2 + $0x8] sm:$0xff]  ;;  %v1353_v36 = vsel %vm1345_vm4, %v1344_v17, %v6659_v12 }
 0x22c   : > { %7076 = vrot.lane.b32.xlu0 %v8555_v45, %s7402_s12  ;;  %v8608_v55 = vsel %vm1336_vm3, %v6543_v32, %v1874_v6  ;;  %v6673_v32 = vunpack.i.l.bf16 %v8421_v58  ;;  %v6713_v6 = vunpack.i.l.bf16 %v8454_v20  ;;  %v1362_v20 = vsel %vm1354_vm5, %v1353_v36, %v6679_v29 }
 0x22f   : > { %6971 = vrot.lane.b32.xlu1 %v8343_v53, %s7397_s21  ;;  %v6548_v53 = vunpack.i.l.bf16 %v8307_v59 }
 0x230   : > { %7086 = vrot.lane.b32.xlu0 %v8261_v24, %s7391_s24  ;;  %v8612_v24 = vpack.i.bf16 %v2788_v8, %v2787_v21  ;;  %v6674_v8 = vunpack.i.h.bf16 %v8421_v58  ;;  %v1343_v58 = vsel %vm1336_vm3, %v8419_v14, %v6648_v52  ;;  %v6719_v21 = vunpack.i.h.bf16 %v6717_v3  ;;  %v6727_v52 = vpop.permute.xlu1 %6726  ;;  %v8652_v3 = vpop.permute.xlu0 %6806 }
 0x231   : > { %v1352_v50 = vsel %vm1345_vm4, %v1343_v58, %v6658_v54  ;;  %v11137_v58 = vunpack.i.l.bf16 %v8043_v13 }
 0x232   : > { %v1360_v35 = vsel %vm1354_vm5, %v1351_v33, %v6674_v8  ;;  %v1361_v43 = vsel %vm1354_vm5, %v1352_v50, %v6678_v49  ;;  %v6669_v8 = vunpack.i.h.bf16 %v8514_v19  ;;  %v11139_v50 = vunpack.i.l.bf16 %v8050_v25 }
 0x233   : > { %6981 = vrot.lane.b32.xlu1 %v8289_v0, %s7401_s30  ;;  %v6699_v0 = vunpack.i.h.bf16 %v8545_v47  ;;  %v1359_v47 = vsel %vm1354_vm5, %v1350_v11, %v6673_v32  ;;  %v1368_v30 = vsel %vm421_vm0, %v1360_v35, %v6694_v40  ;;  %v1369_v12 = vsel %vm421_vm0, %v1361_v43, %v6698_v26 }
 0x234   : > { %7096 = vrot.lane.b32.xlu0 %v8598_v27, %s7402_s12  ;;  %v1367_v14 = vsel %vm421_vm0, %v1359_v47, %v6693_v15  ;;  %v1377_v54 = vsel %vm1371_vm6, %v1368_v30, %v6714_v42  ;;  %v6668_v32 = vunpack.i.l.bf16 %v8514_v19  ;;  %v1378_v29 = vsel %vm1371_vm6, %v1369_v12, %v6718_v37 }
 0x235   : > { %v1370_v11 = vsel %vm421_vm0, %v1362_v20, %v6699_v0  ;;  %v1376_v33 = vsel %vm1371_vm6, %v1367_v14, %v6713_v6  ;;  %v6554_v35 = vunpack.i.h.bf16 %v8359_v9  ;;  %v6553_v40 = vunpack.i.l.bf16 %v8359_v9 }
 0x236   : > { %v1379_v49 = vsel %vm1371_vm6, %v1370_v11, %v6719_v21  ;;  %v6689_v15 = vunpack.i.h.bf16 %v8533_v2  ;;  %v6688_v0 = vunpack.i.l.bf16 %v8533_v2  ;;  %v6709_v19 = vunpack.i.h.bf16 %v8576_v10 }
 0x237   : > { %6991 = vrot.lane.b32.xlu1 %v8353_v46, %s7393_s26  ;;  %v6708_v26 = vunpack.i.l.bf16 %v8576_v10  ;;  %v1385_v17 = vsel %vm1380_vm7, %v1376_v33, %v11137_v58  ;;  %v11138_v9 = vunpack.i.h.bf16 %v8043_v13  ;;  %v6729_v37 = vunpack.i.h.bf16 %v6727_v52 }
 0x238   : > { %7106 = vrot.lane.b32.xlu0 %v8610_v4, %s7397_s21  ;;  %v6728_v2 = vunpack.i.l.bf16 %v6727_v52  ;;  %v1387_v36 = vsel %vm1380_vm7, %v1378_v29, %v11139_v50  ;;  %v11140_v47 = vunpack.i.h.bf16 %v8050_v25  ;;  %v1358_v20 = vsel %vm1354_vm5, %v8562_v63, %v6669_v8 }
 0x239   : > { %v1386_v21 = vsel %vm1380_vm7, %v1377_v54, %v11138_v9  ;;  %v1357_v43 = vsel %vm1354_vm5, %v8559_v31, %v6668_v32  ;;  %v1366_v30 = vsel %vm421_vm0, %v1358_v20, %v6689_v15  ;;  %v11141_v12 = vunpack.i.l.bf16 %v8223_v34 }
 0x23a   : > { %v1388_v10 = vsel %vm1380_vm7, %v1379_v49, %v11140_v47  ;;  %v1365_v52 = vsel %vm421_vm0, %v1357_v43, %v6688_v0  ;;  %v11142_v11 = vunpack.i.h.bf16 %v8223_v34  ;;  %v1375_v33 = vsel %vm1371_vm6, %v1366_v30, %v6709_v19  ;;  %v8717_v19 = vld [vmem:[%s11041_s4 + $0x38] sm:$0xff] }
 0x23b   : > { %7001 = vrot.lane.b32.xlu1 %v8425_v16, %s7400_s15  ;;  %v1394_v25 = vsel %vm1389_vm8, %v1385_v17, %v11141_v12  ;;  %v1374_v31 = vsel %vm1371_vm6, %v1365_v52, %v6708_v26  ;;  %v11143_v32 = vunpack.i.l.bf16 %v8303_v18  ;;  %v11144_v49 = vunpack.i.h.bf16 %v8303_v18 }
 0x23c   : > { %7116 = vrot.lane.b32.xlu0 %v8612_v24, %s7393_s26  ;;  %v1395_v63 = vsel %vm1389_vm8, %v1386_v21, %v11142_v11  ;;  %v1384_v15 = vsel %vm1380_vm7, %v1375_v33, %v6729_v37  ;;  %v1383_v0 = vsel %vm1380_vm7, %v1374_v31, %v6728_v2  ;;  %v6558_v26 = vunpack.i.l.bf16 %v8375_v62 }
 0x23d   : > { %v6737_v42 = vpop.permute.xlu1 %6736  ;;  %v8672_v6 = vpop.permute.xlu0 %6816  ;;  %v1396_v29 = vsel %vm1389_vm8, %v1387_v36, %v11143_v32  ;;  %v1397_v34 = vsel %vm1389_vm8, %v1388_v10, %v11144_v49  ;;  %v2202_v18 = vsel %vm1345_vm4, %v8608_v55, %v6548_v53  ;;  %v11145_v37 = vunpack.i.l.bf16 %v8249_v57  ;;  %v7344_v36 = vld [vmem:[#allocation2 + $0x38] sm:$0xff] }
 0x23e   : > { %v6739_v14 = vunpack.i.h.bf16 %v6737_v42  ;;  %v6738_v13 = vunpack.i.l.bf16 %v6737_v42  ;;  %v11146_v50 = vunpack.i.h.bf16 %v8249_v57  ;;  %v2196_v53 = vsel %vm1336_vm3, %v6553_v40, %v7344_v36  ;;  %v7345_v57 = vld [vmem:[#allocation2 + $0x50] sm:$0xff] }
 0x23f   : > { %7011 = vrot.lane.b32.xlu1 %v8596_v41, %s7401_s30  ;;  %v1403_v2 = vsel %vm1398_vm2, %v1394_v25, %v11145_v37  ;;  %v11147_v20 = vunpack.i.l.bf16 %v8309_v7  ;;  %v2197_v30 = vsel %vm1336_vm3, %v6554_v35, %v7345_v57  ;;  %v11149_v25 = vunpack.i.h.bf16 %v8307_v59  ;;  %v2786_v57 = vld [vmem:[#allocation2 + $0x208] sm:$0xff] }
 0x240   : > { %7126 = vrot.lane.b32.xlu0 %v8612_v24, %s7397_s21  ;;  %v1392_v58 = vsel %vm1389_vm8, %v1383_v0, %v6738_v13  ;;  %v1393_v17 = vsel %vm1389_vm8, %v1384_v15, %v6739_v14  ;;  %v11148_v14 = vunpack.i.h.bf16 %v8309_v7  ;;  %v6559_v11 = vunpack.i.h.bf16 %v8375_v62  ;;  %v8762_v62 = vld [vmem:[%s11041_s4] sm:$0xff] }
 0x241   : > { %v6747_v54 = vpop.permute.xlu1 %6746  ;;  %v8704_v8 = vpop.permute.xlu0 %6826  ;;  %v1405_v43 = vsel %vm1398_vm2, %v1396_v29, %v11147_v20  ;;  %v2203_v40 = vsel %vm1345_vm4, %v8605_v48, %v11149_v25  ;;  %v6758_v31 = vunpack.i.l.bf16 %v8516_v28  ;;  %v2204_v35 = vsel %vm1345_vm4, %v2196_v53, %v6558_v26 }
 0x242   : > { %v6749_v24 = vunpack.i.h.bf16 %v6747_v54  ;;  %v6748_v42 = vunpack.i.l.bf16 %v6747_v54  ;;  %v1406_v13 = vsel %vm1398_vm2, %v1397_v34, %v11148_v14  ;;  %v6763_v48 = vunpack.i.l.bf16 %v8524_v22 }
 0x243   : > { %7021 = vrot.lane.b32.xlu1 %v8353_v46, %s7397_s21  ;;  %v1404_v46 = vsel %vm1398_vm2, %v1395_v63, %v11146_v50  ;;  %v6759_v63 = vunpack.i.h.bf16 %v8516_v28  ;;  %v6352_v54 = vpack.c.bf16 %v1406_v13, %v1405_v43  ;;  %v6764_v28 = vunpack.i.h.bf16 %v8524_v22  ;;  %v8791_v50 = vld [vmem:[%s11041_s4 + $0x20] sm:$0xff]  ;;  %v2785_v13 = vld [vmem:[#allocation2 + $0x1f0] sm:$0xff] }
 0x244   : > { %v1401_v9 = vsel %vm1398_vm2, %v1392_v58, %v6748_v42  ;;  %v1402_v21 = vsel %vm1398_vm2, %v1393_v17, %v6749_v24  ;;  %4014 = vperm.xlu0 %7137, %v8717_v19   ;;  %v6348_v7 = vpack.c.bf16 %v1404_v46, %v1403_v2  ;;  %v6769_v34 = vunpack.i.h.bf16 %v8535_v51 }
 0x245   : > { %v6752_v55 = vpop.permute.xlu1 %6751  ;;  %v8738_v47 = vpop.permute.xlu0 %6836  ;;  %v6344_v10 = vpack.c.bf16 %v1402_v21, %v1401_v9  ;;  %v6768_v15 = vunpack.i.l.bf16 %v8535_v51  ;;  %v6779_v0 = vunpack.i.h.bf16 %v8547_v61  ;;  %v6778_v24 = vunpack.i.l.bf16 %v8547_v61 }
 0x246   : > { %v6754_v52 = vunpack.i.h.bf16 %v6752_v55  ;;  %v6753_v12 = vunpack.i.l.bf16 %v6752_v55  ;;  %v2205_v58 = vsel %vm1345_vm4, %v2197_v30, %v6559_v11  ;;  %v6789_v9 = vunpack.i.h.bf16 %v8578_v39 }
 0x247   : > { %7031 = vrot.lane.b32.xlu1 %v8425_v16, %s7399_s29  ;;  %6345 = vmatprep.subr.bf16.mxu0 %v6344_v10  ;;  %v6788_v61 = vunpack.i.l.bf16 %v8578_v39  ;;  %v7405_v46 = vmov 2   ;;  %v6799_v36 = vunpack.i.h.bf16 %v8618_v23  ;;  %v6798_v39 = vunpack.i.l.bf16 %v8618_v23 }
 0x248   : > { %v2210_v33 = vsel %vm1354_vm5, %v2202_v18, %v6753_v12  ;;  %v2211_v59 = vsel %vm1354_vm5, %v2203_v40, %v6754_v52  ;;  %6347 = vmatpush3.bf16.msra.mxu0 %v6344_v10  ;;  %3979 = vperm.xlu0 %7137, %v8762_v62   ;;  %v6809_v12 = vunpack.i.h.bf16 %v8652_v3  ;;  %v6808_v25 = vunpack.i.l.bf16 %v8652_v3 }
 0x249   : > { %v2218_v16 = vsel %vm421_vm0, %v2210_v33, %v6758_v31  ;;  %v2219_v32 = vsel %vm421_vm0, %v2211_v59, %v6759_v63  ;;  %v6772_v29 = vpop.permute.xlu1 %6771  ;;  %v8768_v49 = vpop.permute.xlu0 %6866  ;;  %6349 = vmatprep.subr.bf16.mxu0 %v6348_v7  ;;  %v1408_v31 = vld [vmem:[%s11040_s3 + $0x8] sm:$0xff]  ;;  %v6818_v3 = vunpack.i.l.bf16 %v8672_v6  ;;  %v1409_v33 = vld [vmem:[%s11040_s3 + $0x10] sm:$0xff]  ;;  %v7070_v59 = vpack.i.bf16 %v2786_v57, %v2785_v13  ;;  %v1414_v57 = vld [vmem:[%s11040_s3 + $0x38] sm:$0xff] }
 0x24a   : > { %v6774_v42 = vunpack.i.h.bf16 %v6772_v29  ;;  %v6773_v22 = vunpack.i.l.bf16 %v6772_v29  ;;  %v2226_v26 = vsel %vm1371_vm6, %v2218_v16, %v6763_v48  ;;  %v2227_v18 = vsel %vm1371_vm6, %v2219_v32, %v6764_v28 }
 0x24b   : > { %7041 = vrot.lane.b32.xlu1 %v8596_v41, %s7392_s25  ;;  %v2234_v17 = vsel %vm1380_vm7, %v2226_v26, %v6768_v15  ;;  %v2235_v51 = vsel %vm1380_vm7, %v2227_v18, %v6769_v34  ;;  %v6828_v28 = vunpack.i.l.bf16 %v8704_v8  ;;  %v2763_v26 = vld [vmem:[#allocation2 + $0x160] sm:$0xff] }
 0x24c   : > { %6351 = vmatpush3.bf16.msra.mxu0 %v6348_v7  ;;  %v2242_v41 = vsel %vm1389_vm8, %v2234_v17, %v6778_v24  ;;  %v2243_v2 = vsel %vm1389_vm8, %v2235_v51, %v6779_v0  ;;  %7140 = vset.pattern.permute.xlu0 %v7405_v46  ;;  %v2213_v10 = vsel %vm1354_vm5, %v2205_v58, %v6774_v42  ;;  %v8817_v7 = vld [vmem:[%s11041_s4 + $0x28] sm:$0xff]  ;;  %v1411_v24 = vld [vmem:[%s11040_s3 + $0x20] sm:$0xff]  ;;  %v2764_v42 = vld [vmem:[#allocation2 + $0x178] sm:$0xff] }
 0x24d   : > { %v6782_v21 = vpop.permute.xlu1 %6781  ;;  %v8784_v37 = vpop.permute.xlu0 %6871  ;;  %6353 = vmatprep.subr.bf16.mxu0 %v6352_v54  ;;  %3148 = vperm.xlu0 %7140, %v8791_v50   ;;  %v2212_v20 = vsel %vm1354_vm5, %v2204_v35, %v6773_v22  ;;  %v2250_v43 = vsel %vm1398_vm2, %v2242_v41, %v6788_v61  ;;  %v2251_v14 = vsel %vm1398_vm2, %v2243_v2, %v6789_v9  ;;  %v6819_v35 = vunpack.i.h.bf16 %v8672_v6  ;;  %v8845_v0 = vld [vmem:[%s11041_s4 + $0x8] sm:$0xff]  ;;  %v1413_v2 = vld [vmem:[%s11040_s3 + $0x30] sm:$0xff] }
 0x24e   : > { %v6784_v53 = vunpack.i.h.bf16 %v6782_v21  ;;  %v6783_v55 = vunpack.i.l.bf16 %v6782_v21  ;;  %v6356_v52 = vpack.c.bf16 %v2251_v14, %v2250_v43  ;;  %v7080_v9 = vpack.i.bf16 %v2764_v42, %v2763_v26  ;;  %v1412_v61 = vld [vmem:[%s11040_s3 + $0x28] sm:$0xff] }
 0x24f   : > { %7051 = vrot.lane.b32.xlu1 %v8555_v45, %s7397_s21 }
 0x250   : > { %v2220_v30 = vsel %vm421_vm0, %v2212_v20, %v6783_v55  ;;  %v2221_v23 = vsel %vm421_vm0, %v2213_v10, %v6784_v53  ;;  %6355 = vmatpush3.bf16.msra.mxu0 %v6352_v54  ;;  %6357 = vmatprep.subr.bf16.mxu1 %v6356_v52  ;;  %v6829_v54 = vunpack.i.h.bf16 %v8704_v8  ;;  %v1410_v8 = vld [vmem:[%s11040_s3 + $0x18] sm:$0xff]  ;;  %v1878_v53 = vld [vmem:[#allocation2 + $0x68] sm:$0xff]  ;;  %v1879_v55 = vld [vmem:[#allocation2 + $0x80] sm:$0xff] }
 0x251   : > { %v2228_v40 = vsel %vm1371_vm6, %v2220_v30, %v6798_v39  ;;  %v2229_v45 = vsel %vm1371_vm6, %v2221_v23, %v6799_v36  ;;  %v6792_v11 = vpop.permute.xlu1 %6791  ;;  %v8809_v63 = vpop.permute.xlu0 %6881  ;;  %3153 = vperm.xlu0 %7140, %v8817_v7   ;;  %6359 = vmatpush3.bf16.msra.mxu1 %v6356_v52  ;;  %v8867_v10 = vld [vmem:[%s11041_s4 + $0x10] sm:$0xff] }
 0x252   : > { %v2236_v48 = vsel %vm1380_vm7, %v2228_v40, %v6808_v25  ;;  %v2237_v6 = vsel %vm1380_vm7, %v2229_v45, %v6809_v12  ;;  %v6794_v18 = vunpack.i.h.bf16 %v6792_v11  ;;  %v6793_v58 = vunpack.i.l.bf16 %v6792_v11  ;;  %v5872_v25 = vld [vmem:[%s11040_s3 + $0x80] sm:$0xff] }
 0x253   : > { %7061 = vrot.lane.b32.xlu1 %v8512_v5, %s7401_s30  ;;  %6109 = vmatmul.mubr.msk.f32.vlgmr.msra.gmra.mrb[0].mxu0 %vm1398_vm2, %v1408_v31  ;;  %v2244_v16 = vsel %vm1389_vm8, %v2236_v48, %v6818_v3  ;;  %v2245_v32 = vsel %vm1389_vm8, %v2237_v6, %v6819_v35  ;;  %v6839_v40 = vunpack.i.h.bf16 %v8738_v47  ;;  %v6838_v45 = vunpack.i.l.bf16 %v8738_v47 }
 0x254   : > { %6111 = vmatprep.mubr.msk.f32.mxu0 %vm1398_vm2, %v1409_v33  ;;  %v2252_v5 = vsel %vm1398_vm2, %v2244_v16, %v6828_v28  ;;  %v2253_v15 = vsel %vm1398_vm2, %v2245_v32, %v6829_v54  ;;  %v2199_v20 = vsel %vm1336_vm3, %v6794_v18, %v1879_v55  ;;  %v2198_v43 = vsel %vm1336_vm3, %v6793_v58, %v1878_v53  ;;  %v8924_v58 = vld [vmem:[%s11041_s4 + $0x18] sm:$0xff] }
 0x255   : > { %v6802_v29 = vpop.permute.xlu1 %6801  ;;  %v8834_v34 = vpop.permute.xlu0 %6891  ;;  %3133 = vperm.xlu0 %7140, %v8845_v0   ;;  %v6360_v22 = vpack.c.bf16 %v2253_v15, %v2252_v5  ;;  %v6564_v33 = vunpack.i.h.bf16 %v8313_v60  ;;  %v6563_v54 = vunpack.i.l.bf16 %v8313_v60  ;;  %v11150_v16 = vmov 1  }
 0x256   : > { %v6804_v21 = vunpack.i.h.bf16 %v6802_v29  ;;  %v6803_v41 = vunpack.i.l.bf16 %v6802_v29  ;;  %v6569_v32 = vunpack.i.h.bf16 %v8317_v38  ;;  %v6568_v60 = vunpack.i.l.bf16 %v8317_v38 }
 0x257   : > { %7071 = vrot.lane.b32.xlu1 %v7070_v59, %s7393_s26  ;;  %6112 = vmatmul.mubr.msk.f32.gmra.mrb[2].mxu0 %vm1398_vm2, %v1410_v8  ;;  %v6574_v29 = vunpack.i.h.bf16 %v8325_v1  ;;  %v6573_v8 = vunpack.i.l.bf16 %v8325_v1  ;;  %v11151_v55 = vmov 3  }
 0x258   : > { %6361 = vmatprep.subr.bf16.mxu1 %v6360_v22  ;;  %6114 = vmatprep.mubr.msk.f32.mxu0 %vm1398_vm2, %v1411_v24  ;;  %v2206_v30 = vsel %vm1345_vm4, %v2198_v43, %v6803_v41  ;;  %v2207_v23 = vsel %vm1345_vm4, %v2199_v20, %v6804_v21 }
 0x259   : > { %v6812_v17 = vpop.permute.xlu1 %6811  ;;  %v8853_v51 = vpop.permute.xlu0 %6906  ;;  %6363 = vmatpush3.bf16.msra.mxu1 %v6360_v22  ;;  %3138 = vperm.xlu0 %7140, %v8867_v10  }
 0x25a   : > { %v6814_v36 = vunpack.i.h.bf16 %v6812_v17  ;;  %v6813_v39 = vunpack.i.l.bf16 %v6812_v17 }
 0x25b   : > { %7081 = vrot.lane.b32.xlu1 %v7080_v9, %s7401_s30  ;;  %6115 = vmatmul.mubr.msk.f32.gmra.mrb[4].mxu0 %vm1398_vm2, %v1412_v61 }
 0x25c   : > { %6117 = vmatprep.mubr.msk.f32.mxu0 %vm1398_vm2, %v1413_v2  ;;  %v2214_v11 = vsel %vm1354_vm5, %v2206_v30, %v6813_v39  ;;  %v2215_v31 = vsel %vm1354_vm5, %v2207_v23, %v6814_v36 }
 0x25d   : > { %v6822_v14 = vpop.permute.xlu1 %6821  ;;  %v8871_v13 = vpop.permute.xlu0 %6916  ;;  %7144 = vset.pattern.permute.xlu0 %v11150_v16 }
 0x25e   : > { %v6824_v52 = vunpack.i.h.bf16 %v6822_v14  ;;  %v6823_v12 = vunpack.i.l.bf16 %v6822_v14 }
 0x25f   : > { %7091 = vrot.lane.b32.xlu1 %v7070_v59, %s7397_s21  ;;  %6118 = vmatmul.mubr.msk.f32.gmra.mrb[6].mxu0 %vm1398_vm2, %v1414_v57  ;;  %v8900_v59 = vld [vmem:[%s11041_s4 + $0x30] sm:$0xff] }
 0x260   : > { %v2222_v35 = vsel %vm421_vm0, %v2214_v11, %v6823_v12  ;;  %v2223_v3 = vsel %vm421_vm0, %v2215_v31, %v6824_v52  ;;  %6164 = vmatprep.mubr.msk.f32.mxu0 %vm1398_vm2, %v5872_v25  ;;  %2307 = vperm.xlu0 %7144, %v8900_v59   ;;  %v11152_v11 = vld [vmem:[#allocation14_spill] sm:$0xff] }
 0x261   : > { %v2230_v28 = vsel %vm1371_vm6, %v2222_v35, %v6838_v45  ;;  %v2231_v47 = vsel %vm1371_vm6, %v2223_v3, %v6839_v40  ;;  %v6832_v48 = vpop.permute.xlu1 %6831  ;;  %v8895_v6 = vpop.permute.xlu0 %6926  ;;  %v6599_v31 = vunpack.i.h.bf16 %v11152_v11 }
 0x262   : > { %v2238_v5 = vsel %vm1380_vm7, %v2230_v28, %v6563_v54  ;;  %v2239_v15 = vsel %vm1380_vm7, %v2231_v47, %v6564_v33  ;;  %v6834_v61 = vunpack.i.h.bf16 %v6832_v48  ;;  %v6833_v21 = vunpack.i.l.bf16 %v6832_v48  ;;  %v11153_v54 = vld [vmem:[#allocation21_spill] sm:$0xff] }
 0x263   : > { %7101 = vrot.lane.b32.xlu1 %v7080_v9, %s7392_s25  ;;  %v2246_v24 = vsel %vm1389_vm8, %v2238_v5, %v6568_v60  ;;  %v2247_v42 = vsel %vm1389_vm8, %v2239_v15, %v6569_v32  ;;  %v6609_v28 = vunpack.i.h.bf16 %v11153_v54  ;;  %v6608_v47 = vunpack.i.l.bf16 %v11153_v54  ;;  %v5861_v54 = vld [vmem:[%s11040_s3 + $0x68] sm:$0xff] }
 0x264   : > { %v2254_v38 = vsel %vm1398_vm2, %v2246_v24, %v6573_v8  ;;  %v2255_v18 = vsel %vm1398_vm2, %v2247_v42, %v6574_v29  ;;  %2312 = vperm.xlu0 %7144, %v8717_v19   ;;  %v2201_v14 = vsel %vm1336_vm3, %v6834_v61, %v8495_v56  ;;  %v6598_v56 = vunpack.i.l.bf16 %v11152_v11  ;;  %v11154_v29 = vld [vmem:[#allocation22_spill] sm:$0xff] }
 0x265   : > { %v6842_v22 = vpop.permute.xlu1 %6841  ;;  %v8914_v26 = vpop.permute.xlu0 %6936  ;;  %v6364_v1 = vpack.c.bf16 %v2255_v18, %v2254_v38  ;;  %v6614_v8 = vunpack.i.h.bf16 %v11154_v29  ;;  %v6613_v5 = vunpack.i.l.bf16 %v11154_v29  ;;  %v11155_v42 = vld [vmem:[#allocation10_spill] sm:$0xff] }
 0x266   : > { %v6844_v41 = vunpack.i.h.bf16 %v6842_v22 }
 0x267   : > { %7111 = vrot.lane.b32.xlu1 %v8598_v27, %s7401_s30  ;;  %6365 = vmatprep.subr.bf16.mxu1 %v6364_v1  ;;  %v6843_v27 = vunpack.i.l.bf16 %v6842_v22  ;;  %v6584_v22 = vunpack.i.h.bf16 %v11155_v42 }
 0x268   : > { %6367 = vmatpush3.bf16.msra.mxu1 %v6364_v1  ;;  %2292 = vperm.xlu0 %7144, %v8924_v58   ;;  %v2209_v30 = vsel %vm1345_vm4, %v2201_v14, %v6844_v41  ;;  %v6583_v1 = vunpack.i.l.bf16 %v11155_v42 }
 0x269   : > { %v6847_v17 = vpop.permute.xlu1 %6846  ;;  %v8926_v9 = vpop.permute.xlu0 %6946 }
 0x26a   : > { %v6849_v39 = vunpack.i.h.bf16 %v6847_v17  ;;  %v6848_v53 = vunpack.i.l.bf16 %v6847_v17  ;;  %v11156_v17 = vld [vmem:[#allocation18_spill] sm:$0xff] }
 0x26b   : > { %7121 = vrot.lane.b32.xlu1 %v8610_v4, %s7402_s12  ;;  %v2200_v4 = vsel %vm1336_vm3, %v6833_v21, %v8499_v44  ;;  %v6579_v61 = vunpack.i.h.bf16 %v11156_v17  ;;  %v6578_v21 = vunpack.i.l.bf16 %v11156_v17  ;;  %v11159_v17 = vld [vmem:[#allocation15_spill] sm:$0xff]  ;;  %s7407_s12 = smov 96  }
 0x26c   : > { %7148 = vset.pattern.permute.xlu0 %v11151_v55  ;;  %v2208_v57 = vsel %vm1345_vm4, %v2200_v4, %v6843_v27  ;;  %v2217_v12 = vsel %vm1354_vm5, %v2209_v30, %v6849_v39  ;;  %v5858_v30 = vld [vmem:[%s11040_s3 + $0x50] sm:$0xff] }
 0x26d   : > { %v6852_v2 = vpop.permute.xlu1 %6851  ;;  %v8931_v36 = vpop.permute.xlu0 %6956  ;;  %v2216_v52 = vsel %vm1354_vm5, %v2208_v57, %v6848_v53  ;;  %v3045_v39 = vsel %vm1336_vm3, %v6578_v21, %v6583_v1  ;;  %v3046_v53 = vsel %vm1336_vm3, %v6579_v61, %v6584_v22  ;;  %v5863_v1 = vld [vmem:[%s11040_s3 + $0x78] sm:$0xff]  ;;  %v6604_v61 = vunpack.i.h.bf16 %v11159_v17 }
 0x26e   : > { %v6854_v20 = vunpack.i.h.bf16 %v6852_v2  ;;  %v6853_v43 = vunpack.i.l.bf16 %v6852_v2  ;;  %v5857_v2 = vld [vmem:[%s11040_s3 + $0x48] sm:$0xff]  ;;  %v6603_v21 = vunpack.i.l.bf16 %v11159_v17 }
 0x26f   : > { %2297 = vperm.xlu1 %7130, %v8791_v50  }
 0x270   : > { %v2224_v35 = vsel %vm421_vm0, %v2216_v52, %v6853_v43  ;;  %v2225_v44 = vsel %vm421_vm0, %v2217_v12, %v6854_v20  ;;  %v2733_v20 = vld [vmem:[#allocation2 + $0x10] sm:$0xff]  ;;  %v2734_v43 = vld [vmem:[#allocation2 + $0x28] sm:$0xff] }
 0x271   : > { %v6857_v23 = vpop.permute.xlu1 %6856  ;;  %v8943_v45 = vpop.permute.xlu0 %6966  ;;  %v3053_v52 = vsel %vm1345_vm4, %v3045_v39, %v2733_v20  ;;  %v3054_v12 = vsel %vm1345_vm4, %v3046_v53, %v2734_v43 }
 0x272   : > { %v6859_v25 = vunpack.i.h.bf16 %v6857_v23  ;;  %v6858_v40 = vunpack.i.l.bf16 %v6857_v23 }
 0x273   : > { %7131 = vset.pattern.permute.xlu1 %v11151_v55 }
 0x274   : > { %v2232_v3 = vsel %vm1371_vm6, %v2224_v35, %v6858_v40  ;;  %v2233_v33 = vsel %vm1371_vm6, %v2225_v44, %v6859_v25  ;;  %3999 = vperm.xlu1 %7131, %v8791_v50   ;;  %v5859_v25 = vld [vmem:[%s11040_s3 + $0x58] sm:$0xff]  ;;  %v6868_v35 = vunpack.i.l.bf16 %v8768_v49 }
 0x275   : > { %v6862_v48 = vpop.permute.xlu1 %6861  ;;  %v2240_v32 = vsel %vm1380_vm7, %v2232_v3, %v6598_v56  ;;  %v2241_v60 = vsel %vm1380_vm7, %v2233_v33, %v6599_v31  ;;  %v8962_v50 = vpop.permute.xlu0 %6976  ;;  %v6869_v56 = vunpack.i.h.bf16 %v8768_v49  ;;  %v6874_v49 = vunpack.i.h.bf16 %v8784_v37 }
 0x276   : > { %v2248_v15 = vsel %vm1389_vm8, %v2240_v32, %v6608_v47  ;;  %v2249_v24 = vsel %vm1389_vm8, %v2241_v60, %v6609_v28  ;;  %v6864_v14 = vunpack.i.h.bf16 %v6862_v48  ;;  %v6863_v4 = vunpack.i.l.bf16 %v6862_v48  ;;  %v5862_v48 = vld [vmem:[%s11040_s3 + $0x70] sm:$0xff]  ;;  %v11157_v32 = vld [vmem:[#allocation12_spill] sm:$0xff] }
 0x277   : > { %v2256_v38 = vsel %vm1398_vm2, %v2248_v15, %v6613_v5  ;;  %v2257_v18 = vsel %vm1398_vm2, %v2249_v24, %v6614_v8  ;;  %v6873_v28 = vunpack.i.l.bf16 %v8784_v37  ;;  %v6589_v60 = vunpack.i.h.bf16 %v11157_v32  ;;  %v11158_v8 = vld [vmem:[#allocation20_spill] sm:$0xff] }
 0x278   : > { %7132 = vset.pattern.permute.xlu1 %v11150_v16  ;;  %v6368_v27 = vpack.c.bf16 %v2257_v18, %v2256_v38  ;;  %v3061_v40 = vsel %vm1354_vm5, %v3053_v52, %v6863_v4  ;;  %v3062_v11 = vsel %vm1354_vm5, %v3054_v12, %v6864_v14  ;;  %v6588_v29 = vunpack.i.l.bf16 %v11157_v32 }
 0x279   : > { %v8970_v41 = vpop.permute.xlu1 %6876  ;;  %2302 = vperm.xlu1 %7132, %v8817_v7   ;;  %v8984_v23 = vpop.permute.xlu0 %6986  ;;  %v3069_v44 = vsel %vm421_vm0, %v3061_v40, %v6868_v35  ;;  %v3070_v3 = vsel %vm421_vm0, %v3062_v11, %v6869_v56  ;;  %v6594_v5 = vunpack.i.h.bf16 %v11158_v8  ;;  %v6593_v15 = vunpack.i.l.bf16 %v11158_v8 }
 0x27a   : > { %6369 = vmatprep.subr.bf16.mxu1 %v6368_v27  ;;  %v3077_v37 = vsel %vm1371_vm6, %v3069_v44, %v6873_v28  ;;  %v3078_v22 = vsel %vm1371_vm6, %v3070_v3, %v6874_v49  ;;  %v6884_v38 = vunpack.i.h.bf16 %v8809_v63  ;;  %v6883_v18 = vunpack.i.l.bf16 %v8809_v63  ;;  %v3592_v3 = vld [vmem:[#allocation2 + $0xc0] sm:$0xff] }
 0x27b   : > { %6371 = vmatpush3.bf16.msra.mxu1 %v6368_v27  ;;  %v3896_v14 = vsel %vm1336_vm3, %v6588_v29, %v6593_v15  ;;  %v6878_v56 = vunpack.i.l.bf16 %v8970_v41  ;;  %v6919_v15 = vunpack.i.h.bf16 %v8871_v13 }
 0x27c   : > { %v3085_v20 = vsel %vm1380_vm7, %v3077_v37, %v6883_v18  ;;  %v3086_v43 = vsel %vm1380_vm7, %v3078_v22, %v6884_v38  ;;  %v3904_v11 = vsel %vm1345_vm4, %v3896_v14, %v6603_v21 }
 0x27d   : > { %v8978_v57 = vpop.permute.xlu1 %6886  ;;  %7133 = vset.pattern.permute.xlu1 %v11151_v55  ;;  %v9006_v33 = vpop.permute.xlu0 %6996 }
 0x27e   : > { %4004 = vperm.xlu1 %7133, %v8817_v7   ;;  %6137 = vmatmul.mubr.msk.f32.vlgmr.msra.gmra.mrb[0].mxu1 %vm1398_vm2, %v5857_v2  ;;  %v5860_v7 = vld [vmem:[%s11040_s3 + $0x60] sm:$0xff]  ;;  %v6889_v35 = vunpack.i.h.bf16 %v8978_v57  ;;  %v6888_v44 = vunpack.i.l.bf16 %v8978_v57 }
 0x27f   : > { %6139 = vmatprep.mubr.msk.f32.mxu1 %vm1398_vm2, %v5858_v30  ;;  %v5888_v2 = vld [vmem:[%s11040_s3 + $0xc0] sm:$0xff] }
 0x281   : > { %v6897_v31 = vpop.permute.xlu1 %6896 }
 0x282   : > { %7134 = vset.pattern.permute.xlu1 %v7405_v46  ;;  %6140 = vmatmul.mubr.msk.f32.gmra.mrb[2].mxu1 %vm1398_vm2, %v5859_v25  ;;  %v6899_v24 = vunpack.i.h.bf16 %v6897_v31  ;;  %v6898_v42 = vunpack.i.l.bf16 %v6897_v31  ;;  %v9039_v39 = vpop.permute.xlu0 %7006 }
 0x283   : > { %3158 = vperm.xlu1 %7134, %v8900_v59   ;;  %6142 = vmatprep.mubr.msk.f32.mxu1 %vm1398_vm2, %v5860_v7  ;;  %v6879_v7 = vunpack.i.h.bf16 %v8970_v41 }
 0x284   : > { %v3093_v4 = vsel %vm1389_vm8, %v3085_v20, %v6898_v42  ;;  %v3094_v30 = vsel %vm1389_vm8, %v3086_v43, %v6899_v24  ;;  %v6918_v24 = vunpack.i.l.bf16 %v8871_v13 }
 0x285   : > { %v9014_v47 = vpop.permute.xlu1 %6901 }
 0x286   : > { %6143 = vmatmul.mubr.msk.f32.gmra.mrb[4].mxu1 %vm1398_vm2, %v5861_v54  ;;  %v3593_v54 = vld [vmem:[#allocation2 + $0xd8] sm:$0xff]  ;;  %v6904_v49 = vunpack.i.h.bf16 %v9014_v47  ;;  %v6903_v28 = vunpack.i.l.bf16 %v9014_v47 }
 0x287   : > { %7135 = vset.pattern.permute.xlu1 %v11151_v55  ;;  %6145 = vmatprep.mubr.msk.f32.mxu1 %vm1398_vm2, %v5862_v48  ;;  %v3912_v48 = vsel %vm1354_vm5, %v3904_v11, %v3592_v3 }
 0x288   : > { %4009 = vperm.xlu1 %7135, %v8900_v59   ;;  %v3897_v59 = vsel %vm1336_vm3, %v6589_v60, %v6594_v5  ;;  %v3920_v41 = vsel %vm421_vm0, %v3912_v48, %v6878_v56 }
 0x289   : > { %v6912_v27 = vpop.permute.xlu1 %6911  ;;  %v3905_v31 = vsel %vm1345_vm4, %v3897_v59, %v6604_v61  ;;  %v3928_v29 = vsel %vm1371_vm6, %v3920_v41, %v6888_v44 }
 0x28a   : > { %v6914_v63 = vunpack.i.h.bf16 %v6912_v27  ;;  %v6913_v53 = vunpack.i.l.bf16 %v6912_v27  ;;  %6146 = vmatmul.mubr.msk.f32.gmra.mrb[6].mxu1 %vm1398_vm2, %v5863_v1  ;;  %v3913_v32 = vsel %vm1354_vm5, %v3905_v31, %v3593_v54  ;;  %v3936_v8 = vsel %vm1380_vm7, %v3928_v29, %v6903_v28 }
 0x28b   : > { %6192 = vmatprep.mubr.msk.f32.mxu1 %vm1398_vm2, %v5888_v2  ;;  %v3921_v57 = vsel %vm421_vm0, %v3913_v32, %v6879_v7  ;;  %v3944_v18 = vsel %vm1389_vm8, %v3936_v8, %v6918_v24  ;;  %v11160_v2 = vld [vmem:[#allocation16_spill] sm:$0xff]  ;;  %v6909_v31 = vunpack.i.h.bf16 %v8853_v51  ;;  %v6908_v7 = vunpack.i.l.bf16 %v8853_v51 }
 0x28c   : > { %v3101_v52 = vsel %vm1398_vm2, %v3093_v4, %v6913_v53  ;;  %v3102_v12 = vsel %vm1398_vm2, %v3094_v30, %v6914_v63  ;;  %7136 = vset.pattern.permute.xlu1 %v7405_v46  ;;  %v3929_v47 = vsel %vm1371_vm6, %v3921_v57, %v6889_v35  ;;  %v6619_v63 = vunpack.i.h.bf16 %v11160_v2  ;;  %v2735_v30 = vld [vmem:[#allocation2 + $0x40] sm:$0xff] }
 0x28d   : > { %v9052_v25 = vpop.permute.xlu1 %6921  ;;  %v6372_v40 = vpack.c.bf16 %v3102_v12, %v3101_v52  ;;  %3163 = vperm.xlu1 %7136, %v8717_v19   ;;  %v9063_v19 = vpop.permute.xlu0 %7016  ;;  %v3937_v5 = vsel %vm1380_vm7, %v3929_v47, %v6904_v49  ;;  %v6618_v53 = vunpack.i.l.bf16 %v11160_v2  ;;  %v2736_v52 = vld [vmem:[#allocation2 + $0x58] sm:$0xff]  ;;  %v6894_v12 = vunpack.i.h.bf16 %v8834_v34  ;;  %v11162_v49 = vld [vmem:[#allocation17_spill] sm:$0xff]  ;;  %v11163_v51 = vld [vmem:[#allocation24_spill] sm:$0xff] }
 0x28e   : > { %v3945_v1 = vsel %vm1389_vm8, %v3937_v5, %v6919_v15  ;;  %v6634_v28 = vunpack.i.h.bf16 %v11162_v49  ;;  %v6629_v41 = vunpack.i.h.bf16 %v11163_v51  ;;  %v6628_v57 = vunpack.i.l.bf16 %v11163_v51 }
 0x28f   : > { %6373 = vmatprep.subr.bf16.mxu0 %v6372_v40  ;;  %v6949_v24 = vunpack.i.h.bf16 %v8926_v9  ;;  %v6999_v51 = vunpack.i.h.bf16 %v9006_v33 }
 0x290   : > { %6375 = vmatpush3.bf16.msra.mxu0 %v6372_v40  ;;  %v6893_v40 = vunpack.i.l.bf16 %v8834_v34  ;;  %v6633_v34 = vunpack.i.l.bf16 %v11162_v49 }
 0x291   : > { %v9067_v60 = vpop.permute.xlu1 %6931  ;;  %7138 = vset.pattern.permute.xlu1 %v11150_v16  ;;  %v9079_v37 = vpop.permute.xlu0 %7026 }
 0x292   : > { %2277 = vperm.xlu1 %7138, %v8762_v62   ;;  %v6934_v35 = vunpack.i.h.bf16 %v9067_v60  ;;  %v6933_v44 = vunpack.i.l.bf16 %v9067_v60 }
 0x295   : > { %v6942_v42 = vpop.permute.xlu1 %6941  ;;  %v9090_v27 = vpop.permute.xlu0 %7036 }
 0x296   : > { %v6944_v22 = vunpack.i.h.bf16 %v6942_v42  ;;  %v6943_v38 = vunpack.i.l.bf16 %v6942_v42  ;;  %7139 = vset.pattern.permute.xlu1 %v7405_v46 }
 0x297   : > { %3128 = vperm.xlu1 %7139, %v8762_v62   ;;  %v11161_v62 = vld [vmem:[#allocation23_spill] sm:$0xff] }
 0x298   : > { %v3952_v17 = vsel %vm1398_vm2, %v3944_v18, %v6943_v38  ;;  %v3953_v61 = vsel %vm1398_vm2, %v3945_v1, %v6944_v22  ;;  %v6624_v20 = vunpack.i.h.bf16 %v11161_v62  ;;  %v6623_v43 = vunpack.i.l.bf16 %v11161_v62  ;;  %v11164_v22 = vld [vmem:[#allocation19_spill] sm:$0xff] }
 0x299   : > { %v9087_v21 = vpop.permute.xlu1 %6951  ;;  %v6388_v13 = vpack.c.bf16 %v3953_v61, %v3952_v17  ;;  %v9107_v56 = vpop.permute.xlu0 %7046  ;;  %v6639_v38 = vunpack.i.h.bf16 %v11164_v22  ;;  %v6638_v18 = vunpack.i.l.bf16 %v11164_v22 }
 0x29a   : > { %v3047_v59 = vsel %vm1336_vm3, %v6618_v53, %v6623_v43  ;;  %v3048_v4 = vsel %vm1336_vm3, %v6619_v63, %v6624_v20  ;;  %v3898_v63 = vsel %vm1336_vm3, %v6628_v57, %v6633_v34  ;;  %v3899_v53 = vsel %vm1336_vm3, %v6629_v41, %v6634_v28 }
 0x29b   : > { %6389 = vmatprep.subr.bf16.mxu1 %v6388_v13  ;;  %7141 = vset.pattern.permute.xlu1 %v11150_v16  ;;  %v3055_v3 = vsel %vm1345_vm4, %v3047_v59, %v2735_v30  ;;  %v3056_v54 = vsel %vm1345_vm4, %v3048_v4, %v2736_v52  ;;  %v3906_v30 = vsel %vm1345_vm4, %v3898_v63, %v6638_v18  ;;  %v6998_v41 = vunpack.i.l.bf16 %v9006_v33 }
 0x29c   : > { %6391 = vmatpush3.bf16.msra.mxu1 %v6388_v13  ;;  %2282 = vperm.xlu1 %7141, %v8845_v0   ;;  %v3064_v48 = vsel %vm1354_vm5, %v3056_v54, %v6894_v12  ;;  %v3907_v52 = vsel %vm1345_vm4, %v3899_v53, %v6639_v38  ;;  %v6939_v12 = vunpack.i.h.bf16 %v8914_v26  ;;  %v6928_v33 = vunpack.i.l.bf16 %v8895_v6 }
 0x29d   : > { %v9097_v14 = vpop.permute.xlu1 %6961  ;;  %v3072_v29 = vsel %vm421_vm0, %v3064_v48, %v6909_v31  ;;  %v9127_v42 = vpop.permute.xlu0 %7056  ;;  %v6979_v53 = vunpack.i.h.bf16 %v8962_v50 }
 0x29e   : > { %v3080_v8 = vsel %vm1371_vm6, %v3072_v29, %v6934_v35  ;;  %v6964_v31 = vunpack.i.h.bf16 %v9097_v14  ;;  %v3595_v35 = vld [vmem:[#allocation2 + $0x108] sm:$0xff] }
 0x29f   : > { %v3088_v2 = vsel %vm1380_vm7, %v3080_v8, %v6949_v24  ;;  %v6923_v8 = vunpack.i.l.bf16 %v9052_v25 }
 0x2a0   : > { %7142 = vset.pattern.permute.xlu1 %v11151_v55 }
 0x2a1   : > { %v6972_v11 = vpop.permute.xlu1 %6971  ;;  %3984 = vperm.xlu1 %7142, %v8845_v0   ;;  %v3063_v0 = vsel %vm1354_vm5, %v3055_v3, %v6893_v40  ;;  %v6938_v40 = vunpack.i.l.bf16 %v8914_v26  ;;  %v3915_v26 = vsel %vm1354_vm5, %v3907_v52, %v3595_v35  ;;  %v3049_v18 = vsel %vm1336_vm3, %v6923_v8, %v6928_v33 }
 0x2a2   : > { %v3071_v60 = vsel %vm421_vm0, %v3063_v0, %v6908_v7  ;;  %v6974_v5 = vunpack.i.h.bf16 %v6972_v11  ;;  %v6973_v15 = vunpack.i.l.bf16 %v6972_v11  ;;  %v9147_v11 = vpop.permute.xlu0 %7066  ;;  %v3594_v7 = vld [vmem:[#allocation2 + $0xf0] sm:$0xff]  ;;  %v7029_v35 = vunpack.i.h.bf16 %v9079_v37 }
 0x2a3   : > { %v3079_v47 = vsel %vm1371_vm6, %v3071_v60, %v6933_v44  ;;  %v3914_v54 = vsel %vm1354_vm5, %v3906_v30, %v3594_v7  ;;  %v7018_v7 = vunpack.i.l.bf16 %v9063_v19  ;;  %v7068_v8 = vunpack.i.l.bf16 %v9147_v11 }
 0x2a4   : > { %v3096_v62 = vsel %vm1389_vm8, %v3088_v2, %v6974_v5  ;;  %v3922_v28 = vsel %vm421_vm0, %v3914_v54, %v6938_v40  ;;  %v6968_v2 = vunpack.i.l.bf16 %v8943_v45  ;;  %v7009_v40 = vunpack.i.h.bf16 %v9039_v39 }
 0x2a5   : > { %v6982_v32 = vpop.permute.xlu1 %6981  ;;  %7143 = vset.pattern.permute.xlu1 %v11150_v16  ;;  %v6948_v16 = vunpack.i.l.bf16 %v8926_v9  ;;  %v7028_v54 = vunpack.i.l.bf16 %v9079_v37  ;;  %v7048_v37 = vunpack.i.l.bf16 %v9107_v56 }
 0x2a6   : > { %2287 = vperm.xlu1 %7143, %v8867_v10   ;;  %v6984_v44 = vunpack.i.h.bf16 %v6982_v32  ;;  %v6983_v3 = vunpack.i.l.bf16 %v6982_v32  ;;  %v9161_v0 = vpop.permute.xlu0 %7076 }
 0x2a7   : > { %v3087_v13 = vsel %vm1380_vm7, %v3079_v47, %v6948_v16  ;;  %v6924_v47 = vunpack.i.h.bf16 %v9052_v25  ;;  %v6929_v16 = vunpack.i.h.bf16 %v8895_v6  ;;  %v6969_v6 = vunpack.i.h.bf16 %v8943_v45 }
 0x2a8   : > { %v3095_v9 = vsel %vm1389_vm8, %v3087_v13, %v6973_v15  ;;  %v6958_v13 = vunpack.i.l.bf16 %v8931_v36 }
 0x2a9   : > { %v6992_v1 = vpop.permute.xlu1 %6991  ;;  %v3050_v25 = vsel %vm1336_vm3, %v6924_v47, %v6929_v16 }
 0x2aa   : > { %v6994_v17 = vunpack.i.h.bf16 %v6992_v1  ;;  %v6993_v61 = vunpack.i.l.bf16 %v6992_v1  ;;  %7145 = vset.pattern.permute.xlu1 %v11151_v55  ;;  %v9179_v38 = vpop.permute.xlu0 %7086  ;;  %v6954_v1 = vunpack.i.h.bf16 %v9087_v21 }
 0x2ab   : > { %3989 = vperm.xlu1 %7145, %v8867_v10   ;;  %v6963_v10 = vunpack.i.l.bf16 %v9097_v14  ;;  %v3923_v14 = vsel %vm421_vm0, %v3915_v26, %v6939_v12  ;;  %v6989_v12 = vunpack.i.h.bf16 %v8984_v23 }
 0x2ac   : > { %v3103_v20 = vsel %vm1398_vm2, %v3095_v9, %v6993_v61  ;;  %v3104_v43 = vsel %vm1398_vm2, %v3096_v62, %v6994_v17  ;;  %v6953_v17 = vunpack.i.l.bf16 %v9087_v21  ;;  %v6959_v61 = vunpack.i.h.bf16 %v8931_v36  ;;  %v7346_v62 = vld [vmem:[#allocation2 + $0x70] sm:$0xff]  ;;  %v7347_v21 = vld [vmem:[#allocation2 + $0x88] sm:$0xff] }
 0x2ad   : > { %v9141_v59 = vpop.permute.xlu1 %7001  ;;  %v6376_v4 = vpack.c.bf16 %v3104_v43, %v3103_v20  ;;  %v3930_v34 = vsel %vm1371_vm6, %v3922_v28, %v6963_v10  ;;  %v6978_v9 = vunpack.i.l.bf16 %v8962_v50  ;;  %v3057_v20 = vsel %vm1345_vm4, %v3049_v18, %v7346_v62 }
 0x2ae   : > { %v3938_v48 = vsel %vm1380_vm7, %v3930_v34, %v6983_v3  ;;  %v3058_v43 = vsel %vm1345_vm4, %v3050_v25, %v7347_v21  ;;  %v3900_v36 = vsel %vm1336_vm3, %v6953_v17, %v6958_v13  ;;  %v3901_v30 = vsel %vm1336_vm3, %v6954_v1, %v6959_v61 }
 0x2af   : > { %6377 = vmatprep.subr.bf16.mxu0 %v6376_v4  ;;  %7146 = vset.pattern.permute.xlu1 %v7405_v46  ;;  %v3931_v46 = vsel %vm1371_vm6, %v3923_v14, %v6964_v31  ;;  %v3946_v5 = vsel %vm1389_vm8, %v3938_v48, %v6998_v41  ;;  %v7004_v45 = vunpack.i.h.bf16 %v9141_v59  ;;  %v7003_v52 = vunpack.i.l.bf16 %v9141_v59 }
 0x2b0   : > { %6379 = vmatpush3.bf16.msra.mxu0 %v6376_v4  ;;  %3143 = vperm.xlu1 %7146, %v8924_v58   ;;  %v3939_v32 = vsel %vm1380_vm7, %v3931_v46, %v6984_v44  ;;  %v9195_v4 = vpop.permute.xlu0 %7096  ;;  %v6988_v50 = vunpack.i.l.bf16 %v8984_v23  ;;  %v7008_v31 = vunpack.i.l.bf16 %v9039_v39  ;;  %v7019_v10 = vunpack.i.h.bf16 %v9063_v19 }
 0x2b1   : > { %v9155_v49 = vpop.permute.xlu1 %7011  ;;  %v3947_v15 = vsel %vm1389_vm8, %v3939_v32, %v6999_v51  ;;  %v3065_v44 = vsel %vm1354_vm5, %v3057_v20, %v6968_v2  ;;  %v3908_v59 = vsel %vm1345_vm4, %v3900_v36, %v6978_v9  ;;  %v3909_v26 = vsel %vm1345_vm4, %v3901_v30, %v6979_v53  ;;  %v3596_v32 = vld [vmem:[#allocation2 + $0x120] sm:$0xff]  ;;  %v3597_v51 = vld [vmem:[#allocation2 + $0x138] sm:$0xff] }
 0x2b2   : > { %v3066_v23 = vsel %vm1354_vm5, %v3058_v43, %v6969_v6  ;;  %v3051_v28 = vsel %vm1336_vm3, %v7003_v52, %v7008_v31  ;;  %v3052_v39 = vsel %vm1336_vm3, %v7004_v45, %v7009_v40  ;;  %v7014_v14 = vunpack.i.h.bf16 %v9155_v49 }
 0x2b3   : > { %v7013_v19 = vunpack.i.l.bf16 %v9155_v49  ;;  %v7038_v34 = vunpack.i.l.bf16 %v9090_v27  ;;  %v7049_v46 = vunpack.i.h.bf16 %v9107_v56  ;;  %v3073_v48 = vsel %vm421_vm0, %v3065_v44, %v6988_v50  ;;  %v7348_v56 = vld [vmem:[#allocation2 + $0xa0] sm:$0xff] }
 0x2b4   : > { %7147 = vset.pattern.permute.xlu1 %v11151_v55  ;;  %v9221_v41 = vpop.permute.xlu0 %7106  ;;  %v3917_v49 = vsel %vm1354_vm5, %v3909_v26, %v3597_v51  ;;  %v7078_v25 = vunpack.i.l.bf16 %v9161_v0  ;;  %v7099_v17 = vunpack.i.h.bf16 %v9195_v4  ;;  %v7098_v61 = vunpack.i.l.bf16 %v9195_v4 }
 0x2b5   : > { %v7022_v57 = vpop.permute.xlu1 %7021  ;;  %3994 = vperm.xlu1 %7147, %v8924_v58   ;;  %v3081_v16 = vsel %vm1371_vm6, %v3073_v48, %v7013_v19  ;;  %v7109_v6 = vunpack.i.h.bf16 %v9221_v41  ;;  %v7039_v48 = vunpack.i.h.bf16 %v9090_v27 }
 0x2b6   : > { %v7024_v60 = vunpack.i.h.bf16 %v7022_v57  ;;  %v7023_v29 = vunpack.i.l.bf16 %v7022_v57  ;;  %v7069_v57 = vunpack.i.h.bf16 %v9147_v11  ;;  %v3925_v11 = vsel %vm421_vm0, %v3917_v49, %v7019_v10 }
 0x2b7   : > { %v3089_v20 = vsel %vm1380_vm7, %v3081_v16, %v7028_v54  ;;  %v7108_v10 = vunpack.i.l.bf16 %v9221_v41  ;;  %v7059_v16 = vunpack.i.h.bf16 %v9127_v42 }
 0x2b8   : > { %v3954_v24 = vsel %vm1398_vm2, %v3946_v5, %v7023_v29  ;;  %v3955_v55 = vsel %vm1398_vm2, %v3947_v15, %v7024_v60  ;;  %v3074_v60 = vsel %vm421_vm0, %v3066_v23, %v6989_v12  ;;  %v3916_v29 = vsel %vm1354_vm5, %v3908_v59, %v3596_v32  ;;  %v7117_v43 = vpop.permute.xlu0 %7116 }
 0x2b9   : > { %v9177_v22 = vpop.permute.xlu1 %7031  ;;  %v6392_v58 = vpack.c.bf16 %v3955_v55, %v3954_v24  ;;  %v7079_v5 = vunpack.i.h.bf16 %v9161_v0  ;;  %v3059_v15 = vsel %vm1345_vm4, %v3051_v28, %v7348_v56  ;;  %v7349_v24 = vld [vmem:[#allocation2 + $0xb8] sm:$0xff]  ;;  %v3082_v33 = vsel %vm1371_vm6, %v3074_v60, %v7014_v14 }
 0x2ba   : > { %v3060_v55 = vsel %vm1345_vm4, %v3052_v39, %v7349_v24  ;;  %v3924_v1 = vsel %vm421_vm0, %v3916_v29, %v7018_v7  ;;  %v3067_v2 = vsel %vm1354_vm5, %v3059_v15, %v7048_v37  ;;  %v3090_v21 = vsel %vm1380_vm7, %v3082_v33, %v7029_v35 }
 0x2bb   : > { %6393 = vmatprep.subr.bf16.mxu1 %v6392_v58  ;;  %v3068_v53 = vsel %vm1354_vm5, %v3060_v55, %v7049_v46  ;;  %v7033_v31 = vunpack.i.l.bf16 %v9177_v22  ;;  %v7119_v44 = vunpack.i.h.bf16 %v7117_v43  ;;  %v7118_v59 = vunpack.i.l.bf16 %v7117_v43  ;;  %v5875_v43 = vld [vmem:[%s11040_s3 + $0x98] sm:$0xff] }
 0x2bc   : > { %6395 = vmatpush3.bf16.msra.mxu1 %v6392_v58  ;;  %v7034_v26 = vunpack.i.h.bf16 %v9177_v22  ;;  %v3076_v39 = vsel %vm421_vm0, %v3068_v53, %v7069_v57  ;;  %v7058_v33 = vunpack.i.l.bf16 %v9127_v42  ;;  %v3599_v42 = vld [vmem:[#allocation2 + $0x168] sm:$0xff]  ;;  %v7127_v53 = vpop.permute.xlu0 %7126 }
 0x2bd   : > { %v9189_v63 = vpop.permute.xlu1 %7041  ;;  %v3902_v22 = vsel %vm1336_vm3, %v7033_v31, %v7038_v34 }
 0x2be   : > { %v7044_v36 = vunpack.i.h.bf16 %v9189_v63  ;;  %v7043_v30 = vunpack.i.l.bf16 %v9189_v63  ;;  %v3075_v63 = vsel %vm421_vm0, %v3067_v2, %v7068_v8  ;;  %v3903_v34 = vsel %vm1336_vm3, %v7034_v26, %v7039_v48  ;;  %v5895_v48 = vld [vmem:[%s11040_s3 + $0xf8] sm:$0xff] }
 0x2bf   : > { %v3911_v0 = vsel %vm1345_vm4, %v3903_v34, %v7059_v16 }
 0x2c0   : > { %v3932_v23 = vsel %vm1371_vm6, %v3924_v1, %v7043_v30  ;;  %v3933_v28 = vsel %vm1371_vm6, %v3925_v11, %v7044_v36  ;;  %v5874_v1 = vld [vmem:[%s11040_s3 + $0x90] sm:$0xff]  ;;  %v3919_v2 = vsel %vm1354_vm5, %v3911_v0, %v3599_v42  ;;  %v5876_v36 = vld [vmem:[%s11040_s3 + $0xa0] sm:$0xff] }
 0x2c1   : > { %v7052_v3 = vpop.permute.xlu1 %7051  ;;  %v3598_v11 = vld [vmem:[#allocation2 + $0x150] sm:$0xff] }
 0x2c2   : > { %v7054_v58 = vunpack.i.h.bf16 %v7052_v3  ;;  %v7053_v18 = vunpack.i.l.bf16 %v7052_v3 }
 0x2c4   : > { %v3097_v4 = vsel %vm1389_vm8, %v3089_v20, %v7053_v18  ;;  %v3098_v45 = vsel %vm1389_vm8, %v3090_v21, %v7054_v58 }
 0x2c5   : > { %v7062_v47 = vpop.permute.xlu1 %7061 }
 0x2c6   : > { %v7064_v52 = vunpack.i.h.bf16 %v7062_v47  ;;  %v7063_v12 = vunpack.i.l.bf16 %v7062_v47 }
 0x2c8   : > { %v3940_v14 = vsel %vm1380_vm7, %v3932_v23, %v7063_v12  ;;  %v3941_v19 = vsel %vm1380_vm7, %v3933_v28, %v7064_v52  ;;  %v7129_v52 = vunpack.i.h.bf16 %v7127_v53  ;;  %v7128_v12 = vunpack.i.l.bf16 %v7127_v53  ;;  %v5879_v23 = vld [vmem:[%s11040_s3 + $0xb8] sm:$0xff]  ;;  %v5889_v28 = vld [vmem:[%s11040_s3 + $0xc8] sm:$0xff]  ;;  %v9407_v53 = vpop.permute.xlu0 %4014 }
 0x2c9   : > { %v7072_v13 = vpop.permute.xlu1 %7071  ;;  %v3948_v56 = vsel %vm1389_vm8, %v3940_v14, %v7078_v25  ;;  %v3949_v27 = vsel %vm1389_vm8, %v3941_v19, %v7079_v5  ;;  %v3910_v25 = vsel %vm1345_vm4, %v3902_v22, %v7058_v33  ;;  %v5873_v5 = vld [vmem:[%s11040_s3 + $0x88] sm:$0xff]  ;;  %v5891_v14 = vld [vmem:[%s11040_s3 + $0xd8] sm:$0xff]  ;;  %v5892_v19 = vld [vmem:[%s11040_s3 + $0xe0] sm:$0xff] }
 0x2ca   : > { %v7074_v9 = vunpack.i.h.bf16 %v7072_v13  ;;  %v7073_v62 = vunpack.i.l.bf16 %v7072_v13  ;;  %v11169_v33 = vld [vmem:[#allocation6_spill] sm:$0xff] }
 0x2cc   : > { %v3105_v50 = vsel %vm1398_vm2, %v3097_v4, %v7073_v62  ;;  %v3106_v40 = vsel %vm1398_vm2, %v3098_v45, %v7074_v9  ;;  %v7089_v9 = vunpack.i.h.bf16 %v9179_v38  ;;  %v7088_v62 = vunpack.i.l.bf16 %v9179_v38 }
 0x2cd   : > { %v7082_v7 = vpop.permute.xlu1 %7081  ;;  %v6380_v35 = vpack.c.bf16 %v3106_v40, %v3105_v50 }
 0x2ce   : > { %v7084_v3 = vunpack.i.h.bf16 %v7082_v7  ;;  %v7083_v54 = vunpack.i.l.bf16 %v7082_v7  ;;  %v3927_v4 = vsel %vm421_vm0, %v3919_v2, %v7089_v9 }
 0x2cf   : > { %6381 = vmatprep.subr.bf16.mxu0 %v6380_v35 }
 0x2d0   : > { %v3083_v46 = vsel %vm1371_vm6, %v3075_v63, %v7083_v54  ;;  %v3084_v37 = vsel %vm1371_vm6, %v3076_v39, %v7084_v3  ;;  %6383 = vmatpush3.bf16.msra.mxu0 %v6380_v35  ;;  %v5877_v35 = vld [vmem:[%s11040_s3 + $0xa8] sm:$0xff]  ;;  %v5878_v54 = vld [vmem:[%s11040_s3 + $0xb0] sm:$0xff] }
 0x2d1   : > { %v7092_v32 = vpop.permute.xlu1 %7091  ;;  %v3091_v51 = vsel %vm1380_vm7, %v3083_v46, %v7098_v61  ;;  %v3092_v41 = vsel %vm1380_vm7, %v3084_v37, %v7099_v17  ;;  %v5890_v39 = vld [vmem:[%s11040_s3 + $0xd0] sm:$0xff]  ;;  %v5893_v46 = vld [vmem:[%s11040_s3 + $0xe8] sm:$0xff] }
 0x2d2   : > { %v7094_v57 = vunpack.i.h.bf16 %v7092_v32  ;;  %v7093_v60 = vunpack.i.l.bf16 %v7092_v32  ;;  %v3099_v29 = vsel %vm1389_vm8, %v3091_v51, %v7108_v10  ;;  %v3100_v49 = vsel %vm1389_vm8, %v3092_v41, %v7109_v6  ;;  %v5894_v37 = vld [vmem:[%s11040_s3 + $0xf0] sm:$0xff] }
 0x2d3   : > { %v3107_v47 = vsel %vm1398_vm2, %v3099_v29, %v7118_v59  ;;  %v3108_v8 = vsel %vm1398_vm2, %v3100_v49, %v7119_v44  ;;  %v3918_v6 = vsel %vm1354_vm5, %v3910_v25, %v3598_v11  ;;  %v11166_v49 = vld [vmem:[#allocation4_spill] sm:$0xff]  ;;  %v11170_v25 = vld [vmem:[#allocation11_spill] sm:$0xff] }
 0x2d4   : > { %v6384_v15 = vpack.c.bf16 %v3108_v8, %v3107_v47  ;;  %v3956_v24 = vsel %vm1398_vm2, %v3948_v56, %v7093_v60  ;;  %v3957_v55 = vsel %vm1398_vm2, %v3949_v27, %v7094_v57  ;;  %v3926_v30 = vsel %vm421_vm0, %v3918_v6, %v7088_v62  ;;  %v11165_v57 = vld [vmem:[#allocation8_spill] sm:$0xff]  ;;  %v11167_v56 = vld [vmem:[#allocation5_spill] sm:$0xff]  ;;  %v11171_v11 = vld [vmem:[#allocation7_spill] sm:$0xff]  ;;  %v9409_v62 = vpop.permute.xlu0 %3979 }
 0x2d5   : > { %v7102_v58 = vpop.permute.xlu1 %7101  ;;  %v6396_v18 = vpack.c.bf16 %v3957_v55, %v3956_v24  ;;  %v11168_v24 = vld [vmem:[#allocation9_spill] sm:$0xff] }
 0x2d6   : > { %6385 = vmatprep.subr.bf16.mxu0 %v6384_v15  ;;  %v7104_v61 = vunpack.i.h.bf16 %v7102_v58  ;;  %v7103_v13 = vunpack.i.l.bf16 %v7102_v58 }
 0x2d7   : > { %6387 = vmatpush3.bf16.msra.mxu0 %v6384_v15  ;;  %6397 = vmatprep.subr.bf16.mxu1 %v6396_v18 }
 0x2d8   : > { %6399 = vmatpush3.bf16.msra.mxu1 %v6396_v18  ;;  %v3934_v38 = vsel %vm1371_vm6, %v3926_v30, %v7103_v13  ;;  %v3935_v50 = vsel %vm1371_vm6, %v3927_v4, %v7104_v61  ;;  %v11172_v61 = vld [vmem:[#allocation13_spill] sm:$0xff] }
 0x2d9   : > { %v7112_v17 = vpop.permute.xlu1 %7111 }
 0x2da   : > { %6165 = vmatmul.mubr.msk.f32.vlgmr.msra.gmra.mrb[8].mxu0 %vm1398_vm2, %v5873_v5  ;;  %v7114_v20 = vunpack.i.h.bf16 %v7112_v17  ;;  %v7113_v21 = vunpack.i.l.bf16 %v7112_v17 }
 0x2db   : > { %6167 = vmatprep.mubr.msk.f32.mxu0 %vm1398_vm2, %v5874_v1 }
 0x2dc   : > { %v3942_v10 = vsel %vm1380_vm7, %v3934_v38, %v7113_v21  ;;  %v3943_v7 = vsel %vm1380_vm7, %v3935_v50, %v7114_v20  ;;  %v9413_v21 = vpop.permute.xlu0 %3148 }
 0x2dd   : > { %v7122_v45 = vpop.permute.xlu1 %7121 }
 0x2de   : > { %v7124_v40 = vunpack.i.h.bf16 %v7122_v45  ;;  %v7123_v31 = vunpack.i.l.bf16 %v7122_v45  ;;  %6168 = vmatmul.mubr.msk.f32.gmra.mrb[10].mxu0 %vm1398_vm2, %v5875_v43 }
 0x2df   : > { %6170 = vmatprep.mubr.msk.f32.mxu0 %vm1398_vm2, %v5876_v36 }
 0x2e0   : > { %v3950_v44 = vsel %vm1389_vm8, %v3942_v10, %v7123_v31  ;;  %v3951_v3 = vsel %vm1389_vm8, %v3943_v7, %v7124_v40  ;;  %v9417_v45 = vpop.permute.xlu0 %3153 }
 0x2e1   : > { %v3958_v63 = vsel %vm1398_vm2, %v3950_v44, %v7128_v12  ;;  %v3959_v59 = vsel %vm1398_vm2, %v3951_v3, %v7129_v52 }
 0x2e2   : > { %6171 = vmatmul.mubr.msk.f32.gmra.mrb[12].mxu0 %vm1398_vm2, %v5877_v35  ;;  %v6400_v26 = vpack.c.bf16 %v3959_v59, %v3958_v63 }
 0x2e3   : > { %6173 = vmatprep.mubr.msk.f32.mxu0 %vm1398_vm2, %v5878_v54 }
 0x2e4   : > { %6401 = vmatprep.subr.bf16.mxu1 %v6400_v26  ;;  %v9427_v38 = vpop.permute.xlu0 %3133 }
 0x2e5   : > { %6403 = vmatpush3.bf16.msra.mxu1 %v6400_v26 }
 0x2e6   : > { %6174 = vmatmul.mubr.msk.f32.gmra.mrb[14].mxu0 %vm1398_vm2, %v5879_v23 }
 0x2e8   : > { %6193 = vmatmul.mubr.msk.f32.vlgmr.msra.gmra.mrb[8].mxu1 %vm1398_vm2, %v5889_v28  ;;  %v9439_v35 = vpop.permute.xlu0 %3138 }
 0x2e9   : > { %6195 = vmatprep.mubr.msk.f32.mxu1 %vm1398_vm2, %v5890_v39 }
 0x2ec   : > { %6196 = vmatmul.mubr.msk.f32.gmra.mrb[10].mxu1 %vm1398_vm2, %v5891_v14  ;;  %v9445_v44 = vpop.permute.xlu0 %2307 }
 0x2ed   : > { %6198 = vmatprep.mubr.msk.f32.mxu1 %vm1398_vm2, %v5892_v19 }
 0x2ee   : > { %v9351_v22 = vpop.permute.xlu1 %2297 }
 0x2f0   : > { %6199 = vmatmul.mubr.msk.f32.gmra.mrb[12].mxu1 %vm1398_vm2, %v5893_v46  ;;  %v9455_v3 = vpop.permute.xlu0 %2312 }
 0x2f1   : > { %6201 = vmatprep.mubr.msk.f32.mxu1 %vm1398_vm2, %v5894_v37 }
 0x2f3   : > { %v9353_v32 = vpop.permute.xlu1 %3999 }
 0x2f4   : > { %6202 = vmatmul.mubr.msk.f32.gmra.mrb[14].mxu1 %vm1398_vm2, %v5895_v48  ;;  %v2293_v54 = vpop.permute.xlu0 %2292 }
 0x2f8   : > { %v9355_v51 = vpop.permute.xlu1 %2302 }
 0x2fd   : > { %v9370_v15 = vpop.permute.xlu1 %4004 }
 0x302   : > { %v9387_v5 = vpop.permute.xlu1 %3158 }
 0x307   : > { %v9403_v6 = vpop.permute.xlu1 %4009 }
 0x30c   : > { %v9405_v2 = vpop.permute.xlu1 %3163 }
 0x311   : > { %v2278_v9 = vpop.permute.xlu1 %2277 }
 0x316   : > { %v9411_v20 = vpop.permute.xlu1 %3128 }
 0x31b   : > { %v2283_v43 = vpop.permute.xlu1 %2282 }
 0x320   : > { %v9471_v59 = vpop.permute.xlu1 %3984 }
 0x325   : > { %v2288_v26 = vpop.permute.xlu1 %2287 }
 0x326   : > { %v6110_v41 = vpop.f32.mrb[0].mxu0 }
 0x327   : > { %v9358_v60 = vadd.f32 %v6110_v41, %v11165_v57  ;;  %v1553_v29 = vpop.f32.mrb[1].mxu0 }
 0x328   : > { %v9361_v47 = vadd.f32 %v1553_v29, %v11166_v49 }
 0x329   : > { %1739 = vrot.lane.b32.xlu1 %v9358_v60, %s7406_s16  ;;  %1610 = vrot.lane.b32.xlu0 %v9358_v60, %s7398_s22 }
 0x32a   : > { %v6113_v8 = vpop.f32.mrb[2].mxu0  ;;  %v9495_v28 = vpop.permute.xlu1 %3989 }
 0x32b   : > { %v9368_v27 = vadd.f32 %v6113_v8, %v11167_v56  ;;  %v1563_v34 = vpop.f32.mrb[3].mxu0 }
 0x32c   : > { %v9373_v55 = vadd.f32 %v1563_v34, %v11168_v24 }
 0x32d   : > { %1642 = vrot.lane.b32.xlu0 %v9358_v60, %s7400_s15 }
 0x32e   : > { %v6116_v16 = vpop.f32.mrb[4].mxu0 }
 0x32f   : > { %v9378_v58 = vadd.f32 %v6116_v16, %v11169_v33  ;;  %v1573_v18 = vpop.f32.mrb[5].mxu0  ;;  %v9504_v14 = vpop.permute.xlu1 %3143 }
 0x330   : > { %v9381_v0 = vadd.f32 %v1573_v18, %v11170_v25 }
 0x331   : > { %1597 = vst.msk [vmem:[#allocation3 + $0x78] sm:$0xff] %vm1336_vm3, %v9378_v58  ;;  %1674 = vrot.lane.b32.xlu0 %v9358_v60, %s7399_s29 }
 0x332   : > { %1596 = vst.msk [vmem:[#allocation3 + $0x60] sm:$0xff] %vm1336_vm3, %v9381_v0  ;;  %v6119_v1 = vpop.f32.mrb[6].mxu0 }
 0x333   : > { %v9392_v42 = vadd.f32 %v6119_v1, %v11171_v11  ;;  %v1583_v17 = vpop.f32.mrb[7].mxu0 }
 0x334   : > { %v9395_v13 = vadd.f32 %v1583_v17, %v11172_v61  ;;  %v9514_v19 = vpop.permute.xlu1 %3994 }
 0x335   : > { %1599 = vst.msk [vmem:[#allocation3 + $0xa8] sm:$0xff] %vm1336_vm3, %v9392_v42  ;;  %1707 = vrot.lane.b32.xlu0 %v9358_v60, %s7407_s12 }
 0x336   : > { %1598 = vst.msk [vmem:[#allocation3 + $0x90] sm:$0xff] %vm1336_vm3, %v9395_v13 }
 0x351   : > { %v6138_v36 = vpop.f32.mrb[0].mxu1 }
 0x352   : > { %v9415_v30 = vadd.f32 %v6138_v36, %v2283_v43  ;;  %v2405_v4 = vpop.f32.mrb[1].mxu1 }
 0x353   : > { %v9435_v10 = vadd.f32 %v2405_v4, %v2278_v9 }
 0x354   : > { %2559 = vrot.lane.b32.xlu1 %v9415_v30, %s7399_s29  ;;  %2527 = vrot.lane.b32.xlu0 %v9415_v30, %s7400_s15 }
 0x355   : > { %v6141_v52 = vpop.f32.mrb[2].mxu1 }
 0x356   : > { %v2415_v12 = vpop.f32.mrb[3].mxu1  ;;  %v9465_v63 = vadd.f32 %v6141_v52, %v2293_v54 }
 0x357   : > { %v9481_v23 = vadd.f32 %v2415_v12, %v2288_v26 }
 0x358   : > { %2591 = vrot.lane.b32.xlu0 %v9415_v30, %s7407_s12  ;;  %1608 = vrot.lane.b32.xlu1 %v9361_v47, %s7398_s22 }
 0x359   : > { %v6144_v50 = vpop.f32.mrb[4].mxu1 }
 0x35a   : > { %v2425_v40 = vpop.f32.mrb[5].mxu1  ;;  %v9502_v39 = vadd.f32 %v6144_v50, %v9355_v51 }
 0x35b   : > { %v9526_v48 = vadd.f32 %v2425_v40, %v9351_v22 }
 0x35c   : > { %1737 = vrot.lane.b32.xlu0 %v9361_v47, %s7406_s16  ;;  %1640 = vrot.lane.b32.xlu1 %v9361_v47, %s7400_s15 }
 0x35d   : > { %v9433_v31 = vpop.f32.mrb[6].mxu1 }
 0x35e   : > { %v9437_v7 = vpop.f32.mrb[7].mxu1  ;;  %v9562_v24 = vadd.f32 %v9433_v31, %v9455_v3 }
 0x35f   : > { %v9574_v18 = vadd.f32 %v9437_v7, %v9445_v44 }
 0x360   : > { %2557 = vrot.lane.b32.xlu0 %v9435_v10, %s7399_s29  ;;  %1672 = vrot.lane.b32.xlu1 %v9361_v47, %s7399_s29 }
 0x364   : > { %1614 = vrot.lane.b32.xlu0 %v9368_v27, %s7398_s22  ;;  %1705 = vrot.lane.b32.xlu1 %v9361_v47, %s7407_s12 }
 0x368   : > { %1646 = vrot.lane.b32.xlu0 %v9368_v27, %s7400_s15  ;;  %2525 = vrot.lane.b32.xlu1 %v9435_v10, %s7400_s15 }
 0x36c   : > { %1678 = vrot.lane.b32.xlu0 %v9368_v27, %s7399_s29  ;;  %2589 = vrot.lane.b32.xlu1 %v9435_v10, %s7407_s12 }
 0x370   : > { %1711 = vrot.lane.b32.xlu0 %v9368_v27, %s7407_s12  ;;  %1743 = vrot.lane.b32.xlu1 %v9368_v27, %s7406_s16 }
 0x374   : > { %2531 = vrot.lane.b32.xlu0 %v9465_v63, %s7400_s15  ;;  %2563 = vrot.lane.b32.xlu1 %v9465_v63, %s7399_s29 }
 0x378   : > { %2595 = vrot.lane.b32.xlu0 %v9465_v63, %s7407_s12  ;;  %1612 = vrot.lane.b32.xlu1 %v9373_v55, %s7398_s22 }
 0x37c   : > { %1741 = vrot.lane.b32.xlu0 %v9373_v55, %s7406_s16  ;;  %1644 = vrot.lane.b32.xlu1 %v9373_v55, %s7400_s15 }
 0x380   : > { %2561 = vrot.lane.b32.xlu0 %v9481_v23, %s7399_s29  ;;  %1676 = vrot.lane.b32.xlu1 %v9373_v55, %s7399_s29 }
 0x384   : > { %1618 = vrot.lane.b32.xlu0 %v9378_v58, %s7398_s22  ;;  %1709 = vrot.lane.b32.xlu1 %v9373_v55, %s7407_s12 }
 0x388   : > { %1650 = vrot.lane.b32.xlu0 %v9378_v58, %s7400_s15  ;;  %2529 = vrot.lane.b32.xlu1 %v9481_v23, %s7400_s15 }
 0x38c   : > { %1682 = vrot.lane.b32.xlu0 %v9378_v58, %s7399_s29  ;;  %2593 = vrot.lane.b32.xlu1 %v9481_v23, %s7407_s12 }
 0x390   : > { %1715 = vrot.lane.b32.xlu0 %v9378_v58, %s7407_s12  ;;  %2462 = vrot.lane.b32.xlu1 %v9502_v39, %s7391_s24 }
 0x394   : > { %2503 = vrot.lane.b32.xlu0 %v9502_v39, %s7398_s22  ;;  %1747 = vrot.lane.b32.xlu1 %v9378_v58, %s7406_s16 }
 0x398   : > { %2535 = vrot.lane.b32.xlu0 %v9502_v39, %s7400_s15  ;;  %2567 = vrot.lane.b32.xlu1 %v9502_v39, %s7399_s29 }
 0x39b   : > { %v1740_v46 = vpop.permute.xlu1 %1739  ;;  %v1611_v37 = vpop.permute.xlu0 %1610 }
 0x39c   : > { %1762 = vst.msk [vmem:[#allocation3 + $0xe8] sm:$0xff] %vm1336_vm3, %v1740_v46  ;;  %2599 = vrot.lane.b32.xlu0 %v9502_v39, %s7407_s12  ;;  %1616 = vrot.lane.b32.xlu1 %v9381_v0, %s7398_s22 }
 0x39f   : > { %v1643_v51 = vpop.permute.xlu0 %1642 }
 0x3a0   : > { %2460 = vrot.lane.b32.xlu0 %v9526_v48, %s7391_s24  ;;  %1648 = vrot.lane.b32.xlu1 %v9381_v0, %s7400_s15 }
 0x3a3   : > { %v1675_v41 = vpop.permute.xlu0 %1674 }
 0x3a4   : > { %1698 = vst.msk [vmem:[#allocation3 + $0xd8] sm:$0xff] %vm1336_vm3, %v1675_v41  ;;  %1745 = vrot.lane.b32.xlu0 %v9381_v0, %s7406_s16  ;;  %1680 = vrot.lane.b32.xlu1 %v9381_v0, %s7399_s29 }
 0x3a7   : > { %v1708_v57 = vpop.permute.xlu0 %1707 }
 0x3a8   : > { %1730 = vst.msk [vmem:[#allocation3 + $0xe0] sm:$0xff] %vm1336_vm3, %v1708_v57  ;;  %2565 = vrot.lane.b32.xlu0 %v9526_v48, %s7399_s29  ;;  %1713 = vrot.lane.b32.xlu1 %v9381_v0, %s7407_s12 }
 0x3ac   : > { %1622 = vrot.lane.b32.xlu0 %v9392_v42, %s7398_s22  ;;  %2501 = vrot.lane.b32.xlu1 %v9526_v48, %s7398_s22 }
 0x3ad   : > { %v6166_v22 = vpop.f32.mrb[8].mxu0 }
 0x3ae   : > { %v3256_v29 = vpop.f32.mrb[9].mxu0  ;;  %v9595_v43 = vadd.f32 %v6166_v22, %v9427_v38 }
 0x3af   : > { %v9616_v31 = vadd.f32 %v3256_v29, %v9411_v20 }
 0x3b0   : > { %1654 = vrot.lane.b32.xlu0 %v9392_v42, %s7400_s15  ;;  %2533 = vrot.lane.b32.xlu1 %v9526_v48, %s7400_s15 }
 0x3b1   : > { %v6169_v49 = vpop.f32.mrb[10].mxu0 }
 0x3b2   : > { %v9550_v8 = vpop.f32.mrb[11].mxu0  ;;  %v9638_v46 = vadd.f32 %v6169_v49, %v9504_v14 }
 0x3b3   : > { %v9656_v14 = vadd.f32 %v9550_v8, %v9439_v35 }
 0x3b4   : > { %1686 = vrot.lane.b32.xlu0 %v9392_v42, %s7399_s29  ;;  %2597 = vrot.lane.b32.xlu1 %v9526_v48, %s7407_s12 }
 0x3b5   : > { %v9556_v56 = vpop.f32.mrb[12].mxu0 }
 0x3b6   : > { %v9558_v34 = vpop.f32.mrb[13].mxu0 }
 0x3b8   : > { %2507 = vrot.lane.b32.xlu0 %v9562_v24, %s7398_s22  ;;  %2466 = vrot.lane.b32.xlu1 %v9562_v24, %s7391_s24 }
 0x3b9   : > { %v9568_v16 = vpop.f32.mrb[14].mxu0 }
 0x3ba   : > { %v9570_v33 = vpop.f32.mrb[15].mxu0 }
 0x3bb   : > { %v6194_v25 = vpop.f32.mrb[8].mxu1 }
 0x3bc   : > { %v4107_v1 = vpop.f32.mrb[9].mxu1  ;;  %2464 = vrot.lane.b32.xlu0 %v9574_v18, %s7391_s24  ;;  %1620 = vrot.lane.b32.xlu1 %v9395_v13, %s7398_s22  ;;  %v9608_v50 = vadd.f32 %v6194_v25, %v9471_v59 }
 0x3bd   : > { %v9629_v20 = vadd.f32 %v4107_v1, %v9409_v62  ;;  %v9681_v1 = vadd.f32 %v9556_v56, %v9417_v45 }
 0x3be   : > { %11173 = vst [vmem:[#allocation14_spill] sm:$0xff] %v9608_v50 }
 0x3bf   : > { %v6197_v11 = vpop.f32.mrb[10].mxu1  ;;  %11174 = vst [vmem:[#allocation21_spill] sm:$0xff] %v9629_v20  ;;  %11177 = vst [vmem:[#allocation18_spill] sm:$0xff] %v9681_v1 }
 0x3c0   : > { %v9580_v17 = vpop.f32.mrb[11].mxu1  ;;  %2537 = vrot.lane.b32.xlu0 %v9574_v18, %s7400_s15  ;;  %1652 = vrot.lane.b32.xlu1 %v9395_v13, %s7400_s15  ;;  %v9646_v62 = vadd.f32 %v6197_v11, %v9514_v19 }
 0x3c1   : > { %v9672_v35 = vadd.f32 %v9580_v17, %v9495_v28 }
 0x3c2   : > { %11175 = vst [vmem:[#allocation22_spill] sm:$0xff] %v9646_v62 }
 0x3c3   : > { %v9586_v61 = vpop.f32.mrb[12].mxu1  ;;  %11176 = vst [vmem:[#allocation10_spill] sm:$0xff] %v9672_v35 }
 0x3c4   : > { %v9588_v9 = vpop.f32.mrb[13].mxu1  ;;  %2601 = vrot.lane.b32.xlu0 %v9574_v18, %s7407_s12  ;;  %1684 = vrot.lane.b32.xlu1 %v9395_v13, %s7399_s29  ;;  %v9690_v28 = vadd.f32 %v9586_v61, %v9370_v15 }
 0x3c6   : > { %v2560_v36 = vpop.permute.xlu1 %2559  ;;  %v2528_v4 = vpop.permute.xlu0 %2527  ;;  %11178 = vst [vmem:[#allocation12_spill] sm:$0xff] %v9690_v28 }
 0x3c7   : > { %2582 = vst.msk [vmem:[#allocation3 + $0xe0] sm:$0xff] %vm2476_vm9, %v2560_v36  ;;  %2550 = vst.msk [vmem:[#allocation3 + $0xd8] sm:$0xff] %vm2476_vm9, %v2528_v4  ;;  %v9599_v52 = vpop.f32.mrb[14].mxu1 }
 0x3c8   : > { %v9601_v12 = vpop.f32.mrb[15].mxu1  ;;  %3410 = vrot.lane.b32.xlu0 %v9595_v43, %s7400_s15  ;;  %2505 = vrot.lane.b32.xlu1 %v9574_v18, %s7398_s22 }
 0x3ca   : > { %v2592_v38 = vpop.permute.xlu0 %2591  ;;  %v1609_v40 = vpop.permute.xlu1 %1608 }
 0x3cb   : > { %2614 = vst.msk [vmem:[#allocation3 + $0xe8] sm:$0xff] %vm2476_vm9, %v2592_v38 }
 0x3cc   : > { %4261 = vrot.lane.b32.xlu0 %v9608_v50, %s7398_s22  ;;  %1717 = vrot.lane.b32.xlu1 %v9395_v13, %s7407_s12 }
 0x3ce   : > { %v1738_v7 = vpop.permute.xlu0 %1737  ;;  %v1641_v44 = vpop.permute.xlu1 %1640 }
 0x3cf   : > { %1761 = vst.msk [vmem:[#allocation3 + $0xd0] sm:$0xff] %vm1336_vm3, %v1738_v7  ;;  %v9720_v7 = vadd.f32 %v9558_v34, %v9413_v21 }
 0x3d0   : > { %3376 = vrot.lane.b32.xlu0 %v9616_v31, %s7398_s22  ;;  %1749 = vrot.lane.b32.xlu1 %v9395_v13, %s7406_s16 }
 0x3d2   : > { %v2558_v3 = vpop.permute.xlu0 %2557  ;;  %v1673_v54 = vpop.permute.xlu1 %1672 }
 0x3d3   : > { %1697 = vst.msk [vmem:[#allocation3 + $0xc0] sm:$0xff] %vm1336_vm3, %v1673_v54  ;;  %v9730_v54 = vadd.f32 %v9588_v9, %v9353_v32 }
 0x3d4   : > { %3440 = vrot.lane.b32.xlu0 %v9616_v31, %s7399_s29  ;;  %2569 = vrot.lane.b32.xlu1 %v9574_v18, %s7399_s29 }
 0x3d5   : > { %11179 = vst [vmem:[#allocation20_spill] sm:$0xff] %v9730_v54 }
 0x3d6   : > { %v1615_v59 = vpop.permute.xlu0 %1614  ;;  %v1706_v26 = vpop.permute.xlu1 %1705 }
 0x3d7   : > { %1729 = vst.msk [vmem:[#allocation3 + $0xc8] sm:$0xff] %vm1336_vm3, %v1706_v26 }
 0x3d8   : > { %2581 = vst.msk [vmem:[#allocation3 + $0xc8] sm:$0xff] %vm2476_vm9, %v2558_v3  ;;  %4291 = vrot.lane.b32.xlu0 %v9629_v20, %s7400_s15  ;;  %3378 = vrot.lane.b32.xlu1 %v9595_v43, %s7398_s22 }
 0x3da   : > { %v1647_v37 = vpop.permute.xlu0 %1646  ;;  %v2526_v51 = vpop.permute.xlu1 %2525 }
 0x3db   : > { %2549 = vst.msk [vmem:[#allocation3 + $0xc0] sm:$0xff] %vm2476_vm9, %v2526_v51 }
 0x3dc   : > { %3414 = vrot.lane.b32.xlu0 %v9638_v46, %s7400_s15  ;;  %3442 = vrot.lane.b32.xlu1 %v9595_v43, %s7399_s29 }
 0x3de   : > { %v1679_v41 = vpop.permute.xlu0 %1678  ;;  %v2590_v57 = vpop.permute.xlu1 %2589 }
 0x3df   : > { %1700 = vst.msk [vmem:[#allocation3 + $0x108] sm:$0xff] %vm1336_vm3, %v1679_v41 }
 0x3e0   : > { %2613 = vst.msk [vmem:[#allocation3 + $0xd0] sm:$0xff] %vm2476_vm9, %v2590_v57  ;;  %4265 = vrot.lane.b32.xlu0 %v9646_v62, %s7398_s22  ;;  %4293 = vrot.lane.b32.xlu1 %v9608_v50, %s7400_s15 }
 0x3e2   : > { %v1712_v22 = vpop.permute.xlu0 %1711  ;;  %v1744_v29 = vpop.permute.xlu1 %1743 }
 0x3e3   : > { %1732 = vst.msk [vmem:[#allocation3 + $0x110] sm:$0xff] %vm1336_vm3, %v1712_v22  ;;  %1764 = vst.msk [vmem:[#allocation3 + $0x118] sm:$0xff] %vm1336_vm3, %v1744_v29  ;;  %v9768_v22 = vadd.f32 %v9568_v16, %v9405_v2  ;;  %v9792_v2 = vadd.f32 %v9570_v33, %v9387_v5 }
 0x3e4   : > { %3380 = vrot.lane.b32.xlu0 %v9656_v14, %s7398_s22  ;;  %3408 = vrot.lane.b32.xlu1 %v9616_v31, %s7400_s15 }
 0x3e5   : > { %11180 = vst [vmem:[#allocation15_spill] sm:$0xff] %v9768_v22 }
 0x3e6   : > { %v2532_v19 = vpop.permute.xlu0 %2531  ;;  %v2564_v49 = vpop.permute.xlu1 %2563 }
 0x3e7   : > { %2552 = vst.msk [vmem:[#allocation3 + $0x108] sm:$0xff] %vm2476_vm9, %v2532_v19  ;;  %2584 = vst.msk [vmem:[#allocation3 + $0x110] sm:$0xff] %vm2476_vm9, %v2564_v49  ;;  %v9778_v49 = vadd.f32 %v9599_v52, %v9407_v53  ;;  %v9802_v52 = vadd.f32 %v9601_v12, %v9403_v6 }
 0x3e8   : > { %3444 = vrot.lane.b32.xlu0 %v9656_v14, %s7399_s29  ;;  %4259 = vrot.lane.b32.xlu1 %v9629_v20, %s7398_s22 }
 0x3e9   : > { %11181 = vst [vmem:[#allocation16_spill] sm:$0xff] %v9778_v49  ;;  %11182 = vst [vmem:[#allocation23_spill] sm:$0xff] %v9802_v52 }
 0x3ea   : > { %v2596_v8 = vpop.permute.xlu0 %2595  ;;  %v1613_v25 = vpop.permute.xlu1 %1612 }
 0x3eb   : > { %2616 = vst.msk [vmem:[#allocation3 + $0x118] sm:$0xff] %vm2476_vm9, %v2596_v8 }
 0x3ec   : > { %4295 = vrot.lane.b32.xlu0 %v9672_v35, %s7400_s15  ;;  %3382 = vrot.lane.b32.xlu1 %v9638_v46, %s7398_s22 }
 0x3ee   : > { %v1742_v11 = vpop.permute.xlu0 %1741  ;;  %v1645_v36 = vpop.permute.xlu1 %1644 }
 0x3ef   : > { %1763 = vst.msk [vmem:[#allocation3 + $0x100] sm:$0xff] %vm1336_vm3, %v1742_v11 }
 0x3f0   : > { %3346 = vrot.lane.b32.xlu0 %v9681_v1, %s7391_s24  ;;  %3446 = vrot.lane.b32.xlu1 %v9638_v46, %s7399_s29 }
 0x3f2   : > { %v2562_v17 = vpop.permute.xlu0 %2561  ;;  %v1677_v4 = vpop.permute.xlu1 %1676 }
 0x3f3   : > { %1699 = vst.msk [vmem:[#allocation3 + $0xf0] sm:$0xff] %vm1336_vm3, %v1677_v4 }
 0x3f4   : > { %4197 = vrot.lane.b32.xlu0 %v9690_v28, %s7392_s25  ;;  %4297 = vrot.lane.b32.xlu1 %v9646_v62, %s7400_s15 }
 0x3f6   : > { %v1619_v45 = vpop.permute.xlu0 %1618  ;;  %v1710_v56 = vpop.permute.xlu1 %1709 }
 0x3f7   : > { %1637 = vst.msk [vmem:[#allocation3 + $0x80] sm:$0xff] %vm1336_vm3, %v1619_v45  ;;  %1731 = vst.msk [vmem:[#allocation3 + $0xf8] sm:$0xff] %vm1336_vm3, %v1710_v56 }
 0x3f8   : > { %2490 = vst.msk [vmem:[#allocation3 + $0x80] sm:$0xff] %vm2476_vm9, %v9502_v39  ;;  %2583 = vst.msk [vmem:[#allocation3 + $0xf8] sm:$0xff] %vm2476_vm9, %v2562_v17  ;;  %3418 = vrot.lane.b32.xlu0 %v9681_v1, %s7400_s15  ;;  %3412 = vrot.lane.b32.xlu1 %v9656_v14, %s7400_s15 }
 0x3fa   : > { %v1651_v15 = vpop.permute.xlu0 %1650  ;;  %v2530_v61 = vpop.permute.xlu1 %2529 }
 0x3fb   : > { %1669 = vst.msk [vmem:[#allocation3 + $0x88] sm:$0xff] %vm1336_vm3, %v1651_v15 }
 0x3fc   : > { %2551 = vst.msk [vmem:[#allocation3 + $0xf0] sm:$0xff] %vm2476_vm9, %v2530_v61  ;;  %4269 = vrot.lane.b32.xlu0 %v9690_v28, %s7398_s22  ;;  %4263 = vrot.lane.b32.xlu1 %v9672_v35, %s7398_s22 }
 0x3fe   : > { %v1683_v38 = vpop.permute.xlu0 %1682  ;;  %v2594_v40 = vpop.permute.xlu1 %2593 }
 0x3ff   : > { %1702 = vst.msk [vmem:[#allocation3 + $0x138] sm:$0xff] %vm1336_vm3, %v1683_v38 }
 0x400   : > { %2615 = vst.msk [vmem:[#allocation3 + $0x100] sm:$0xff] %vm2476_vm9, %v2594_v40  ;;  %4301 = vrot.lane.b32.xlu0 %v9690_v28, %s7400_s15  ;;  %3313 = vrot.lane.b32.xlu1 %v9681_v1, %s7392_s25 }
 0x402   : > { %v1716_v44 = vpop.permute.xlu0 %1715  ;;  %v2463_v3 = vpop.permute.xlu1 %2462 }
 0x403   : > { %1734 = vst.msk [vmem:[#allocation3 + $0x140] sm:$0xff] %vm1336_vm3, %v1716_v44 }
 0x404   : > { %2482 = vst.msk [vmem:[#allocation3 + $0x78] sm:$0xff] %vm2476_vm9, %v2463_v3  ;;  %3311 = vrot.lane.b32.xlu0 %v9720_v7, %s7392_s25  ;;  %4164 = vrot.lane.b32.xlu1 %v9690_v28, %s7401_s30 }
 0x406   : > { %v2504_v59 = vpop.permute.xlu0 %2503  ;;  %v1748_v21 = vpop.permute.xlu1 %1747 }
 0x407   : > { %2522 = vst.msk [vmem:[#allocation3 + $0x88] sm:$0xff] %vm2476_vm9, %v2504_v59 }
 0x408   : > { %1766 = vst.msk [vmem:[#allocation3 + $0x148] sm:$0xff] %vm1336_vm3, %v1748_v21  ;;  %4162 = vrot.lane.b32.xlu0 %v9730_v54, %s7401_s30  ;;  %4229 = vrot.lane.b32.xlu1 %v9690_v28, %s7391_s24 }
 0x409   : > { %3373 = vst.msk [vmem:[#allocation3 + $0x88] sm:$0xff] %vm3327_vm10, %v9681_v1 }
 0x40a   : > { %v2536_v34 = vpop.permute.xlu0 %2535  ;;  %v2568_v26 = vpop.permute.xlu1 %2567 }
 0x40b   : > { %2554 = vst.msk [vmem:[#allocation3 + $0x138] sm:$0xff] %vm2476_vm9, %v2536_v34  ;;  %2586 = vst.msk [vmem:[#allocation3 + $0x140] sm:$0xff] %vm2476_vm9, %v2568_v26 }
 0x40c   : > { %4227 = vrot.lane.b32.xlu0 %v9730_v54, %s7391_s24  ;;  %3386 = vrot.lane.b32.xlu1 %v9681_v1, %s7398_s22 }
 0x40e   : > { %v2600_v32 = vpop.permute.xlu0 %2599  ;;  %v1617_v9 = vpop.permute.xlu1 %1616 }
 0x40f   : > { %2618 = vst.msk [vmem:[#allocation3 + $0x148] sm:$0xff] %vm2476_vm9, %v2600_v32 }
 0x410   : > { %1636 = vst.msk [vmem:[#allocation3 + $0x68] sm:$0xff] %vm1336_vm3, %v1617_v9  ;;  %3384 = vrot.lane.b32.xlu0 %v9720_v7, %s7398_s22  ;;  %3450 = vrot.lane.b32.xlu1 %v9681_v1, %s7399_s29 }
 0x411   : > { %2489 = vst.msk [vmem:[#allocation3 + $0x68] sm:$0xff] %vm2476_vm9, %v9526_v48 }
 0x412   : > { %v2461_v37 = vpop.permute.xlu0 %2460  ;;  %v1649_v51 = vpop.permute.xlu1 %1648 }
 0x413   : > { %2481 = vst.msk [vmem:[#allocation3 + $0x60] sm:$0xff] %vm2476_vm9, %v2461_v37 }
 0x414   : > { %1668 = vst.msk [vmem:[#allocation3 + $0x70] sm:$0xff] %vm1336_vm3, %v1649_v51  ;;  %3448 = vrot.lane.b32.xlu0 %v9720_v7, %s7399_s29  ;;  %3344 = vrot.lane.b32.xlu1 %v9720_v7, %s7391_s24 }
 0x416   : > { %v1746_v41 = vpop.permute.xlu0 %1745  ;;  %v1681_v57 = vpop.permute.xlu1 %1680 }
 0x417   : > { %1765 = vst.msk [vmem:[#allocation3 + $0x130] sm:$0xff] %vm1336_vm3, %v1746_v41  ;;  %1701 = vst.msk [vmem:[#allocation3 + $0x120] sm:$0xff] %vm1336_vm3, %v1681_v57 }
 0x418   : > { %4299 = vrot.lane.b32.xlu0 %v9730_v54, %s7400_s15  ;;  %4195 = vrot.lane.b32.xlu1 %v9730_v54, %s7392_s25 }
 0x41a   : > { %v2566_v29 = vpop.permute.xlu0 %2565  ;;  %v1714_v19 = vpop.permute.xlu1 %1713 }
 0x41b   : > { %1733 = vst.msk [vmem:[#allocation3 + $0x128] sm:$0xff] %vm1336_vm3, %v1714_v19 }
 0x41c   : > { %2585 = vst.msk [vmem:[#allocation3 + $0x128] sm:$0xff] %vm2476_vm9, %v2566_v29  ;;  %3350 = vrot.lane.b32.xlu0 %v9768_v22, %s7391_s24  ;;  %3416 = vrot.lane.b32.xlu1 %v9720_v7, %s7400_s15 }
 0x41e   : > { %v1623_v8 = vpop.permute.xlu0 %1622  ;;  %v2502_v25 = vpop.permute.xlu1 %2501 }
 0x41f   : > { %1639 = vst.msk [vmem:[#allocation3 + $0xb0] sm:$0xff] %vm1336_vm3, %v1623_v8 }
 0x420   : > { %2521 = vst.msk [vmem:[#allocation3 + $0x70] sm:$0xff] %vm2476_vm9, %v2502_v25  ;;  %2492 = vst.msk [vmem:[#allocation3 + $0xb0] sm:$0xff] %vm2476_vm9, %v9562_v24  ;;  %4201 = vrot.lane.b32.xlu0 %v9778_v49, %s7392_s25  ;;  %4267 = vrot.lane.b32.xlu1 %v9730_v54, %s7398_s22 }
 0x421   : > { %3372 = vst.msk [vmem:[#allocation3 + $0x70] sm:$0xff] %vm3327_vm10, %v9720_v7 }
 0x422   : > { %v1655_v53 = vpop.permute.xlu0 %1654  ;;  %v2534_v16 = vpop.permute.xlu1 %2533 }
 0x423   : > { %1671 = vst.msk [vmem:[#allocation3 + $0xb8] sm:$0xff] %vm1336_vm3, %v1655_v53 }
 0x424   : > { %2553 = vst.msk [vmem:[#allocation3 + $0x120] sm:$0xff] %vm2476_vm9, %v2534_v16  ;;  %3315 = vrot.lane.b32.xlu0 %v9792_v2, %s7392_s25  ;;  %3317 = vrot.lane.b32.xlu1 %v9768_v22, %s7392_s25 }
 0x426   : > { %v1687_v11 = vpop.permute.xlu0 %1686  ;;  %v2598_v36 = vpop.permute.xlu1 %2597 }
 0x427   : > { %1704 = vst.msk [vmem:[#allocation3 + $0x168] sm:$0xff] %vm1336_vm3, %v1687_v11 }
 0x428   : > { %2617 = vst.msk [vmem:[#allocation3 + $0x130] sm:$0xff] %vm2476_vm9, %v2598_v36  ;;  %4166 = vrot.lane.b32.xlu0 %v9802_v52, %s7401_s30  ;;  %4168 = vrot.lane.b32.xlu1 %v9778_v49, %s7401_s30 }
 0x42a   : > { %v2508_v5 = vpop.permute.xlu0 %2507  ;;  %v2467_v33 = vpop.permute.xlu1 %2466 }
 0x42b   : > { %2524 = vst.msk [vmem:[#allocation3 + $0xb8] sm:$0xff] %vm2476_vm9, %v2508_v5  ;;  %2484 = vst.msk [vmem:[#allocation3 + $0xa8] sm:$0xff] %vm2476_vm9, %v2467_v33 }
 0x42c   : > { %4231 = vrot.lane.b32.xlu0 %v9802_v52, %s7391_s24  ;;  %4233 = vrot.lane.b32.xlu1 %v9778_v49, %s7391_s24  ;;  %3375 = vst.msk [vmem:[#allocation3 + $0xb8] sm:$0xff] %vm3327_vm10, %v9768_v22 }
 0x42e   : > { %v2465_v6 = vpop.permute.xlu0 %2464  ;;  %v1621_v12 = vpop.permute.xlu1 %1620 }
 0x42f   : > { %2483 = vst.msk [vmem:[#allocation3 + $0x90] sm:$0xff] %vm2476_vm9, %v2465_v6 }
 0x430   : > { %1638 = vst.msk [vmem:[#allocation3 + $0x98] sm:$0xff] %vm1336_vm3, %v1621_v12  ;;  %3420 = vrot.lane.b32.xlu0 %v9792_v2, %s7400_s15  ;;  %3348 = vrot.lane.b32.xlu1 %v9792_v2, %s7391_s24 }
 0x431   : > { %2491 = vst.msk [vmem:[#allocation3 + $0x98] sm:$0xff] %vm2476_vm9, %v9574_v18 }
 0x432   : > { %v2538_v17 = vpop.permute.xlu0 %2537  ;;  %v1653_v4 = vpop.permute.xlu1 %1652 }
 0x433   : > { %1670 = vst.msk [vmem:[#allocation3 + $0xa0] sm:$0xff] %vm1336_vm3, %v1653_v4 }
 0x434   : > { %4271 = vrot.lane.b32.xlu0 %v9802_v52, %s7398_s22  ;;  %4199 = vrot.lane.b32.xlu1 %v9802_v52, %s7392_s25 }
 0x436   : > { %v2602_v45 = vpop.permute.xlu0 %2601  ;;  %v1685_v56 = vpop.permute.xlu1 %1684 }
 0x437   : > { %1703 = vst.msk [vmem:[#allocation3 + $0x150] sm:$0xff] %vm1336_vm3, %v1685_v56 }
 0x438   : > { %2555 = vst.msk [vmem:[#allocation3 + $0x150] sm:$0xff] %vm2476_vm9, %v2538_v17  ;;  %4303 = vrot.lane.b32.xlu0 %v9802_v52, %s7400_s15  ;;  %3388 = vrot.lane.b32.xlu1 %v9792_v2, %s7398_s22 }
 0x43a   : > { %v3411_v15 = vpop.permute.xlu0 %3410  ;;  %v2506_v61 = vpop.permute.xlu1 %2505 }
 0x43b   : > { %3433 = vst.msk [vmem:[#allocation3 + $0xe0] sm:$0xff] %vm3327_vm10, %v3411_v15 }
 0x43c   : > { %2523 = vst.msk [vmem:[#allocation3 + $0xa0] sm:$0xff] %vm2476_vm9, %v2506_v61  ;;  %2539 = vrot.lane.b32.xlu0 %v9562_v24, %s7400_s15  ;;  %3452 = vrot.lane.b32.xlu1 %v9792_v2, %s7399_s29 }
 0x43d   : > { %3374 = vst.msk [vmem:[#allocation3 + $0xa0] sm:$0xff] %vm3327_vm10, %v9792_v2 }
 0x43e   : > { %v4262_v38 = vpop.permute.xlu0 %4261  ;;  %v1718_v40 = vpop.permute.xlu1 %1717 }
 0x43f   : > { %4284 = vst.msk [vmem:[#allocation3 + $0xe0] sm:$0xff] %vm4178_vm11, %v4262_v38 }
 0x440   : > { %1735 = vst.msk [vmem:[#allocation3 + $0x158] sm:$0xff] %vm1336_vm3, %v1718_v40  ;;  %2603 = vrot.lane.b32.xlu0 %v9562_v24, %s7407_s12  ;;  %1719 = vrot.lane.b32.xlu1 %v9392_v42, %s7407_s12 }
 0x442   : > { %v3377_v44 = vpop.permute.xlu0 %3376  ;;  %v1750_v3 = vpop.permute.xlu1 %1749 }
 0x443   : > { %3400 = vst.msk [vmem:[#allocation3 + $0xc0] sm:$0xff] %vm3327_vm10, %v3377_v44 }
 0x444   : > { %1767 = vst.msk [vmem:[#allocation3 + $0x160] sm:$0xff] %vm1336_vm3, %v1750_v3  ;;  %3422 = vrot.lane.b32.xlu0 %v9768_v22, %s7400_s15  ;;  %1751 = vrot.lane.b32.xlu1 %v9392_v42, %s7406_s16 }
 0x445   : > { %4251 = vst.msk [vmem:[#allocation3 + $0xc0] sm:$0xff] %vm4178_vm11, %v9629_v20 }
 0x446   : > { %2619 = vst.msk [vmem:[#allocation3 + $0x160] sm:$0xff] %vm2476_vm9, %v2602_v45  ;;  %v3441_v59 = vpop.permute.xlu0 %3440  ;;  %v2570_v21 = vpop.permute.xlu1 %2569 }
 0x447   : > { %3464 = vst.msk [vmem:[#allocation3 + $0xd0] sm:$0xff] %vm3327_vm10, %v3441_v59 }
 0x448   : > { %2587 = vst.msk [vmem:[#allocation3 + $0x158] sm:$0xff] %vm2476_vm9, %v2570_v21  ;;  %4273 = vrot.lane.b32.xlu0 %v9778_v49, %s7398_s22  ;;  %2571 = vrot.lane.b32.xlu1 %v9562_v24, %s7399_s29 }
 0x44a   : > { %v4292_v34 = vpop.permute.xlu0 %4291  ;;  %v3379_v26 = vpop.permute.xlu1 %3378 }
 0x44b   : > { %4315 = vst.msk [vmem:[#allocation3 + $0xd0] sm:$0xff] %vm4178_vm11, %v4292_v34 }
 0x44c   : > { %3401 = vst.msk [vmem:[#allocation3 + $0xd8] sm:$0xff] %vm3327_vm10, %v3379_v26  ;;  %1802 = vrot.lane.b32.xlu0 %v9361_v47, %s7408_s19  ;;  %3390 = vrot.lane.b32.xlu1 %v9768_v22, %s7398_s22 }
 0x44d   : > { %4252 = vst.msk [vmem:[#allocation3 + $0xd8] sm:$0xff] %vm4178_vm11, %v9608_v50 }
 0x44e   : > { %v3415_v32 = vpop.permute.xlu0 %3414  ;;  %v3443_v9 = vpop.permute.xlu1 %3442 }
 0x44f   : > { %3435 = vst.msk [vmem:[#allocation3 + $0x110] sm:$0xff] %vm3327_vm10, %v3415_v32  ;;  %3465 = vst.msk [vmem:[#allocation3 + $0xe8] sm:$0xff] %vm3327_vm10, %v3443_v9 }
 0x450   : > { %1834 = vrot.lane.b32.xlu0 %v9361_v47, %s7396_s28  ;;  %3454 = vrot.lane.b32.xlu1 %v9768_v22, %s7399_s29 }
 0x452   : > { %v4266_v37 = vpop.permute.xlu0 %4265  ;;  %v4294_v51 = vpop.permute.xlu1 %4293 }
 0x453   : > { %4286 = vst.msk [vmem:[#allocation3 + $0x110] sm:$0xff] %vm4178_vm11, %v4266_v37  ;;  %4316 = vst.msk [vmem:[#allocation3 + $0xe8] sm:$0xff] %vm4178_vm11, %v4294_v51 }
 0x454   : > { %2653 = vrot.lane.b32.xlu0 %v9435_v10, %s7409_s20  ;;  %1769 = vrot.lane.b32.xlu1 %v9361_v47, %s7409_s20 }
 0x456   : > { %v3381_v41 = vpop.permute.xlu0 %3380  ;;  %v3409_v57 = vpop.permute.xlu1 %3408 }
 0x457   : > { %3402 = vst.msk [vmem:[#allocation3 + $0xf0] sm:$0xff] %vm3327_vm10, %v3381_v41  ;;  %3432 = vst.msk [vmem:[#allocation3 + $0xc8] sm:$0xff] %vm3327_vm10, %v3409_v57 }
 0x458   : > { %4253 = vst.msk [vmem:[#allocation3 + $0xf0] sm:$0xff] %vm4178_vm11, %v9672_v35  ;;  %3472 = vrot.lane.b32.xlu0 %v9616_v31, %s7407_s12  ;;  %4305 = vrot.lane.b32.xlu1 %v9778_v49, %s7400_s15 }
 0x45a   : > { %v3445_v29 = vpop.permute.xlu0 %3444  ;;  %v4260_v19 = vpop.permute.xlu1 %4259 }
 0x45b   : > { %3466 = vst.msk [vmem:[#allocation3 + $0x100] sm:$0xff] %vm3327_vm10, %v3445_v29 }
 0x45c   : > { %4283 = vst.msk [vmem:[#allocation3 + $0xc8] sm:$0xff] %vm4178_vm11, %v4260_v19  ;;  %3536 = vrot.lane.b32.xlu0 %v9616_v31, %s7409_s20  ;;  %2621 = vrot.lane.b32.xlu1 %v9435_v10, %s7406_s16 }
 0x45e   : > { %v4296_v47 = vpop.permute.xlu0 %4295  ;;  %v3383_v8 = vpop.permute.xlu1 %3382 }
 0x45f   : > { %4317 = vst.msk [vmem:[#allocation3 + $0x100] sm:$0xff] %vm4178_vm11, %v4296_v47 }
 0x460   : > { %3403 = vst.msk [vmem:[#allocation3 + $0x108] sm:$0xff] %vm3327_vm10, %v3383_v8  ;;  %4355 = vrot.lane.b32.xlu0 %v9629_v20, %s7407_s12  ;;  %2685 = vrot.lane.b32.xlu1 %v9435_v10, %s7408_s19 }
 0x461   : > { %4254 = vst.msk [vmem:[#allocation3 + $0x108] sm:$0xff] %vm4178_vm11, %v9646_v62 }
 0x462   : > { %v3347_v25 = vpop.permute.xlu0 %3346  ;;  %v3447_v53 = vpop.permute.xlu1 %3446 }
 0x463   : > { %3365 = vst.msk [vmem:[#allocation3 + $0x80] sm:$0xff] %vm3327_vm10, %v3347_v25  ;;  %3467 = vst.msk [vmem:[#allocation3 + $0x118] sm:$0xff] %vm3327_vm10, %v3447_v53 }
 0x464   : > { %1804 = vrot.lane.b32.xlu0 %v9358_v60, %s7408_s19  ;;  %3504 = vrot.lane.b32.xlu1 %v9616_v31, %s7406_s16 }
 0x466   : > { %v4198_v16 = vpop.permute.xlu0 %4197  ;;  %v4298_v11 = vpop.permute.xlu1 %4297 }
 0x467   : > { %4216 = vst.msk [vmem:[#allocation3 + $0x80] sm:$0xff] %vm4178_vm11, %v4198_v16  ;;  %4318 = vst.msk [vmem:[#allocation3 + $0x118] sm:$0xff] %vm4178_vm11, %v4298_v11 }
 0x468   : > { %1836 = vrot.lane.b32.xlu0 %v9358_v60, %s7396_s28  ;;  %4323 = vrot.lane.b32.xlu1 %v9629_v20, %s7399_s29 }
 0x46a   : > { %v3419_v36 = vpop.permute.xlu0 %3418  ;;  %v3413_v5 = vpop.permute.xlu1 %3412 }
 0x46b   : > { %3437 = vst.msk [vmem:[#allocation3 + $0x140] sm:$0xff] %vm3327_vm10, %v3419_v36  ;;  %3434 = vst.msk [vmem:[#allocation3 + $0xf8] sm:$0xff] %vm3327_vm10, %v3413_v5 }
 0x46c   : > { %2655 = vrot.lane.b32.xlu0 %v9415_v30, %s7409_s20  ;;  %1771 = vrot.lane.b32.xlu1 %v9358_v60, %s7409_s20 }
 0x46e   : > { %v4270_v33 = vpop.permute.xlu0 %4269  ;;  %v4264_v6 = vpop.permute.xlu1 %4263 }
 0x46f   : > { %4288 = vst.msk [vmem:[#allocation3 + $0x140] sm:$0xff] %vm4178_vm11, %v4270_v33  ;;  %4285 = vst.msk [vmem:[#allocation3 + $0xf8] sm:$0xff] %vm4178_vm11, %v4264_v6 }
 0x470   : > { %3474 = vrot.lane.b32.xlu0 %v9595_v43, %s7407_s12  ;;  %4387 = vrot.lane.b32.xlu1 %v9629_v20, %s7406_s16 }
 0x472   : > { %v4302_v12 = vpop.permute.xlu0 %4301  ;;  %v3314_v17 = vpop.permute.xlu1 %3313 }
 0x473   : > { %3333 = vst.msk [vmem:[#allocation3 + $0x78] sm:$0xff] %vm3327_vm10, %v3314_v17 }
 0x474   : > { %3538 = vrot.lane.b32.xlu0 %v9595_v43, %s7409_s20  ;;  %2623 = vrot.lane.b32.xlu1 %v9415_v30, %s7406_s16 }
 0x476   : > { %v3312_v60 = vpop.permute.xlu0 %3311  ;;  %v4165_v4 = vpop.permute.xlu1 %4164 }
 0x477   : > { %3332 = vst.msk [vmem:[#allocation3 + $0x60] sm:$0xff] %vm3327_vm10, %v3312_v60 }
 0x478   : > { %4184 = vst.msk [vmem:[#allocation3 + $0x78] sm:$0xff] %vm4178_vm11, %v4165_v4  ;;  %4357 = vrot.lane.b32.xlu0 %v9608_v50, %s7407_s12  ;;  %2687 = vrot.lane.b32.xlu1 %v9415_v30, %s7408_s19 }
 0x47a   : > { %v4163_v45 = vpop.permute.xlu0 %4162  ;;  %v4230_v56 = vpop.permute.xlu1 %4229 }
 0x47b   : > { %4183 = vst.msk [vmem:[#allocation3 + $0x60] sm:$0xff] %vm4178_vm11, %v4163_v45  ;;  %4248 = vst.msk [vmem:[#allocation3 + $0x88] sm:$0xff] %vm4178_vm11, %v4230_v56 }
 0x47c   : > { %1806 = vrot.lane.b32.xlu0 %v9373_v55, %s7408_s19  ;;  %3506 = vrot.lane.b32.xlu1 %v9595_v43, %s7406_s16 }
 0x47e   : > { %v4228_v15 = vpop.permute.xlu0 %4227  ;;  %v3387_v61 = vpop.permute.xlu1 %3386 }
 0x47f   : > { %4247 = vst.msk [vmem:[#allocation3 + $0x70] sm:$0xff] %vm4178_vm11, %v4228_v15 }
 0x480   : > { %3405 = vst.msk [vmem:[#allocation3 + $0x138] sm:$0xff] %vm3327_vm10, %v3387_v61  ;;  %1838 = vrot.lane.b32.xlu0 %v9373_v55, %s7396_s28  ;;  %4325 = vrot.lane.b32.xlu1 %v9608_v50, %s7399_s29  ;;  %v7350_v61 = vld [vmem:[%s7544_s23] sm:$0xff] }
 0x481   : > { %4256 = vst.msk [vmem:[#allocation3 + $0x138] sm:$0xff] %vm4178_vm11, %v9690_v28 }
 0x482   : > { %v3385_v38 = vpop.permute.xlu0 %3384  ;;  %v3451_v40 = vpop.permute.xlu1 %3450 }
 0x483   : > { %3404 = vst.msk [vmem:[#allocation3 + $0x120] sm:$0xff] %vm3327_vm10, %v3385_v38  ;;  %3469 = vst.msk [vmem:[#allocation3 + $0x148] sm:$0xff] %vm3327_vm10, %v3451_v40  ;;  %v4422_v40 = vld [vmem:[#allocation3 + $0x7c] sm:$0xff] }
 0x484   : > { %4255 = vst.msk [vmem:[#allocation3 + $0x120] sm:$0xff] %vm4178_vm11, %v9730_v54  ;;  %4320 = vst.msk [vmem:[#allocation3 + $0x148] sm:$0xff] %vm4178_vm11, %v4302_v12  ;;  %2657 = vrot.lane.b32.xlu0 %v9481_v23, %s7409_s20  ;;  %1773 = vrot.lane.b32.xlu1 %v9373_v55, %s7409_s20  ;;  %v7381_v54 = vld [vmem:[%s7544_s23 + $0xf8] sm:$0xff] }
 0x486   : > { %v3449_v44 = vpop.permute.xlu0 %3448  ;;  %v3345_v3 = vpop.permute.xlu1 %3344 }
 0x487   : > { %3468 = vst.msk [vmem:[#allocation3 + $0x130] sm:$0xff] %vm3327_vm10, %v3449_v44  ;;  %3364 = vst.msk [vmem:[#allocation3 + $0x68] sm:$0xff] %vm3327_vm10, %v3345_v3 }
 0x488   : > { %3476 = vrot.lane.b32.xlu0 %v9656_v14, %s7407_s12  ;;  %4389 = vrot.lane.b32.xlu1 %v9608_v50, %s7406_s16 }
 0x48a   : > { %v4300_v59 = vpop.permute.xlu0 %4299  ;;  %v4196_v21 = vpop.permute.xlu1 %4195 }
 0x48b   : > { %4319 = vst.msk [vmem:[#allocation3 + $0x130] sm:$0xff] %vm4178_vm11, %v4300_v59  ;;  %4215 = vst.msk [vmem:[#allocation3 + $0x68] sm:$0xff] %vm4178_vm11, %v4196_v21  ;;  %v7351_v21 = vld [vmem:[%s7544_s23 + $0x10] sm:$0xff] }
 0x48c   : > { %3540 = vrot.lane.b32.xlu0 %v9656_v14, %s7409_s20  ;;  %2625 = vrot.lane.b32.xlu1 %v9481_v23, %s7406_s16 }
 0x48e   : > { %v3351_v55 = vpop.permute.xlu0 %3350  ;;  %v3417_v34 = vpop.permute.xlu1 %3416 }
 0x48f   : > { %3367 = vst.msk [vmem:[#allocation3 + $0xb0] sm:$0xff] %vm3327_vm10, %v3351_v55  ;;  %3436 = vst.msk [vmem:[#allocation3 + $0x128] sm:$0xff] %vm3327_vm10, %v3417_v34  ;;  %v10050_v55 = vadd.f32 %v7351_v21, %v4422_v40  ;;  %v4423_v34 = vld [vmem:[#allocation3 + $0x84] sm:$0xff] }
 0x490   : > { %4359 = vrot.lane.b32.xlu0 %v9672_v35, %s7407_s12  ;;  %2689 = vrot.lane.b32.xlu1 %v9481_v23, %s7408_s19  ;;  %v7357_v40 = vld [vmem:[%s7544_s23 + $0x28] sm:$0xff] }
 0x491   : > { %11184 = vst [vmem:[#allocation24_spill] sm:$0xff] %v10050_v55 }
 0x492   : > { %v4202_v26 = vpop.permute.xlu0 %4201  ;;  %v4268_v32 = vpop.permute.xlu1 %4267  ;;  %v4420_v45 = vld [vmem:[#allocation3 + $0x64] sm:$0xff] }
 0x493   : > { %4218 = vst.msk [vmem:[#allocation3 + $0xb0] sm:$0xff] %vm4178_vm11, %v4202_v26  ;;  %4287 = vst.msk [vmem:[#allocation3 + $0x128] sm:$0xff] %vm4178_vm11, %v4268_v32  ;;  %v10043_v38 = vadd.f32 %v7350_v61, %v4420_v45 }
 0x494   : > { %1808 = vrot.lane.b32.xlu0 %v9368_v27, %s7408_s19  ;;  %3508 = vrot.lane.b32.xlu1 %v9656_v14, %s7406_s16 }
 0x495   : > { %11183 = vst [vmem:[#allocation17_spill] sm:$0xff] %v10043_v38  ;;  %v4486_v59 = vsel %vm421_vm0, %v10043_v38, 0.0 }
 0x496   : > { %v3316_v9 = vpop.permute.xlu0 %3315  ;;  %v3318_v37 = vpop.permute.xlu1 %3317 }
 0x497   : > { %3334 = vst.msk [vmem:[#allocation3 + $0x90] sm:$0xff] %vm3327_vm10, %v3316_v9  ;;  %3335 = vst.msk [vmem:[#allocation3 + $0xa8] sm:$0xff] %vm3327_vm10, %v3318_v37  ;;  %v4492_v9 = vsel %vm421_vm0, %v10050_v55, 0.0  ;;  %v7352_v37 = vld [vmem:[%s7544_s23 + $0x18] sm:$0xff] }
 0x498   : > { %1840 = vrot.lane.b32.xlu0 %v9368_v27, %s7396_s28  ;;  %4327 = vrot.lane.b32.xlu1 %v9672_v35, %s7399_s29 }
 0x49a   : > { %v4167_v51 = vpop.permute.xlu0 %4166  ;;  %v4169_v41 = vpop.permute.xlu1 %4168 }
 0x49b   : > { %4185 = vst.msk [vmem:[#allocation3 + $0x90] sm:$0xff] %vm4178_vm11, %v4167_v51  ;;  %4186 = vst.msk [vmem:[#allocation3 + $0xa8] sm:$0xff] %vm4178_vm11, %v4169_v41  ;;  %v10057_v51 = vadd.f32 %v7352_v37, %v4423_v34 }
 0x49c   : > { %2659 = vrot.lane.b32.xlu0 %v9465_v63, %s7409_s20  ;;  %1775 = vrot.lane.b32.xlu1 %v9368_v27, %s7409_s20 }
 0x49d   : > { %11185 = vst [vmem:[#allocation19_spill] sm:$0xff] %v10057_v51 }
 0x49e   : > { %v4232_v57 = vpop.permute.xlu0 %4231  ;;  %v4234_v29 = vpop.permute.xlu1 %4233 }
 0x49f   : > { %4249 = vst.msk [vmem:[#allocation3 + $0xa0] sm:$0xff] %vm4178_vm11, %v4232_v57  ;;  %4250 = vst.msk [vmem:[#allocation3 + $0xb8] sm:$0xff] %vm4178_vm11, %v4234_v29 }
 0x4a0   : > { %3478 = vrot.lane.b32.xlu0 %v9638_v46, %s7407_s12  ;;  %4391 = vrot.lane.b32.xlu1 %v9672_v35, %s7406_s16 }
 0x4a2   : > { %v3421_v19 = vpop.permute.xlu0 %3420  ;;  %v3349_v47 = vpop.permute.xlu1 %3348 }
 0x4a3   : > { %3438 = vst.msk [vmem:[#allocation3 + $0x158] sm:$0xff] %vm3327_vm10, %v3421_v19  ;;  %3366 = vst.msk [vmem:[#allocation3 + $0x98] sm:$0xff] %vm3327_vm10, %v3349_v47  ;;  %v4495_v19 = vsel %vm421_vm0, %v10057_v51, 0.0  ;;  %v7353_v47 = vld [vmem:[%s7544_s23 + $0x20] sm:$0xff] }
 0x4a4   : > { %3542 = vrot.lane.b32.xlu0 %v9638_v46, %s7409_s20  ;;  %2627 = vrot.lane.b32.xlu1 %v9465_v63, %s7406_s16 }
 0x4a6   : > { %v4272_v27 = vpop.permute.xlu0 %4271  ;;  %v4200_v8 = vpop.permute.xlu1 %4199 }
 0x4a7   : > { %4289 = vst.msk [vmem:[#allocation3 + $0x158] sm:$0xff] %vm4178_vm11, %v4272_v27  ;;  %4217 = vst.msk [vmem:[#allocation3 + $0x98] sm:$0xff] %vm4178_vm11, %v4200_v8  ;;  %v4426_v8 = vld [vmem:[#allocation3 + $0xac] sm:$0xff] }
 0x4a8   : > { %4361 = vrot.lane.b32.xlu0 %v9646_v62, %s7407_s12  ;;  %2691 = vrot.lane.b32.xlu1 %v9465_v63, %s7408_s19 }
 0x4aa   : > { %v4304_v25 = vpop.permute.xlu0 %4303  ;;  %v3389_v53 = vpop.permute.xlu1 %3388 }
 0x4ab   : > { %3406 = vst.msk [vmem:[#allocation3 + $0x150] sm:$0xff] %vm3327_vm10, %v3389_v53 }
 0x4ac   : > { %4257 = vst.msk [vmem:[#allocation3 + $0x150] sm:$0xff] %vm4178_vm11, %v9802_v52  ;;  %3510 = vrot.lane.b32.xlu1 %v9638_v46, %s7406_s16  ;;  %v7377_v52 = vld [vmem:[%s7544_s23 + $0xd8] sm:$0xff] }
 0x4ae   : > { %v2540_v16 = vpop.permute.xlu0 %2539  ;;  %v3453_v11 = vpop.permute.xlu1 %3452  ;;  %v4424_v41 = vld [vmem:[#allocation3 + $0x94] sm:$0xff] }
 0x4af   : > { %2556 = vst.msk [vmem:[#allocation3 + $0x168] sm:$0xff] %vm2476_vm9, %v2540_v16  ;;  %v10063_v27 = vadd.f32 %v7353_v47, %v4424_v41  ;;  %v7359_v41 = vld [vmem:[%s7544_s23 + $0x38] sm:$0xff] }
 0x4b0   : > { %3470 = vst.msk [vmem:[#allocation3 + $0x160] sm:$0xff] %vm3327_vm10, %v3453_v11  ;;  %4329 = vrot.lane.b32.xlu1 %v9646_v62, %s7399_s29 }
 0x4b1   : > { %4321 = vst.msk [vmem:[#allocation3 + $0x160] sm:$0xff] %vm4178_vm11, %v4304_v25  ;;  %11186 = vst [vmem:[#allocation8_spill] sm:$0xff] %v10063_v27  ;;  %v4421_v25 = vld [vmem:[#allocation3 + $0x6c] sm:$0xff]  ;;  %v4498_v11 = vsel %vm421_vm0, %v10063_v27, 0.0 }
 0x4b2   : > { %v2604_v36 = vpop.permute.xlu0 %2603  ;;  %v1720_v5 = vpop.permute.xlu1 %1719 }
 0x4b3   : > { %1736 = vst.msk [vmem:[#allocation3 + $0x170] sm:$0xff] %vm1336_vm3, %v1720_v5 }
 0x4b4   : > { %4393 = vrot.lane.b32.xlu1 %v9646_v62, %s7406_s16 }
 0x4b6   : > { %v3423_v33 = vpop.permute.xlu0 %3422  ;;  %v1752_v6 = vpop.permute.xlu1 %1751 }
 0x4b7   : > { %1768 = vst.msk [vmem:[#allocation3 + $0x178] sm:$0xff] %vm1336_vm3, %v1752_v6 }
 0x4b8   : > { %2620 = vst.msk [vmem:[#allocation3 + $0x178] sm:$0xff] %vm2476_vm9, %v2604_v36  ;;  %v7354_v36 = vld [vmem:[%s7544_s23 + $0x30] sm:$0xff] }
 0x4b9   : > { %v10070_v5 = vadd.f32 %v7354_v36, %v4426_v8  ;;  %v7361_v36 = vld [vmem:[%s7544_s23 + $0x48] sm:$0xff] }
 0x4ba   : > { %v4274_v12 = vpop.permute.xlu0 %4273  ;;  %v2572_v17 = vpop.permute.xlu1 %2571 }
 0x4bb   : > { %2588 = vst.msk [vmem:[#allocation3 + $0x170] sm:$0xff] %vm2476_vm9, %v2572_v17  ;;  %11187 = vst [vmem:[#allocation4_spill] sm:$0xff] %v10070_v5  ;;  %v4425_v17 = vld [vmem:[#allocation3 + $0x9c] sm:$0xff]  ;;  %v4504_v45 = vsel %vm421_vm0, %v10070_v5, 0.0 }
 0x4bc   : > { %3439 = vst.msk [vmem:[#allocation3 + $0x170] sm:$0xff] %vm3327_vm10, %v3423_v33  ;;  %v7355_v33 = vld [vmem:[%s7544_s23 + $0x8] sm:$0xff] }
 0x4bd   : > { %4290 = vst.msk [vmem:[#allocation3 + $0x170] sm:$0xff] %vm4178_vm11, %v4274_v12  ;;  %v10074_v6 = vadd.f32 %v7355_v33, %v4421_v25  ;;  %v4428_v12 = vld [vmem:[#allocation3 + $0xc4] sm:$0xff] }
 0x4be   : > { %v1803_v60 = vpop.permute.xlu0 %1802  ;;  %v3391_v4 = vpop.permute.xlu1 %3390 }
 0x4bf   : > { %1826 = vst.msk [vmem:[#allocation3 + $0x188] sm:$0xff] %vm1336_vm3, %v1803_v60  ;;  %11188 = vst [vmem:[#allocation5_spill] sm:$0xff] %v10074_v6  ;;  %v4489_v61 = vsel %vm421_vm0, %v10074_v6, 0.0 }
 0x4c0   : > { %3407 = vst.msk [vmem:[#allocation3 + $0x168] sm:$0xff] %vm3327_vm10, %v3391_v4 }
 0x4c1   : > { %4258 = vst.msk [vmem:[#allocation3 + $0x168] sm:$0xff] %vm4178_vm11, %v9778_v49 }
 0x4c2   : > { %v1835_v56 = vpop.permute.xlu0 %1834  ;;  %v3455_v15 = vpop.permute.xlu1 %3454 }
 0x4c3   : > { %1858 = vst.msk [vmem:[#allocation3 + $0x190] sm:$0xff] %vm1336_vm3, %v1835_v56  ;;  %v7356_v56 = vld [vmem:[%s7544_s23 + $0x40] sm:$0xff] }
 0x4c4   : > { %3471 = vst.msk [vmem:[#allocation3 + $0x178] sm:$0xff] %vm3327_vm10, %v3455_v15  ;;  %v10080_v15 = vadd.f32 %v7356_v56, %v4428_v12  ;;  %v4434_v12 = vld [vmem:[#allocation3 + $0x10c] sm:$0xff] }
 0x4c5   : > { %v7362_v56 = vld [vmem:[%s7544_s23 + $0x70] sm:$0xff] }
 0x4c6   : > { %v2654_v44 = vpop.permute.xlu0 %2653  ;;  %v1770_v3 = vpop.permute.xlu1 %1769  ;;  %11189 = vst [vmem:[#allocation9_spill] sm:$0xff] %v10080_v15 }
 0x4c7   : > { %2677 = vst.msk [vmem:[#allocation3 + $0x188] sm:$0xff] %vm2476_vm9, %v2654_v44  ;;  %4487 = vadd.xlane.f32.xlu0 %v4486_v59  ;;  %v10087_v44 = vadd.f32 %v7357_v40, %v4425_v17  ;;  %v4427_v59 = vld [vmem:[#allocation3 + $0xb4] sm:$0xff]  ;;  %v4431_v17 = vld [vmem:[#allocation3 + $0xe4] sm:$0xff] }
 0x4c8   : > { %1794 = vst.msk [vmem:[#allocation3 + $0x180] sm:$0xff] %vm1336_vm3, %v1770_v3  ;;  %v4430_v3 = vld [vmem:[#allocation3 + $0xdc] sm:$0xff] }
 0x4c9   : > { %11190 = vst [vmem:[#allocation6_spill] sm:$0xff] %v10087_v44  ;;  %v4501_v37 = vsel %vm421_vm0, %v10087_v44, 0.0 }
 0x4ca   : > { %v3473_v26 = vpop.permute.xlu0 %3472  ;;  %v4306_v32 = vpop.permute.xlu1 %4305 }
 0x4cb   : > { %4322 = vst.msk [vmem:[#allocation3 + $0x178] sm:$0xff] %vm4178_vm11, %v4306_v32  ;;  %4493 = vadd.xlane.f32.xlu0 %v4492_v9  ;;  %v7358_v32 = vld [vmem:[%s7544_s23 + $0x50] sm:$0xff] }
 0x4cc   : > { %v10093_v9 = vadd.f32 %v7358_v32, %v4430_v3  ;;  %v7363_v3 = vld [vmem:[%s7544_s23 + $0x58] sm:$0xff] }
 0x4ce   : > { %v3537_v57 = vpop.permute.xlu0 %3536  ;;  %v2622_v29 = vpop.permute.xlu1 %2621  ;;  %11191 = vst [vmem:[#allocation11_spill] sm:$0xff] %v10093_v9  ;;  %v4516_v25 = vsel %vm421_vm0, %v10093_v9, 0.0 }
 0x4cf   : > { %2645 = vst.msk [vmem:[#allocation3 + $0x180] sm:$0xff] %vm2476_vm9, %v2622_v29  ;;  %4496 = vadd.xlane.f32.xlu0 %v4495_v19  ;;  %v4432_v29 = vld [vmem:[#allocation3 + $0xf4] sm:$0xff]  ;;  %v4429_v19 = vld [vmem:[#allocation3 + $0xcc] sm:$0xff] }
 0x4d0   : > { %3496 = vst.msk [vmem:[#allocation3 + $0x180] sm:$0xff] %vm3327_vm10, %v3473_v26  ;;  %v4510_v26 = vsel %vm421_vm0, %v10080_v15, 0.0  ;;  %v10112_v33 = vadd.f32 %v7361_v36, %v4429_v19 }
 0x4d2   : > { %v4356_v53 = vpop.permute.xlu0 %4355  ;;  %v2686_v16 = vpop.permute.xlu1 %2685  ;;  %11194 = vst [vmem:[#allocation25_spill] sm:$0xff] %v10112_v33  ;;  %v4513_v40 = vsel %vm421_vm0, %v10112_v33, 0.0 }
 0x4d3   : > { %2709 = vst.msk [vmem:[#allocation3 + $0x190] sm:$0xff] %vm2476_vm9, %v2686_v16  ;;  %4499 = vadd.xlane.f32.xlu0 %v4498_v11 }
 0x4d4   : > { %3560 = vst.msk [vmem:[#allocation3 + $0x190] sm:$0xff] %vm3327_vm10, %v3537_v57  ;;  %v10100_v57 = vadd.f32 %v7359_v41, %v4427_v59  ;;  %v10123_v59 = vadd.f32 %v7363_v3, %v4431_v17  ;;  %v7364_v41 = vld [vmem:[%s7544_s23 + $0x80] sm:$0xff]  ;;  %v7366_v17 = vld [vmem:[%s7544_s23 + $0x90] sm:$0xff] }
 0x4d5   : > { %v4437_v3 = vld [vmem:[#allocation3 + $0x12c] sm:$0xff] }
 0x4d6   : > { %v1805_v60 = vpop.permute.xlu0 %1804  ;;  %v3505_v4 = vpop.permute.xlu1 %3504  ;;  %11192 = vst [vmem:[#allocation7_spill] sm:$0xff] %v10100_v57  ;;  %v4507_v11 = vsel %vm421_vm0, %v10100_v57, 0.0  ;;  %11196 = vst [vmem:[#allocation27_spill] sm:$0xff] %v10123_v59  ;;  %v4519_v19 = vsel %vm421_vm0, %v10123_v59, 0.0 }
 0x4d7   : > { %1827 = vst.msk [vmem:[#allocation3 + $0x1a0] sm:$0xff] %vm1336_vm3, %v1805_v60  ;;  %4505 = vadd.xlane.f32.xlu0 %v4504_v45 }
 0x4d8   : > { %3528 = vst.msk [vmem:[#allocation3 + $0x188] sm:$0xff] %vm3327_vm10, %v3505_v4  ;;  %4490 = vadd.xlane.f32.xlu1 %v4489_v61  ;;  %v10117_v61 = vadd.f32 %v7362_v56, %v4434_v12  ;;  %v7367_v56 = vld [vmem:[%s7544_s23 + $0x78] sm:$0xff] }
 0x4d9   : > { %4379 = vst.msk [vmem:[#allocation3 + $0x188] sm:$0xff] %vm4178_vm11, %v4356_v53  ;;  %v7360_v53 = vld [vmem:[%s7544_s23 + $0x60] sm:$0xff] }
 0x4da   : > { %v1837_v21 = vpop.permute.xlu0 %1836  ;;  %v4324_v34 = vpop.permute.xlu1 %4323  ;;  %v10105_v16 = vadd.f32 %v7360_v53, %v4432_v29  ;;  %11195 = vst [vmem:[#allocation26_spill] sm:$0xff] %v10117_v61  ;;  %v4435_v53 = vld [vmem:[#allocation3 + $0x114] sm:$0xff] }
 0x4db   : > { %1859 = vst.msk [vmem:[#allocation3 + $0x1a8] sm:$0xff] %vm1336_vm3, %v1837_v21  ;;  %4511 = vadd.xlane.f32.xlu0 %v4510_v26  ;;  %v4436_v21 = vld [vmem:[#allocation3 + $0x124] sm:$0xff] }
 0x4dc   : > { %4347 = vst.msk [vmem:[#allocation3 + $0x180] sm:$0xff] %vm4178_vm11, %v4324_v34  ;;  %4502 = vadd.xlane.f32.xlu1 %v4501_v37  ;;  %11193 = vst [vmem:[#allocation13_spill] sm:$0xff] %v10105_v16  ;;  %v4522_v45 = vsel %vm421_vm0, %v10105_v16, 0.0  ;;  %v4433_v34 = vld [vmem:[#allocation3 + $0xfc] sm:$0xff]  ;;  %v4528_v37 = vsel %vm421_vm0, %v10117_v61, 0.0  ;;  %v10128_v29 = vadd.f32 %v7364_v41, %v4436_v21 }
 0x4de   : > { %v2656_v47 = vpop.permute.xlu0 %2655  ;;  %v1772_v8 = vpop.permute.xlu1 %1771  ;;  %11197 = vst [vmem:[#allocation28_spill] sm:$0xff] %v10128_v29  ;;  %v4534_v12 = vsel %vm421_vm0, %v10128_v29, 0.0 }
 0x4df   : > { %2678 = vst.msk [vmem:[#allocation3 + $0x1a0] sm:$0xff] %vm2476_vm9, %v2656_v47  ;;  %4517 = vadd.xlane.f32.xlu0 %v4516_v25  ;;  %v7365_v47 = vld [vmem:[%s7544_s23 + $0x68] sm:$0xff]  ;;  %v4438_v25 = vld [vmem:[#allocation3 + $0x13c] sm:$0xff] }
 0x4e0   : > { %1795 = vst.msk [vmem:[#allocation3 + $0x198] sm:$0xff] %vm1336_vm3, %v1772_v8  ;;  %4508 = vadd.xlane.f32.xlu1 %v4507_v11  ;;  %v10134_v8 = vadd.f32 %v7365_v47, %v4433_v34 }
 0x4e2   : > { %v3475_v60 = vpop.permute.xlu0 %3474  ;;  %v4388_v4 = vpop.permute.xlu1 %4387  ;;  %11198 = vst [vmem:[#allocation29_spill] sm:$0xff] %v10134_v8 }
 0x4e3   : > { %4411 = vst.msk [vmem:[#allocation3 + $0x190] sm:$0xff] %vm4178_vm11, %v4388_v4  ;;  %4523 = vadd.xlane.f32.xlu0 %v4522_v45  ;;  %v10140_v4 = vadd.f32 %v7366_v17, %v4438_v25  ;;  %v4525_v45 = vsel %vm421_vm0, %v10134_v8, 0.0  ;;  %v4442_v25 = vld [vmem:[#allocation3 + $0x16c] sm:$0xff] }
 0x4e4   : > { %4514 = vadd.xlane.f32.xlu1 %v4513_v40  ;;  %v4440_v40 = vld [vmem:[#allocation3 + $0x154] sm:$0xff] }
 0x4e5   : > { %11199 = vst [vmem:[#allocation30_spill] sm:$0xff] %v10140_v4 }
 0x4e6   : > { %v3539_v26 = vpop.permute.xlu0 %3538  ;;  %v2624_v32 = vpop.permute.xlu1 %2623 }
 0x4e7   : > { %2646 = vst.msk [vmem:[#allocation3 + $0x198] sm:$0xff] %vm2476_vm9, %v2624_v32  ;;  %4529 = vadd.xlane.f32.xlu0 %v4528_v37  ;;  %v4540_v32 = vsel %vm421_vm0, %v10140_v4, 0.0  ;;  %v7368_v37 = vld [vmem:[%s7544_s23 + $0xa0] sm:$0xff] }
 0x4e8   : > { %3497 = vst.msk [vmem:[#allocation3 + $0x198] sm:$0xff] %vm3327_vm10, %v3475_v60  ;;  %4520 = vadd.xlane.f32.xlu1 %v4519_v19  ;;  %v10146_v60 = vadd.f32 %v7367_v56, %v4435_v53  ;;  %v10152_v41 = vadd.f32 %v7368_v37, %v4440_v40  ;;  %v4439_v53 = vld [vmem:[#allocation3 + $0x144] sm:$0xff]  ;;  %v7371_v40 = vld [vmem:[%s7544_s23 + $0x98] sm:$0xff] }
 0x4ea   : > { %v4358_v11 = vpop.permute.xlu0 %4357  ;;  %v2688_v36 = vpop.permute.xlu1 %2687  ;;  %11200 = vst [vmem:[#allocation31_spill] sm:$0xff] %v10146_v60  ;;  %11201 = vst [vmem:[#allocation32_spill] sm:$0xff] %v10152_v41  ;;  %v4531_v19 = vsel %vm421_vm0, %v10146_v60, 0.0  ;;  %v4546_v17 = vsel %vm421_vm0, %v10152_v41, 0.0 }
 0x4eb   : > { %2710 = vst.msk [vmem:[#allocation3 + $0x1a8] sm:$0xff] %vm2476_vm9, %v2688_v36  ;;  %4535 = vadd.xlane.f32.xlu0 %v4534_v12 }
 0x4ec   : > { %3561 = vst.msk [vmem:[#allocation3 + $0x1a8] sm:$0xff] %vm3327_vm10, %v3539_v26  ;;  %4526 = vadd.xlane.f32.xlu1 %v4525_v45  ;;  %v7369_v26 = vld [vmem:[%s7544_s23 + $0x88] sm:$0xff]  ;;  %v7370_v45 = vld [vmem:[%s7544_s23 + $0xb0] sm:$0xff] }
 0x4ed   : > { %v10159_v47 = vadd.f32 %v7369_v26, %v4437_v3  ;;  %v10165_v56 = vadd.f32 %v7370_v45, %v4442_v25  ;;  %v10172_v3 = vadd.f32 %v7371_v40, %v4439_v53  ;;  %v7372_v26 = vld [vmem:[%s7544_s23 + $0xc0] sm:$0xff] }
 0x4ee   : > { %v1807_v21 = vpop.permute.xlu0 %1806  ;;  %v3507_v34 = vpop.permute.xlu1 %3506 }
 0x4ef   : > { %1828 = vst.msk [vmem:[#allocation3 + $0x1b8] sm:$0xff] %vm1336_vm3, %v1807_v21  ;;  %4541 = vadd.xlane.f32.xlu0 %v4540_v32  ;;  %11202 = vst [vmem:[#allocation33_spill] sm:$0xff] %v10159_v47  ;;  %v4444_v21 = vld [vmem:[#allocation3 + $0x184] sm:$0xff]  ;;  %v4543_v53 = vsel %vm421_vm0, %v10172_v3, 0.0 }
 0x4f0   : > { %3529 = vst.msk [vmem:[#allocation3 + $0x1a0] sm:$0xff] %vm3327_vm10, %v3507_v34  ;;  %4532 = vadd.xlane.f32.xlu1 %v4531_v19  ;;  %11203 = vst [vmem:[#allocation34_spill] sm:$0xff] %v10165_v56  ;;  %v4441_v34 = vld [vmem:[#allocation3 + $0x15c] sm:$0xff]  ;;  %v4552_v19 = vsel %vm421_vm0, %v10165_v56, 0.0  ;;  %v10177_v25 = vadd.f32 %v7372_v26, %v4444_v21 }
 0x4f1   : > { %4380 = vst.msk [vmem:[#allocation3 + $0x1a0] sm:$0xff] %vm4178_vm11, %v4358_v11  ;;  %v4537_v11 = vsel %vm421_vm0, %v10159_v47, 0.0  ;;  %11204 = vst [vmem:[#allocation35_spill] sm:$0xff] %v10172_v3 }
 0x4f2   : > { %v1839_v36 = vpop.permute.xlu0 %1838  ;;  %v4326_v12 = vpop.permute.xlu1 %4325  ;;  %11205 = vst [vmem:[#allocation36_spill] sm:$0xff] %v10177_v25  ;;  %v4558_v40 = vsel %vm421_vm0, %v10177_v25, 0.0 }
 0x4f3   : > { %1860 = vst.msk [vmem:[#allocation3 + $0x1c0] sm:$0xff] %vm1336_vm3, %v1839_v36  ;;  %4547 = vadd.xlane.f32.xlu0 %v4546_v17  ;;  %v7373_v36 = vld [vmem:[%s7544_s23 + $0xa8] sm:$0xff]  ;;  %v4443_v17 = vld [vmem:[#allocation3 + $0x174] sm:$0xff] }
 0x4f4   : > { %4348 = vst.msk [vmem:[#allocation3 + $0x198] sm:$0xff] %vm4178_vm11, %v4326_v12  ;;  %4538 = vadd.xlane.f32.xlu1 %v4537_v11  ;;  %v10184_v12 = vadd.f32 %v7373_v36, %v4441_v34  ;;  %v7375_v34 = vld [vmem:[%s7544_s23 + $0xb8] sm:$0xff] }
 0x4f5   : > { %v10195_v26 = vadd.f32 %v7375_v34, %v4443_v17 }
 0x4f6   : > { %v2658_v32 = vpop.permute.xlu0 %2657  ;;  %v1774_v37 = vpop.permute.xlu1 %1773  ;;  %11206 = vst [vmem:[#allocation37_spill] sm:$0xff] %v10184_v12 }
 0x4f7   : > { %2679 = vst.msk [vmem:[#allocation3 + $0x1b8] sm:$0xff] %vm2476_vm9, %v2658_v32  ;;  %4553 = vadd.xlane.f32.xlu0 %v4552_v19  ;;  %v4549_v32 = vsel %vm421_vm0, %v10184_v12, 0.0 }
 0x4f8   : > { %1796 = vst.msk [vmem:[#allocation3 + $0x1b0] sm:$0xff] %vm1336_vm3, %v1774_v37  ;;  %4544 = vadd.xlane.f32.xlu1 %v4543_v53  ;;  %v7374_v37 = vld [vmem:[%s7544_s23 + $0xd0] sm:$0xff] }
 0x4f9   : > { %v4445_v53 = vld [vmem:[#allocation3 + $0x18c] sm:$0xff] }
 0x4fa   : > { %v3477_v45 = vpop.permute.xlu0 %3476  ;;  %v4390_v11 = vpop.permute.xlu1 %4389 }
 0x4fb   : > { %v4446_v21 = vld [vmem:[#allocation3 + $0x19c] sm:$0xff]  ;;  %4412 = vst.msk [vmem:[#allocation3 + $0x1a8] sm:$0xff] %vm4178_vm11, %v4390_v11  ;;  %4559 = vadd.xlane.f32.xlu0 %v4558_v40  ;;  %v4555_v11 = vsel %vm421_vm0, %v10195_v26, 0.0  ;;  %v7376_v40 = vld [vmem:[%s7544_s23 + $0xc8] sm:$0xff] }
 0x4fc   : > { %v10192_v19 = vadd.f32 %v7374_v37, %v4446_v21  ;;  %4550 = vadd.xlane.f32.xlu1 %v4549_v32  ;;  %v10203_v21 = vadd.f32 %v7376_v40, %v4445_v53 }
 0x4fe   : > { %11207 = vst [vmem:[#allocation38_spill] sm:$0xff] %v10192_v19  ;;  %v4564_v36 = vsel %vm421_vm0, %v10192_v19, 0.0  ;;  %v3541_v49 = vpop.permute.xlu0 %3540  ;;  %v2626_v28 = vpop.permute.xlu1 %2625  ;;  %v4561_v34 = vsel %vm421_vm0, %v10203_v21, 0.0 }
 0x4ff   : > { %2647 = vst.msk [vmem:[#allocation3 + $0x1b0] sm:$0xff] %vm2476_vm9, %v2626_v28  ;;  %4565 = vadd.xlane.f32.xlu0 %v4564_v36 }
 0x500   : > { %3498 = vst.msk [vmem:[#allocation3 + $0x1b0] sm:$0xff] %vm3327_vm10, %v3477_v45  ;;  %4556 = vadd.xlane.f32.xlu1 %v4555_v11 }
 0x502   : > { %v4360_v17 = vpop.permute.xlu0 %4359  ;;  %v2690_v32 = vpop.permute.xlu1 %2689  ;;  %v4447_v37 = vld [vmem:[#allocation3 + $0x1a4] sm:$0xff] }
 0x503   : > { %2711 = vst.msk [vmem:[#allocation3 + $0x1c0] sm:$0xff] %vm2476_vm9, %v2690_v32  ;;  %v10210_v28 = vadd.f32 %v7377_v52, %v4447_v37 }
 0x504   : > { %3562 = vst.msk [vmem:[#allocation3 + $0x1c0] sm:$0xff] %vm3327_vm10, %v3541_v49  ;;  %4562 = vadd.xlane.f32.xlu1 %v4561_v34 }
 0x505   : > { %11208 = vst [vmem:[#allocation39_spill] sm:$0xff] %v10210_v28  ;;  %v4567_v45 = vsel %vm421_vm0, %v10210_v28, 0.0 }
 0x506   : > { %v1809_v36 = vpop.permute.xlu0 %1808  ;;  %v3509_v53 = vpop.permute.xlu1 %3508 }
 0x507   : > { %1829 = vst.msk [vmem:[#allocation3 + $0x1d0] sm:$0xff] %vm1336_vm3, %v1809_v36 }
 0x508   : > { %3530 = vst.msk [vmem:[#allocation3 + $0x1b8] sm:$0xff] %vm3327_vm10, %v3509_v53  ;;  %4568 = vadd.xlane.f32.xlu1 %v4567_v45 }
 0x509   : > { %4381 = vst.msk [vmem:[#allocation3 + $0x1b8] sm:$0xff] %vm4178_vm11, %v4360_v17  ;;  %v7378_v17 = vld [vmem:[%s7544_s23 + $0xe0] sm:$0xff] }
 0x50a   : > { %v1841_v11 = vpop.permute.xlu0 %1840  ;;  %v4328_v40 = vpop.permute.xlu1 %4327 }
 0x50b   : > { %1861 = vst.msk [vmem:[#allocation3 + $0x1d8] sm:$0xff] %vm1336_vm3, %v1841_v11 }
 0x50c   : > { %4349 = vst.msk [vmem:[#allocation3 + $0x1b0] sm:$0xff] %vm4178_vm11, %v4328_v40 }
 0x50e   : > { %v2660_v49 = vpop.permute.xlu0 %2659  ;;  %v1776_v52 = vpop.permute.xlu1 %1775 }
 0x50f   : > { %2680 = vst.msk [vmem:[#allocation3 + $0x1d0] sm:$0xff] %vm2476_vm9, %v2660_v49 }
 0x510   : > { %1797 = vst.msk [vmem:[#allocation3 + $0x1c8] sm:$0xff] %vm1336_vm3, %v1776_v52  ;;  %v7379_v52 = vld [vmem:[%s7544_s23 + $0xe8] sm:$0xff] }
 0x512   : > { %v4392_v32 = vpop.permute.xlu1 %4391  ;;  %v3479_v34 = vpop.permute.xlu0 %3478 }
 0x513   : > { %v4448_v37 = vld [vmem:[#allocation3 + $0x1b4] sm:$0xff]  ;;  %4413 = vst.msk [vmem:[#allocation3 + $0x1c0] sm:$0xff] %vm4178_vm11, %v4392_v32 }
 0x514   : > { %v10224_v36 = vadd.f32 %v7378_v17, %v4448_v37 }
 0x516   : > { %11209 = vst [vmem:[#allocation40_spill] sm:$0xff] %v10224_v36  ;;  %v4570_v53 = vsel %vm421_vm0, %v10224_v36, 0.0  ;;  %v2628_v45 = vpop.permute.xlu1 %2627  ;;  %v3543_v11 = vpop.permute.xlu0 %3542 }
 0x517   : > { %4571 = vadd.xlane.f32.xlu0 %v4570_v53  ;;  %2648 = vst.msk [vmem:[#allocation3 + $0x1c8] sm:$0xff] %vm2476_vm9, %v2628_v45 }
 0x518   : > { %3499 = vst.msk [vmem:[#allocation3 + $0x1c8] sm:$0xff] %vm3327_vm10, %v3479_v34 }
 0x51a   : > { %v2692_v40 = vpop.permute.xlu1 %2691  ;;  %v4449_v49 = vld [vmem:[#allocation3 + $0x1bc] sm:$0xff]  ;;  %v4362_v53 = vpop.permute.xlu0 %4361 }
 0x51b   : > { %2712 = vst.msk [vmem:[#allocation3 + $0x1d8] sm:$0xff] %vm2476_vm9, %v2692_v40  ;;  %v10232_v32 = vadd.f32 %v7379_v52, %v4449_v49  ;;  %v7380_v49 = vld [vmem:[%s7544_s23 + $0xf0] sm:$0xff] }
 0x51c   : > { %3563 = vst.msk [vmem:[#allocation3 + $0x1d8] sm:$0xff] %vm3327_vm10, %v3543_v11 }
 0x51d   : > { %v4573_v37 = vsel %vm421_vm0, %v10232_v32, 0.0 }
 0x51e   : > { %4574 = vadd.xlane.f32.xlu1 %v4573_v37  ;;  %v3511_v17 = vpop.permute.xlu1 %3510 }
 0x51f   : > { %3531 = vst.msk [vmem:[#allocation3 + $0x1d0] sm:$0xff] %vm3327_vm10, %v3511_v17 }
 0x520   : > { %4382 = vst.msk [vmem:[#allocation3 + $0x1d0] sm:$0xff] %vm4178_vm11, %v4362_v53 }
 0x522   : > { %v4330_v34 = vpop.permute.xlu1 %4329 }
 0x523   : > { %4350 = vst.msk [vmem:[#allocation3 + $0x1c8] sm:$0xff] %vm4178_vm11, %v4330_v34 }
 0x526   : > { %v4394_v45 = vpop.permute.xlu1 %4393 }
 0x527   : > { %4414 = vst.msk [vmem:[#allocation3 + $0x1d8] sm:$0xff] %vm4178_vm11, %v4394_v45 }
 0x52a   : > { %v4450_v40 = vld [vmem:[#allocation3 + $0x1cc] sm:$0xff] }
 0x52b   : > { %v10242_v11 = vadd.f32 %v7380_v49, %v4450_v40 }
 0x52d   : > { %11210 = vst [vmem:[#allocation41_spill] sm:$0xff] %v10242_v11  ;;  %v4576_v52 = vsel %vm421_vm0, %v10242_v11, 0.0 }
 0x52e   : > { %4577 = vadd.xlane.f32.xlu0 %v4576_v52  ;;  %v4451_v37 = vld [vmem:[#allocation3 + $0x1d4] sm:$0xff] }
 0x52f   : > { %v10247_v62 = vadd.f32 %v7381_v54, %v4451_v37 }
 0x531   : > { %v4579_v17 = vsel %vm421_vm0, %v10247_v62, 0.0 }
 0x532   : > { %4580 = vadd.xlane.f32.xlu1 %v4579_v17 }
 0x554   : > { %v4488_v53 = vpop.xlane.xlu0 %4487 }
 0x555   : > { %v4582_v34 = vmul.f32 0.03125, %v4488_v53 }
 0x557   : > { %v10252_v45 = vsub.f32 %v10043_v38, %v4582_v34 }
 0x558   : > { %v4494_v50 = vpop.xlane.xlu0 %4493 }
 0x559   : > { %v4584_v40 = vmul.f32 0.03125, %v4494_v50  ;;  %v4646_v49 = vmul.f32 %v10252_v45, %v10252_v45 }
 0x55b   : > { %v10257_v52 = vsub.f32 %v10050_v55, %v4584_v40  ;;  %v4678_v54 = vsel %vm421_vm0, %v4646_v49, 0.0 }
 0x55c   : > { %v4497_v37 = vpop.xlane.xlu0 %4496  ;;  %4679 = vadd.xlane.f32.xlu0 %v4678_v54 }
 0x55d   : > { %v4648_v17 = vmul.f32 %v10257_v52, %v10257_v52  ;;  %v4585_v38 = vmul.f32 0.03125, %v4497_v37 }
 0x55f   : > { %v4684_v53 = vsel %vm421_vm0, %v4648_v17, 0.0  ;;  %v10273_v17 = vsub.f32 %v10057_v51, %v4585_v38 }
 0x560   : > { %v4500_v35 = vpop.xlane.xlu0 %4499  ;;  %4685 = vadd.xlane.f32.xlu0 %v4684_v53 }
 0x561   : > { %v4586_v34 = vmul.f32 0.03125, %v4500_v35 }
 0x563   : > { %v10264_v50 = vsub.f32 %v10063_v27, %v4586_v34 }
 0x564   : > { %v4506_v20 = vpop.xlane.xlu0 %4505 }
 0x565   : > { %v4588_v22 = vmul.f32 0.03125, %v4506_v20  ;;  %v4491_v40 = vpop.xlane.xlu1 %4490  ;;  %v4650_v49 = vmul.f32 %v10264_v50, %v10264_v50 }
 0x566   : > { %v4583_v55 = vmul.f32 0.03125, %v4491_v40 }
 0x567   : > { %v10269_v54 = vsub.f32 %v10070_v5, %v4588_v22  ;;  %v4690_v1 = vsel %vm421_vm0, %v4650_v49, 0.0 }
 0x568   : > { %v10276_v35 = vsub.f32 %v10074_v6, %v4583_v55  ;;  %v4512_v53 = vpop.xlane.xlu0 %4511  ;;  %4691 = vadd.xlane.f32.xlu0 %v4690_v1 }
 0x569   : > { %v4590_v37 = vmul.f32 0.03125, %v4512_v53  ;;  %v4503_v20 = vpop.xlane.xlu1 %4502  ;;  %v4652_v34 = vmul.f32 %v10269_v54, %v10269_v54  ;;  %v4649_v53 = vmul.f32 %v10273_v17, %v10273_v17 }
 0x56a   : > { %v4587_v27 = vmul.f32 0.03125, %v4503_v20  ;;  %v4647_v22 = vmul.f32 %v10276_v35, %v10276_v35 }
 0x56b   : > { %v10283_v40 = vsub.f32 %v10080_v15, %v4590_v37  ;;  %v4696_v38 = vsel %vm421_vm0, %v4652_v34, 0.0 }
 0x56c   : > { %v10287_v49 = vsub.f32 %v10087_v44, %v4587_v27  ;;  %v4518_v55 = vpop.xlane.xlu0 %4517  ;;  %4697 = vadd.xlane.f32.xlu0 %v4696_v38  ;;  %v4681_v1 = vsel %vm421_vm0, %v4647_v22, 0.0  ;;  %v4687_v22 = vsel %vm421_vm0, %v4649_v53, 0.0 }
 0x56d   : > { %v4592_v5 = vmul.f32 0.03125, %v4518_v55  ;;  %4682 = vadd.xlane.f32.xlu1 %v4681_v1  ;;  %v4509_v20 = vpop.xlane.xlu1 %4508  ;;  %v4654_v51 = vmul.f32 %v10283_v40, %v10283_v40 }
 0x56e   : > { %v4589_v37 = vmul.f32 0.03125, %v4509_v20  ;;  %v4651_v55 = vmul.f32 %v10287_v49, %v10287_v49 }
 0x56f   : > { %v10295_v15 = vsub.f32 %v10093_v9, %v4592_v5  ;;  %v4702_v27 = vsel %vm421_vm0, %v4654_v51, 0.0 }
 0x570   : > { %v10299_v34 = vsub.f32 %v10100_v57, %v4589_v37  ;;  %v4524_v38 = vpop.xlane.xlu0 %4523  ;;  %4703 = vadd.xlane.f32.xlu0 %v4702_v27  ;;  %v4693_v53 = vsel %vm421_vm0, %v4651_v55, 0.0 }
 0x571   : > { %v4594_v1 = vmul.f32 0.03125, %v4524_v38  ;;  %4688 = vadd.xlane.f32.xlu1 %v4687_v22  ;;  %v4515_v44 = vpop.xlane.xlu1 %4514  ;;  %v4656_v20 = vmul.f32 %v10295_v15, %v10295_v15 }
 0x572   : > { %v4591_v5 = vmul.f32 0.03125, %v4515_v44  ;;  %v4653_v38 = vmul.f32 %v10299_v34, %v10299_v34 }
 0x573   : > { %v10307_v9 = vsub.f32 %v10105_v16, %v4594_v1  ;;  %v4708_v51 = vsel %vm421_vm0, %v4656_v20, 0.0 }
 0x574   : > { %v10311_v37 = vsub.f32 %v10112_v33, %v4591_v5  ;;  %v4530_v27 = vpop.xlane.xlu0 %4529  ;;  %4709 = vadd.xlane.f32.xlu0 %v4708_v51  ;;  %v4699_v55 = vsel %vm421_vm0, %v4653_v38, 0.0 }
 0x575   : > { %v4596_v22 = vmul.f32 0.03125, %v4530_v27  ;;  %4694 = vadd.xlane.f32.xlu1 %v4693_v53  ;;  %v4521_v57 = vpop.xlane.xlu1 %4520  ;;  %v4658_v44 = vmul.f32 %v10307_v9, %v10307_v9 }
 0x576   : > { %v4593_v1 = vmul.f32 0.03125, %v4521_v57  ;;  %v4655_v27 = vmul.f32 %v10311_v37, %v10311_v37 }
 0x577   : > { %v10319_v16 = vsub.f32 %v10117_v61, %v4596_v22  ;;  %v4714_v20 = vsel %vm421_vm0, %v4658_v44, 0.0 }
 0x578   : > { %v10323_v5 = vsub.f32 %v10123_v59, %v4593_v1  ;;  %v4536_v51 = vpop.xlane.xlu0 %4535  ;;  %4715 = vadd.xlane.f32.xlu0 %v4714_v20  ;;  %v4705_v38 = vsel %vm421_vm0, %v4655_v27, 0.0 }
 0x579   : > { %v4598_v53 = vmul.f32 0.03125, %v4536_v51  ;;  %4700 = vadd.xlane.f32.xlu1 %v4699_v55  ;;  %v4527_v33 = vpop.xlane.xlu1 %4526  ;;  %v4660_v57 = vmul.f32 %v10319_v16, %v10319_v16 }
 0x57a   : > { %v4595_v22 = vmul.f32 0.03125, %v4527_v33  ;;  %v4657_v51 = vmul.f32 %v10323_v5, %v10323_v5 }
 0x57b   : > { %v10331_v61 = vsub.f32 %v10128_v29, %v4598_v53  ;;  %v4720_v44 = vsel %vm421_vm0, %v4660_v57, 0.0 }
 0x57c   : > { %v10335_v1 = vsub.f32 %v10134_v8, %v4595_v22  ;;  %v4542_v20 = vpop.xlane.xlu0 %4541  ;;  %4721 = vadd.xlane.f32.xlu0 %v4720_v44  ;;  %v4711_v27 = vsel %vm421_vm0, %v4657_v51, 0.0 }
 0x57d   : > { %v4600_v55 = vmul.f32 0.03125, %v4542_v20  ;;  %4706 = vadd.xlane.f32.xlu1 %v4705_v38  ;;  %v4533_v59 = vpop.xlane.xlu1 %4532  ;;  %v4662_v33 = vmul.f32 %v10331_v61, %v10331_v61 }
 0x57e   : > { %v4597_v53 = vmul.f32 0.03125, %v4533_v59  ;;  %v4659_v20 = vmul.f32 %v10335_v1, %v10335_v1 }
 0x57f   : > { %v10343_v29 = vsub.f32 %v10140_v4, %v4600_v55  ;;  %v4726_v57 = vsel %vm421_vm0, %v4662_v33, 0.0 }
 0x580   : > { %v10347_v22 = vsub.f32 %v10146_v60, %v4597_v53  ;;  %v4548_v44 = vpop.xlane.xlu0 %4547  ;;  %4727 = vadd.xlane.f32.xlu0 %v4726_v57  ;;  %v4717_v51 = vsel %vm421_vm0, %v4659_v20, 0.0 }
 0x581   : > { %v4602_v38 = vmul.f32 0.03125, %v4548_v44  ;;  %4712 = vadd.xlane.f32.xlu1 %v4711_v27  ;;  %v4539_v8 = vpop.xlane.xlu1 %4538  ;;  %v4664_v59 = vmul.f32 %v10343_v29, %v10343_v29 }
 0x582   : > { %v4599_v55 = vmul.f32 0.03125, %v4539_v8  ;;  %v4661_v44 = vmul.f32 %v10347_v22, %v10347_v22 }
 0x583   : > { %v10355_v4 = vsub.f32 %v10152_v41, %v4602_v38  ;;  %v4732_v33 = vsel %vm421_vm0, %v4664_v59, 0.0 }
 0x584   : > { %v10359_v53 = vsub.f32 %v10159_v47, %v4599_v55  ;;  %v4554_v57 = vpop.xlane.xlu0 %4553  ;;  %4733 = vadd.xlane.f32.xlu0 %v4732_v33  ;;  %v4723_v20 = vsel %vm421_vm0, %v4661_v44, 0.0 }
 0x585   : > { %v4604_v27 = vmul.f32 0.03125, %v4554_v57  ;;  %4718 = vadd.xlane.f32.xlu1 %v4717_v51  ;;  %v4545_v60 = vpop.xlane.xlu1 %4544  ;;  %v4666_v8 = vmul.f32 %v10355_v4, %v10355_v4  ;;  %v4978_v51 = vld [vmem:[%s11044_s7] sm:$0xff] }
 0x586   : > { %v4601_v38 = vmul.f32 0.03125, %v4545_v60  ;;  %v4663_v57 = vmul.f32 %v10359_v53, %v10359_v53  ;;  %v4979_v60 = vld [vmem:[%s11044_s7 + $0x8] sm:$0xff] }
 0x587   : > { %v10367_v41 = vsub.f32 %v10165_v56, %v4604_v27  ;;  %v4738_v59 = vsel %vm421_vm0, %v4666_v8, 0.0 }
 0x588   : > { %v10371_v55 = vsub.f32 %v10172_v3, %v4601_v38  ;;  %v4560_v33 = vpop.xlane.xlu0 %4559  ;;  %4739 = vadd.xlane.f32.xlu0 %v4738_v59  ;;  %v6404_v59 = vpack.c.bf16 %v4979_v60, %v4978_v51  ;;  %v4980_v51 = vld [vmem:[%s11044_s7 + $0x10] sm:$0xff]  ;;  %v4981_v60 = vld [vmem:[%s11044_s7 + $0x18] sm:$0xff] }
 0x589   : > { %v4606_v27 = vmul.f32 0.03125, %v4560_v33  ;;  %4724 = vadd.xlane.f32.xlu1 %v4723_v20  ;;  %v4551_v8 = vpop.xlane.xlu1 %4550  ;;  %v4668_v38 = vmul.f32 %v10367_v41, %v10367_v41  ;;  %v4729_v33 = vsel %vm421_vm0, %v4663_v57, 0.0 }
 0x58a   : > { %v4603_v56 = vmul.f32 0.03125, %v4551_v8  ;;  %6405 = vmatprep.subr.bf16.mxu0 %v6404_v59  ;;  %v4665_v20 = vmul.f32 %v10371_v55, %v10371_v55  ;;  %v6408_v8 = vpack.c.bf16 %v4981_v60, %v4980_v51 }
 0x58b   : > { %v10385_v44 = vsub.f32 %v10177_v25, %v4606_v27  ;;  %v4744_v3 = vsel %vm421_vm0, %v4668_v38, 0.0  ;;  %6407 = vmatpush3.bf16.msra.mxu0 %v6404_v59 }
 0x58c   : > { %v10389_v47 = vsub.f32 %v10184_v12, %v4603_v56  ;;  %v4566_v6 = vpop.xlane.xlu0 %4565  ;;  %4745 = vadd.xlane.f32.xlu0 %v4744_v3  ;;  %6409 = vmatprep.subr.bf16.mxu0 %v6408_v8  ;;  %v4735_v12 = vsel %vm421_vm0, %v4665_v20, 0.0 }
 0x58d   : > { %v4608_v27 = vmul.f32 0.03125, %v4566_v6  ;;  %4730 = vadd.xlane.f32.xlu1 %v4729_v33  ;;  %v4557_v56 = vpop.xlane.xlu1 %4556  ;;  %v4670_v3 = vmul.f32 %v10385_v44, %v10385_v44 }
 0x58e   : > { %v4605_v57 = vmul.f32 0.03125, %v4557_v56  ;;  %v4667_v6 = vmul.f32 %v10389_v47, %v10389_v47 }
 0x58f   : > { %v10403_v38 = vsub.f32 %v10192_v19, %v4608_v27  ;;  %v4750_v59 = vsel %vm421_vm0, %v4670_v3, 0.0  ;;  %6411 = vmatpush3.bf16.msra.mxu0 %v6408_v8 }
 0x590   : > { %v10407_v25 = vsub.f32 %v10195_v26, %v4605_v57  ;;  %4751 = vadd.xlane.f32.xlu0 %v4750_v59  ;;  %v4741_v3 = vsel %vm421_vm0, %v4667_v6, 0.0 }
 0x591   : > { %4736 = vadd.xlane.f32.xlu1 %v4735_v12  ;;  %v4563_v33 = vpop.xlane.xlu1 %4562  ;;  %v4672_v51 = vmul.f32 %v10403_v38, %v10403_v38 }
 0x592   : > { %v4607_v60 = vmul.f32 0.03125, %v4563_v33  ;;  %v4669_v20 = vmul.f32 %v10407_v25, %v10407_v25 }
 0x593   : > { %v4756_v27 = vsel %vm421_vm0, %v4672_v51, 0.0 }
 0x594   : > { %v10416_v56 = vsub.f32 %v10203_v21, %v4607_v60  ;;  %4757 = vadd.xlane.f32.xlu0 %v4756_v27  ;;  %v4747_v59 = vsel %vm421_vm0, %v4669_v20, 0.0 }
 0x595   : > { %4742 = vadd.xlane.f32.xlu1 %v4741_v3  ;;  %v4569_v57 = vpop.xlane.xlu1 %4568 }
 0x596   : > { %v4609_v8 = vmul.f32 0.03125, %v4569_v57  ;;  %v4671_v33 = vmul.f32 %v10416_v56, %v10416_v56 }
 0x598   : > { %v10422_v12 = vsub.f32 %v10210_v28, %v4609_v8  ;;  %v4753_v51 = vsel %vm421_vm0, %v4671_v33, 0.0 }
 0x599   : > { %4748 = vadd.xlane.f32.xlu1 %v4747_v59 }
 0x59a   : > { %v4673_v6 = vmul.f32 %v10422_v12, %v10422_v12 }
 0x59c   : > { %v4759_v60 = vsel %vm421_vm0, %v4673_v6, 0.0 }
 0x59d   : > { %4754 = vadd.xlane.f32.xlu1 %v4753_v51 }
 0x5a1   : > { %4760 = vadd.xlane.f32.xlu1 %v4759_v60 }
 0x5a4   : > { %v4572_v27 = vpop.xlane.xlu0 %4571 }
 0x5a5   : > { %v4610_v3 = vmul.f32 0.03125, %v4572_v27 }
 0x5a7   : > { %v10432_v57 = vsub.f32 %v10224_v36, %v4610_v3 }
 0x5a9   : > { %v4674_v20 = vmul.f32 %v10432_v57, %v10432_v57 }
 0x5ab   : > { %v4762_v8 = vsel %vm421_vm0, %v4674_v20, 0.0  ;;  %v4575_v59 = vpop.xlane.xlu1 %4574 }
 0x5ac   : > { %4763 = vadd.xlane.f32.xlu0 %v4762_v8  ;;  %v4611_v33 = vmul.f32 0.03125, %v4575_v59 }
 0x5ae   : > { %v10438_v19 = vsub.f32 %v10232_v32, %v4611_v33 }
 0x5b0   : > { %v4675_v51 = vmul.f32 %v10438_v19, %v10438_v19 }
 0x5b2   : > { %v4765_v6 = vsel %vm421_vm0, %v4675_v51, 0.0 }
 0x5b3   : > { %4766 = vadd.xlane.f32.xlu1 %v4765_v6 }
 0x5bb   : > { %v4578_v60 = vpop.xlane.xlu0 %4577 }
 0x5bc   : > { %v4612_v27 = vmul.f32 0.03125, %v4578_v60 }
 0x5be   : > { %v10444_v3 = vsub.f32 %v10242_v11, %v4612_v27 }
 0x5bf   : > { %v4581_v36 = vpop.xlane.xlu1 %4580 }
 0x5c0   : > { %v4613_v28 = vmul.f32 0.03125, %v4581_v36  ;;  %v4676_v20 = vmul.f32 %v10444_v3, %v10444_v3 }
 0x5c2   : > { %v10449_v8 = vsub.f32 %v10247_v62, %v4613_v28  ;;  %v4768_v59 = vsel %vm421_vm0, %v4676_v20, 0.0 }
 0x5c3   : > { %4769 = vadd.xlane.f32.xlu0 %v4768_v59 }
 0x5c4   : > { %v4677_v33 = vmul.f32 %v10449_v8, %v10449_v8 }
 0x5c6   : > { %v4771_v51 = vsel %vm421_vm0, %v4677_v33, 0.0 }
 0x5c7   : > { %4772 = vadd.xlane.f32.xlu1 %v4771_v51 }
 0x5d8   : > { %1779 = vrot.lane.b32.xlu1 %v9378_v58, %s7409_s20 }
 0x5d9   : > { %1777 = vrot.lane.b32.xlu0 %v9381_v0, %s7409_s20 }
 0x5dc   : > { %1781 = vrot.lane.b32.xlu1 %v9395_v13, %s7409_s20 }
 0x5dd   : > { %1810 = vrot.lane.b32.xlu0 %v9381_v0, %s7408_s19 }
 0x5e0   : > { %1783 = vrot.lane.b32.xlu1 %v9392_v42, %s7409_s20 }
 0x5e1   : > { %1814 = vrot.lane.b32.xlu0 %v9395_v13, %s7408_s19 }
 0x5e4   : > { %1812 = vrot.lane.b32.xlu1 %v9378_v58, %s7408_s19 }
 0x5e5   : > { %1842 = vrot.lane.b32.xlu0 %v9381_v0, %s7396_s28 }
 0x5e8   : > { %1816 = vrot.lane.b32.xlu1 %v9392_v42, %s7408_s19 }
 0x5e9   : > { %1846 = vrot.lane.b32.xlu0 %v9395_v13, %s7396_s28  ;;  %v4680_v28 = vpop.xlane.xlu0 %4679 }
 0x5ea   : > { %v4774_v36 = vmul.f32 0.03125, %v4680_v28 }
 0x5ec   : > { %v4806_v6 = vadd.f32 1e-05, %v4774_v36  ;;  %1844 = vrot.lane.b32.xlu1 %v9378_v58, %s7396_s28  ;;  %v10500_v36 = vld [vmem:[%s11043_s6] ss:$0 sm:$0xff] }
 0x5ed   : > { %2452 = vrot.lane.b32.xlu0 %v9435_v10, %s7391_s24  ;;  %v4686_v60 = vpop.xlane.xlu0 %4685 }
 0x5ee   : > { %7213 = vrsqrt.f32 %v4806_v6  ;;  %v4776_v0 = vmul.f32 0.03125, %v4686_v60 }
 0x5f0   : > { %1848 = vrot.lane.b32.xlu1 %v9392_v42, %s7396_s28  ;;  %v4808_v58 = vadd.f32 1e-05, %v4776_v0  ;;  %v10492_v42 = vld [vmem:[%s11042_s5] ss:$0 sm:$0xff] }
 0x5f1   : > { %2456 = vrot.lane.b32.xlu0 %v9481_v23, %s7391_s24 }
 0x5f2   : > { %7215 = vrsqrt.f32 %v4808_v58 }
 0x5f4   : > { %2454 = vrot.lane.b32.xlu1 %v9415_v30, %s7391_s24 }
 0x5f5   : > { %2493 = vrot.lane.b32.xlu0 %v9435_v10, %s7398_s22  ;;  %v4692_v13 = vpop.xlane.xlu0 %4691 }
 0x5f6   : > { %v4778_v27 = vmul.f32 0.03125, %v4692_v13 }
 0x5f8   : > { %v7214_v20 = vpop.eup %7213  ;;  %2458 = vrot.lane.b32.xlu1 %v9465_v63, %s7391_s24  ;;  %v4810_v10 = vadd.f32 1e-05, %v4778_v27 }
 0x5f9   : > { %2497 = vrot.lane.b32.xlu0 %v9481_v23, %s7398_s22  ;;  %v4698_v59 = vpop.xlane.xlu0 %4697  ;;  %v4870_v33 = vmul.f32 %v7214_v20, %v10252_v45 }
 0x5fa   : > { %v4780_v51 = vmul.f32 0.03125, %v4698_v59  ;;  %v4683_v28 = vpop.xlane.xlu1 %4682  ;;  %7217 = vrsqrt.f32 %v4810_v10 }
 0x5fb   : > { %v4775_v6 = vmul.f32 0.03125, %v4683_v28  ;;  %v4908_v60 = vmul.f32 %v10492_v42, %v4870_v33 }
 0x5fc   : > { %v4812_v0 = vadd.f32 1e-05, %v4780_v51  ;;  %2495 = vrot.lane.b32.xlu1 %v9415_v30, %s7398_s22 }
 0x5fd   : > { %v4807_v23 = vadd.f32 1e-05, %v4775_v6  ;;  %2629 = vrot.lane.b32.xlu0 %v9526_v48, %s7406_s16  ;;  %v4704_v45 = vpop.xlane.xlu0 %4703  ;;  %v4946_v13 = vadd.f32 %v10500_v36, %v4908_v60  ;;  %v7216_v6 = vpop.eup %7215 }
 0x5fe   : > { %v4782_v58 = vmul.f32 0.03125, %v4704_v45  ;;  %v4689_v27 = vpop.xlane.xlu1 %4688 }
 0x5ff   : > { %7219 = vrsqrt.f32 %v4807_v23  ;;  %v4777_v20 = vmul.f32 0.03125, %v4689_v27  ;;  %6212 = vmatprep.mubr.msk.f32.mxu0 %vm421_vm0, %v4946_v13 }
 0x600   : > { %7221 = vrsqrt.f32 %v4812_v0  ;;  %2499 = vrot.lane.b32.xlu1 %v9465_v63, %s7398_s22  ;;  %v4814_v33 = vadd.f32 1e-05, %v4782_v58  ;;  %v4872_v58 = vmul.f32 %v7216_v6, %v10257_v52 }
 0x601   : > { %v4809_v59 = vadd.f32 1e-05, %v4777_v20  ;;  %2633 = vrot.lane.b32.xlu0 %v9574_v18, %s7406_s16  ;;  %v4710_v30 = vpop.xlane.xlu0 %4709 }
 0x602   : > { %v4784_v51 = vmul.f32 0.03125, %v4710_v30  ;;  %v4695_v28 = vpop.xlane.xlu1 %4694  ;;  %v4910_v52 = vmul.f32 %v10492_v42, %v4872_v58 }
 0x603   : > { %7223 = vrsqrt.f32 %v4809_v59  ;;  %v4779_v10 = vmul.f32 0.03125, %v4695_v28 }
 0x604   : > { %2631 = vrot.lane.b32.xlu1 %v9502_v39, %s7406_s16  ;;  %7225 = vrsqrt.f32 %v4814_v33  ;;  %v4816_v63 = vadd.f32 1e-05, %v4784_v51  ;;  %v7218_v27 = vpop.eup %7217 }
 0x605   : > { %v4811_v60 = vadd.f32 1e-05, %v4779_v10  ;;  %2661 = vrot.lane.b32.xlu0 %v9526_v48, %s7409_s20  ;;  %v4716_v0 = vpop.xlane.xlu0 %4715  ;;  %v4874_v6 = vmul.f32 %v7218_v27, %v10264_v50 }
 0x606   : > { %v4786_v23 = vmul.f32 0.03125, %v4716_v0  ;;  %v4701_v45 = vpop.xlane.xlu1 %4700 }
 0x607   : > { %7227 = vrsqrt.f32 %v4811_v60  ;;  %v4781_v13 = vmul.f32 0.03125, %v4701_v45 }
 0x608   : > { %v4818_v20 = vadd.f32 1e-05, %v4786_v23  ;;  %2635 = vrot.lane.b32.xlu1 %v9562_v24, %s7406_s16  ;;  %7229 = vrsqrt.f32 %v4816_v63 }
 0x609   : > { %v7220_v59 = vpop.eup %7219  ;;  %v4813_v30 = vadd.f32 1e-05, %v4781_v13  ;;  %2665 = vrot.lane.b32.xlu0 %v9574_v18, %s7409_s20  ;;  %v4722_v28 = vpop.xlane.xlu0 %4721 }
 0x60a   : > { %v7222_v10 = vpop.eup %7221  ;;  %v4871_v33 = vmul.f32 %v7220_v59, %v10276_v35  ;;  %v4788_v51 = vmul.f32 0.03125, %v4722_v28  ;;  %v4707_v60 = vpop.xlane.xlu1 %4706  ;;  %v4912_v28 = vmul.f32 %v10492_v42, %v4874_v6 }
 0x60b   : > { %7231 = vrsqrt.f32 %v4813_v30  ;;  %v4783_v0 = vmul.f32 0.03125, %v4707_v60  ;;  %v4876_v63 = vmul.f32 %v7222_v10, %v10269_v54 }
 0x60c   : > { %v4909_v23 = vmul.f32 %v10492_v42, %v4871_v33  ;;  %7233 = vrsqrt.f32 %v4818_v20  ;;  %2663 = vrot.lane.b32.xlu1 %v9502_v39, %s7409_s20  ;;  %v4820_v13 = vadd.f32 1e-05, %v4788_v51  ;;  %v4948_v20 = vadd.f32 %v10500_v36, %v4910_v52 }
 0x60d   : > { %v7224_v45 = vpop.eup %7223  ;;  %v4815_v11 = vadd.f32 1e-05, %v4783_v0  ;;  %2693 = vrot.lane.b32.xlu0 %v9526_v48, %s7408_s19  ;;  %v4728_v35 = vpop.xlane.xlu0 %4727 }
 0x60e   : > { %v4790_v59 = vmul.f32 0.03125, %v4728_v35  ;;  %v4713_v30 = vpop.xlane.xlu1 %4712  ;;  %v4947_v58 = vadd.f32 %v10500_v36, %v4909_v23  ;;  %v4873_v50 = vmul.f32 %v7224_v45, %v10273_v17  ;;  %v7226_v33 = vpop.eup %7225  ;;  %v4914_v17 = vmul.f32 %v10492_v42, %v4876_v63 }
 0x60f   : > { %7235 = vrsqrt.f32 %v4815_v11  ;;  %v4785_v27 = vmul.f32 0.03125, %v4713_v30  ;;  %v4950_v45 = vadd.f32 %v10500_v36, %v4912_v28 }
 0x610   : > { %2667 = vrot.lane.b32.xlu1 %v9562_v24, %s7409_s20  ;;  %6213 = vmatmul.mubr.msk.f32.vlgmr.msra.gmra.mrb[16].mxu0 %vm421_vm0, %v4947_v58  ;;  %v4911_v48 = vmul.f32 %v10492_v42, %v4873_v50  ;;  %7237 = vrsqrt.f32 %v4820_v13  ;;  %v4822_v51 = vadd.f32 1e-05, %v4790_v59  ;;  %v4878_v13 = vmul.f32 %v7226_v33, %v10283_v40 }
 0x611   : > { %v7228_v54 = vpop.eup %7227  ;;  %v4817_v10 = vadd.f32 1e-05, %v4785_v27  ;;  %2697 = vrot.lane.b32.xlu0 %v9574_v18, %s7408_s19  ;;  %v4734_v11 = vpop.xlane.xlu0 %4733  ;;  %6215 = vmatprep.mubr.msk.f32.mxu0 %vm421_vm0, %v4948_v20  ;;  %v4952_v58 = vadd.f32 %v10500_v36, %v4914_v17 }
 0x612   : > { %v4792_v60 = vmul.f32 0.03125, %v4734_v11  ;;  %v4719_v0 = vpop.xlane.xlu1 %4718  ;;  %v4949_v52 = vadd.f32 %v10500_v36, %v4911_v48  ;;  %v4875_v6 = vmul.f32 %v7228_v54, %v10287_v49  ;;  %v7230_v35 = vpop.eup %7229  ;;  %v4916_v33 = vmul.f32 %v10492_v42, %v4878_v13 }
 0x613   : > { %7239 = vrsqrt.f32 %v4817_v10  ;;  %v4787_v23 = vmul.f32 0.03125, %v4719_v0  ;;  %v4880_v48 = vmul.f32 %v7230_v35, %v10295_v15 }
 0x614   : > { %v4824_v18 = vadd.f32 1e-05, %v4792_v60  ;;  %2695 = vrot.lane.b32.xlu1 %v9502_v39, %s7408_s19  ;;  %6216 = vmatmul.mubr.msk.f32.gmra.mrb[18].mxu0 %vm421_vm0, %v4949_v52  ;;  %v4913_v63 = vmul.f32 %v10492_v42, %v4875_v6  ;;  %7241 = vrsqrt.f32 %v4822_v51 }
 0x615   : > { %v7232_v59 = vpop.eup %7231  ;;  %v4819_v30 = vadd.f32 1e-05, %v4787_v23  ;;  %3303 = vrot.lane.b32.xlu0 %v9616_v31, %s7392_s25  ;;  %v4740_v49 = vpop.xlane.xlu0 %4739  ;;  %6218 = vmatprep.mubr.msk.f32.mxu0 %vm421_vm0, %v4950_v45  ;;  %v4954_v23 = vadd.f32 %v10500_v36, %v4916_v33  ;;  %v4918_v45 = vmul.f32 %v10492_v42, %v4880_v48 }
 0x616   : > { %v7234_v40 = vpop.eup %7233  ;;  %v4794_v50 = vmul.f32 0.03125, %v4740_v49  ;;  %v4725_v27 = vpop.xlane.xlu1 %4724  ;;  %v4951_v39 = vadd.f32 %v10500_v36, %v4913_v63  ;;  %v4877_v20 = vmul.f32 %v7232_v59, %v10299_v34 }
 0x617   : > { %7243 = vrsqrt.f32 %v4819_v30  ;;  %v4789_v28 = vmul.f32 0.03125, %v4725_v27  ;;  %v4882_v17 = vmul.f32 %v7234_v40, %v10307_v9 }
 0x618   : > { %7245 = vrsqrt.f32 %v4824_v18  ;;  %2699 = vrot.lane.b32.xlu1 %v9562_v24, %s7408_s19  ;;  %6219 = vmatmul.mubr.msk.f32.gmra.mrb[20].mxu0 %vm421_vm0, %v4951_v39  ;;  %v4915_v54 = vmul.f32 %v10492_v42, %v4877_v20  ;;  %v4826_v51 = vadd.f32 1e-05, %v4794_v50  ;;  %v4956_v50 = vadd.f32 %v10500_v36, %v4918_v45 }
 0x619   : > { %v7236_v10 = vpop.eup %7235  ;;  %v4821_v11 = vadd.f32 1e-05, %v4789_v28  ;;  %3307 = vrot.lane.b32.xlu0 %v9656_v14, %s7392_s25  ;;  %v4746_v34 = vpop.xlane.xlu0 %4745  ;;  %6221 = vmatprep.mubr.msk.f32.mxu0 %vm421_vm0, %v4952_v58  ;;  %v4920_v63 = vmul.f32 %v10492_v42, %v4882_v17 }
 0x61a   : > { %v4796_v15 = vmul.f32 0.03125, %v4746_v34  ;;  %v4731_v60 = vpop.xlane.xlu1 %4730  ;;  %v4953_v0 = vadd.f32 %v10500_v36, %v4915_v54  ;;  %v4879_v24 = vmul.f32 %v7236_v10, %v10311_v37  ;;  %v7238_v52 = vpop.eup %7237 }
 0x61b   : > { %7247 = vrsqrt.f32 %v4821_v11  ;;  %v4791_v6 = vmul.f32 0.03125, %v4731_v60  ;;  %v4884_v27 = vmul.f32 %v7238_v52, %v10319_v16  ;;  %v4958_v33 = vadd.f32 %v10500_v36, %v4920_v63 }
 0x61c   : > { %3305 = vrot.lane.b32.xlu1 %v9595_v43, %s7392_s25  ;;  %6222 = vmatmul.mubr.msk.f32.gmra.mrb[22].mxu0 %vm421_vm0, %v4953_v0  ;;  %v4917_v9 = vmul.f32 %v10492_v42, %v4879_v24  ;;  %v4828_v35 = vadd.f32 1e-05, %v4796_v15  ;;  %7249 = vrsqrt.f32 %v4826_v51 }
 0x61d   : > { %v7240_v13 = vpop.eup %7239  ;;  %v4823_v18 = vadd.f32 1e-05, %v4791_v6  ;;  %3336 = vrot.lane.b32.xlu0 %v9616_v31, %s7391_s24  ;;  %v4752_v37 = vpop.xlane.xlu0 %4751  ;;  %6224 = vmatprep.mubr.msk.f32.mxu0 %vm421_vm0, %v4954_v23  ;;  %v4922_v51 = vmul.f32 %v10492_v42, %v4884_v27 }
 0x61e   : > { %v4798_v59 = vmul.f32 0.03125, %v4752_v37  ;;  %v4737_v30 = vpop.xlane.xlu1 %4736  ;;  %v4955_v49 = vadd.f32 %v10500_v36, %v4917_v9  ;;  %v4881_v58 = vmul.f32 %v7240_v13, %v10323_v5  ;;  %v7242_v39 = vpop.eup %7241 }
 0x61f   : > { %7251 = vrsqrt.f32 %v4823_v18  ;;  %v4793_v40 = vmul.f32 0.03125, %v4737_v30  ;;  %v4886_v15 = vmul.f32 %v7242_v39, %v10331_v61  ;;  %v4960_v23 = vadd.f32 %v10500_v36, %v4922_v51 }
 0x620   : > { %3309 = vrot.lane.b32.xlu1 %v9638_v46, %s7392_s25  ;;  %6225 = vmatmul.mubr.msk.f32.gmra.mrb[24].mxu0 %vm421_vm0, %v4955_v49  ;;  %v4919_v31 = vmul.f32 %v10492_v42, %v4881_v58  ;;  %7253 = vrsqrt.f32 %v4828_v35  ;;  %v4830_v48 = vadd.f32 1e-05, %v4798_v59  ;;  %v11211_v58 = vld [vmem:[#allocation18_spill] sm:$0xff] }
 0x621   : > { %v7244_v20 = vpop.eup %7243  ;;  %v4825_v28 = vadd.f32 1e-05, %v4793_v40  ;;  %3340 = vrot.lane.b32.xlu0 %v9656_v14, %s7391_s24  ;;  %v4758_v5 = vpop.xlane.xlu0 %4757  ;;  %6227 = vmatprep.mubr.msk.f32.mxu0 %vm421_vm0, %v4956_v50  ;;  %v4924_v45 = vmul.f32 %v10492_v42, %v4886_v15 }
 0x622   : > { %v7246_v16 = vpop.eup %7245  ;;  %v4800_v54 = vmul.f32 0.03125, %v4758_v5  ;;  %v4743_v10 = vpop.xlane.xlu1 %4742  ;;  %v4957_v11 = vadd.f32 %v10500_v36, %v4919_v31  ;;  %v4883_v34 = vmul.f32 %v7244_v20, %v10335_v1 }
 0x623   : > { %7255 = vrsqrt.f32 %v4825_v28  ;;  %v4795_v17 = vmul.f32 0.03125, %v4743_v10  ;;  %v4888_v1 = vmul.f32 %v7246_v16, %v10343_v29  ;;  %v4962_v30 = vadd.f32 %v10500_v36, %v4924_v45  ;;  %v11212_v16 = vld [vmem:[#allocation15_spill] sm:$0xff] }
 0x624   : > { %3338 = vrot.lane.b32.xlu1 %v9595_v43, %s7391_s24  ;;  %6228 = vmatmul.mubr.msk.f32.gmra.mrb[26].mxu0 %vm421_vm0, %v4957_v11  ;;  %v4921_v14 = vmul.f32 %v10492_v42, %v4883_v34  ;;  %7257 = vrsqrt.f32 %v4830_v48  ;;  %v4832_v24 = vadd.f32 1e-05, %v4800_v54 }
 0x625   : > { %v7248_v60 = vpop.eup %7247  ;;  %v4827_v0 = vadd.f32 1e-05, %v4795_v17  ;;  %3480 = vrot.lane.b32.xlu0 %v9720_v7, %s7407_s12  ;;  %6230 = vmatprep.mubr.msk.f32.mxu0 %vm421_vm0, %v4958_v33  ;;  %v4926_v63 = vmul.f32 %v10492_v42, %v4888_v1 }
 0x626   : > { %v4749_v52 = vpop.xlane.xlu1 %4748  ;;  %v4959_v61 = vadd.f32 %v10500_v36, %v4921_v14  ;;  %v4885_v43 = vmul.f32 %v7248_v60, %v10347_v22  ;;  %v7250_v9 = vpop.eup %7249 }
 0x627   : > { %7259 = vrsqrt.f32 %v4827_v0  ;;  %v4797_v6 = vmul.f32 0.03125, %v4749_v52  ;;  %v4890_v49 = vmul.f32 %v7250_v9, %v10355_v4  ;;  %v4964_v31 = vadd.f32 %v10500_v36, %v4926_v63 }
 0x628   : > { %3342 = vrot.lane.b32.xlu1 %v9638_v46, %s7391_s24  ;;  %6231 = vmatmul.mubr.msk.f32.gmra.mrb[28].mxu0 %vm421_vm0, %v4959_v61  ;;  %v4923_v29 = vmul.f32 %v10492_v42, %v4885_v43  ;;  %7261 = vrsqrt.f32 %v4832_v24 }
 0x629   : > { %v7252_v13 = vpop.eup %7251  ;;  %v4829_v35 = vadd.f32 1e-05, %v4797_v6  ;;  %3484 = vrot.lane.b32.xlu0 %v9792_v2, %s7407_s12  ;;  %6233 = vmatprep.mubr.msk.f32.mxu0 %vm421_vm0, %v4960_v23  ;;  %v4928_v28 = vmul.f32 %v10492_v42, %v4890_v49 }
 0x62a   : > { %v4755_v22 = vpop.xlane.xlu1 %4754  ;;  %v4961_v18 = vadd.f32 %v10500_v36, %v4923_v29  ;;  %v4887_v37 = vmul.f32 %v7252_v13, %v10359_v53  ;;  %v7254_v46 = vpop.eup %7253 }
 0x62b   : > { %7263 = vrsqrt.f32 %v4829_v35  ;;  %v4799_v59 = vmul.f32 0.03125, %v4755_v22  ;;  %v4892_v5 = vmul.f32 %v7254_v46, %v10367_v41  ;;  %v4966_v41 = vadd.f32 %v10500_v36, %v4928_v28 }
 0x62c   : > { %3482 = vrot.lane.b32.xlu1 %v11211_v58, %s7407_s12  ;;  %6234 = vmatmul.mubr.msk.f32.gmra.mrb[30].mxu0 %vm421_vm0, %v4961_v18  ;;  %v4925_v40 = vmul.f32 %v10492_v42, %v4887_v37  ;;  %v11214_v37 = vld [vmem:[#allocation10_spill] sm:$0xff] }
 0x62d   : > { %v7256_v50 = vpop.eup %7255  ;;  %v4831_v27 = vadd.f32 1e-05, %v4799_v59  ;;  %3512 = vrot.lane.b32.xlu0 %v9720_v7, %s7406_s16  ;;  %6236 = vmatprep.mubr.msk.f32.mxu0 %vm421_vm0, %v4962_v30  ;;  %v4930_v34 = vmul.f32 %v10492_v42, %v4892_v5  ;;  %v11216_v30 = vld [vmem:[#allocation22_spill] sm:$0xff] }
 0x62e   : > { %v4761_v53 = vpop.xlane.xlu1 %4760  ;;  %v4963_v39 = vadd.f32 %v10500_v36, %v4925_v40  ;;  %v4889_v4 = vmul.f32 %v7256_v50, %v10371_v55  ;;  %v7258_v33 = vpop.eup %7257 }
 0x62f   : > { %7265 = vrsqrt.f32 %v4831_v27  ;;  %v4801_v20 = vmul.f32 0.03125, %v4761_v53  ;;  %v4894_v17 = vmul.f32 %v7258_v33, %v10385_v44  ;;  %v4968_v44 = vadd.f32 %v10500_v36, %v4930_v34  ;;  %v11217_v33 = vld [vmem:[#allocation20_spill] sm:$0xff] }
 0x630   : > { %3486 = vrot.lane.b32.xlu1 %v11212_v16, %s7407_s12  ;;  %6237 = vmatmul.mubr.msk.f32.gmra.mrb[32].mxu0 %vm421_vm0, %v4963_v39  ;;  %v4927_v48 = vmul.f32 %v10492_v42, %v4889_v4  ;;  %v11219_v34 = vld [vmem:[#allocation12_spill] sm:$0xff] }
 0x631   : > { %v7260_v54 = vpop.eup %7259  ;;  %v4833_v10 = vadd.f32 1e-05, %v4801_v20  ;;  %3516 = vrot.lane.b32.xlu0 %v9792_v2, %s7406_s16  ;;  %6239 = vmatprep.mubr.msk.f32.mxu0 %vm421_vm0, %v4964_v31  ;;  %v4932_v0 = vmul.f32 %v10492_v42, %v4894_v17 }
 0x632   : > { %v4965_v55 = vadd.f32 %v10500_v36, %v4927_v48  ;;  %v4891_v11 = vmul.f32 %v7260_v54, %v10389_v47  ;;  %v7262_v51 = vpop.eup %7261  ;;  %v11218_v54 = vld [vmem:[#allocation23_spill] sm:$0xff] }
 0x633   : > { %7267 = vrsqrt.f32 %v4833_v10  ;;  %v4896_v1 = vmul.f32 %v7262_v51, %v10403_v38  ;;  %v4970_v6 = vadd.f32 %v10500_v36, %v4932_v0  ;;  %v5470_v10 = vld [vmem:[%s11046_s9] sm:$0xff]  ;;  %v5472_v51 = vld [vmem:[%s11046_s9 + $0x10] sm:$0xff] }
 0x634   : > { %3514 = vrot.lane.b32.xlu1 %v11211_v58, %s7406_s16  ;;  %6240 = vmatmul.mubr.msk.f32.gmra.mrb[34].mxu0 %vm421_vm0, %v4965_v55  ;;  %v4929_v15 = vmul.f32 %v10492_v42, %v4891_v11  ;;  %v5471_v55 = vld [vmem:[%s11046_s9 + $0x8] sm:$0xff] }
 0x635   : > { %v7264_v14 = vpop.eup %7263  ;;  %3544 = vrot.lane.b32.xlu0 %v9720_v7, %s7409_s20  ;;  %6242 = vmatprep.mubr.msk.f32.mxu0 %vm421_vm0, %v4966_v41  ;;  %v4934_v23 = vmul.f32 %v10492_v42, %v4896_v1  ;;  %v6412_v11 = vpack.c.bf16 %v5471_v55, %v5470_v10 }
 0x636   : > { %v4967_v47 = vadd.f32 %v10500_v36, %v4929_v15  ;;  %v4893_v60 = vmul.f32 %v7264_v14, %v10407_v25  ;;  %v5473_v15 = vld [vmem:[%s11046_s9 + $0x18] sm:$0xff] }
 0x637   : > { %v4972_v13 = vadd.f32 %v10500_v36, %v4934_v23  ;;  %6413 = vmatprep.subr.bf16.mxu0 %v6412_v11  ;;  %v6416_v14 = vpack.c.bf16 %v5473_v15, %v5472_v51  ;;  %6444 = vmatprep.subr.bf16.mxu1 %v6412_v11  ;;  %v5476_v23 = vld [vmem:[%s11046_s9 + $0x30] sm:$0xff] }
 0x638   : > { %3518 = vrot.lane.b32.xlu1 %v11212_v16, %s7406_s16  ;;  %6243 = vmatmul.mubr.msk.f32.gmra.mrb[36].mxu0 %vm421_vm0, %v4967_v47  ;;  %v4931_v7 = vmul.f32 %v10492_v42, %v4893_v60 }
 0x639   : > { %v4764_v24 = vpop.xlane.xlu0 %4763  ;;  %v7266_v52 = vpop.eup %7265  ;;  %3548 = vrot.lane.b32.xlu0 %v9792_v2, %s7409_s20  ;;  %6245 = vmatprep.mubr.msk.f32.mxu0 %vm421_vm0, %v4968_v44  ;;  %v11213_v2 = vld [vmem:[#allocation21_spill] sm:$0xff]  ;;  %v11220_v44 = vld [vmem:[#allocation16_spill] sm:$0xff] }
 0x63a   : > { %v4802_v61 = vmul.f32 0.03125, %v4764_v24  ;;  %v4969_v25 = vadd.f32 %v10500_v36, %v4931_v7  ;;  %v4895_v43 = vmul.f32 %v7266_v52, %v10416_v56  ;;  %6415 = vmatpush3.bf16.msra.mxu0 %v6412_v11  ;;  %6452 = vmatpush3.bf16.msra.mxu1 %v6412_v11  ;;  %v5474_v24 = vld [vmem:[%s11046_s9 + $0x20] sm:$0xff]  ;;  %v5475_v7 = vld [vmem:[%s11046_s9 + $0x28] sm:$0xff] }
 0x63b   : > { %6417 = vmatprep.subr.bf16.mxu0 %v6416_v14  ;;  %6445 = vmatprep.subr.bf16.mxu1 %v6416_v14 }
 0x63c   : > { %v4834_v38 = vadd.f32 1e-05, %v4802_v61  ;;  %3546 = vrot.lane.b32.xlu1 %v11211_v58, %s7409_s20  ;;  %6246 = vmatmul.mubr.msk.f32.gmra.mrb[38].mxu0 %vm421_vm0, %v4969_v25  ;;  %v4933_v45 = vmul.f32 %v10492_v42, %v4895_v43  ;;  %v6420_v61 = vpack.c.bf16 %v5475_v7, %v5474_v24 }
 0x63d   : > { %v7268_v9 = vpop.eup %7267  ;;  %4154 = vrot.lane.b32.xlu0 %v11213_v2, %s7401_s30  ;;  %6248 = vmatprep.mubr.msk.f32.mxu0 %vm421_vm0, %v4970_v6 }
 0x63e   : > { %7269 = vrsqrt.f32 %v4834_v38  ;;  %v4971_v56 = vadd.f32 %v10500_v36, %v4933_v45  ;;  %v4897_v29 = vmul.f32 %v7268_v9, %v10422_v12  ;;  %v11215_v12 = vld [vmem:[#allocation14_spill] sm:$0xff]  ;;  %6419 = vmatpush3.bf16.msra.mxu0 %v6416_v14  ;;  %6453 = vmatpush3.bf16.msra.mxu1 %v6416_v14  ;;  %v5477_v45 = vld [vmem:[%s11046_s9 + $0x38] sm:$0xff] }
 0x63f   : > { %6421 = vmatprep.subr.bf16.mxu0 %v6420_v61  ;;  %6446 = vmatprep.subr.bf16.mxu1 %v6420_v61 }
 0x640   : > { %3550 = vrot.lane.b32.xlu1 %v11212_v16, %s7409_s20  ;;  %6249 = vmatmul.mubr.msk.f32.gmra.mrb[40].mxu0 %vm421_vm0, %v4971_v56  ;;  %v4767_v35 = vpop.xlane.xlu1 %4766  ;;  %v4935_v22 = vmul.f32 %v10492_v42, %v4897_v29 }
 0x641   : > { %v4803_v18 = vmul.f32 0.03125, %v4767_v35  ;;  %4158 = vrot.lane.b32.xlu0 %v11214_v37, %s7401_s30  ;;  %6251 = vmatprep.mubr.msk.f32.mxu0 %vm421_vm0, %v4972_v13  ;;  %v5478_v13 = vld [vmem:[%s11046_s9 + $0x40] sm:$0xff] }
 0x642   : > { %v4973_v63 = vadd.f32 %v10500_v36, %v4935_v22  ;;  %6423 = vmatpush3.bf16.msra.mxu0 %v6420_v61  ;;  %6454 = vmatpush3.bf16.msra.mxu1 %v6420_v61 }
 0x643   : > { %v4835_v46 = vadd.f32 1e-05, %v4803_v18  ;;  %v5480_v18 = vld [vmem:[%s11046_s9 + $0x50] sm:$0xff] }
 0x644   : > { %4156 = vrot.lane.b32.xlu1 %v11215_v12, %s7401_s30  ;;  %6252 = vmatmul.mubr.msk.f32.gmra.mrb[42].mxu0 %vm421_vm0, %v4973_v63 }
 0x645   : > { %7271 = vrsqrt.f32 %v4835_v46  ;;  %4187 = vrot.lane.b32.xlu0 %v11213_v2, %s7392_s25 }
 0x648   : > { %v7270_v59 = vpop.eup %7269  ;;  %4160 = vrot.lane.b32.xlu1 %v11216_v30, %s7401_s30 }
 0x649   : > { %v4898_v49 = vmul.f32 %v7270_v59, %v10432_v57  ;;  %4191 = vrot.lane.b32.xlu0 %v11214_v37, %s7392_s25  ;;  %v5482_v59 = vld [vmem:[%s11046_s9 + $0x60] sm:$0xff] }
 0x64b   : > { %v4936_v58 = vmul.f32 %v10492_v42, %v4898_v49 }
 0x64c   : > { %4189 = vrot.lane.b32.xlu1 %v11215_v12, %s7392_s25 }
 0x64d   : > { %v4974_v40 = vadd.f32 %v10500_v36, %v4936_v58  ;;  %4219 = vrot.lane.b32.xlu0 %v11213_v2, %s7391_s24  ;;  %v6424_v2 = vpack.c.bf16 %v5477_v45, %v5476_v23 }
 0x64f   : > { %6254 = vmatprep.mubr.msk.f32.mxu0 %vm421_vm0, %v4974_v40  ;;  %v7272_v50 = vpop.eup %7271  ;;  %6425 = vmatprep.subr.bf16.mxu0 %v6424_v2 }
 0x650   : > { %v4770_v27 = vpop.xlane.xlu0 %4769  ;;  %4193 = vrot.lane.b32.xlu1 %v11216_v30, %s7392_s25  ;;  %v4899_v57 = vmul.f32 %v7272_v50, %v10438_v19  ;;  %6427 = vmatpush3.bf16.msra.mxu0 %v6424_v2  ;;  %v5484_v50 = vld [vmem:[%s11046_s9 + $0x70] sm:$0xff] }
 0x651   : > { %v4804_v53 = vmul.f32 0.03125, %v4770_v27  ;;  %4223 = vrot.lane.b32.xlu0 %v11214_v37, %s7391_s24  ;;  %6447 = vmatprep.subr.bf16.mxu1 %v6424_v2  ;;  %v5481_v37 = vld [vmem:[%s11046_s9 + $0x58] sm:$0xff] }
 0x652   : > { %v4937_v39 = vmul.f32 %v10492_v42, %v4899_v57  ;;  %6455 = vmatpush3.bf16.msra.mxu1 %v6424_v2  ;;  %v6432_v63 = vpack.c.bf16 %v5481_v37, %v5480_v18  ;;  %v5485_v27 = vld [vmem:[%s11046_s9 + $0x78] sm:$0xff] }
 0x653   : > { %v4836_v31 = vadd.f32 1e-05, %v4804_v53  ;;  %v6440_v57 = vpack.c.bf16 %v5485_v27, %v5484_v50 }
 0x654   : > { %v1778_v4 = vpop.permute.xlu0 %1777  ;;  %4221 = vrot.lane.b32.xlu1 %v11215_v12, %s7391_s24  ;;  %v4773_v20 = vpop.xlane.xlu1 %4772  ;;  %v4975_v28 = vadd.f32 %v10500_v36, %v4937_v39 }
 0x655   : > { %7273 = vrsqrt.f32 %v4836_v31  ;;  %v4805_v5 = vmul.f32 0.03125, %v4773_v20  ;;  %4331 = vrot.lane.b32.xlu0 %v11217_v33, %s7399_s29 }
 0x656   : > { %6255 = vmatmul.mubr.msk.f32.gmra.mrb[44].mxu0 %vm421_vm0, %v4975_v28 }
 0x657   : > { %v4837_v19 = vadd.f32 1e-05, %v4805_v5 }
 0x658   : > { %v1811_v16 = vpop.permute.xlu0 %1810  ;;  %4225 = vrot.lane.b32.xlu1 %v11216_v30, %s7391_s24  ;;  %v1780_v48 = vpop.permute.xlu1 %1779  ;;  %v5483_v30 = vld [vmem:[%s11046_s9 + $0x68] sm:$0xff]  ;;  %s11221_s24 = sshll.u32 %s11251_s18, 8 }
 0x659   : > { %7275 = vrsqrt.f32 %v4837_v19  ;;  %4335 = vrot.lane.b32.xlu0 %v11218_v54, %s7399_s29  ;;  %v6436_v49 = vpack.c.bf16 %v5483_v30, %v5482_v59  ;;  %s10905_s14 = scalar_lea.vmem %s11048_s11, %s11221_s24 }
 0x65c   : > { %v1815_v41 = vpop.permute.xlu0 %1814  ;;  %4333 = vrot.lane.b32.xlu1 %v11219_v34, %s7399_s29  ;;  %v1782_v17 = vpop.permute.xlu1 %1781 }
 0x65d   : > { %4363 = vrot.lane.b32.xlu0 %v11217_v33, %s7407_s12 }
 0x65f   : > { %v7274_v47 = vpop.eup %7273 }
 0x660   : > { %v1843_v60 = vpop.permute.xlu0 %1842  ;;  %4337 = vrot.lane.b32.xlu1 %v11220_v44, %s7399_s29  ;;  %v1784_v0 = vpop.permute.xlu1 %1783  ;;  %v4900_v1 = vmul.f32 %v7274_v47, %v10444_v3 }
 0x661   : > { %4367 = vrot.lane.b32.xlu0 %v11218_v54, %s7407_s12 }
 0x662   : > { %v4938_v52 = vmul.f32 %v10492_v42, %v4900_v1 }
 0x663   : > { %v7276_v25 = vpop.eup %7275 }
 0x664   : > { %v1847_v3 = vpop.permute.xlu0 %1846  ;;  %4365 = vrot.lane.b32.xlu1 %v11219_v34, %s7407_s12  ;;  %v1813_v43 = vpop.permute.xlu1 %1812  ;;  %v4976_v38 = vadd.f32 %v10500_v36, %v4938_v52  ;;  %v4901_v6 = vmul.f32 %v7276_v25, %v10449_v8 }
 0x665   : > { %4395 = vrot.lane.b32.xlu0 %v11217_v33, %s7406_s16 }
 0x666   : > { %6257 = vmatprep.mubr.msk.f32.mxu0 %vm421_vm0, %v4976_v38  ;;  %v4939_v9 = vmul.f32 %v10492_v42, %v4901_v6  ;;  %v5479_v42 = vld [vmem:[%s11046_s9 + $0x48] sm:$0xff] }
 0x667   : > { %v6428_v35 = vpack.c.bf16 %v5479_v42, %v5478_v13 }
 0x668   : > { %v2453_v8 = vpop.permute.xlu0 %2452  ;;  %4369 = vrot.lane.b32.xlu1 %v11220_v44, %s7407_s12  ;;  %v1817_v56 = vpop.permute.xlu1 %1816  ;;  %v4977_v29 = vadd.f32 %v10500_v36, %v4939_v9 }
 0x669   : > { %4399 = vrot.lane.b32.xlu0 %v11218_v54, %s7406_s16  ;;  %6429 = vmatprep.subr.bf16.mxu0 %v6428_v35 }
 0x66a   : > { %6258 = vmatmul.mubr.msk.f32.gmra.mrb[46].mxu0 %vm421_vm0, %v4977_v29  ;;  %6448 = vmatprep.subr.bf16.mxu1 %v6428_v35 }
 0x66b   : > { %6431 = vmatpush3.bf16.msra.mxu0 %v6428_v35  ;;  %6456 = vmatpush3.bf16.msra.mxu1 %v6428_v35 }
 0x66c   : > { %v2457_v22 = vpop.permute.xlu0 %2456  ;;  %4397 = vrot.lane.b32.xlu1 %v11219_v34, %s7406_s16  ;;  %v1845_v36 = vpop.permute.xlu1 %1844  ;;  %6433 = vmatprep.subr.bf16.mxu0 %v6432_v63 }
 0x66d   : > { %6449 = vmatprep.subr.bf16.mxu1 %v6432_v63 }
 0x66f   : > { %6435 = vmatpush3.bf16.msra.mxu0 %v6432_v63  ;;  %6457 = vmatpush3.bf16.msra.mxu1 %v6432_v63 }
 0x670   : > { %v2494_v46 = vpop.permute.xlu0 %2493  ;;  %4401 = vrot.lane.b32.xlu1 %v11220_v44, %s7406_s16  ;;  %v1849_v12 = vpop.permute.xlu1 %1848  ;;  %6437 = vmatprep.subr.bf16.mxu0 %v6436_v49 }
 0x671   : > { %6450 = vmatprep.subr.bf16.mxu1 %v6436_v49 }
 0x673   : > { %6439 = vmatpush3.bf16.msra.mxu0 %v6436_v49  ;;  %6458 = vmatpush3.bf16.msra.mxu1 %v6436_v49  ;;  %v10796_v49 = vld [vmem:[%s11045_s8] ss:$0 sm:$0xff] }
 0x674   : > { %v2498_v58 = vpop.permute.xlu0 %2497  ;;  %v2455_v40 = vpop.permute.xlu1 %2454  ;;  %6441 = vmatprep.subr.bf16.mxu0 %v6440_v57  ;;  %6451 = vmatprep.subr.bf16.mxu1 %v6440_v57 }
 0x677   : > { %6443 = vmatpush3.bf16.msra.mxu0 %v6440_v57  ;;  %6459 = vmatpush3.bf16.msra.mxu1 %v6440_v57 }
 0x678   : > { %v2630_v53 = vpop.permute.xlu0 %2629  ;;  %v2459_v39 = vpop.permute.xlu1 %2458 }
 0x67c   : > { %v2634_v31 = vpop.permute.xlu0 %2633  ;;  %v2496_v4 = vpop.permute.xlu1 %2495 }
 0x680   : > { %v2662_v20 = vpop.permute.xlu0 %2661  ;;  %v2500_v28 = vpop.permute.xlu1 %2499 }
 0x684   : > { %v2666_v5 = vpop.permute.xlu0 %2665  ;;  %v2632_v33 = vpop.permute.xlu1 %2631 }
 0x688   : > { %v2694_v19 = vpop.permute.xlu0 %2693  ;;  %v2636_v16 = vpop.permute.xlu1 %2635 }
 0x68c   : > { %v2698_v48 = vpop.permute.xlu0 %2697  ;;  %v2664_v54 = vpop.permute.xlu1 %2663 }
 0x690   : > { %v3304_v10 = vpop.permute.xlu0 %3303  ;;  %v2668_v55 = vpop.permute.xlu1 %2667 }
 0x694   : > { %v3308_v11 = vpop.permute.xlu0 %3307  ;;  %v2696_v41 = vpop.permute.xlu1 %2695 }
 0x698   : > { %v3337_v34 = vpop.permute.xlu0 %3336  ;;  %v2700_v17 = vpop.permute.xlu1 %2699 }
 0x69c   : > { %v3341_v51 = vpop.permute.xlu0 %3340  ;;  %v3306_v15 = vpop.permute.xlu1 %3305 }
 0x6a0   : > { %v3481_v14 = vpop.permute.xlu0 %3480  ;;  %v3310_v47 = vpop.permute.xlu1 %3309 }
 0x6a4   : > { %v3485_v60 = vpop.permute.xlu0 %3484  ;;  %v3339_v44 = vpop.permute.xlu1 %3338 }
 0x6a8   : > { %v3513_v0 = vpop.permute.xlu0 %3512  ;;  %v3343_v1 = vpop.permute.xlu1 %3342 }
 0x6ac   : > { %v3517_v24 = vpop.permute.xlu0 %3516  ;;  %v3483_v7 = vpop.permute.xlu1 %3482 }
 0x6b0   : > { %v3545_v52 = vpop.permute.xlu0 %3544  ;;  %v3487_v61 = vpop.permute.xlu1 %3486 }
 0x6b4   : > { %v3549_v25 = vpop.permute.xlu0 %3548  ;;  %v3515_v3 = vpop.permute.xlu1 %3514 }
 0x6b8   : > { %v4155_v43 = vpop.permute.xlu0 %4154  ;;  %v3519_v38 = vpop.permute.xlu1 %3518 }
 0x6bc   : > { %v4159_v6 = vpop.permute.xlu0 %4158  ;;  %v3547_v23 = vpop.permute.xlu1 %3546 }
 0x6c0   : > { %v4188_v45 = vpop.permute.xlu0 %4187  ;;  %v3551_v9 = vpop.permute.xlu1 %3550 }
 0x6c4   : > { %v4192_v2 = vpop.permute.xlu0 %4191  ;;  %v4157_v8 = vpop.permute.xlu1 %4156 }
 0x6c8   : > { %v4220_v56 = vpop.permute.xlu0 %4219  ;;  %v4161_v29 = vpop.permute.xlu1 %4160 }
 0x6cc   : > { %v4224_v13 = vpop.permute.xlu0 %4223  ;;  %v4190_v42 = vpop.permute.xlu1 %4189 }
 0x6d0   : > { %v4332_v35 = vpop.permute.xlu0 %4331  ;;  %v4194_v22 = vpop.permute.xlu1 %4193 }
 0x6d4   : > { %v4336_v36 = vpop.permute.xlu0 %4335  ;;  %v4222_v18 = vpop.permute.xlu1 %4221 }
 0x6d8   : > { %v4364_v37 = vpop.permute.xlu0 %4363  ;;  %v4226_v63 = vpop.permute.xlu1 %4225 }
 0x6dc   : > { %v4368_v46 = vpop.permute.xlu0 %4367  ;;  %v4334_v12 = vpop.permute.xlu1 %4333 }
 0x6e0   : > { %v4396_v59 = vpop.permute.xlu0 %4395  ;;  %v4338_v30 = vpop.permute.xlu1 %4337 }
 0x6e3   : > { %v6214_v58 = vpop.f32.mrb[16].mxu0 }
 0x6e4   : > { %v5157_v40 = vadd.f32 %v6214_v58, %v10796_v49  ;;  %v4400_v50 = vpop.permute.xlu0 %4399  ;;  %v5151_v27 = vpop.f32.mrb[17].mxu0 }
 0x6e5   : > { %v5152_v57 = vadd.f32 %v10796_v49, %v5151_v27  ;;  %v4366_v53 = vpop.permute.xlu1 %4365 }
 0x6e6   : > { %v5343_v39 = vmul.f32 0.70710677, %v5157_v40  ;;  %v5311_v43 = vmul.f32 0.5, %v5157_v40 }
 0x6e7   : > { %v5342_v31 = vmul.f32 0.70710677, %v5152_v57  ;;  %v6217_v4 = vpop.f32.mrb[18].mxu0  ;;  %v5310_v52 = vmul.f32 0.5, %v5152_v57 }
 0x6e8   : > { %7277 = verf.f32 %v5343_v39  ;;  %v5167_v20 = vadd.f32 %v6217_v4, %v10796_v49  ;;  %v5161_v28 = vpop.f32.mrb[19].mxu0 }
 0x6e9   : > { %7279 = verf.f32 %v5342_v31  ;;  %v5162_v5 = vadd.f32 %v10796_v49, %v5161_v28  ;;  %v4370_v33 = vpop.permute.xlu1 %4369 }
 0x6ea   : > { %v5345_v19 = vmul.f32 0.70710677, %v5167_v20  ;;  %v5313_v36 = vmul.f32 0.5, %v5167_v20 }
 0x6eb   : > { %v5344_v16 = vmul.f32 0.70710677, %v5162_v5  ;;  %v6220_v48 = vpop.f32.mrb[20].mxu0  ;;  %v5312_v13 = vmul.f32 0.5, %v5162_v5 }
 0x6ec   : > { %7281 = verf.f32 %v5345_v19  ;;  %v5177_v54 = vadd.f32 %v6220_v48, %v10796_v49  ;;  %v5171_v10 = vpop.f32.mrb[21].mxu0 }
 0x6ed   : > { %7283 = verf.f32 %v5344_v16  ;;  %v5172_v55 = vadd.f32 %v10796_v49, %v5171_v10  ;;  %v4398_v11 = vpop.permute.xlu1 %4397 }
 0x6ee   : > { %v5347_v41 = vmul.f32 0.70710677, %v5177_v54  ;;  %v5315_v39 = vmul.f32 0.5, %v5177_v54 }
 0x6ef   : > { %v5346_v34 = vmul.f32 0.70710677, %v5172_v55  ;;  %v6223_v17 = vpop.f32.mrb[22].mxu0  ;;  %v5314_v50 = vmul.f32 0.5, %v5172_v55 }
 0x6f0   : > { %7285 = verf.f32 %v5347_v41  ;;  %v10805_v51 = vadd.f32 %v6223_v17, %v10796_v49  ;;  %v5181_v15 = vpop.f32.mrb[23].mxu0 }
 0x6f1   : > { %7287 = verf.f32 %v5346_v34  ;;  %v5182_v14 = vadd.f32 %v10796_v49, %v5181_v15  ;;  %v4402_v47 = vpop.permute.xlu1 %4401 }
 0x6f2   : > { %v7278_v60 = vpop.eup %7277  ;;  %v5349_v44 = vmul.f32 0.70710677, %v10805_v51  ;;  %v5317_v41 = vmul.f32 0.5, %v10805_v51 }
 0x6f3   : > { %v7280_v0 = vpop.eup %7279  ;;  %v5407_v1 = vadd.f32 1.0, %v7278_v60  ;;  %v5348_v24 = vmul.f32 0.70710677, %v5182_v14  ;;  %v6226_v7 = vpop.f32.mrb[24].mxu0  ;;  %v5316_v10 = vmul.f32 0.5, %v5182_v14 }
 0x6f4   : > { %v5406_v61 = vadd.f32 1.0, %v7280_v0  ;;  %7289 = verf.f32 %v5349_v44  ;;  %v10810_v25 = vadd.f32 %v6226_v7, %v10796_v49  ;;  %v5191_v3 = vpop.f32.mrb[25].mxu0 }
 0x6f5   : > { %7291 = verf.f32 %v5348_v24  ;;  %v10813_v38 = vadd.f32 %v10796_v49, %v5191_v3  ;;  %v5439_v2 = vmul.f32 %v5407_v1, %v5311_v43 }
 0x6f6   : > { %v7282_v6 = vpop.eup %7281  ;;  %v5351_v23 = vmul.f32 0.70710677, %v10810_v25  ;;  %v5438_v45 = vmul.f32 %v5406_v61, %v5310_v52  ;;  %v5319_v61 = vmul.f32 0.5, %v10810_v25 }
 0x6f7   : > { %v7284_v9 = vpop.eup %7283  ;;  %v5409_v8 = vadd.f32 1.0, %v7282_v6  ;;  %v5350_v56 = vmul.f32 0.70710677, %v10813_v38  ;;  %v6229_v29 = vpop.f32.mrb[26].mxu0  ;;  %v5318_v24 = vmul.f32 0.5, %v10813_v38 }
 0x6f8   : > { %v5408_v42 = vadd.f32 1.0, %v7284_v9  ;;  %7293 = verf.f32 %v5351_v23  ;;  %v10818_v35 = vadd.f32 %v6229_v29, %v10796_v49  ;;  %v5201_v22 = vpop.f32.mrb[27].mxu0  ;;  %6292 = vmatprep.mubr.f32.mxu0 %v5438_v45 }
 0x6f9   : > { %7295 = verf.f32 %v5350_v56  ;;  %v10821_v18 = vadd.f32 %v10796_v49, %v5201_v22  ;;  %6293 = vmatmul.mubr.f32.vlgmr.msra.gmra.mrb[48].mxu0 %v5439_v2  ;;  %v5441_v40 = vmul.f32 %v5409_v8, %v5313_v36 }
 0x6fa   : > { %v7286_v37 = vpop.eup %7285  ;;  %v5353_v63 = vmul.f32 0.70710677, %v10818_v35  ;;  %v5440_v46 = vmul.f32 %v5408_v42, %v5312_v13  ;;  %v5321_v42 = vmul.f32 0.5, %v10818_v35 }
 0x6fb   : > { %v7288_v12 = vpop.eup %7287  ;;  %v5411_v59 = vadd.f32 1.0, %v7286_v37  ;;  %v5352_v30 = vmul.f32 0.70710677, %v10821_v18  ;;  %v6232_v58 = vpop.f32.mrb[28].mxu0  ;;  %v5320_v56 = vmul.f32 0.5, %v10821_v18 }
 0x6fc   : > { %v5410_v27 = vadd.f32 1.0, %v7288_v12  ;;  %7297 = verf.f32 %v5353_v63  ;;  %v10826_v57 = vadd.f32 %v6232_v58, %v10796_v49  ;;  %v5211_v53 = vpop.f32.mrb[29].mxu0  ;;  %6295 = vmatprep.mubr.f32.mxu0 %v5440_v46 }
 0x6fd   : > { %7299 = verf.f32 %v5352_v30  ;;  %v10829_v31 = vadd.f32 %v10796_v49, %v5211_v53  ;;  %6296 = vmatmul.mubr.f32.gmra.mrb[50].mxu0 %v5441_v40  ;;  %v5443_v33 = vmul.f32 %v5411_v59, %v5315_v39 }
 0x6fe   : > { %v7290_v4 = vpop.eup %7289  ;;  %v5355_v20 = vmul.f32 0.70710677, %v10826_v57  ;;  %v5442_v28 = vmul.f32 %v5410_v27, %v5314_v50  ;;  %v5323_v27 = vmul.f32 0.5, %v10826_v57 }
 0x6ff   : > { %v7292_v5 = vpop.eup %7291  ;;  %v5413_v19 = vadd.f32 1.0, %v7290_v4  ;;  %v5354_v16 = vmul.f32 0.70710677, %v10829_v31  ;;  %v6235_v48 = vpop.f32.mrb[30].mxu0  ;;  %v5322_v58 = vmul.f32 0.5, %v10829_v31 }
 0x700   : > { %v5412_v55 = vadd.f32 1.0, %v7292_v5  ;;  %7301 = verf.f32 %v5355_v20  ;;  %v10834_v54 = vadd.f32 %v6235_v48, %v10796_v49  ;;  %v5221_v11 = vpop.f32.mrb[31].mxu0  ;;  %6298 = vmatprep.mubr.f32.mxu1 %v5442_v28 }
 0x701   : > { %7303 = verf.f32 %v5354_v16  ;;  %v10838_v34 = vadd.f32 %v10796_v49, %v5221_v11  ;;  %6299 = vmatmul.mubr.f32.vlgmr.msra.gmra.mrb[16].mxu1 %v5443_v33  ;;  %v5445_v1 = vmul.f32 %v5413_v19, %v5317_v41 }
 0x702   : > { %v7294_v17 = vpop.eup %7293  ;;  %v5357_v15 = vmul.f32 0.70710677, %v10834_v54  ;;  %v5444_v47 = vmul.f32 %v5412_v55, %v5316_v10  ;;  %v5325_v55 = vmul.f32 0.5, %v10834_v54 }
 0x703   : > { %v7296_v60 = vpop.eup %7295  ;;  %v5415_v14 = vadd.f32 1.0, %v7294_v17  ;;  %v5356_v44 = vmul.f32 0.70710677, %v10838_v34  ;;  %v6238_v0 = vpop.f32.mrb[32].mxu0  ;;  %v5324_v16 = vmul.f32 0.5, %v10838_v34 }
 0x704   : > { %v5414_v7 = vadd.f32 1.0, %v7296_v60  ;;  %7305 = verf.f32 %v5357_v15  ;;  %v10844_v51 = vadd.f32 %v6238_v0, %v10796_v49  ;;  %v5231_v52 = vpop.f32.mrb[33].mxu0  ;;  %6301 = vmatprep.mubr.f32.mxu1 %v5444_v47 }
 0x705   : > { %7307 = verf.f32 %v5356_v44  ;;  %v10848_v3 = vadd.f32 %v10796_v49, %v5231_v52  ;;  %6302 = vmatmul.mubr.f32.gmra.mrb[18].mxu1 %v5445_v1  ;;  %v5447_v8 = vmul.f32 %v5415_v14, %v5319_v61 }
 0x706   : > { %v7298_v43 = vpop.eup %7297  ;;  %v5359_v6 = vmul.f32 0.70710677, %v10844_v51  ;;  %v5446_v23 = vmul.f32 %v5414_v7, %v5318_v24  ;;  %v5327_v7 = vmul.f32 0.5, %v10844_v51 }
 0x707   : > { %v7300_v45 = vpop.eup %7299  ;;  %v5417_v38 = vadd.f32 1.0, %v7298_v43  ;;  %v5358_v9 = vmul.f32 0.70710677, %v10848_v3  ;;  %v6241_v2 = vpop.f32.mrb[34].mxu0  ;;  %v5326_v0 = vmul.f32 0.5, %v10848_v3 }
 0x708   : > { %v5416_v29 = vadd.f32 1.0, %v7300_v45  ;;  %7309 = verf.f32 %v5359_v6  ;;  %v10854_v25 = vadd.f32 %v6241_v2, %v10796_v49  ;;  %v5241_v13 = vpop.f32.mrb[35].mxu0  ;;  %6304 = vmatprep.mubr.f32.mxu1 %v5446_v23 }
 0x709   : > { %7311 = verf.f32 %v5358_v9  ;;  %v10858_v22 = vadd.f32 %v10796_v49, %v5241_v13  ;;  %6305 = vmatmul.mubr.f32.gmra.mrb[20].mxu1 %v5447_v8  ;;  %v5449_v30 = vmul.f32 %v5417_v38, %v5321_v42 }
 0x70a   : > { %v7302_v36 = vpop.eup %7301  ;;  %v5361_v37 = vmul.f32 0.70710677, %v10854_v25  ;;  %v5448_v63 = vmul.f32 %v5416_v29, %v5320_v56  ;;  %v5329_v51 = vmul.f32 0.5, %v10854_v25 }
 0x70b   : > { %v7304_v46 = vpop.eup %7303  ;;  %v5419_v18 = vadd.f32 1.0, %v7302_v36  ;;  %v5360_v12 = vmul.f32 0.70710677, %v10858_v22  ;;  %v6244_v59 = vpop.f32.mrb[36].mxu0  ;;  %v5328_v2 = vmul.f32 0.5, %v10858_v22 }
 0x70c   : > { %v5418_v40 = vadd.f32 1.0, %v7304_v46  ;;  %7313 = verf.f32 %v5361_v37  ;;  %v10864_v35 = vadd.f32 %v6244_v59, %v10796_v49  ;;  %v5251_v50 = vpop.f32.mrb[37].mxu0  ;;  %6307 = vmatprep.mubr.f32.mxu1 %v5448_v63 }
 0x70d   : > { %7315 = verf.f32 %v5360_v12  ;;  %v10868_v53 = vadd.f32 %v10796_v49, %v5251_v50  ;;  %6308 = vmatmul.mubr.f32.gmra.mrb[22].mxu1 %v5449_v30  ;;  %v5451_v19 = vmul.f32 %v5419_v18, %v5323_v27 }
 0x70e   : > { %v7306_v39 = vpop.eup %7305  ;;  %v5363_v4 = vmul.f32 0.70710677, %v10864_v35  ;;  %v5450_v20 = vmul.f32 %v5418_v40, %v5322_v58  ;;  %v5331_v30 = vmul.f32 0.5, %v10864_v35 }
 0x70f   : > { %v7308_v28 = vpop.eup %7307  ;;  %v5421_v31 = vadd.f32 1.0, %v7306_v39  ;;  %v5362_v5 = vmul.f32 0.70710677, %v10868_v53  ;;  %v6247_v33 = vpop.f32.mrb[38].mxu0  ;;  %v5330_v22 = vmul.f32 0.5, %v10868_v53 }
 0x710   : > { %v5420_v48 = vadd.f32 1.0, %v7308_v28  ;;  %7317 = verf.f32 %v5363_v4  ;;  %v10874_v57 = vadd.f32 %v6247_v33, %v10796_v49  ;;  %v5261_v10 = vpop.f32.mrb[39].mxu0  ;;  %6310 = vmatprep.mubr.f32.mxu1 %v5450_v20 }
 0x711   : > { %7319 = verf.f32 %v5362_v5  ;;  %v5262_v11 = vadd.f32 %v10796_v49, %v5261_v10  ;;  %6311 = vmatmul.mubr.f32.gmra.mrb[24].mxu1 %v5451_v19  ;;  %v5453_v44 = vmul.f32 %v5421_v31, %v5325_v55 }
 0x712   : > { %v7310_v41 = vpop.eup %7309  ;;  %v5365_v17 = vmul.f32 0.70710677, %v10874_v57  ;;  %v5452_v15 = vmul.f32 %v5420_v48, %v5324_v16  ;;  %v5333_v20 = vmul.f32 0.5, %v10874_v57 }
 0x713   : > { %v7312_v47 = vpop.eup %7311  ;;  %v5423_v60 = vadd.f32 1.0, %v7310_v41  ;;  %v5364_v34 = vmul.f32 0.70710677, %v5262_v11  ;;  %v6250_v14 = vpop.f32.mrb[40].mxu0  ;;  %v5332_v39 = vmul.f32 0.5, %v5262_v11 }
 0x714   : > { %v5422_v1 = vadd.f32 1.0, %v7312_v47  ;;  %7321 = verf.f32 %v5365_v17  ;;  %v5277_v24 = vadd.f32 %v6250_v14, %v10796_v49  ;;  %v5271_v54 = vpop.f32.mrb[41].mxu0  ;;  %6313 = vmatprep.mubr.f32.mxu1 %v5452_v15 }
 0x715   : > { %7323 = verf.f32 %v5364_v34  ;;  %v5272_v52 = vadd.f32 %v10796_v49, %v5271_v54  ;;  %6314 = vmatmul.mubr.f32.gmra.mrb[26].mxu1 %v5453_v44  ;;  %v5455_v3 = vmul.f32 %v5423_v60, %v5327_v7 }
 0x716   : > { %v7314_v61 = vpop.eup %7313  ;;  %v5367_v43 = vmul.f32 0.70710677, %v5277_v24  ;;  %v5454_v6 = vmul.f32 %v5422_v1, %v5326_v0  ;;  %v5335_v16 = vmul.f32 0.5, %v5277_v24 }
 0x717   : > { %v7316_v23 = vpop.eup %7315  ;;  %v5425_v45 = vadd.f32 1.0, %v7314_v61  ;;  %v5366_v38 = vmul.f32 0.70710677, %v5272_v52  ;;  %v6253_v9 = vpop.f32.mrb[42].mxu0  ;;  %v5334_v19 = vmul.f32 0.5, %v5272_v52 }
 0x718   : > { %v5424_v8 = vadd.f32 1.0, %v7316_v23  ;;  %7325 = verf.f32 %v5367_v43  ;;  %v5287_v56 = vadd.f32 %v6253_v9, %v10796_v49  ;;  %v5281_v29 = vpop.f32.mrb[43].mxu0  ;;  %6316 = vmatprep.mubr.f32.mxu1 %v5454_v6 }
 0x719   : > { %7327 = verf.f32 %v5366_v38  ;;  %v5282_v13 = vadd.f32 %v10796_v49, %v5281_v29  ;;  %6317 = vmatmul.mubr.f32.gmra.mrb[28].mxu1 %v5455_v3  ;;  %v5457_v12 = vmul.f32 %v5425_v45, %v5329_v51 }
 0x71a   : > { %v7318_v42 = vpop.eup %7317  ;;  %v5369_v36 = vmul.f32 0.70710677, %v5287_v56  ;;  %v5456_v37 = vmul.f32 %v5424_v8, %v5328_v2  ;;  %v5337_v57 = vmul.f32 0.5, %v5287_v56 }
 0x71b   : > { %v7320_v63 = vpop.eup %7319  ;;  %v5427_v46 = vadd.f32 1.0, %v7318_v42  ;;  %v5368_v18 = vmul.f32 0.70710677, %v5282_v13  ;;  %v5336_v17 = vmul.f32 0.5, %v5282_v13 }
 0x71c   : > { %v5426_v59 = vadd.f32 1.0, %v7320_v63  ;;  %7329 = verf.f32 %v5369_v36  ;;  %6319 = vmatprep.mubr.f32.mxu1 %v5456_v37 }
 0x71d   : > { %7331 = verf.f32 %v5368_v18  ;;  %6320 = vmatmul.mubr.f32.gmra.mrb[30].mxu1 %v5457_v12  ;;  %v5459_v27 = vmul.f32 %v5427_v46, %v5331_v30  ;;  %v11222_v30 = vld [vmem:[#allocation5_spill] sm:$0xff] }
 0x71e   : > { %v7322_v25 = vpop.eup %7321  ;;  %v5458_v58 = vmul.f32 %v5426_v59, %v5330_v22 }
 0x71f   : > { %v7324_v40 = vpop.eup %7323  ;;  %v5429_v50 = vadd.f32 1.0, %v7322_v25 }
 0x720   : > { %v5428_v4 = vadd.f32 1.0, %v7324_v40  ;;  %6322 = vmatprep.mubr.f32.mxu1 %v5458_v58  ;;  %v11223_v58 = vld [vmem:[#allocation17_spill] sm:$0xff] }
 0x721   : > { %6323 = vmatmul.mubr.f32.gmra.mrb[32].mxu1 %v5459_v27  ;;  %v5461_v33 = vmul.f32 %v5429_v50, %v5333_v20  ;;  %v11224_v20 = vld [vmem:[#allocation19_spill] sm:$0xff] }
 0x722   : > { %v7326_v28 = vpop.eup %7325  ;;  %v5460_v53 = vmul.f32 %v5428_v4, %v5332_v39 }
 0x723   : > { %v7328_v31 = vpop.eup %7327  ;;  %v5431_v5 = vadd.f32 1.0, %v7326_v28 }
 0x724   : > { %v5430_v35 = vadd.f32 1.0, %v7328_v31  ;;  %6325 = vmatprep.mubr.f32.mxu1 %v5460_v53  ;;  %v11225_v53 = vld [vmem:[#allocation24_spill] sm:$0xff] }
 0x725   : > { %6326 = vmatmul.mubr.f32.gmra.mrb[34].mxu1 %v5461_v33  ;;  %v5463_v11 = vmul.f32 %v5431_v5, %v5335_v16  ;;  %v11226_v16 = vld [vmem:[#allocation6_spill] sm:$0xff] }
 0x726   : > { %v7330_v48 = vpop.eup %7329  ;;  %v5462_v10 = vmul.f32 %v5430_v35, %v5334_v19 }
 0x727   : > { %v7332_v55 = vpop.eup %7331  ;;  %v5433_v41 = vadd.f32 1.0, %v7330_v48 }
 0x728   : > { %v5432_v15 = vadd.f32 1.0, %v7332_v55  ;;  %6328 = vmatprep.mubr.f32.mxu1 %v5462_v10  ;;  %v11227_v10 = vld [vmem:[#allocation8_spill] sm:$0xff] }
 0x729   : > { %v6256_v47 = vpop.f32.mrb[44].mxu0  ;;  %6329 = vmatmul.mubr.f32.gmra.mrb[36].mxu1 %v5463_v11  ;;  %v5465_v0 = vmul.f32 %v5433_v41, %v5337_v57  ;;  %v11228_v57 = vld [vmem:[#allocation7_spill] sm:$0xff] }
 0x72a   : > { %v5297_v60 = vadd.f32 %v6256_v47, %v10796_v49  ;;  %v5291_v34 = vpop.f32.mrb[45].mxu0  ;;  %v5464_v14 = vmul.f32 %v5432_v15, %v5336_v17 }
 0x72b   : > { %v5292_v44 = vadd.f32 %v10796_v49, %v5291_v34 }
 0x72c   : > { %v5371_v1 = vmul.f32 0.70710677, %v5297_v60  ;;  %6331 = vmatprep.mubr.f32.mxu1 %v5464_v14  ;;  %v5339_v6 = vmul.f32 0.5, %v5297_v60  ;;  %v11229_v60 = vld [vmem:[#allocation4_spill] sm:$0xff] }
 0x72d   : > { %v5370_v24 = vmul.f32 0.70710677, %v5292_v44  ;;  %6332 = vmatmul.mubr.f32.gmra.mrb[38].mxu1 %v5465_v0  ;;  %v5338_v61 = vmul.f32 0.5, %v5292_v44 }
 0x72e   : > { %7333 = verf.f32 %v5371_v1 }
 0x72f   : > { %7335 = verf.f32 %v5370_v24  ;;  %v11230_v24 = vld [vmem:[#allocation25_spill] sm:$0xff] }
 0x738   : > { %v7334_v54 = vpop.eup %7333 }
 0x739   : > { %v7336_v7 = vpop.eup %7335  ;;  %v5435_v52 = vadd.f32 1.0, %v7334_v54 }
 0x73a   : > { %v5434_v43 = vadd.f32 1.0, %v7336_v7  ;;  %v11231_v7 = vld [vmem:[#allocation9_spill] sm:$0xff] }
 0x73b   : > { %v5467_v38 = vmul.f32 %v5435_v52, %v5339_v6 }
 0x73c   : > { %v5466_v23 = vmul.f32 %v5434_v43, %v5338_v61 }
 0x73d   : > { %v6259_v45 = vpop.f32.mrb[46].mxu0 }
 0x73e   : > { %v5307_v9 = vadd.f32 %v6259_v45, %v10796_v49  ;;  %v5301_v3 = vpop.f32.mrb[47].mxu0  ;;  %6334 = vmatprep.mubr.f32.mxu1 %v5466_v23  ;;  %v11232_v45 = vld [vmem:[#allocation27_spill] sm:$0xff] }
 0x73f   : > { %v5302_v2 = vadd.f32 %v10796_v49, %v5301_v3  ;;  %6335 = vmatmul.mubr.f32.gmra.mrb[40].mxu1 %v5467_v38  ;;  %v10897_v49 = vld [vmem:[%s11047_s10] ss:$0 sm:$0xff] }
 0x740   : > { %v5373_v8 = vmul.f32 0.70710677, %v5307_v9  ;;  %v5341_v37 = vmul.f32 0.5, %v5307_v9  ;;  %v11233_v9 = vld [vmem:[#allocation11_spill] sm:$0xff] }
 0x741   : > { %v5372_v56 = vmul.f32 0.70710677, %v5302_v2  ;;  %v5340_v42 = vmul.f32 0.5, %v5302_v2 }
 0x742   : > { %7337 = verf.f32 %v5373_v8 }
 0x743   : > { %7339 = verf.f32 %v5372_v56 }
 0x74c   : > { %v7338_v29 = vpop.eup %7337 }
 0x74d   : > { %v7340_v51 = vpop.eup %7339  ;;  %v5437_v13 = vadd.f32 1.0, %v7338_v29 }
 0x74e   : > { %v5436_v36 = vadd.f32 1.0, %v7340_v51  ;;  %v11234_v51 = vld [vmem:[#allocation29_spill] sm:$0xff] }
 0x74f   : > { %v5469_v46 = vmul.f32 %v5437_v13, %v5341_v37 }
 0x750   : > { %v5468_v63 = vmul.f32 %v5436_v36, %v5340_v42  ;;  %v11235_v42 = vld [vmem:[#allocation13_spill] sm:$0xff] }
 0x752   : > { %6337 = vmatprep.mubr.f32.mxu1 %v5468_v63 }
 0x753   : > { %6338 = vmatmul.mubr.f32.gmra.mrb[42].mxu1 %v5469_v46 }
 0x7cc   : > { %v6294_v18 = vpop.f32.mrb[48].mxu0 }
 0x7cd   : > { %v5565_v12 = vadd.f32 %v6294_v18, %v10897_v49  ;;  %v5559_v22 = vpop.f32.mrb[49].mxu0 }
 0x7ce   : > { %v5560_v59 = vadd.f32 %v10897_v49, %v5559_v22 }
 0x7cf   : > { %v5719_v25 = vadd.f32 %v5565_v12, %v11222_v30  ;;  %v11236_v12 = vld [vmem:[#allocation31_spill] sm:$0xff] }
 0x7d0   : > { %v5718_v40 = vadd.f32 %v5560_v59, %v11223_v58  ;;  %v6297_v50 = vpop.f32.mrb[50].mxu0  ;;  %v11237_v59 = vld [vmem:[#allocation26_spill] sm:$0xff] }
 0x7d1   : > { %5751 = vst.msk [vmem:[%s10905_s14 + $0x8] sm:$0xff] %vm421_vm0, %v5719_v25  ;;  %v5575_v27 = vadd.f32 %v6297_v50, %v10897_v49  ;;  %v5569_v39 = vpop.f32.mrb[51].mxu0 }
 0x7d2   : > { %5750 = vst.msk [vmem:[%s10905_s14] sm:$0xff] %vm421_vm0, %v5718_v40  ;;  %v5570_v4 = vadd.f32 %v10897_v49, %v5569_v39 }
 0x7d3   : > { %v5721_v28 = vadd.f32 %v5575_v27, %v11224_v20  ;;  %v11238_v27 = vld [vmem:[#allocation33_spill] sm:$0xff] }
 0x7d4   : > { %v5720_v31 = vadd.f32 %v5570_v4, %v11225_v53  ;;  %v6300_v5 = vpop.f32.mrb[16].mxu1  ;;  %v11239_v4 = vld [vmem:[#allocation28_spill] sm:$0xff] }
 0x7d5   : > { %5753 = vst.msk [vmem:[%s10905_s14 + $0x18] sm:$0xff] %vm421_vm0, %v5721_v28  ;;  %v5585_v33 = vadd.f32 %v6300_v5, %v10897_v49  ;;  %v5579_v19 = vpop.f32.mrb[17].mxu1 }
 0x7d6   : > { %5752 = vst.msk [vmem:[%s10905_s14 + $0x10] sm:$0xff] %vm421_vm0, %v5720_v31  ;;  %v5580_v35 = vadd.f32 %v10897_v49, %v5579_v19 }
 0x7d7   : > { %v5723_v48 = vadd.f32 %v5585_v33, %v11226_v16  ;;  %v11240_v33 = vld [vmem:[#allocation35_spill] sm:$0xff] }
 0x7d8   : > { %v5722_v55 = vadd.f32 %v5580_v35, %v11227_v10  ;;  %v6303_v41 = vpop.f32.mrb[18].mxu1  ;;  %v11241_v35 = vld [vmem:[#allocation30_spill] sm:$0xff] }
 0x7d9   : > { %5755 = vst.msk [vmem:[%s10905_s14 + $0x28] sm:$0xff] %vm421_vm0, %v5723_v48  ;;  %v5595_v11 = vadd.f32 %v6303_v41, %v10897_v49  ;;  %v5589_v17 = vpop.f32.mrb[19].mxu1 }
 0x7da   : > { %5754 = vst.msk [vmem:[%s10905_s14 + $0x20] sm:$0xff] %vm421_vm0, %v5722_v55  ;;  %v5590_v15 = vadd.f32 %v10897_v49, %v5589_v17 }
 0x7db   : > { %v5725_v47 = vadd.f32 %v5595_v11, %v11228_v57  ;;  %v11242_v11 = vld [vmem:[#allocation37_spill] sm:$0xff] }
 0x7dc   : > { %v5724_v34 = vadd.f32 %v5590_v15, %v11229_v60  ;;  %v6306_v14 = vpop.f32.mrb[20].mxu1  ;;  %v11243_v15 = vld [vmem:[#allocation32_spill] sm:$0xff] }
 0x7dd   : > { %5757 = vst.msk [vmem:[%s10905_s14 + $0x38] sm:$0xff] %vm421_vm0, %v5725_v47  ;;  %v5605_v44 = vadd.f32 %v6306_v14, %v10897_v49  ;;  %v5599_v0 = vpop.f32.mrb[21].mxu1 }
 0x7de   : > { %5756 = vst.msk [vmem:[%s10905_s14 + $0x30] sm:$0xff] %vm421_vm0, %v5724_v34  ;;  %v5600_v1 = vadd.f32 %v10897_v49, %v5599_v0  ;;  %v11244_v0 = vld [vmem:[#allocation34_spill] sm:$0xff] }
 0x7df   : > { %v5727_v54 = vadd.f32 %v5605_v44, %v11230_v24 }
 0x7e0   : > { %v5726_v52 = vadd.f32 %v5600_v1, %v11231_v7  ;;  %v6309_v61 = vpop.f32.mrb[22].mxu1 }
 0x7e1   : > { %5759 = vst.msk [vmem:[%s10905_s14 + $0x48] sm:$0xff] %vm421_vm0, %v5727_v54  ;;  %v5615_v43 = vadd.f32 %v6309_v61, %v10897_v49  ;;  %v5609_v6 = vpop.f32.mrb[23].mxu1 }
 0x7e2   : > { %5758 = vst.msk [vmem:[%s10905_s14 + $0x40] sm:$0xff] %vm421_vm0, %v5726_v52  ;;  %v5610_v23 = vadd.f32 %v10897_v49, %v5609_v6 }
 0x7e3   : > { %v5729_v38 = vadd.f32 %v5615_v43, %v11232_v45  ;;  %v11245_v43 = vld [vmem:[#allocation36_spill] sm:$0xff] }
 0x7e4   : > { %v5728_v3 = vadd.f32 %v5610_v23, %v11233_v9  ;;  %v6312_v2 = vpop.f32.mrb[24].mxu1  ;;  %v11246_v9 = vld [vmem:[#allocation39_spill] sm:$0xff] }
 0x7e5   : > { %5761 = vst.msk [vmem:[%s10905_s14 + $0x58] sm:$0xff] %vm421_vm0, %v5729_v38  ;;  %v5625_v8 = vadd.f32 %v6312_v2, %v10897_v49  ;;  %v5619_v56 = vpop.f32.mrb[25].mxu1  ;;  %v11247_v2 = vld [vmem:[#allocation38_spill] sm:$0xff] }
 0x7e6   : > { %5760 = vst.msk [vmem:[%s10905_s14 + $0x50] sm:$0xff] %vm421_vm0, %v5728_v3  ;;  %v5620_v29 = vadd.f32 %v10897_v49, %v5619_v56 }
 0x7e7   : > { %v5731_v13 = vadd.f32 %v5625_v8, %v11234_v51 }
 0x7e8   : > { %v5730_v36 = vadd.f32 %v5620_v29, %v11235_v42  ;;  %v6315_v37 = vpop.f32.mrb[26].mxu1  ;;  %v11248_v42 = vld [vmem:[#allocation40_spill] sm:$0xff] }
 0x7e9   : > { %5763 = vst.msk [vmem:[%s10905_s14 + $0x68] sm:$0xff] %vm421_vm0, %v5731_v13  ;;  %v5635_v63 = vadd.f32 %v6315_v37, %v10897_v49  ;;  %v5629_v46 = vpop.f32.mrb[27].mxu1 }
 0x7ea   : > { %5762 = vst.msk [vmem:[%s10905_s14 + $0x60] sm:$0xff] %vm421_vm0, %v5730_v36  ;;  %v5630_v18 = vadd.f32 %v10897_v49, %v5629_v46 }
 0x7eb   : > { %v5733_v22 = vadd.f32 %v5635_v63, %v11236_v12 }
 0x7ec   : > { %v5732_v30 = vadd.f32 %v5630_v18, %v11237_v59  ;;  %v6318_v25 = vpop.f32.mrb[28].mxu1 }
 0x7ed   : > { %5765 = vst.msk [vmem:[%s10905_s14 + $0x78] sm:$0xff] %vm421_vm0, %v5733_v22  ;;  %v5645_v58 = vadd.f32 %v6318_v25, %v10897_v49  ;;  %v5639_v40 = vpop.f32.mrb[29].mxu1  ;;  %v11249_v22 = vld [vmem:[#allocation41_spill] sm:$0xff] }
 0x7ee   : > { %5764 = vst.msk [vmem:[%s10905_s14 + $0x70] sm:$0xff] %vm421_vm0, %v5732_v30  ;;  %v5640_v50 = vadd.f32 %v10897_v49, %v5639_v40 }
 0x7ef   : > { %v5735_v39 = vadd.f32 %v5645_v58, %v11238_v27 }
 0x7f0   : > { %v5734_v20 = vadd.f32 %v5640_v50, %v11239_v4  ;;  %v6321_v28 = vpop.f32.mrb[30].mxu1 }
 0x7f1   : > { %5767 = vst.msk [vmem:[%s10905_s14 + $0x88] sm:$0xff] %vm421_vm0, %v5735_v39  ;;  %v5655_v53 = vadd.f32 %v6321_v28, %v10897_v49  ;;  %v5649_v31 = vpop.f32.mrb[31].mxu1 }
 0x7f2   : > { %5766 = vst.msk [vmem:[%s10905_s14 + $0x80] sm:$0xff] %vm421_vm0, %v5734_v20  ;;  %v5650_v5 = vadd.f32 %v10897_v49, %v5649_v31 }
 0x7f3   : > { %v5737_v19 = vadd.f32 %v5655_v53, %v11240_v33 }
 0x7f4   : > { %v5736_v16 = vadd.f32 %v5650_v5, %v11241_v35  ;;  %v6324_v48 = vpop.f32.mrb[32].mxu1 }
 0x7f5   : > { %5769 = vst.msk [vmem:[%s10905_s14 + $0x98] sm:$0xff] %vm421_vm0, %v5737_v19  ;;  %v5665_v10 = vadd.f32 %v6324_v48, %v10897_v49  ;;  %v5659_v55 = vpop.f32.mrb[33].mxu1 }
 0x7f6   : > { %5768 = vst.msk [vmem:[%s10905_s14 + $0x90] sm:$0xff] %vm421_vm0, %v5736_v16  ;;  %v5660_v41 = vadd.f32 %v10897_v49, %v5659_v55 }
 0x7f7   : > { %v5739_v17 = vadd.f32 %v5665_v10, %v11242_v11 }
 0x7f8   : > { %v5738_v57 = vadd.f32 %v5660_v41, %v11243_v15  ;;  %v6327_v47 = vpop.f32.mrb[34].mxu1 }
 0x7f9   : > { %5771 = vst.msk [vmem:[%s10905_s14 + $0xa8] sm:$0xff] %vm421_vm0, %v5739_v17  ;;  %v5675_v60 = vadd.f32 %v6327_v47, %v10897_v49  ;;  %v5669_v34 = vpop.f32.mrb[35].mxu1 }
 0x7fa   : > { %5770 = vst.msk [vmem:[%s10905_s14 + $0xa0] sm:$0xff] %vm421_vm0, %v5738_v57  ;;  %v5670_v14 = vadd.f32 %v10897_v49, %v5669_v34 }
 0x7fb   : > { %v5741_v44 = vadd.f32 %v5675_v60, %v10195_v26 }
 0x7fc   : > { %v5740_v1 = vadd.f32 %v5670_v14, %v11244_v0  ;;  %v6330_v24 = vpop.f32.mrb[36].mxu1 }
 0x7fd   : > { %5773 = vst.msk [vmem:[%s10905_s14 + $0xb8] sm:$0xff] %vm421_vm0, %v5741_v44  ;;  %v5685_v54 = vadd.f32 %v6330_v24, %v10897_v49  ;;  %v5679_v7 = vpop.f32.mrb[37].mxu1 }
 0x7fe   : > { %5772 = vst.msk [vmem:[%s10905_s14 + $0xb0] sm:$0xff] %vm421_vm0, %v5740_v1  ;;  %v5680_v52 = vadd.f32 %v10897_v49, %v5679_v7 }
 0x7ff   : > { %v5743_v61 = vadd.f32 %v5685_v54, %v10203_v21 }
 0x800   : > { %v5742_v6 = vadd.f32 %v5680_v52, %v11245_v43  ;;  %v6333_v23 = vpop.f32.mrb[38].mxu1 }
 0x801   : > { %5775 = vst.msk [vmem:[%s10905_s14 + $0xc8] sm:$0xff] %vm421_vm0, %v5743_v61  ;;  %v5695_v26 = vadd.f32 %v6333_v23, %v10897_v49  ;;  %v5689_v45 = vpop.f32.mrb[39].mxu1 }
 0x802   : > { %5774 = vst.msk [vmem:[%s10905_s14 + $0xc0] sm:$0xff] %vm421_vm0, %v5742_v6  ;;  %v5690_v38 = vadd.f32 %v10897_v49, %v5689_v45 }
 0x803   : > { %v5745_v3 = vadd.f32 %v5695_v26, %v11246_v9 }
 0x804   : > { %v5744_v8 = vadd.f32 %v5690_v38, %v11247_v2 }
 0x805   : > { %5777 = vst.msk [vmem:[%s10905_s14 + $0xd8] sm:$0xff] %vm421_vm0, %v5745_v3 }
 0x806   : > { %5776 = vst.msk [vmem:[%s10905_s14 + $0xd0] sm:$0xff] %vm421_vm0, %v5744_v8 }
 0x812   : > { %v6336_v21 = vpop.f32.mrb[40].mxu1 }
 0x813   : > { %v5705_v56 = vadd.f32 %v6336_v21, %v10897_v49  ;;  %v5699_v29 = vpop.f32.mrb[41].mxu1 }
 0x814   : > { %v5700_v51 = vadd.f32 %v10897_v49, %v5699_v29 }
 0x815   : > { %v5747_v13 = vadd.f32 %v5705_v56, %v10232_v32 }
 0x816   : > { %v5746_v36 = vadd.f32 %v5700_v51, %v11248_v42 }
 0x817   : > { %5779 = vst.msk [vmem:[%s10905_s14 + $0xe8] sm:$0xff] %vm421_vm0, %v5747_v13 }
 0x818   : > { %5778 = vst.msk [vmem:[%s10905_s14 + $0xe0] sm:$0xff] %vm421_vm0, %v5746_v36 }
 0x826   : > { %v6339_v37 = vpop.f32.mrb[42].mxu1 }
 0x827   : > { %v5715_v63 = vadd.f32 %v6339_v37, %v10897_v49  ;;  %v5709_v46 = vpop.f32.mrb[43].mxu1 }
 0x828   : > { %v5710_v18 = vadd.f32 %v10897_v49, %v5709_v46 }
 0x829   : > { %v5749_v12 = vadd.f32 %v5715_v63, %v10247_v62 }
 0x82a   : > { %v5748_v59 = vadd.f32 %v5710_v18, %v11249_v22 }
 0x82b   : > { %5781 = vst.msk [vmem:[%s10905_s14 + $0xf8] sm:$0xff] %vm421_vm0, %v5749_v12 }
 0x82c   : > { %5780 = vst.msk [vmem:[%s10905_s14 + $0xf0] sm:$0xff] %vm421_vm0, %v5748_v59 }
 0x82d PF: > { %s21_s17 = sadd.s32 1, %s7388_s17  }
 0x82e   : > { %p18_p4 = scmp.ge.s32.totalorder %s21_s17, 4  }
 0x830   :  { %20 = sbr.rel (!%p18_p4) target bundleno = 1 (0x1), region = 104 }

</bundles_post_ra>
